<compile_context>
chip_gen: v7x
topology: tpu7x:2x2x1
jax: 0.10.0
libtpu: 0.0.40
codegen_flags: <defaults>
</compile_context>

<pallas_src>
import math
import functools

import jax
import jax.numpy as jnp
from jax.experimental import pallas as pl
from jax.experimental.pallas import tpu as pltpu

VMEM_LIMIT = 32 * 1024 * 1024   # explicit scoped-VMEM cap (safe on v5e/v6e/v7x)
MAX_ROW_TILE = 256              # multiple of 8; keeps double-buffered tiles small on v7x
LN_EPS = 1e-5


# ---------------------------------------------------------------------------
# In-kernel helpers
# ---------------------------------------------------------------------------

def _ln(x, g, b, eps):
    mu = jnp.mean(x, axis=-1, keepdims=True)
    xc = x - mu
    var = jnp.mean(xc * xc, axis=-1, keepdims=True)
    return xc * jax.lax.rsqrt(var + eps) * g + b


def _mm(x, w, bias):
    # bf16 MXU inputs, f32 accumulation (fast path on v6e/v7x, harmless on v5e).
    y = jnp.dot(x.astype(jnp.bfloat16), w.astype(jnp.bfloat16),
                preferred_element_type=jnp.float32)
    return y + bias


# ---------------------------------------------------------------------------
# Pallas kernels (each fuses a whole LN/Linear/... sub-chain on a row tile)
# ---------------------------------------------------------------------------

def _linear_kernel(x_ref, w_ref, b_ref, o_ref, *, activation):
    y = _mm(x_ref[...].astype(jnp.float32), w_ref[...], b_ref[...])
    if activation == "sigmoid":
        y = jax.nn.sigmoid(y)
    o_ref[...] = y.astype(o_ref.dtype)


def _matmul2_kernel(x_ref, w1_ref, b1_ref, w2_ref, b2_ref, o_ref):
    y = _mm(x_ref[...].astype(jnp.float32), w1_ref[...], b1_ref[...])
    y = _mm(y, w2_ref[...], b2_ref[...])
    o_ref[...] = y.astype(o_ref.dtype)


def _ln_linear_kernel(x_ref, g_ref, b_ref, w_ref, bias_ref, o_ref, *, eps, activation):
    y = _ln(x_ref[...].astype(jnp.float32), g_ref[...], b_ref[...], eps)
    y = _mm(y, w_ref[...], bias_ref[...])
    if activation == "sigmoid":
        y = jax.nn.sigmoid(y)
    o_ref[...] = y.astype(o_ref.dtype)


def _ln_linear_res_kernel(x_ref, res_ref, g_ref, b_ref, w_ref, bias_ref, o_ref, *, eps):
    y = _ln(x_ref[...].astype(jnp.float32), g_ref[...], b_ref[...], eps)
    y = _mm(y, w_ref[...], bias_ref[...])
    o_ref[...] = (y + res_ref[...]).astype(o_ref.dtype)


def _preattn_kernel(x_ref, g_ref, b_ref, w1_ref, b1_ref, wqkv_ref, bqkv_ref, o_ref, *, eps):
    # [LN1 -> fc1 -> fused QKV projection]; output (rows, 3*D) is lane-dense.
    y = _ln(x_ref[...].astype(jnp.float32), g_ref[...], b_ref[...], eps)
    y = _mm(y, w1_ref[...], b1_ref[...])
    y = _mm(y, wqkv_ref[...], bqkv_ref[...])
    o_ref[...] = y.astype(o_ref.dtype)


def _postattn_kernel(a_ref, res_ref, wo_ref, bo_ref, g_ref, b_ref, w2_ref, b2_ref,
                     o_ref, *, eps):
    # [attention-out -> o_proj -> LN2 -> fc2 -> + residual]
    y = _mm(a_ref[...].astype(jnp.float32), wo_ref[...], bo_ref[...])
    y = _ln(y, g_ref[...], b_ref[...], eps)
    y = _mm(y, w2_ref[...], b2_ref[...])
    o_ref[...] = (y + res_ref[...]).astype(o_ref.dtype)


def _attention_kernel(q_ref, k_ref, v_ref, o_ref, *, scale):
    # Many (batch*head) slices per grid step; batched einsum keeps the MXU busier
    # than a single tiny per-head matmul.
    q = q_ref[...].astype(jnp.bfloat16)
    k = k_ref[...].astype(jnp.bfloat16)
    v = v_ref[...].astype(jnp.bfloat16)
    s = jnp.einsum("bqd,bkd->bqk", q, k,
                   preferred_element_type=jnp.float32) * scale
    s = s - jnp.max(s, axis=-1, keepdims=True)
    p = jnp.exp(s)
    p = p * pl.reciprocal(jnp.sum(p, axis=-1, keepdims=True), approx=True)
    o = jnp.einsum("bqk,bkd->bqd", p.astype(jnp.bfloat16), v,
                   preferred_element_type=jnp.float32)
    o_ref[...] = o.astype(o_ref.dtype)


# ---------------------------------------------------------------------------
# pallas_call wrappers
# ---------------------------------------------------------------------------

def _compiler_params(n_axes=1):
    return pltpu.CompilerParams(
        dimension_semantics=("parallel",) * n_axes,
        vmem_limit_bytes=VMEM_LIMIT)


def _rows_call(kernel_fn, out_dim, row_inputs, params):
    """Run a fused row kernel over a 1-D grid of row tiles.

    row_inputs: (N, feat_i) arrays tiled along rows with block (tm, feat_i).
    params:     weights / biases / LN params, loaded whole each step
                (index_map -> (0, 0)); 1-D params are reshaped to (1, D).
    """
    n = row_inputs[0].shape[0]
    tm = n if n <= MAX_ROW_TILE else MAX_ROW_TILE
    grid = (pl.cdiv(n, tm),)
    row_specs = [pl.BlockSpec((tm, a.shape[-1]), lambda i: (i, 0)) for a in row_inputs]
    pars = [a if a.ndim == 2 else a.reshape(1, -1) for a in params]
    par_specs = [pl.BlockSpec(a.shape, lambda i: (0, 0)) for a in pars]
    return pl.pallas_call(
        kernel_fn,
        out_shape=jax.ShapeDtypeStruct((n, out_dim), jnp.float32),
        grid=grid,
        in_specs=row_specs + par_specs,
        out_specs=pl.BlockSpec((tm, out_dim), lambda i: (i, 0)),
        compiler_params=_compiler_params(1),
    )(*row_inputs, *pars)


def _largest_divisor(n, cap):
    for t in range(min(n, cap), 0, -1):
        if n % t == 0:
            return t
    return 1


def pallas_attention(q, k, v, scale):
    """q,k,v: (B*H, S, Dh) -> softmax(q k^T * scale) v, many heads per grid step."""
    bh, s, dh = q.shape
    bt = _largest_divisor(bh, 16)
    spec = pl.BlockSpec((bt, s, dh), lambda i: (i, 0, 0))
    return pl.pallas_call(
        functools.partial(_attention_kernel, scale=scale),
        out_shape=jax.ShapeDtypeStruct((bh, s, dh), jnp.float32),
        grid=(bh // bt,),
        in_specs=[spec, spec, spec],
        out_specs=spec,
        compiler_params=_compiler_params(1),
    )(q, k, v)


# ---------------------------------------------------------------------------
# Rotary / xPos helpers (plain JAX glue; elementwise, tiny)
# ---------------------------------------------------------------------------

def rotary_angles(seq, n_freq, *, pixel):
    if pixel:
        freqs = jnp.linspace(1.0, 10.0 / 2.0, n_freq) * jnp.pi
    else:
        rot_dim = 2 * n_freq
        freqs = 1.0 / (10000.0 ** (jnp.arange(0, rot_dim, 2, dtype=jnp.float32) / rot_dim))
    t = jnp.arange(seq, dtype=jnp.float32)
    return t[:, None] * freqs[None, :]  # (seq, n_freq)


def xpos_scale(seq, n_freq, scale_base=512.0):
    rot_dim = 2 * n_freq
    power = (jnp.arange(seq, dtype=jnp.float32) - seq // 2) / scale_base
    base = (jnp.arange(0, rot_dim, 2, dtype=jnp.float32) + 0.4 * rot_dim) / (1.4 * rot_dim)
    return base[None, :] ** power[:, None]  # (seq, n_freq)


def apply_rotary(x, angles, scale=None):
    # x: (B, H, S, Dh); rotates the first 2*n_freq dims (interleaved pairs).
    rot_dim = angles.shape[-1] * 2
    x_rot, x_pass = x[..., :rot_dim], x[..., rot_dim:]
    x1, x2 = x_rot[..., 0::2], x_rot[..., 1::2]
    cos = jnp.cos(angles)[None, None]
    sin = jnp.sin(angles)[None, None]
    if scale is not None:
        cos = cos * scale[None, None]
        sin = sin * scale[None, None]
    o1 = x1 * cos - x2 * sin
    o2 = x1 * sin + x2 * cos
    rotated = jnp.stack([o1, o2], axis=-1).reshape(x_rot.shape)
    return jnp.concatenate([rotated, x_pass], axis=-1)


def make_vision_rotary(seq, head_dim):
    # RotaryEmbedding(dim=floor(dim/heads/2), freqs_for='pixel') -> rotate first half of head.
    n_freq = max(head_dim // 4, 1)
    ang = rotary_angles(seq, n_freq, pixel=True)

    def rot(q, k):
        return apply_rotary(q, ang), apply_rotary(k, ang)
    return rot


def make_xpos_rotary(seq, head_dim):
    n_freq = max(head_dim // 4, 1)
    ang = rotary_angles(seq, n_freq, pixel=False)
    sc = xpos_scale(seq, n_freq)

    def rot(q, k):
        return apply_rotary(q, ang, sc), apply_rotary(k, ang, 1.0 / sc)
    return rot


# ---------------------------------------------------------------------------
# Model blocks
# ---------------------------------------------------------------------------

def _split_heads(qkv, B, S, H, Dh):
    qkv = qkv.reshape(B, S, 3, H, Dh)
    q = qkv[:, :, 0].transpose(0, 2, 1, 3)   # (B, H, S, Dh)
    k = qkv[:, :, 1].transpose(0, 2, 1, 3)
    v = qkv[:, :, 2].transpose(0, 2, 1, 3)
    return q, k, v


def _attend(q, k, v, rotary):
    B, H, S, Dh = q.shape
    if rotary is not None:
        q, k = rotary(q, k)
    o = pallas_attention(q.reshape(B * H, S, Dh), k.reshape(B * H, S, Dh),
                         v.reshape(B * H, S, Dh), 1.0 / math.sqrt(Dh))
    return o.reshape(B, H, S, Dh).transpose(0, 2, 1, 3).reshape(B * S, H * Dh)


def encoder_block(p, x, num_heads, rotary, eps=LN_EPS):
    """vision/language encoder: [LN, Linear, Attn, LN, Linear] + res,
       then [LN, Linear, GELU, LN, Linear] + res — fused into 4 pallas calls."""
    b, l, s, d = x.shape
    assert d % num_heads == 0, "dim must be divisible by num_heads"
    B, H, Dh = b * l, num_heads, d // num_heads
    x_flat = x.reshape(-1, d)

    # [LN1 -> fc1 -> fused QKV] in one kernel
    qkv = _rows_call(
        functools.partial(_preattn_kernel, eps=eps), 3 * d, [x_flat],
        [p["ln1"]["g"], p["ln1"]["b"], p["fc1"]["W"], p["fc1"]["b"],
         p["attn"]["Wqkv"], p["attn"]["bqkv"]])
    q, k, v = _split_heads(qkv, B, s, H, Dh)
    a = _attend(q, k, v, rotary)

    # [o_proj -> LN2 -> fc2 -> + x] in one kernel
    inter = _rows_call(
        functools.partial(_postattn_kernel, eps=eps), d, [a, x_flat],
        [p["attn"]["o"]["W"], p["attn"]["o"]["b"],
         p["ln2"]["g"], p["ln2"]["b"], p["fc2"]["W"], p["fc2"]["b"]])

    # FFN: [LN3 -> fc3] kernel, exact GELU in XLA, [LN4 -> fc4 -> + resid] kernel
    y = _rows_call(
        functools.partial(_ln_linear_kernel, eps=eps, activation="none"), d, [inter],
        [p["ln3"]["g"], p["ln3"]["b"], p["fc3"]["W"], p["fc3"]["b"]])
    # TODO(synk): exact erf-GELU kept in XLA glue; fuse into the kernel once lax.erf
    #             lowering in Mosaic is confirmed on all target generations.
    y = jax.nn.gelu(y, approximate=False)
    out = _rows_call(
        functools.partial(_ln_linear_res_kernel, eps=eps), d, [y, inter],
        [p["ln4"]["g"], p["ln4"]["b"], p["fc4"]["W"], p["fc4"]["b"]])
    return out.reshape(b, l, s, d)


def temporal_encoder(p, x, num_heads):
    """[Linear, temporal-attention, Linear] after adding the learned temporal embedding."""
    b, l, d = x.shape
    assert d % num_heads == 0, "temporal dim must be divisible by num_heads"
    H, Dh = num_heads, d // num_heads
    x = x + p["temp_embedding"]
    x_flat = x.reshape(-1, d)

    # [fc1 -> fused QKV] in one kernel
    qkv = _rows_call(_matmul2_kernel, 3 * d, [x_flat],
                     [p["fc1"]["W"], p["fc1"]["b"],
                      p["attn"]["Wqkv"], p["attn"]["bqkv"]])
    q, k, v = _split_heads(qkv, b, l, H, Dh)
    a = _attend(q, k, v, None)

    # [o_proj -> fc2] in one kernel
    y = _rows_call(_matmul2_kernel, d, [a],
                   [p["attn"]["o"]["W"], p["attn"]["o"]["b"],
                    p["fc2"]["W"], p["fc2"]["b"]])
    return y.reshape(b, l, d)


def meant_forward(params, tweets, images, prices, cfg):
    b, l, c, H, W = images.shape
    p_res = cfg["patch_res"]
    text_dim, image_dim = cfg["text_dim"], cfg["image_dim"]
    num_heads = cfg["num_heads"]

    # ---- language branch ----
    words = params["emb"][tweets]                                   # (b*l, s, text_dim)
    s = words.shape[1]
    words = words.reshape(b, l, s, text_dim)
    txt_cls = jnp.broadcast_to(params["txt_classtkn"], (b, l, 1, text_dim))
    words = jnp.concatenate([txt_cls, words], axis=2)               # (b, l, s+1, text_dim)
    xpos_rot = make_xpos_rotary(s + 1, text_dim // num_heads)
    for enc in params["lang"]:
        words = encoder_block(enc, words, num_heads, xpos_rot)

    # ---- vision branch: 'b l c (h p1) (w p2) -> b l (h w) (p1 p2 c)' then Linear ----
    hh, ww = H // p_res, W // p_res
    img = images.reshape(b, l, c, hh, p_res, ww, p_res)
    img = img.transpose(0, 1, 3, 5, 4, 6, 2).reshape(b * l * hh * ww, p_res * p_res * c)
    img = _rows_call(functools.partial(_linear_kernel, activation="none"), image_dim,
                     [img], [params["patch"]["W"], params["patch"]["b"]])
    img = img.reshape(b, l, hh * ww, image_dim)
    img_cls = jnp.broadcast_to(params["img_classtkn"], (b, l, 1, image_dim))
    image = jnp.concatenate([img_cls, img], axis=2)                 # (b, l, n+1, image_dim)
    vis_rot = make_vision_rotary(hh * ww + 1, image_dim // num_heads)
    for enc in params["vis"]:
        image = encoder_block(enc, image, num_heads, vis_rot)

    # ---- temporal fusion of class tokens + prices ----
    temporal_input = jnp.concatenate(
        [words[:, :, 0, :], image[:, :, 0, :], prices], axis=2).astype(jnp.float32)
    out = temporal_encoder(params["temp"], temporal_input, num_heads)

    # ---- mlp head: LayerNorm, Linear, Sigmoid (fused into one kernel) ----
    d = out.shape[-1]
    num_classes = params["head_fc"]["W"].shape[1]
    y = _rows_call(
        functools.partial(_ln_linear_kernel, eps=LN_EPS, activation="sigmoid"),
        num_classes, [out.reshape(-1, d)],
        [params["head_ln"]["g"], params["head_ln"]["b"],
         params["head_fc"]["W"], params["head_fc"]["b"]])
    return y.reshape(b, l, num_classes)


# ---------------------------------------------------------------------------
# Deterministic parameter initialization
# ---------------------------------------------------------------------------

def init_linear(key, din, dout):
    kw, kb = jax.random.split(key)
    lim = 1.0 / math.sqrt(din)
    return {"W": jax.random.uniform(kw, (din, dout), jnp.float32, -lim, lim),
            "b": jax.random.uniform(kb, (dout,), jnp.float32, -lim, lim)}


def init_layernorm(dim):
    return {"g": jnp.ones((dim,), jnp.float32), "b": jnp.zeros((dim,), jnp.float32)}


def init_mha(key, dim):
    # Q, K, V projections are stored pre-fused as a single (dim, 3*dim) weight.
    ks = jax.random.split(key, 4)
    q = init_linear(ks[0], dim, dim)
    k = init_linear(ks[1], dim, dim)
    v = init_linear(ks[2], dim, dim)
    return {"Wqkv": jnp.concatenate([q["W"], k["W"], v["W"]], axis=1),
            "bqkv": jnp.concatenate([q["b"], k["b"], v["b"]], axis=0),
            "o": init_linear(ks[3], dim, dim)}


def init_encoder(key, dim):
    ks = jax.random.split(key, 5)
    return {"ln1": init_layernorm(dim), "fc1": init_linear(ks[0], dim, dim),
            "attn": init_mha(ks[1], dim),
            "ln2": init_layernorm(dim), "fc2": init_linear(ks[2], dim, dim),
            "ln3": init_layernorm(dim), "fc3": init_linear(ks[3], dim, dim),
            "ln4": init_layernorm(dim), "fc4": init_linear(ks[4], dim, dim)}


if __name__ == "__main__":
    # small but structurally faithful shapes
    b, lag, seq = 2, 3, 8
    channels, height, width, patch_res = 4, 16, 16, 8
    text_dim, image_dim, price_dim = 32, 32, 4
    num_heads, num_encoders, num_classes = 4, 1, 3
    vocab = 100
    temp_dim = text_dim + image_dim + price_dim   # analogue of the hard-coded 1540

    key = jax.random.PRNGKey(0)
    ks = jax.random.split(key, 12)

    params = {
        "emb": jax.random.normal(ks[0], (vocab, text_dim), jnp.float32),      # nn.Embedding table
        "txt_classtkn": jax.random.normal(ks[1], (1, lag, 1, text_dim), jnp.float32),
        "img_classtkn": jax.random.normal(ks[2], (1, lag, 1, image_dim), jnp.float32),
        "patch": init_linear(ks[3], channels * patch_res * patch_res, image_dim),
        "lang": [init_encoder(k, text_dim) for k in jax.random.split(ks[4], num_encoders)],
        "vis": [init_encoder(k, image_dim) for k in jax.random.split(ks[5], num_encoders)],
        "temp": {
            "temp_embedding": jax.random.normal(ks[6], (1, lag, temp_dim), jnp.float32),
            "fc1": init_linear(ks[7], temp_dim, temp_dim),
            "attn": init_mha(ks[8], temp_dim),
            "fc2": init_linear(ks[9], temp_dim, temp_dim),
        },
        "head_ln": init_layernorm(temp_dim),
        "head_fc": init_linear(ks[10], temp_dim, num_classes),
    }

    tweets = jax.random.randint(ks[11], (b * lag, seq), 0, vocab)
    kimg, kpr = jax.random.split(jax.random.PRNGKey(1))
    images = jax.random.normal(kimg, (b, lag, channels, height, width), jnp.float32)
    prices = jax.random.normal(kpr, (b, lag, price_dim), jnp.float32)

    cfg = dict(patch_res=patch_res, text_dim=text_dim, image_dim=image_dim, num_heads=num_heads)
    fwd = jax.jit(functools.partial(meant_forward, cfg=cfg))
    out = fwd(params, tweets, images, prices)
    jax.block_until_ready(out)
    assert out.shape == (b, lag, num_classes)
    assert bool(jnp.all(jnp.isfinite(out)))
    print("KERNEL_OK")
</pallas_src>

<mosaic_0001>
module attributes {stable_mosaic.version = 11 : i64} {
  func.func @_preattn_kernel(%arg0: i32, %arg1: memref<54x32xf32, #tpu.memory_space<vmem>>, %arg2: memref<1x32xf32, #tpu.memory_space<vmem>>, %arg3: memref<1x32xf32, #tpu.memory_space<vmem>>, %arg4: memref<32x32xf32, #tpu.memory_space<vmem>>, %arg5: memref<1x32xf32, #tpu.memory_space<vmem>>, %arg6: memref<32x96xf32, #tpu.memory_space<vmem>>, %arg7: memref<1x96xf32, #tpu.memory_space<vmem>>, %arg8: memref<54x96xf32, #tpu.memory_space<vmem>>) attributes {dimension_semantics = [#tpu.dimension_semantics<parallel>], iteration_bounds = array<i64: 1>, scalar_prefetch = 0 : i64, scratch_operands = 0 : i64, tpu.core_type = #tpu.core_type<tc>, window_params = [{transform_indices = @transform_0, window_bounds = array<i64: 54, 32>}, {pipeline_mode = #tpu.pipeline_mode<synchronous>, transform_indices = @transform_1, window_bounds = array<i64: 1, 32>}, {pipeline_mode = #tpu.pipeline_mode<synchronous>, transform_indices = @transform_2, window_bounds = array<i64: 1, 32>}, {pipeline_mode = #tpu.pipeline_mode<synchronous>, transform_indices = @transform_3, window_bounds = array<i64: 32, 32>}, {pipeline_mode = #tpu.pipeline_mode<synchronous>, transform_indices = @transform_4, window_bounds = array<i64: 1, 32>}, {pipeline_mode = #tpu.pipeline_mode<synchronous>, transform_indices = @transform_5, window_bounds = array<i64: 32, 96>}, {pipeline_mode = #tpu.pipeline_mode<synchronous>, transform_indices = @transform_6, window_bounds = array<i64: 1, 96>}, {transform_indices = @transform_7, window_bounds = array<i64: 54, 96>}]} {
    %c0 = arith.constant 0 : index
    %c0_0 = arith.constant 0 : index
    %0 = vector.load %arg1[%c0, %c0_0] : memref<54x32xf32, #tpu.memory_space<vmem>>, vector<54x32xf32>
    %c0_1 = arith.constant 0 : index
    %c0_2 = arith.constant 0 : index
    %1 = vector.load %arg2[%c0_1, %c0_2] : memref<1x32xf32, #tpu.memory_space<vmem>>, vector<1x32xf32>
    %c0_3 = arith.constant 0 : index
    %c0_4 = arith.constant 0 : index
    %2 = vector.load %arg3[%c0_3, %c0_4] : memref<1x32xf32, #tpu.memory_space<vmem>>, vector<1x32xf32>
    %cst = arith.constant dense<0.000000e+00> : vector<54xf32>
    %3 = vector.multi_reduction <add>, %0, %cst [1] : vector<54x32xf32> to vector<54xf32>
    %4 = vector.shape_cast %3 : vector<54xf32> to vector<54x1xf32>
    %cst_5 = arith.constant 3.200000e+01 : f32
    %5 = vector.broadcast %cst_5 : f32 to vector<54x1xf32>
    %6 = arith.divf %4, %5 : vector<54x1xf32>
    %7 = vector.broadcast %6 : vector<54x1xf32> to vector<54x32xf32>
    %8 = arith.subf %0, %7 : vector<54x32xf32>
    %9 = arith.mulf %8, %8 : vector<54x32xf32>
    %cst_6 = arith.constant dense<0.000000e+00> : vector<54xf32>
    %10 = vector.multi_reduction <add>, %9, %cst_6 [1] : vector<54x32xf32> to vector<54xf32>
    %11 = vector.shape_cast %10 : vector<54xf32> to vector<54x1xf32>
    %cst_7 = arith.constant 3.200000e+01 : f32
    %12 = vector.broadcast %cst_7 : f32 to vector<54x1xf32>
    %13 = arith.divf %11, %12 : vector<54x1xf32>
    %cst_8 = arith.constant 9.99999974E-6 : f32
    %14 = vector.broadcast %cst_8 : f32 to vector<54x1xf32>
    %15 = arith.addf %13, %14 : vector<54x1xf32>
    %16 = math.rsqrt %15 : vector<54x1xf32>
    %17 = vector.broadcast %16 : vector<54x1xf32> to vector<54x32xf32>
    %18 = arith.mulf %8, %17 : vector<54x32xf32>
    %19 = vector.broadcast %1 : vector<1x32xf32> to vector<54x32xf32>
    %20 = arith.mulf %18, %19 : vector<54x32xf32>
    %21 = vector.broadcast %2 : vector<1x32xf32> to vector<54x32xf32>
    %22 = arith.addf %20, %21 : vector<54x32xf32>
    %c0_9 = arith.constant 0 : index
    %c0_10 = arith.constant 0 : index
    %23 = vector.load %arg4[%c0_9, %c0_10] : memref<32x32xf32, #tpu.memory_space<vmem>>, vector<32x32xf32>
    %c0_11 = arith.constant 0 : index
    %c0_12 = arith.constant 0 : index
    %24 = vector.load %arg5[%c0_11, %c0_12] : memref<1x32xf32, #tpu.memory_space<vmem>>, vector<1x32xf32>
    %25 = arith.truncf %22 : vector<54x32xf32> to vector<54x32xbf16>
    %26 = arith.truncf %23 : vector<32x32xf32> to vector<32x32xbf16>
    %cst_13 = arith.constant dense<0.000000e+00> : vector<54x32xf32>
    %27 = tpu.matmul %25, %26, %cst_13 {dimension_numbers = #tpu.dot_dimension_numbers<[1], [0], [0], [1], [0, 0, 1, 1], [], []>} : vector<54x32xbf16>, vector<32x32xbf16>, vector<54x32xf32> -> vector<54x32xf32>
    %28 = vector.broadcast %24 : vector<1x32xf32> to vector<54x32xf32>
    %29 = arith.addf %27, %28 : vector<54x32xf32>
    %c0_14 = arith.constant 0 : index
    %c0_15 = arith.constant 0 : index
    %30 = vector.load %arg6[%c0_14, %c0_15] : memref<32x96xf32, #tpu.memory_space<vmem>>, vector<32x96xf32>
    %c0_16 = arith.constant 0 : index
    %c0_17 = arith.constant 0 : index
    %31 = vector.load %arg7[%c0_16, %c0_17] : memref<1x96xf32, #tpu.memory_space<vmem>>, vector<1x96xf32>
    %32 = arith.truncf %29 : vector<54x32xf32> to vector<54x32xbf16>
    %33 = arith.truncf %30 : vector<32x96xf32> to vector<32x96xbf16>
    %cst_18 = arith.constant dense<0.000000e+00> : vector<54x96xf32>
    %34 = tpu.matmul %32, %33, %cst_18 {dimension_numbers = #tpu.dot_dimension_numbers<[1], [0], [0], [1], [0, 0, 1, 1], [], []>} : vector<54x32xbf16>, vector<32x96xbf16>, vector<54x96xf32> -> vector<54x96xf32>
    %35 = vector.broadcast %31 : vector<1x96xf32> to vector<54x96xf32>
    %36 = arith.addf %34, %35 : vector<54x96xf32>
    %c0_19 = arith.constant 0 : index
    %c0_20 = arith.constant 0 : index
    %37 = vector.load %arg8[%c0_19, %c0_20] : memref<54x96xf32, #tpu.memory_space<vmem>>, vector<54x96xf32>
    tpu.vector_store %arg8[%c0_19, %c0_20], %36 {strides = array<i32>} : memref<54x96xf32, #tpu.memory_space<vmem>>, vector<54x96xf32>,
    return
  }
  func.func @transform_0(%arg0: i32) -> (i32, i32) {
    %c0_i32 = arith.constant 0 : i32
    %c0_i32_0 = arith.constant 0 : i32
    return %arg0, %c0_i32 : i32, i32
  }
  func.func @transform_1(%arg0: i32) -> (i32, i32) {
    %c0_i32 = arith.constant 0 : i32
    %c0_i32_0 = arith.constant 0 : i32
    %c0_i32_1 = arith.constant 0 : i32
    return %c0_i32, %c0_i32_0 : i32, i32
  }
  func.func @transform_2(%arg0: i32) -> (i32, i32) {
    %c0_i32 = arith.constant 0 : i32
    %c0_i32_0 = arith.constant 0 : i32
    %c0_i32_1 = arith.constant 0 : i32
    return %c0_i32, %c0_i32_0 : i32, i32
  }
  func.func @transform_3(%arg0: i32) -> (i32, i32) {
    %c0_i32 = arith.constant 0 : i32
    %c0_i32_0 = arith.constant 0 : i32
    %c0_i32_1 = arith.constant 0 : i32
    return %c0_i32, %c0_i32_0 : i32, i32
  }
  func.func @transform_4(%arg0: i32) -> (i32, i32) {
    %c0_i32 = arith.constant 0 : i32
    %c0_i32_0 = arith.constant 0 : i32
    %c0_i32_1 = arith.constant 0 : i32
    return %c0_i32, %c0_i32_0 : i32, i32
  }
  func.func @transform_5(%arg0: i32) -> (i32, i32) {
    %c0_i32 = arith.constant 0 : i32
    %c0_i32_0 = arith.constant 0 : i32
    %c0_i32_1 = arith.constant 0 : i32
    return %c0_i32, %c0_i32_0 : i32, i32
  }
  func.func @transform_6(%arg0: i32) -> (i32, i32) {
    %c0_i32 = arith.constant 0 : i32
    %c0_i32_0 = arith.constant 0 : i32
    %c0_i32_1 = arith.constant 0 : i32
    return %c0_i32, %c0_i32_0 : i32, i32
  }
  func.func @transform_7(%arg0: i32) -> (i32, i32) {
    %c0_i32 = arith.constant 0 : i32
    %c0_i32_0 = arith.constant 0 : i32
    return %arg0, %c0_i32 : i32, i32
  }
}

module attributes {stable_mosaic.version = 11 : i64} {
  func.func @_ln_linear_kernel(%arg0: i32, %arg1: memref<54x32xf32, #tpu.memory_space<vmem>>, %arg2: memref<1x32xf32, #tpu.memory_space<vmem>>, %arg3: memref<1x32xf32, #tpu.memory_space<vmem>>, %arg4: memref<32x32xf32, #tpu.memory_space<vmem>>, %arg5: memref<1x32xf32, #tpu.memory_space<vmem>>, %arg6: memref<54x32xf32, #tpu.memory_space<vmem>>) attributes {dimension_semantics = [#tpu.dimension_semantics<parallel>], iteration_bounds = array<i64: 1>, scalar_prefetch = 0 : i64, scratch_operands = 0 : i64, tpu.core_type = #tpu.core_type<tc>, window_params = [{transform_indices = @transform_0, window_bounds = array<i64: 54, 32>}, {pipeline_mode = #tpu.pipeline_mode<synchronous>, transform_indices = @transform_1, window_bounds = array<i64: 1, 32>}, {pipeline_mode = #tpu.pipeline_mode<synchronous>, transform_indices = @transform_2, window_bounds = array<i64: 1, 32>}, {pipeline_mode = #tpu.pipeline_mode<synchronous>, transform_indices = @transform_3, window_bounds = array<i64: 32, 32>}, {pipeline_mode = #tpu.pipeline_mode<synchronous>, transform_indices = @transform_4, window_bounds = array<i64: 1, 32>}, {transform_indices = @transform_5, window_bounds = array<i64: 54, 32>}]} {
    %c0 = arith.constant 0 : index
    %c0_0 = arith.constant 0 : index
    %0 = vector.load %arg1[%c0, %c0_0] : memref<54x32xf32, #tpu.memory_space<vmem>>, vector<54x32xf32>
    %c0_1 = arith.constant 0 : index
    %c0_2 = arith.constant 0 : index
    %1 = vector.load %arg2[%c0_1, %c0_2] : memref<1x32xf32, #tpu.memory_space<vmem>>, vector<1x32xf32>
    %c0_3 = arith.constant 0 : index
    %c0_4 = arith.constant 0 : index
    %2 = vector.load %arg3[%c0_3, %c0_4] : memref<1x32xf32, #tpu.memory_space<vmem>>, vector<1x32xf32>
    %cst = arith.constant dense<0.000000e+00> : vector<54xf32>
    %3 = vector.multi_reduction <add>, %0, %cst [1] : vector<54x32xf32> to vector<54xf32>
    %4 = vector.shape_cast %3 : vector<54xf32> to vector<54x1xf32>
    %cst_5 = arith.constant 3.200000e+01 : f32
    %5 = vector.broadcast %cst_5 : f32 to vector<54x1xf32>
    %6 = arith.divf %4, %5 : vector<54x1xf32>
    %7 = vector.broadcast %6 : vector<54x1xf32> to vector<54x32xf32>
    %8 = arith.subf %0, %7 : vector<54x32xf32>
    %9 = arith.mulf %8, %8 : vector<54x32xf32>
    %cst_6 = arith.constant dense<0.000000e+00> : vector<54xf32>
    %10 = vector.multi_reduction <add>, %9, %cst_6 [1] : vector<54x32xf32> to vector<54xf32>
    %11 = vector.shape_cast %10 : vector<54xf32> to vector<54x1xf32>
    %cst_7 = arith.constant 3.200000e+01 : f32
    %12 = vector.broadcast %cst_7 : f32 to vector<54x1xf32>
    %13 = arith.divf %11, %12 : vector<54x1xf32>
    %cst_8 = arith.constant 9.99999974E-6 : f32
    %14 = vector.broadcast %cst_8 : f32 to vector<54x1xf32>
    %15 = arith.addf %13, %14 : vector<54x1xf32>
    %16 = math.rsqrt %15 : vector<54x1xf32>
    %17 = vector.broadcast %16 : vector<54x1xf32> to vector<54x32xf32>
    %18 = arith.mulf %8, %17 : vector<54x32xf32>
    %19 = vector.broadcast %1 : vector<1x32xf32> to vector<54x32xf32>
    %20 = arith.mulf %18, %19 : vector<54x32xf32>
    %21 = vector.broadcast %2 : vector<1x32xf32> to vector<54x32xf32>
    %22 = arith.addf %20, %21 : vector<54x32xf32>
    %c0_9 = arith.constant 0 : index
    %c0_10 = arith.constant 0 : index
    %23 = vector.load %arg4[%c0_9, %c0_10] : memref<32x32xf32, #tpu.memory_space<vmem>>, vector<32x32xf32>
    %c0_11 = arith.constant 0 : index
    %c0_12 = arith.constant 0 : index
    %24 = vector.load %arg5[%c0_11, %c0_12] : memref<1x32xf32, #tpu.memory_space<vmem>>, vector<1x32xf32>
    %25 = arith.truncf %22 : vector<54x32xf32> to vector<54x32xbf16>
    %26 = arith.truncf %23 : vector<32x32xf32> to vector<32x32xbf16>
    %cst_13 = arith.constant dense<0.000000e+00> : vector<54x32xf32>
    %27 = tpu.matmul %25, %26, %cst_13 {dimension_numbers = #tpu.dot_dimension_numbers<[1], [0], [0], [1], [0, 0, 1, 1], [], []>} : vector<54x32xbf16>, vector<32x32xbf16>, vector<54x32xf32> -> vector<54x32xf32>
    %28 = vector.broadcast %24 : vector<1x32xf32> to vector<54x32xf32>
    %29 = arith.addf %27, %28 : vector<54x32xf32>
    %c0_14 = arith.constant 0 : index
    %c0_15 = arith.constant 0 : index
    %30 = vector.load %arg6[%c0_14, %c0_15] : memref<54x32xf32, #tpu.memory_space<vmem>>, vector<54x32xf32>
    tpu.vector_store %arg6[%c0_14, %c0_15], %29 {strides = array<i32>} : memref<54x32xf32, #tpu.memory_space<vmem>>, vector<54x32xf32>,
    return
  }
  func.func @transform_0(%arg0: i32) -> (i32, i32) {
    %c0_i32 = arith.constant 0 : i32
    %c0_i32_0 = arith.constant 0 : i32
    return %arg0, %c0_i32 : i32, i32
  }
  func.func @transform_1(%arg0: i32) -> (i32, i32) {
    %c0_i32 = arith.constant 0 : i32
    %c0_i32_0 = arith.constant 0 : i32
    %c0_i32_1 = arith.constant 0 : i32
    return %c0_i32, %c0_i32_0 : i32, i32
  }
  func.func @transform_2(%arg0: i32) -> (i32, i32) {
    %c0_i32 = arith.constant 0 : i32
    %c0_i32_0 = arith.constant 0 : i32
    %c0_i32_1 = arith.constant 0 : i32
    return %c0_i32, %c0_i32_0 : i32, i32
  }
  func.func @transform_3(%arg0: i32) -> (i32, i32) {
    %c0_i32 = arith.constant 0 : i32
    %c0_i32_0 = arith.constant 0 : i32
    %c0_i32_1 = arith.constant 0 : i32
    return %c0_i32, %c0_i32_0 : i32, i32
  }
  func.func @transform_4(%arg0: i32) -> (i32, i32) {
    %c0_i32 = arith.constant 0 : i32
    %c0_i32_0 = arith.constant 0 : i32
    %c0_i32_1 = arith.constant 0 : i32
    return %c0_i32, %c0_i32_0 : i32, i32
  }
  func.func @transform_5(%arg0: i32) -> (i32, i32) {
    %c0_i32 = arith.constant 0 : i32
    %c0_i32_0 = arith.constant 0 : i32
    return %arg0, %c0_i32 : i32, i32
  }
}

module attributes {stable_mosaic.version = 11 : i64} {
  func.func @_attention_kernel(%arg0: i32, %arg1: memref<12x9x8xf32, #tpu.memory_space<vmem>>, %arg2: memref<12x9x8xf32, #tpu.memory_space<vmem>>, %arg3: memref<12x9x8xf32, #tpu.memory_space<vmem>>, %arg4: memref<12x9x8xf32, #tpu.memory_space<vmem>>) attributes {dimension_semantics = [#tpu.dimension_semantics<parallel>], iteration_bounds = array<i64: 2>, scalar_prefetch = 0 : i64, scratch_operands = 0 : i64, tpu.core_type = #tpu.core_type<tc>, window_params = [{transform_indices = @transform_0, window_bounds = array<i64: 12, 9, 8>}, {transform_indices = @transform_1, window_bounds = array<i64: 12, 9, 8>}, {transform_indices = @transform_2, window_bounds = array<i64: 12, 9, 8>}, {transform_indices = @transform_3, window_bounds = array<i64: 12, 9, 8>}]} {
    %c0 = arith.constant 0 : index
    %c0_0 = arith.constant 0 : index
    %c0_1 = arith.constant 0 : index
    %0 = vector.load %arg1[%c0, %c0_0, %c0_1] : memref<12x9x8xf32, #tpu.memory_space<vmem>>, vector<12x9x8xf32>
    %1 = arith.truncf %0 : vector<12x9x8xf32> to vector<12x9x8xbf16>
    %c0_2 = arith.constant 0 : index
    %c0_3 = arith.constant 0 : index
    %c0_4 = arith.constant 0 : index
    %2 = vector.load %arg2[%c0_2, %c0_3, %c0_4] : memref<12x9x8xf32, #tpu.memory_space<vmem>>, vector<12x9x8xf32>
    %3 = arith.truncf %2 : vector<12x9x8xf32> to vector<12x9x8xbf16>
    %c0_5 = arith.constant 0 : index
    %c0_6 = arith.constant 0 : index
    %c0_7 = arith.constant 0 : index
    %4 = vector.load %arg3[%c0_5, %c0_6, %c0_7] : memref<12x9x8xf32, #tpu.memory_space<vmem>>, vector<12x9x8xf32>
    %5 = arith.truncf %4 : vector<12x9x8xf32> to vector<12x9x8xbf16>
    "tpu.trace_start"() <{level = 10 : i32, message = "bqd,bkd->bqk"}> : () -> ()
    %cst = arith.constant dense<0.000000e+00> : vector<12x9x9xf32>
    %6 = tpu.matmul %1, %3, %cst {dimension_numbers = #tpu.dot_dimension_numbers<[2], [2], [1], [1], [0, 0, 0, 1, 1, 1], [0], [0]>} : vector<12x9x8xbf16>, vector<12x9x8xbf16>, vector<12x9x9xf32> -> vector<12x9x9xf32>
    "tpu.trace_stop"() : () -> ()
    %cst_8 = arith.constant 0.353553385 : f32
    %7 = vector.broadcast %cst_8 : f32 to vector<12x9x9xf32>
    %8 = arith.mulf %6, %7 : vector<12x9x9xf32>
    %cst_9 = arith.constant dense<0xFF800000> : vector<12x9xf32>
    %9 = vector.multi_reduction <maximumf>, %8, %cst_9 [2] : vector<12x9x9xf32> to vector<12x9xf32>
    %10 = vector.shape_cast %9 : vector<12x9xf32> to vector<12x9x1xf32>
    %11 = vector.broadcast %10 : vector<12x9x1xf32> to vector<12x9x9xf32>
    %12 = arith.subf %8, %11 : vector<12x9x9xf32>
    %13 = math.exp %12 : vector<12x9x9xf32>
    %cst_10 = arith.constant dense<0.000000e+00> : vector<12x9xf32>
    %14 = vector.multi_reduction <add>, %13, %cst_10 [2] : vector<12x9x9xf32> to vector<12x9xf32>
    %15 = vector.shape_cast %14 : vector<12x9xf32> to vector<12x9x1xf32>
    %16 = tpu.reciprocal %15 {approx = true} : vector<12x9x1xf32> -> vector<12x9x1xf32>
    %17 = vector.broadcast %16 : vector<12x9x1xf32> to vector<12x9x9xf32>
    %18 = arith.mulf %13, %17 : vector<12x9x9xf32>
    %19 = arith.truncf %18 : vector<12x9x9xf32> to vector<12x9x9xbf16>
    "tpu.trace_start"() <{level = 10 : i32, message = "bqk,bkd->bqd"}> : () -> ()
    %cst_11 = arith.constant dense<0.000000e+00> : vector<12x9x8xf32>
    %20 = tpu.matmul %19, %5, %cst_11 {dimension_numbers = #tpu.dot_dimension_numbers<[2], [1], [1], [2], [0, 0, 0, 1, 1, 2], [0], [0]>} : vector<12x9x9xbf16>, vector<12x9x8xbf16>, vector<12x9x8xf32> -> vector<12x9x8xf32>
    "tpu.trace_stop"() : () -> ()
    %c0_12 = arith.constant 0 : index
    %c0_13 = arith.constant 0 : index
    %c0_14 = arith.constant 0 : index
    %21 = vector.load %arg4[%c0_12, %c0_13, %c0_14] : memref<12x9x8xf32, #tpu.memory_space<vmem>>, vector<12x9x8xf32>
    tpu.vector_store %arg4[%c0_12, %c0_13, %c0_14], %20 {strides = array<i32>} : memref<12x9x8xf32, #tpu.memory_space<vmem>>, vector<12x9x8xf32>,
    return
  }
  func.func @transform_0(%arg0: i32) -> (i32, i32, i32) {
    %c0_i32 = arith.constant 0 : i32
    %c0_i32_0 = arith.constant 0 : i32
    %c0_i32_1 = arith.constant 0 : i32
    return %arg0, %c0_i32, %c0_i32_0 : i32, i32, i32
  }
  func.func @transform_1(%arg0: i32) -> (i32, i32, i32) {
    %c0_i32 = arith.constant 0 : i32
    %c0_i32_0 = arith.constant 0 : i32
    %c0_i32_1 = arith.constant 0 : i32
    return %arg0, %c0_i32, %c0_i32_0 : i32, i32, i32
  }
  func.func @transform_2(%arg0: i32) -> (i32, i32, i32) {
    %c0_i32 = arith.constant 0 : i32
    %c0_i32_0 = arith.constant 0 : i32
    %c0_i32_1 = arith.constant 0 : i32
    return %arg0, %c0_i32, %c0_i32_0 : i32, i32, i32
  }
  func.func @transform_3(%arg0: i32) -> (i32, i32, i32) {
    %c0_i32 = arith.constant 0 : i32
    %c0_i32_0 = arith.constant 0 : i32
    %c0_i32_1 = arith.constant 0 : i32
    return %arg0, %c0_i32, %c0_i32_0 : i32, i32, i32
  }
}

module attributes {stable_mosaic.version = 11 : i64} {
  func.func @_postattn_kernel(%arg0: i32, %arg1: memref<54x32xf32, #tpu.memory_space<vmem>>, %arg2: memref<54x32xf32, #tpu.memory_space<vmem>>, %arg3: memref<32x32xf32, #tpu.memory_space<vmem>>, %arg4: memref<1x32xf32, #tpu.memory_space<vmem>>, %arg5: memref<1x32xf32, #tpu.memory_space<vmem>>, %arg6: memref<1x32xf32, #tpu.memory_space<vmem>>, %arg7: memref<32x32xf32, #tpu.memory_space<vmem>>, %arg8: memref<1x32xf32, #tpu.memory_space<vmem>>, %arg9: memref<54x32xf32, #tpu.memory_space<vmem>>) attributes {dimension_semantics = [#tpu.dimension_semantics<parallel>], iteration_bounds = array<i64: 1>, scalar_prefetch = 0 : i64, scratch_operands = 0 : i64, tpu.core_type = #tpu.core_type<tc>, window_params = [{transform_indices = @transform_0, window_bounds = array<i64: 54, 32>}, {transform_indices = @transform_1, window_bounds = array<i64: 54, 32>}, {pipeline_mode = #tpu.pipeline_mode<synchronous>, transform_indices = @transform_2, window_bounds = array<i64: 32, 32>}, {pipeline_mode = #tpu.pipeline_mode<synchronous>, transform_indices = @transform_3, window_bounds = array<i64: 1, 32>}, {pipeline_mode = #tpu.pipeline_mode<synchronous>, transform_indices = @transform_4, window_bounds = array<i64: 1, 32>}, {pipeline_mode = #tpu.pipeline_mode<synchronous>, transform_indices = @transform_5, window_bounds = array<i64: 1, 32>}, {pipeline_mode = #tpu.pipeline_mode<synchronous>, transform_indices = @transform_6, window_bounds = array<i64: 32, 32>}, {pipeline_mode = #tpu.pipeline_mode<synchronous>, transform_indices = @transform_7, window_bounds = array<i64: 1, 32>}, {transform_indices = @transform_8, window_bounds = array<i64: 54, 32>}]} {
    %c0 = arith.constant 0 : index
    %c0_0 = arith.constant 0 : index
    %0 = vector.load %arg1[%c0, %c0_0] : memref<54x32xf32, #tpu.memory_space<vmem>>, vector<54x32xf32>
    %c0_1 = arith.constant 0 : index
    %c0_2 = arith.constant 0 : index
    %1 = vector.load %arg3[%c0_1, %c0_2] : memref<32x32xf32, #tpu.memory_space<vmem>>, vector<32x32xf32>
    %c0_3 = arith.constant 0 : index
    %c0_4 = arith.constant 0 : index
    %2 = vector.load %arg4[%c0_3, %c0_4] : memref<1x32xf32, #tpu.memory_space<vmem>>, vector<1x32xf32>
    %3 = arith.truncf %0 : vector<54x32xf32> to vector<54x32xbf16>
    %4 = arith.truncf %1 : vector<32x32xf32> to vector<32x32xbf16>
    %cst = arith.constant dense<0.000000e+00> : vector<54x32xf32>
    %5 = tpu.matmul %3, %4, %cst {dimension_numbers = #tpu.dot_dimension_numbers<[1], [0], [0], [1], [0, 0, 1, 1], [], []>} : vector<54x32xbf16>, vector<32x32xbf16>, vector<54x32xf32> -> vector<54x32xf32>
    %6 = vector.broadcast %2 : vector<1x32xf32> to vector<54x32xf32>
    %7 = arith.addf %5, %6 : vector<54x32xf32>
    %c0_5 = arith.constant 0 : index
    %c0_6 = arith.constant 0 : index
    %8 = vector.load %arg5[%c0_5, %c0_6] : memref<1x32xf32, #tpu.memory_space<vmem>>, vector<1x32xf32>
    %c0_7 = arith.constant 0 : index
    %c0_8 = arith.constant 0 : index
    %9 = vector.load %arg6[%c0_7, %c0_8] : memref<1x32xf32, #tpu.memory_space<vmem>>, vector<1x32xf32>
    %cst_9 = arith.constant dense<0.000000e+00> : vector<54xf32>
    %10 = vector.multi_reduction <add>, %7, %cst_9 [1] : vector<54x32xf32> to vector<54xf32>
    %11 = vector.shape_cast %10 : vector<54xf32> to vector<54x1xf32>
    %cst_10 = arith.constant 3.200000e+01 : f32
    %12 = vector.broadcast %cst_10 : f32 to vector<54x1xf32>
    %13 = arith.divf %11, %12 : vector<54x1xf32>
    %14 = vector.broadcast %13 : vector<54x1xf32> to vector<54x32xf32>
    %15 = arith.subf %7, %14 : vector<54x32xf32>
    %16 = arith.mulf %15, %15 : vector<54x32xf32>
    %cst_11 = arith.constant dense<0.000000e+00> : vector<54xf32>
    %17 = vector.multi_reduction <add>, %16, %cst_11 [1] : vector<54x32xf32> to vector<54xf32>
    %18 = vector.shape_cast %17 : vector<54xf32> to vector<54x1xf32>
    %cst_12 = arith.constant 3.200000e+01 : f32
    %19 = vector.broadcast %cst_12 : f32 to vector<54x1xf32>
    %20 = arith.divf %18, %19 : vector<54x1xf32>
    %cst_13 = arith.constant 9.99999974E-6 : f32
    %21 = vector.broadcast %cst_13 : f32 to vector<54x1xf32>
    %22 = arith.addf %20, %21 : vector<54x1xf32>
    %23 = math.rsqrt %22 : vector<54x1xf32>
    %24 = vector.broadcast %23 : vector<54x1xf32> to vector<54x32xf32>
    %25 = arith.mulf %15, %24 : vector<54x32xf32>
    %26 = vector.broadcast %8 : vector<1x32xf32> to vector<54x32xf32>
    %27 = arith.mulf %25, %26 : vector<54x32xf32>
    %28 = vector.broadcast %9 : vector<1x32xf32> to vector<54x32xf32>
    %29 = arith.addf %27, %28 : vector<54x32xf32>
    %c0_14 = arith.constant 0 : index
    %c0_15 = arith.constant 0 : index
    %30 = vector.load %arg7[%c0_14, %c0_15] : memref<32x32xf32, #tpu.memory_space<vmem>>, vector<32x32xf32>
    %c0_16 = arith.constant 0 : index
    %c0_17 = arith.constant 0 : index
    %31 = vector.load %arg8[%c0_16, %c0_17] : memref<1x32xf32, #tpu.memory_space<vmem>>, vector<1x32xf32>
    %32 = arith.truncf %29 : vector<54x32xf32> to vector<54x32xbf16>
    %33 = arith.truncf %30 : vector<32x32xf32> to vector<32x32xbf16>
    %cst_18 = arith.constant dense<0.000000e+00> : vector<54x32xf32>
    %34 = tpu.matmul %32, %33, %cst_18 {dimension_numbers = #tpu.dot_dimension_numbers<[1], [0], [0], [1], [0, 0, 1, 1], [], []>} : vector<54x32xbf16>, vector<32x32xbf16>, vector<54x32xf32> -> vector<54x32xf32>
    %35 = vector.broadcast %31 : vector<1x32xf32> to vector<54x32xf32>
    %36 = arith.addf %34, %35 : vector<54x32xf32>
    %c0_19 = arith.constant 0 : index
    %c0_20 = arith.constant 0 : index
    %37 = vector.load %arg2[%c0_19, %c0_20] : memref<54x32xf32, #tpu.memory_space<vmem>>, vector<54x32xf32>
    %38 = arith.addf %36, %37 : vector<54x32xf32>
    %c0_21 = arith.constant 0 : index
    %c0_22 = arith.constant 0 : index
    %39 = vector.load %arg9[%c0_21, %c0_22] : memref<54x32xf32, #tpu.memory_space<vmem>>, vector<54x32xf32>
    tpu.vector_store %arg9[%c0_21, %c0_22], %38 {strides = array<i32>} : memref<54x32xf32, #tpu.memory_space<vmem>>, vector<54x32xf32>,
    return
  }
  func.func @transform_0(%arg0: i32) -> (i32, i32) {
    %c0_i32 = arith.constant 0 : i32
    %c0_i32_0 = arith.constant 0 : i32
    return %arg0, %c0_i32 : i32, i32
  }
  func.func @transform_1(%arg0: i32) -> (i32, i32) {
    %c0_i32 = arith.constant 0 : i32
    %c0_i32_0 = arith.constant 0 : i32
    return %arg0, %c0_i32 : i32, i32
  }
  func.func @transform_2(%arg0: i32) -> (i32, i32) {
    %c0_i32 = arith.constant 0 : i32
    %c0_i32_0 = arith.constant 0 : i32
    %c0_i32_1 = arith.constant 0 : i32
    return %c0_i32, %c0_i32_0 : i32, i32
  }
  func.func @transform_3(%arg0: i32) -> (i32, i32) {
    %c0_i32 = arith.constant 0 : i32
    %c0_i32_0 = arith.constant 0 : i32
    %c0_i32_1 = arith.constant 0 : i32
    return %c0_i32, %c0_i32_0 : i32, i32
  }
  func.func @transform_4(%arg0: i32) -> (i32, i32) {
    %c0_i32 = arith.constant 0 : i32
    %c0_i32_0 = arith.constant 0 : i32
    %c0_i32_1 = arith.constant 0 : i32
    return %c0_i32, %c0_i32_0 : i32, i32
  }
  func.func @transform_5(%arg0: i32) -> (i32, i32) {
    %c0_i32 = arith.constant 0 : i32
    %c0_i32_0 = arith.constant 0 : i32
    %c0_i32_1 = arith.constant 0 : i32
    return %c0_i32, %c0_i32_0 : i32, i32
  }
  func.func @transform_6(%arg0: i32) -> (i32, i32) {
    %c0_i32 = arith.constant 0 : i32
    %c0_i32_0 = arith.constant 0 : i32
    %c0_i32_1 = arith.constant 0 : i32
    return %c0_i32, %c0_i32_0 : i32, i32
  }
  func.func @transform_7(%arg0: i32) -> (i32, i32) {
    %c0_i32 = arith.constant 0 : i32
    %c0_i32_0 = arith.constant 0 : i32
    %c0_i32_1 = arith.constant 0 : i32
    return %c0_i32, %c0_i32_0 : i32, i32
  }
  func.func @transform_8(%arg0: i32) -> (i32, i32) {
    %c0_i32 = arith.constant 0 : i32
    %c0_i32_0 = arith.constant 0 : i32
    return %arg0, %c0_i32 : i32, i32
  }
}

module attributes {stable_mosaic.version = 11 : i64} {
  func.func @_ln_linear_res_kernel(%arg0: i32, %arg1: memref<54x32xf32, #tpu.memory_space<vmem>>, %arg2: memref<54x32xf32, #tpu.memory_space<vmem>>, %arg3: memref<1x32xf32, #tpu.memory_space<vmem>>, %arg4: memref<1x32xf32, #tpu.memory_space<vmem>>, %arg5: memref<32x32xf32, #tpu.memory_space<vmem>>, %arg6: memref<1x32xf32, #tpu.memory_space<vmem>>, %arg7: memref<54x32xf32, #tpu.memory_space<vmem>>) attributes {dimension_semantics = [#tpu.dimension_semantics<parallel>], iteration_bounds = array<i64: 1>, scalar_prefetch = 0 : i64, scratch_operands = 0 : i64, tpu.core_type = #tpu.core_type<tc>, window_params = [{transform_indices = @transform_0, window_bounds = array<i64: 54, 32>}, {transform_indices = @transform_1, window_bounds = array<i64: 54, 32>}, {pipeline_mode = #tpu.pipeline_mode<synchronous>, transform_indices = @transform_2, window_bounds = array<i64: 1, 32>}, {pipeline_mode = #tpu.pipeline_mode<synchronous>, transform_indices = @transform_3, window_bounds = array<i64: 1, 32>}, {pipeline_mode = #tpu.pipeline_mode<synchronous>, transform_indices = @transform_4, window_bounds = array<i64: 32, 32>}, {pipeline_mode = #tpu.pipeline_mode<synchronous>, transform_indices = @transform_5, window_bounds = array<i64: 1, 32>}, {transform_indices = @transform_6, window_bounds = array<i64: 54, 32>}]} {
    %c0 = arith.constant 0 : index
    %c0_0 = arith.constant 0 : index
    %0 = vector.load %arg1[%c0, %c0_0] : memref<54x32xf32, #tpu.memory_space<vmem>>, vector<54x32xf32>
    %c0_1 = arith.constant 0 : index
    %c0_2 = arith.constant 0 : index
    %1 = vector.load %arg3[%c0_1, %c0_2] : memref<1x32xf32, #tpu.memory_space<vmem>>, vector<1x32xf32>
    %c0_3 = arith.constant 0 : index
    %c0_4 = arith.constant 0 : index
    %2 = vector.load %arg4[%c0_3, %c0_4] : memref<1x32xf32, #tpu.memory_space<vmem>>, vector<1x32xf32>
    %cst = arith.constant dense<0.000000e+00> : vector<54xf32>
    %3 = vector.multi_reduction <add>, %0, %cst [1] : vector<54x32xf32> to vector<54xf32>
    %4 = vector.shape_cast %3 : vector<54xf32> to vector<54x1xf32>
    %cst_5 = arith.constant 3.200000e+01 : f32
    %5 = vector.broadcast %cst_5 : f32 to vector<54x1xf32>
    %6 = arith.divf %4, %5 : vector<54x1xf32>
    %7 = vector.broadcast %6 : vector<54x1xf32> to vector<54x32xf32>
    %8 = arith.subf %0, %7 : vector<54x32xf32>
    %9 = arith.mulf %8, %8 : vector<54x32xf32>
    %cst_6 = arith.constant dense<0.000000e+00> : vector<54xf32>
    %10 = vector.multi_reduction <add>, %9, %cst_6 [1] : vector<54x32xf32> to vector<54xf32>
    %11 = vector.shape_cast %10 : vector<54xf32> to vector<54x1xf32>
    %cst_7 = arith.constant 3.200000e+01 : f32
    %12 = vector.broadcast %cst_7 : f32 to vector<54x1xf32>
    %13 = arith.divf %11, %12 : vector<54x1xf32>
    %cst_8 = arith.constant 9.99999974E-6 : f32
    %14 = vector.broadcast %cst_8 : f32 to vector<54x1xf32>
    %15 = arith.addf %13, %14 : vector<54x1xf32>
    %16 = math.rsqrt %15 : vector<54x1xf32>
    %17 = vector.broadcast %16 : vector<54x1xf32> to vector<54x32xf32>
    %18 = arith.mulf %8, %17 : vector<54x32xf32>
    %19 = vector.broadcast %1 : vector<1x32xf32> to vector<54x32xf32>
    %20 = arith.mulf %18, %19 : vector<54x32xf32>
    %21 = vector.broadcast %2 : vector<1x32xf32> to vector<54x32xf32>
    %22 = arith.addf %20, %21 : vector<54x32xf32>
    %c0_9 = arith.constant 0 : index
    %c0_10 = arith.constant 0 : index
    %23 = vector.load %arg5[%c0_9, %c0_10] : memref<32x32xf32, #tpu.memory_space<vmem>>, vector<32x32xf32>
    %c0_11 = arith.constant 0 : index
    %c0_12 = arith.constant 0 : index
    %24 = vector.load %arg6[%c0_11, %c0_12] : memref<1x32xf32, #tpu.memory_space<vmem>>, vector<1x32xf32>
    %25 = arith.truncf %22 : vector<54x32xf32> to vector<54x32xbf16>
    %26 = arith.truncf %23 : vector<32x32xf32> to vector<32x32xbf16>
    %cst_13 = arith.constant dense<0.000000e+00> : vector<54x32xf32>
    %27 = tpu.matmul %25, %26, %cst_13 {dimension_numbers = #tpu.dot_dimension_numbers<[1], [0], [0], [1], [0, 0, 1, 1], [], []>} : vector<54x32xbf16>, vector<32x32xbf16>, vector<54x32xf32> -> vector<54x32xf32>
    %28 = vector.broadcast %24 : vector<1x32xf32> to vector<54x32xf32>
    %29 = arith.addf %27, %28 : vector<54x32xf32>
    %c0_14 = arith.constant 0 : index
    %c0_15 = arith.constant 0 : index
    %30 = vector.load %arg2[%c0_14, %c0_15] : memref<54x32xf32, #tpu.memory_space<vmem>>, vector<54x32xf32>
    %31 = arith.addf %29, %30 : vector<54x32xf32>
    %c0_16 = arith.constant 0 : index
    %c0_17 = arith.constant 0 : index
    %32 = vector.load %arg7[%c0_16, %c0_17] : memref<54x32xf32, #tpu.memory_space<vmem>>, vector<54x32xf32>
    tpu.vector_store %arg7[%c0_16, %c0_17], %31 {strides = array<i32>} : memref<54x32xf32, #tpu.memory_space<vmem>>, vector<54x32xf32>,
    return
  }
  func.func @transform_0(%arg0: i32) -> (i32, i32) {
    %c0_i32 = arith.constant 0 : i32
    %c0_i32_0 = arith.constant 0 : i32
    return %arg0, %c0_i32 : i32, i32
  }
  func.func @transform_1(%arg0: i32) -> (i32, i32) {
    %c0_i32 = arith.constant 0 : i32
    %c0_i32_0 = arith.constant 0 : i32
    return %arg0, %c0_i32 : i32, i32
  }
  func.func @transform_2(%arg0: i32) -> (i32, i32) {
    %c0_i32 = arith.constant 0 : i32
    %c0_i32_0 = arith.constant 0 : i32
    %c0_i32_1 = arith.constant 0 : i32
    return %c0_i32, %c0_i32_0 : i32, i32
  }
  func.func @transform_3(%arg0: i32) -> (i32, i32) {
    %c0_i32 = arith.constant 0 : i32
    %c0_i32_0 = arith.constant 0 : i32
    %c0_i32_1 = arith.constant 0 : i32
    return %c0_i32, %c0_i32_0 : i32, i32
  }
  func.func @transform_4(%arg0: i32) -> (i32, i32) {
    %c0_i32 = arith.constant 0 : i32
    %c0_i32_0 = arith.constant 0 : i32
    %c0_i32_1 = arith.constant 0 : i32
    return %c0_i32, %c0_i32_0 : i32, i32
  }
  func.func @transform_5(%arg0: i32) -> (i32, i32) {
    %c0_i32 = arith.constant 0 : i32
    %c0_i32_0 = arith.constant 0 : i32
    %c0_i32_1 = arith.constant 0 : i32
    return %c0_i32, %c0_i32_0 : i32, i32
  }
  func.func @transform_6(%arg0: i32) -> (i32, i32) {
    %c0_i32 = arith.constant 0 : i32
    %c0_i32_0 = arith.constant 0 : i32
    return %arg0, %c0_i32 : i32, i32
  }
}

module attributes {stable_mosaic.version = 11 : i64} {
  func.func @_linear_kernel(%arg0: i32, %arg1: memref<24x256xf32, #tpu.memory_space<vmem>>, %arg2: memref<256x32xf32, #tpu.memory_space<vmem>>, %arg3: memref<1x32xf32, #tpu.memory_space<vmem>>, %arg4: memref<24x32xf32, #tpu.memory_space<vmem>>) attributes {dimension_semantics = [#tpu.dimension_semantics<parallel>], iteration_bounds = array<i64: 1>, scalar_prefetch = 0 : i64, scratch_operands = 0 : i64, tpu.core_type = #tpu.core_type<tc>, window_params = [{transform_indices = @transform_0, window_bounds = array<i64: 24, 256>}, {pipeline_mode = #tpu.pipeline_mode<synchronous>, transform_indices = @transform_1, window_bounds = array<i64: 256, 32>}, {pipeline_mode = #tpu.pipeline_mode<synchronous>, transform_indices = @transform_2, window_bounds = array<i64: 1, 32>}, {transform_indices = @transform_3, window_bounds = array<i64: 24, 32>}]} {
    %c0 = arith.constant 0 : index
    %c0_0 = arith.constant 0 : index
    %0 = vector.load %arg1[%c0, %c0_0] : memref<24x256xf32, #tpu.memory_space<vmem>>, vector<24x256xf32>
    %c0_1 = arith.constant 0 : index
    %c0_2 = arith.constant 0 : index
    %1 = vector.load %arg2[%c0_1, %c0_2] : memref<256x32xf32, #tpu.memory_space<vmem>>, vector<256x32xf32>
    %c0_3 = arith.constant 0 : index
    %c0_4 = arith.constant 0 : index
    %2 = vector.load %arg3[%c0_3, %c0_4] : memref<1x32xf32, #tpu.memory_space<vmem>>, vector<1x32xf32>
    %3 = arith.truncf %0 : vector<24x256xf32> to vector<24x256xbf16>
    %4 = arith.truncf %1 : vector<256x32xf32> to vector<256x32xbf16>
    %cst = arith.constant dense<0.000000e+00> : vector<24x32xf32>
    %5 = tpu.matmul %3, %4, %cst {dimension_numbers = #tpu.dot_dimension_numbers<[1], [0], [0], [1], [0, 0, 1, 1], [], []>} : vector<24x256xbf16>, vector<256x32xbf16>, vector<24x32xf32> -> vector<24x32xf32>
    %6 = vector.broadcast %2 : vector<1x32xf32> to vector<24x32xf32>
    %7 = arith.addf %5, %6 : vector<24x32xf32>
    %c0_5 = arith.constant 0 : index
    %c0_6 = arith.constant 0 : index
    %8 = vector.load %arg4[%c0_5, %c0_6] : memref<24x32xf32, #tpu.memory_space<vmem>>, vector<24x32xf32>
    tpu.vector_store %arg4[%c0_5, %c0_6], %7 {strides = array<i32>} : memref<24x32xf32, #tpu.memory_space<vmem>>, vector<24x32xf32>,
    return
  }
  func.func @transform_0(%arg0: i32) -> (i32, i32) {
    %c0_i32 = arith.constant 0 : i32
    %c0_i32_0 = arith.constant 0 : i32
    return %arg0, %c0_i32 : i32, i32
  }
  func.func @transform_1(%arg0: i32) -> (i32, i32) {
    %c0_i32 = arith.constant 0 : i32
    %c0_i32_0 = arith.constant 0 : i32
    %c0_i32_1 = arith.constant 0 : i32
    return %c0_i32, %c0_i32_0 : i32, i32
  }
  func.func @transform_2(%arg0: i32) -> (i32, i32) {
    %c0_i32 = arith.constant 0 : i32
    %c0_i32_0 = arith.constant 0 : i32
    %c0_i32_1 = arith.constant 0 : i32
    return %c0_i32, %c0_i32_0 : i32, i32
  }
  func.func @transform_3(%arg0: i32) -> (i32, i32) {
    %c0_i32 = arith.constant 0 : i32
    %c0_i32_0 = arith.constant 0 : i32
    return %arg0, %c0_i32 : i32, i32
  }
}

module attributes {stable_mosaic.version = 11 : i64} {
  func.func @_preattn_kernel(%arg0: i32, %arg1: memref<30x32xf32, #tpu.memory_space<vmem>>, %arg2: memref<1x32xf32, #tpu.memory_space<vmem>>, %arg3: memref<1x32xf32, #tpu.memory_space<vmem>>, %arg4: memref<32x32xf32, #tpu.memory_space<vmem>>, %arg5: memref<1x32xf32, #tpu.memory_space<vmem>>, %arg6: memref<32x96xf32, #tpu.memory_space<vmem>>, %arg7: memref<1x96xf32, #tpu.memory_space<vmem>>, %arg8: memref<30x96xf32, #tpu.memory_space<vmem>>) attributes {dimension_semantics = [#tpu.dimension_semantics<parallel>], iteration_bounds = array<i64: 1>, scalar_prefetch = 0 : i64, scratch_operands = 0 : i64, tpu.core_type = #tpu.core_type<tc>, window_params = [{transform_indices = @transform_0, window_bounds = array<i64: 30, 32>}, {pipeline_mode = #tpu.pipeline_mode<synchronous>, transform_indices = @transform_1, window_bounds = array<i64: 1, 32>}, {pipeline_mode = #tpu.pipeline_mode<synchronous>, transform_indices = @transform_2, window_bounds = array<i64: 1, 32>}, {pipeline_mode = #tpu.pipeline_mode<synchronous>, transform_indices = @transform_3, window_bounds = array<i64: 32, 32>}, {pipeline_mode = #tpu.pipeline_mode<synchronous>, transform_indices = @transform_4, window_bounds = array<i64: 1, 32>}, {pipeline_mode = #tpu.pipeline_mode<synchronous>, transform_indices = @transform_5, window_bounds = array<i64: 32, 96>}, {pipeline_mode = #tpu.pipeline_mode<synchronous>, transform_indices = @transform_6, window_bounds = array<i64: 1, 96>}, {transform_indices = @transform_7, window_bounds = array<i64: 30, 96>}]} {
    %c0 = arith.constant 0 : index
    %c0_0 = arith.constant 0 : index
    %0 = vector.load %arg1[%c0, %c0_0] : memref<30x32xf32, #tpu.memory_space<vmem>>, vector<30x32xf32>
    %c0_1 = arith.constant 0 : index
    %c0_2 = arith.constant 0 : index
    %1 = vector.load %arg2[%c0_1, %c0_2] : memref<1x32xf32, #tpu.memory_space<vmem>>, vector<1x32xf32>
    %c0_3 = arith.constant 0 : index
    %c0_4 = arith.constant 0 : index
    %2 = vector.load %arg3[%c0_3, %c0_4] : memref<1x32xf32, #tpu.memory_space<vmem>>, vector<1x32xf32>
    %cst = arith.constant dense<0.000000e+00> : vector<30xf32>
    %3 = vector.multi_reduction <add>, %0, %cst [1] : vector<30x32xf32> to vector<30xf32>
    %4 = vector.shape_cast %3 : vector<30xf32> to vector<30x1xf32>
    %cst_5 = arith.constant 3.200000e+01 : f32
    %5 = vector.broadcast %cst_5 : f32 to vector<30x1xf32>
    %6 = arith.divf %4, %5 : vector<30x1xf32>
    %7 = vector.broadcast %6 : vector<30x1xf32> to vector<30x32xf32>
    %8 = arith.subf %0, %7 : vector<30x32xf32>
    %9 = arith.mulf %8, %8 : vector<30x32xf32>
    %cst_6 = arith.constant dense<0.000000e+00> : vector<30xf32>
    %10 = vector.multi_reduction <add>, %9, %cst_6 [1] : vector<30x32xf32> to vector<30xf32>
    %11 = vector.shape_cast %10 : vector<30xf32> to vector<30x1xf32>
    %cst_7 = arith.constant 3.200000e+01 : f32
    %12 = vector.broadcast %cst_7 : f32 to vector<30x1xf32>
    %13 = arith.divf %11, %12 : vector<30x1xf32>
    %cst_8 = arith.constant 9.99999974E-6 : f32
    %14 = vector.broadcast %cst_8 : f32 to vector<30x1xf32>
    %15 = arith.addf %13, %14 : vector<30x1xf32>
    %16 = math.rsqrt %15 : vector<30x1xf32>
    %17 = vector.broadcast %16 : vector<30x1xf32> to vector<30x32xf32>
    %18 = arith.mulf %8, %17 : vector<30x32xf32>
    %19 = vector.broadcast %1 : vector<1x32xf32> to vector<30x32xf32>
    %20 = arith.mulf %18, %19 : vector<30x32xf32>
    %21 = vector.broadcast %2 : vector<1x32xf32> to vector<30x32xf32>
    %22 = arith.addf %20, %21 : vector<30x32xf32>
    %c0_9 = arith.constant 0 : index
    %c0_10 = arith.constant 0 : index
    %23 = vector.load %arg4[%c0_9, %c0_10] : memref<32x32xf32, #tpu.memory_space<vmem>>, vector<32x32xf32>
    %c0_11 = arith.constant 0 : index
    %c0_12 = arith.constant 0 : index
    %24 = vector.load %arg5[%c0_11, %c0_12] : memref<1x32xf32, #tpu.memory_space<vmem>>, vector<1x32xf32>
    %25 = arith.truncf %22 : vector<30x32xf32> to vector<30x32xbf16>
    %26 = arith.truncf %23 : vector<32x32xf32> to vector<32x32xbf16>
    %cst_13 = arith.constant dense<0.000000e+00> : vector<30x32xf32>
    %27 = tpu.matmul %25, %26, %cst_13 {dimension_numbers = #tpu.dot_dimension_numbers<[1], [0], [0], [1], [0, 0, 1, 1], [], []>} : vector<30x32xbf16>, vector<32x32xbf16>, vector<30x32xf32> -> vector<30x32xf32>
    %28 = vector.broadcast %24 : vector<1x32xf32> to vector<30x32xf32>
    %29 = arith.addf %27, %28 : vector<30x32xf32>
    %c0_14 = arith.constant 0 : index
    %c0_15 = arith.constant 0 : index
    %30 = vector.load %arg6[%c0_14, %c0_15] : memref<32x96xf32, #tpu.memory_space<vmem>>, vector<32x96xf32>
    %c0_16 = arith.constant 0 : index
    %c0_17 = arith.constant 0 : index
    %31 = vector.load %arg7[%c0_16, %c0_17] : memref<1x96xf32, #tpu.memory_space<vmem>>, vector<1x96xf32>
    %32 = arith.truncf %29 : vector<30x32xf32> to vector<30x32xbf16>
    %33 = arith.truncf %30 : vector<32x96xf32> to vector<32x96xbf16>
    %cst_18 = arith.constant dense<0.000000e+00> : vector<30x96xf32>
    %34 = tpu.matmul %32, %33, %cst_18 {dimension_numbers = #tpu.dot_dimension_numbers<[1], [0], [0], [1], [0, 0, 1, 1], [], []>} : vector<30x32xbf16>, vector<32x96xbf16>, vector<30x96xf32> -> vector<30x96xf32>
    %35 = vector.broadcast %31 : vector<1x96xf32> to vector<30x96xf32>
    %36 = arith.addf %34, %35 : vector<30x96xf32>
    %c0_19 = arith.constant 0 : index
    %c0_20 = arith.constant 0 : index
    %37 = vector.load %arg8[%c0_19, %c0_20] : memref<30x96xf32, #tpu.memory_space<vmem>>, vector<30x96xf32>
    tpu.vector_store %arg8[%c0_19, %c0_20], %36 {strides = array<i32>} : memref<30x96xf32, #tpu.memory_space<vmem>>, vector<30x96xf32>,
    return
  }
  func.func @transform_0(%arg0: i32) -> (i32, i32) {
    %c0_i32 = arith.constant 0 : i32
    %c0_i32_0 = arith.constant 0 : i32
    return %arg0, %c0_i32 : i32, i32
  }
  func.func @transform_1(%arg0: i32) -> (i32, i32) {
    %c0_i32 = arith.constant 0 : i32
    %c0_i32_0 = arith.constant 0 : i32
    %c0_i32_1 = arith.constant 0 : i32
    return %c0_i32, %c0_i32_0 : i32, i32
  }
  func.func @transform_2(%arg0: i32) -> (i32, i32) {
    %c0_i32 = arith.constant 0 : i32
    %c0_i32_0 = arith.constant 0 : i32
    %c0_i32_1 = arith.constant 0 : i32
    return %c0_i32, %c0_i32_0 : i32, i32
  }
  func.func @transform_3(%arg0: i32) -> (i32, i32) {
    %c0_i32 = arith.constant 0 : i32
    %c0_i32_0 = arith.constant 0 : i32
    %c0_i32_1 = arith.constant 0 : i32
    return %c0_i32, %c0_i32_0 : i32, i32
  }
  func.func @transform_4(%arg0: i32) -> (i32, i32) {
    %c0_i32 = arith.constant 0 : i32
    %c0_i32_0 = arith.constant 0 : i32
    %c0_i32_1 = arith.constant 0 : i32
    return %c0_i32, %c0_i32_0 : i32, i32
  }
  func.func @transform_5(%arg0: i32) -> (i32, i32) {
    %c0_i32 = arith.constant 0 : i32
    %c0_i32_0 = arith.constant 0 : i32
    %c0_i32_1 = arith.constant 0 : i32
    return %c0_i32, %c0_i32_0 : i32, i32
  }
  func.func @transform_6(%arg0: i32) -> (i32, i32) {
    %c0_i32 = arith.constant 0 : i32
    %c0_i32_0 = arith.constant 0 : i32
    %c0_i32_1 = arith.constant 0 : i32
    return %c0_i32, %c0_i32_0 : i32, i32
  }
  func.func @transform_7(%arg0: i32) -> (i32, i32) {
    %c0_i32 = arith.constant 0 : i32
    %c0_i32_0 = arith.constant 0 : i32
    return %arg0, %c0_i32 : i32, i32
  }
}

module attributes {stable_mosaic.version = 11 : i64} {
  func.func @_attention_kernel(%arg0: i32, %arg1: memref<12x5x8xf32, #tpu.memory_space<vmem>>, %arg2: memref<12x5x8xf32, #tpu.memory_space<vmem>>, %arg3: memref<12x5x8xf32, #tpu.memory_space<vmem>>, %arg4: memref<12x5x8xf32, #tpu.memory_space<vmem>>) attributes {dimension_semantics = [#tpu.dimension_semantics<parallel>], iteration_bounds = array<i64: 2>, scalar_prefetch = 0 : i64, scratch_operands = 0 : i64, tpu.core_type = #tpu.core_type<tc>, window_params = [{transform_indices = @transform_0, window_bounds = array<i64: 12, 5, 8>}, {transform_indices = @transform_1, window_bounds = array<i64: 12, 5, 8>}, {transform_indices = @transform_2, window_bounds = array<i64: 12, 5, 8>}, {transform_indices = @transform_3, window_bounds = array<i64: 12, 5, 8>}]} {
    %c0 = arith.constant 0 : index
    %c0_0 = arith.constant 0 : index
    %c0_1 = arith.constant 0 : index
    %0 = vector.load %arg1[%c0, %c0_0, %c0_1] : memref<12x5x8xf32, #tpu.memory_space<vmem>>, vector<12x5x8xf32>
    %1 = arith.truncf %0 : vector<12x5x8xf32> to vector<12x5x8xbf16>
    %c0_2 = arith.constant 0 : index
    %c0_3 = arith.constant 0 : index
    %c0_4 = arith.constant 0 : index
    %2 = vector.load %arg2[%c0_2, %c0_3, %c0_4] : memref<12x5x8xf32, #tpu.memory_space<vmem>>, vector<12x5x8xf32>
    %3 = arith.truncf %2 : vector<12x5x8xf32> to vector<12x5x8xbf16>
    %c0_5 = arith.constant 0 : index
    %c0_6 = arith.constant 0 : index
    %c0_7 = arith.constant 0 : index
    %4 = vector.load %arg3[%c0_5, %c0_6, %c0_7] : memref<12x5x8xf32, #tpu.memory_space<vmem>>, vector<12x5x8xf32>
    %5 = arith.truncf %4 : vector<12x5x8xf32> to vector<12x5x8xbf16>
    "tpu.trace_start"() <{level = 10 : i32, message = "bqd,bkd->bqk"}> : () -> ()
    %cst = arith.constant dense<0.000000e+00> : vector<12x5x5xf32>
    %6 = tpu.matmul %1, %3, %cst {dimension_numbers = #tpu.dot_dimension_numbers<[2], [2], [1], [1], [0, 0, 0, 1, 1, 1], [0], [0]>} : vector<12x5x8xbf16>, vector<12x5x8xbf16>, vector<12x5x5xf32> -> vector<12x5x5xf32>
    "tpu.trace_stop"() : () -> ()
    %cst_8 = arith.constant 0.353553385 : f32
    %7 = vector.broadcast %cst_8 : f32 to vector<12x5x5xf32>
    %8 = arith.mulf %6, %7 : vector<12x5x5xf32>
    %cst_9 = arith.constant dense<0xFF800000> : vector<12x5xf32>
    %9 = vector.multi_reduction <maximumf>, %8, %cst_9 [2] : vector<12x5x5xf32> to vector<12x5xf32>
    %10 = vector.shape_cast %9 : vector<12x5xf32> to vector<12x5x1xf32>
    %11 = vector.broadcast %10 : vector<12x5x1xf32> to vector<12x5x5xf32>
    %12 = arith.subf %8, %11 : vector<12x5x5xf32>
    %13 = math.exp %12 : vector<12x5x5xf32>
    %cst_10 = arith.constant dense<0.000000e+00> : vector<12x5xf32>
    %14 = vector.multi_reduction <add>, %13, %cst_10 [2] : vector<12x5x5xf32> to vector<12x5xf32>
    %15 = vector.shape_cast %14 : vector<12x5xf32> to vector<12x5x1xf32>
    %16 = tpu.reciprocal %15 {approx = true} : vector<12x5x1xf32> -> vector<12x5x1xf32>
    %17 = vector.broadcast %16 : vector<12x5x1xf32> to vector<12x5x5xf32>
    %18 = arith.mulf %13, %17 : vector<12x5x5xf32>
    %19 = arith.truncf %18 : vector<12x5x5xf32> to vector<12x5x5xbf16>
    "tpu.trace_start"() <{level = 10 : i32, message = "bqk,bkd->bqd"}> : () -> ()
    %cst_11 = arith.constant dense<0.000000e+00> : vector<12x5x8xf32>
    %20 = tpu.matmul %19, %5, %cst_11 {dimension_numbers = #tpu.dot_dimension_numbers<[2], [1], [1], [2], [0, 0, 0, 1, 1, 2], [0], [0]>} : vector<12x5x5xbf16>, vector<12x5x8xbf16>, vector<12x5x8xf32> -> vector<12x5x8xf32>
    "tpu.trace_stop"() : () -> ()
    %c0_12 = arith.constant 0 : index
    %c0_13 = arith.constant 0 : index
    %c0_14 = arith.constant 0 : index
    %21 = vector.load %arg4[%c0_12, %c0_13, %c0_14] : memref<12x5x8xf32, #tpu.memory_space<vmem>>, vector<12x5x8xf32>
    tpu.vector_store %arg4[%c0_12, %c0_13, %c0_14], %20 {strides = array<i32>} : memref<12x5x8xf32, #tpu.memory_space<vmem>>, vector<12x5x8xf32>,
    return
  }
  func.func @transform_0(%arg0: i32) -> (i32, i32, i32) {
    %c0_i32 = arith.constant 0 : i32
    %c0_i32_0 = arith.constant 0 : i32
    %c0_i32_1 = arith.constant 0 : i32
    return %arg0, %c0_i32, %c0_i32_0 : i32, i32, i32
  }
  func.func @transform_1(%arg0: i32) -> (i32, i32, i32) {
    %c0_i32 = arith.constant 0 : i32
    %c0_i32_0 = arith.constant 0 : i32
    %c0_i32_1 = arith.constant 0 : i32
    return %arg0, %c0_i32, %c0_i32_0 : i32, i32, i32
  }
  func.func @transform_2(%arg0: i32) -> (i32, i32, i32) {
    %c0_i32 = arith.constant 0 : i32
    %c0_i32_0 = arith.constant 0 : i32
    %c0_i32_1 = arith.constant 0 : i32
    return %arg0, %c0_i32, %c0_i32_0 : i32, i32, i32
  }
  func.func @transform_3(%arg0: i32) -> (i32, i32, i32) {
    %c0_i32 = arith.constant 0 : i32
    %c0_i32_0 = arith.constant 0 : i32
    %c0_i32_1 = arith.constant 0 : i32
    return %arg0, %c0_i32, %c0_i32_0 : i32, i32, i32
  }
}

module attributes {stable_mosaic.version = 11 : i64} {
  func.func @_postattn_kernel(%arg0: i32, %arg1: memref<30x32xf32, #tpu.memory_space<vmem>>, %arg2: memref<30x32xf32, #tpu.memory_space<vmem>>, %arg3: memref<32x32xf32, #tpu.memory_space<vmem>>, %arg4: memref<1x32xf32, #tpu.memory_space<vmem>>, %arg5: memref<1x32xf32, #tpu.memory_space<vmem>>, %arg6: memref<1x32xf32, #tpu.memory_space<vmem>>, %arg7: memref<32x32xf32, #tpu.memory_space<vmem>>, %arg8: memref<1x32xf32, #tpu.memory_space<vmem>>, %arg9: memref<30x32xf32, #tpu.memory_space<vmem>>) attributes {dimension_semantics = [#tpu.dimension_semantics<parallel>], iteration_bounds = array<i64: 1>, scalar_prefetch = 0 : i64, scratch_operands = 0 : i64, tpu.core_type = #tpu.core_type<tc>, window_params = [{transform_indices = @transform_0, window_bounds = array<i64: 30, 32>}, {transform_indices = @transform_1, window_bounds = array<i64: 30, 32>}, {pipeline_mode = #tpu.pipeline_mode<synchronous>, transform_indices = @transform_2, window_bounds = array<i64: 32, 32>}, {pipeline_mode = #tpu.pipeline_mode<synchronous>, transform_indices = @transform_3, window_bounds = array<i64: 1, 32>}, {pipeline_mode = #tpu.pipeline_mode<synchronous>, transform_indices = @transform_4, window_bounds = array<i64: 1, 32>}, {pipeline_mode = #tpu.pipeline_mode<synchronous>, transform_indices = @transform_5, window_bounds = array<i64: 1, 32>}, {pipeline_mode = #tpu.pipeline_mode<synchronous>, transform_indices = @transform_6, window_bounds = array<i64: 32, 32>}, {pipeline_mode = #tpu.pipeline_mode<synchronous>, transform_indices = @transform_7, window_bounds = array<i64: 1, 32>}, {transform_indices = @transform_8, window_bounds = array<i64: 30, 32>}]} {
    %c0 = arith.constant 0 : index
    %c0_0 = arith.constant 0 : index
    %0 = vector.load %arg1[%c0, %c0_0] : memref<30x32xf32, #tpu.memory_space<vmem>>, vector<30x32xf32>
    %c0_1 = arith.constant 0 : index
    %c0_2 = arith.constant 0 : index
    %1 = vector.load %arg3[%c0_1, %c0_2] : memref<32x32xf32, #tpu.memory_space<vmem>>, vector<32x32xf32>
    %c0_3 = arith.constant 0 : index
    %c0_4 = arith.constant 0 : index
    %2 = vector.load %arg4[%c0_3, %c0_4] : memref<1x32xf32, #tpu.memory_space<vmem>>, vector<1x32xf32>
    %3 = arith.truncf %0 : vector<30x32xf32> to vector<30x32xbf16>
    %4 = arith.truncf %1 : vector<32x32xf32> to vector<32x32xbf16>
    %cst = arith.constant dense<0.000000e+00> : vector<30x32xf32>
    %5 = tpu.matmul %3, %4, %cst {dimension_numbers = #tpu.dot_dimension_numbers<[1], [0], [0], [1], [0, 0, 1, 1], [], []>} : vector<30x32xbf16>, vector<32x32xbf16>, vector<30x32xf32> -> vector<30x32xf32>
    %6 = vector.broadcast %2 : vector<1x32xf32> to vector<30x32xf32>
    %7 = arith.addf %5, %6 : vector<30x32xf32>
    %c0_5 = arith.constant 0 : index
    %c0_6 = arith.constant 0 : index
    %8 = vector.load %arg5[%c0_5, %c0_6] : memref<1x32xf32, #tpu.memory_space<vmem>>, vector<1x32xf32>
    %c0_7 = arith.constant 0 : index
    %c0_8 = arith.constant 0 : index
    %9 = vector.load %arg6[%c0_7, %c0_8] : memref<1x32xf32, #tpu.memory_space<vmem>>, vector<1x32xf32>
    %cst_9 = arith.constant dense<0.000000e+00> : vector<30xf32>
    %10 = vector.multi_reduction <add>, %7, %cst_9 [1] : vector<30x32xf32> to vector<30xf32>
    %11 = vector.shape_cast %10 : vector<30xf32> to vector<30x1xf32>
    %cst_10 = arith.constant 3.200000e+01 : f32
    %12 = vector.broadcast %cst_10 : f32 to vector<30x1xf32>
    %13 = arith.divf %11, %12 : vector<30x1xf32>
    %14 = vector.broadcast %13 : vector<30x1xf32> to vector<30x32xf32>
    %15 = arith.subf %7, %14 : vector<30x32xf32>
    %16 = arith.mulf %15, %15 : vector<30x32xf32>
    %cst_11 = arith.constant dense<0.000000e+00> : vector<30xf32>
    %17 = vector.multi_reduction <add>, %16, %cst_11 [1] : vector<30x32xf32> to vector<30xf32>
    %18 = vector.shape_cast %17 : vector<30xf32> to vector<30x1xf32>
    %cst_12 = arith.constant 3.200000e+01 : f32
    %19 = vector.broadcast %cst_12 : f32 to vector<30x1xf32>
    %20 = arith.divf %18, %19 : vector<30x1xf32>
    %cst_13 = arith.constant 9.99999974E-6 : f32
    %21 = vector.broadcast %cst_13 : f32 to vector<30x1xf32>
    %22 = arith.addf %20, %21 : vector<30x1xf32>
    %23 = math.rsqrt %22 : vector<30x1xf32>
    %24 = vector.broadcast %23 : vector<30x1xf32> to vector<30x32xf32>
    %25 = arith.mulf %15, %24 : vector<30x32xf32>
    %26 = vector.broadcast %8 : vector<1x32xf32> to vector<30x32xf32>
    %27 = arith.mulf %25, %26 : vector<30x32xf32>
    %28 = vector.broadcast %9 : vector<1x32xf32> to vector<30x32xf32>
    %29 = arith.addf %27, %28 : vector<30x32xf32>
    %c0_14 = arith.constant 0 : index
    %c0_15 = arith.constant 0 : index
    %30 = vector.load %arg7[%c0_14, %c0_15] : memref<32x32xf32, #tpu.memory_space<vmem>>, vector<32x32xf32>
    %c0_16 = arith.constant 0 : index
    %c0_17 = arith.constant 0 : index
    %31 = vector.load %arg8[%c0_16, %c0_17] : memref<1x32xf32, #tpu.memory_space<vmem>>, vector<1x32xf32>
    %32 = arith.truncf %29 : vector<30x32xf32> to vector<30x32xbf16>
    %33 = arith.truncf %30 : vector<32x32xf32> to vector<32x32xbf16>
    %cst_18 = arith.constant dense<0.000000e+00> : vector<30x32xf32>
    %34 = tpu.matmul %32, %33, %cst_18 {dimension_numbers = #tpu.dot_dimension_numbers<[1], [0], [0], [1], [0, 0, 1, 1], [], []>} : vector<30x32xbf16>, vector<32x32xbf16>, vector<30x32xf32> -> vector<30x32xf32>
    %35 = vector.broadcast %31 : vector<1x32xf32> to vector<30x32xf32>
    %36 = arith.addf %34, %35 : vector<30x32xf32>
    %c0_19 = arith.constant 0 : index
    %c0_20 = arith.constant 0 : index
    %37 = vector.load %arg2[%c0_19, %c0_20] : memref<30x32xf32, #tpu.memory_space<vmem>>, vector<30x32xf32>
    %38 = arith.addf %36, %37 : vector<30x32xf32>
    %c0_21 = arith.constant 0 : index
    %c0_22 = arith.constant 0 : index
    %39 = vector.load %arg9[%c0_21, %c0_22] : memref<30x32xf32, #tpu.memory_space<vmem>>, vector<30x32xf32>
    tpu.vector_store %arg9[%c0_21, %c0_22], %38 {strides = array<i32>} : memref<30x32xf32, #tpu.memory_space<vmem>>, vector<30x32xf32>,
    return
  }
  func.func @transform_0(%arg0: i32) -> (i32, i32) {
    %c0_i32 = arith.constant 0 : i32
    %c0_i32_0 = arith.constant 0 : i32
    return %arg0, %c0_i32 : i32, i32
  }
  func.func @transform_1(%arg0: i32) -> (i32, i32) {
    %c0_i32 = arith.constant 0 : i32
    %c0_i32_0 = arith.constant 0 : i32
    return %arg0, %c0_i32 : i32, i32
  }
  func.func @transform_2(%arg0: i32) -> (i32, i32) {
    %c0_i32 = arith.constant 0 : i32
    %c0_i32_0 = arith.constant 0 : i32
    %c0_i32_1 = arith.constant 0 : i32
    return %c0_i32, %c0_i32_0 : i32, i32
  }
  func.func @transform_3(%arg0: i32) -> (i32, i32) {
    %c0_i32 = arith.constant 0 : i32
    %c0_i32_0 = arith.constant 0 : i32
    %c0_i32_1 = arith.constant 0 : i32
    return %c0_i32, %c0_i32_0 : i32, i32
  }
  func.func @transform_4(%arg0: i32) -> (i32, i32) {
    %c0_i32 = arith.constant 0 : i32
    %c0_i32_0 = arith.constant 0 : i32
    %c0_i32_1 = arith.constant 0 : i32
    return %c0_i32, %c0_i32_0 : i32, i32
  }
  func.func @transform_5(%arg0: i32) -> (i32, i32) {
    %c0_i32 = arith.constant 0 : i32
    %c0_i32_0 = arith.constant 0 : i32
    %c0_i32_1 = arith.constant 0 : i32
    return %c0_i32, %c0_i32_0 : i32, i32
  }
  func.func @transform_6(%arg0: i32) -> (i32, i32) {
    %c0_i32 = arith.constant 0 : i32
    %c0_i32_0 = arith.constant 0 : i32
    %c0_i32_1 = arith.constant 0 : i32
    return %c0_i32, %c0_i32_0 : i32, i32
  }
  func.func @transform_7(%arg0: i32) -> (i32, i32) {
    %c0_i32 = arith.constant 0 : i32
    %c0_i32_0 = arith.constant 0 : i32
    %c0_i32_1 = arith.constant 0 : i32
    return %c0_i32, %c0_i32_0 : i32, i32
  }
  func.func @transform_8(%arg0: i32) -> (i32, i32) {
    %c0_i32 = arith.constant 0 : i32
    %c0_i32_0 = arith.constant 0 : i32
    return %arg0, %c0_i32 : i32, i32
  }
}

module attributes {stable_mosaic.version = 11 : i64} {
  func.func @_ln_linear_kernel(%arg0: i32, %arg1: memref<30x32xf32, #tpu.memory_space<vmem>>, %arg2: memref<1x32xf32, #tpu.memory_space<vmem>>, %arg3: memref<1x32xf32, #tpu.memory_space<vmem>>, %arg4: memref<32x32xf32, #tpu.memory_space<vmem>>, %arg5: memref<1x32xf32, #tpu.memory_space<vmem>>, %arg6: memref<30x32xf32, #tpu.memory_space<vmem>>) attributes {dimension_semantics = [#tpu.dimension_semantics<parallel>], iteration_bounds = array<i64: 1>, scalar_prefetch = 0 : i64, scratch_operands = 0 : i64, tpu.core_type = #tpu.core_type<tc>, window_params = [{transform_indices = @transform_0, window_bounds = array<i64: 30, 32>}, {pipeline_mode = #tpu.pipeline_mode<synchronous>, transform_indices = @transform_1, window_bounds = array<i64: 1, 32>}, {pipeline_mode = #tpu.pipeline_mode<synchronous>, transform_indices = @transform_2, window_bounds = array<i64: 1, 32>}, {pipeline_mode = #tpu.pipeline_mode<synchronous>, transform_indices = @transform_3, window_bounds = array<i64: 32, 32>}, {pipeline_mode = #tpu.pipeline_mode<synchronous>, transform_indices = @transform_4, window_bounds = array<i64: 1, 32>}, {transform_indices = @transform_5, window_bounds = array<i64: 30, 32>}]} {
    %c0 = arith.constant 0 : index
    %c0_0 = arith.constant 0 : index
    %0 = vector.load %arg1[%c0, %c0_0] : memref<30x32xf32, #tpu.memory_space<vmem>>, vector<30x32xf32>
    %c0_1 = arith.constant 0 : index
    %c0_2 = arith.constant 0 : index
    %1 = vector.load %arg2[%c0_1, %c0_2] : memref<1x32xf32, #tpu.memory_space<vmem>>, vector<1x32xf32>
    %c0_3 = arith.constant 0 : index
    %c0_4 = arith.constant 0 : index
    %2 = vector.load %arg3[%c0_3, %c0_4] : memref<1x32xf32, #tpu.memory_space<vmem>>, vector<1x32xf32>
    %cst = arith.constant dense<0.000000e+00> : vector<30xf32>
    %3 = vector.multi_reduction <add>, %0, %cst [1] : vector<30x32xf32> to vector<30xf32>
    %4 = vector.shape_cast %3 : vector<30xf32> to vector<30x1xf32>
    %cst_5 = arith.constant 3.200000e+01 : f32
    %5 = vector.broadcast %cst_5 : f32 to vector<30x1xf32>
    %6 = arith.divf %4, %5 : vector<30x1xf32>
    %7 = vector.broadcast %6 : vector<30x1xf32> to vector<30x32xf32>
    %8 = arith.subf %0, %7 : vector<30x32xf32>
    %9 = arith.mulf %8, %8 : vector<30x32xf32>
    %cst_6 = arith.constant dense<0.000000e+00> : vector<30xf32>
    %10 = vector.multi_reduction <add>, %9, %cst_6 [1] : vector<30x32xf32> to vector<30xf32>
    %11 = vector.shape_cast %10 : vector<30xf32> to vector<30x1xf32>
    %cst_7 = arith.constant 3.200000e+01 : f32
    %12 = vector.broadcast %cst_7 : f32 to vector<30x1xf32>
    %13 = arith.divf %11, %12 : vector<30x1xf32>
    %cst_8 = arith.constant 9.99999974E-6 : f32
    %14 = vector.broadcast %cst_8 : f32 to vector<30x1xf32>
    %15 = arith.addf %13, %14 : vector<30x1xf32>
    %16 = math.rsqrt %15 : vector<30x1xf32>
    %17 = vector.broadcast %16 : vector<30x1xf32> to vector<30x32xf32>
    %18 = arith.mulf %8, %17 : vector<30x32xf32>
    %19 = vector.broadcast %1 : vector<1x32xf32> to vector<30x32xf32>
    %20 = arith.mulf %18, %19 : vector<30x32xf32>
    %21 = vector.broadcast %2 : vector<1x32xf32> to vector<30x32xf32>
    %22 = arith.addf %20, %21 : vector<30x32xf32>
    %c0_9 = arith.constant 0 : index
    %c0_10 = arith.constant 0 : index
    %23 = vector.load %arg4[%c0_9, %c0_10] : memref<32x32xf32, #tpu.memory_space<vmem>>, vector<32x32xf32>
    %c0_11 = arith.constant 0 : index
    %c0_12 = arith.constant 0 : index
    %24 = vector.load %arg5[%c0_11, %c0_12] : memref<1x32xf32, #tpu.memory_space<vmem>>, vector<1x32xf32>
    %25 = arith.truncf %22 : vector<30x32xf32> to vector<30x32xbf16>
    %26 = arith.truncf %23 : vector<32x32xf32> to vector<32x32xbf16>
    %cst_13 = arith.constant dense<0.000000e+00> : vector<30x32xf32>
    %27 = tpu.matmul %25, %26, %cst_13 {dimension_numbers = #tpu.dot_dimension_numbers<[1], [0], [0], [1], [0, 0, 1, 1], [], []>} : vector<30x32xbf16>, vector<32x32xbf16>, vector<30x32xf32> -> vector<30x32xf32>
    %28 = vector.broadcast %24 : vector<1x32xf32> to vector<30x32xf32>
    %29 = arith.addf %27, %28 : vector<30x32xf32>
    %c0_14 = arith.constant 0 : index
    %c0_15 = arith.constant 0 : index
    %30 = vector.load %arg6[%c0_14, %c0_15] : memref<30x32xf32, #tpu.memory_space<vmem>>, vector<30x32xf32>
    tpu.vector_store %arg6[%c0_14, %c0_15], %29 {strides = array<i32>} : memref<30x32xf32, #tpu.memory_space<vmem>>, vector<30x32xf32>,
    return
  }
  func.func @transform_0(%arg0: i32) -> (i32, i32) {
    %c0_i32 = arith.constant 0 : i32
    %c0_i32_0 = arith.constant 0 : i32
    return %arg0, %c0_i32 : i32, i32
  }
  func.func @transform_1(%arg0: i32) -> (i32, i32) {
    %c0_i32 = arith.constant 0 : i32
    %c0_i32_0 = arith.constant 0 : i32
    %c0_i32_1 = arith.constant 0 : i32
    return %c0_i32, %c0_i32_0 : i32, i32
  }
  func.func @transform_2(%arg0: i32) -> (i32, i32) {
    %c0_i32 = arith.constant 0 : i32
    %c0_i32_0 = arith.constant 0 : i32
    %c0_i32_1 = arith.constant 0 : i32
    return %c0_i32, %c0_i32_0 : i32, i32
  }
  func.func @transform_3(%arg0: i32) -> (i32, i32) {
    %c0_i32 = arith.constant 0 : i32
    %c0_i32_0 = arith.constant 0 : i32
    %c0_i32_1 = arith.constant 0 : i32
    return %c0_i32, %c0_i32_0 : i32, i32
  }
  func.func @transform_4(%arg0: i32) -> (i32, i32) {
    %c0_i32 = arith.constant 0 : i32
    %c0_i32_0 = arith.constant 0 : i32
    %c0_i32_1 = arith.constant 0 : i32
    return %c0_i32, %c0_i32_0 : i32, i32
  }
  func.func @transform_5(%arg0: i32) -> (i32, i32) {
    %c0_i32 = arith.constant 0 : i32
    %c0_i32_0 = arith.constant 0 : i32
    return %arg0, %c0_i32 : i32, i32
  }
}

module attributes {stable_mosaic.version = 11 : i64} {
  func.func @_ln_linear_res_kernel(%arg0: i32, %arg1: memref<30x32xf32, #tpu.memory_space<vmem>>, %arg2: memref<30x32xf32, #tpu.memory_space<vmem>>, %arg3: memref<1x32xf32, #tpu.memory_space<vmem>>, %arg4: memref<1x32xf32, #tpu.memory_space<vmem>>, %arg5: memref<32x32xf32, #tpu.memory_space<vmem>>, %arg6: memref<1x32xf32, #tpu.memory_space<vmem>>, %arg7: memref<30x32xf32, #tpu.memory_space<vmem>>) attributes {dimension_semantics = [#tpu.dimension_semantics<parallel>], iteration_bounds = array<i64: 1>, scalar_prefetch = 0 : i64, scratch_operands = 0 : i64, tpu.core_type = #tpu.core_type<tc>, window_params = [{transform_indices = @transform_0, window_bounds = array<i64: 30, 32>}, {transform_indices = @transform_1, window_bounds = array<i64: 30, 32>}, {pipeline_mode = #tpu.pipeline_mode<synchronous>, transform_indices = @transform_2, window_bounds = array<i64: 1, 32>}, {pipeline_mode = #tpu.pipeline_mode<synchronous>, transform_indices = @transform_3, window_bounds = array<i64: 1, 32>}, {pipeline_mode = #tpu.pipeline_mode<synchronous>, transform_indices = @transform_4, window_bounds = array<i64: 32, 32>}, {pipeline_mode = #tpu.pipeline_mode<synchronous>, transform_indices = @transform_5, window_bounds = array<i64: 1, 32>}, {transform_indices = @transform_6, window_bounds = array<i64: 30, 32>}]} {
    %c0 = arith.constant 0 : index
    %c0_0 = arith.constant 0 : index
    %0 = vector.load %arg1[%c0, %c0_0] : memref<30x32xf32, #tpu.memory_space<vmem>>, vector<30x32xf32>
    %c0_1 = arith.constant 0 : index
    %c0_2 = arith.constant 0 : index
    %1 = vector.load %arg3[%c0_1, %c0_2] : memref<1x32xf32, #tpu.memory_space<vmem>>, vector<1x32xf32>
    %c0_3 = arith.constant 0 : index
    %c0_4 = arith.constant 0 : index
    %2 = vector.load %arg4[%c0_3, %c0_4] : memref<1x32xf32, #tpu.memory_space<vmem>>, vector<1x32xf32>
    %cst = arith.constant dense<0.000000e+00> : vector<30xf32>
    %3 = vector.multi_reduction <add>, %0, %cst [1] : vector<30x32xf32> to vector<30xf32>
    %4 = vector.shape_cast %3 : vector<30xf32> to vector<30x1xf32>
    %cst_5 = arith.constant 3.200000e+01 : f32
    %5 = vector.broadcast %cst_5 : f32 to vector<30x1xf32>
    %6 = arith.divf %4, %5 : vector<30x1xf32>
    %7 = vector.broadcast %6 : vector<30x1xf32> to vector<30x32xf32>
    %8 = arith.subf %0, %7 : vector<30x32xf32>
    %9 = arith.mulf %8, %8 : vector<30x32xf32>
    %cst_6 = arith.constant dense<0.000000e+00> : vector<30xf32>
    %10 = vector.multi_reduction <add>, %9, %cst_6 [1] : vector<30x32xf32> to vector<30xf32>
    %11 = vector.shape_cast %10 : vector<30xf32> to vector<30x1xf32>
    %cst_7 = arith.constant 3.200000e+01 : f32
    %12 = vector.broadcast %cst_7 : f32 to vector<30x1xf32>
    %13 = arith.divf %11, %12 : vector<30x1xf32>
    %cst_8 = arith.constant 9.99999974E-6 : f32
    %14 = vector.broadcast %cst_8 : f32 to vector<30x1xf32>
    %15 = arith.addf %13, %14 : vector<30x1xf32>
    %16 = math.rsqrt %15 : vector<30x1xf32>
    %17 = vector.broadcast %16 : vector<30x1xf32> to vector<30x32xf32>
    %18 = arith.mulf %8, %17 : vector<30x32xf32>
    %19 = vector.broadcast %1 : vector<1x32xf32> to vector<30x32xf32>
    %20 = arith.mulf %18, %19 : vector<30x32xf32>
    %21 = vector.broadcast %2 : vector<1x32xf32> to vector<30x32xf32>
    %22 = arith.addf %20, %21 : vector<30x32xf32>
    %c0_9 = arith.constant 0 : index
    %c0_10 = arith.constant 0 : index
    %23 = vector.load %arg5[%c0_9, %c0_10] : memref<32x32xf32, #tpu.memory_space<vmem>>, vector<32x32xf32>
    %c0_11 = arith.constant 0 : index
    %c0_12 = arith.constant 0 : index
    %24 = vector.load %arg6[%c0_11, %c0_12] : memref<1x32xf32, #tpu.memory_space<vmem>>, vector<1x32xf32>
    %25 = arith.truncf %22 : vector<30x32xf32> to vector<30x32xbf16>
    %26 = arith.truncf %23 : vector<32x32xf32> to vector<32x32xbf16>
    %cst_13 = arith.constant dense<0.000000e+00> : vector<30x32xf32>
    %27 = tpu.matmul %25, %26, %cst_13 {dimension_numbers = #tpu.dot_dimension_numbers<[1], [0], [0], [1], [0, 0, 1, 1], [], []>} : vector<30x32xbf16>, vector<32x32xbf16>, vector<30x32xf32> -> vector<30x32xf32>
    %28 = vector.broadcast %24 : vector<1x32xf32> to vector<30x32xf32>
    %29 = arith.addf %27, %28 : vector<30x32xf32>
    %c0_14 = arith.constant 0 : index
    %c0_15 = arith.constant 0 : index
    %30 = vector.load %arg2[%c0_14, %c0_15] : memref<30x32xf32, #tpu.memory_space<vmem>>, vector<30x32xf32>
    %31 = arith.addf %29, %30 : vector<30x32xf32>
    %c0_16 = arith.constant 0 : index
    %c0_17 = arith.constant 0 : index
    %32 = vector.load %arg7[%c0_16, %c0_17] : memref<30x32xf32, #tpu.memory_space<vmem>>, vector<30x32xf32>
    tpu.vector_store %arg7[%c0_16, %c0_17], %31 {strides = array<i32>} : memref<30x32xf32, #tpu.memory_space<vmem>>, vector<30x32xf32>,
    return
  }
  func.func @transform_0(%arg0: i32) -> (i32, i32) {
    %c0_i32 = arith.constant 0 : i32
    %c0_i32_0 = arith.constant 0 : i32
    return %arg0, %c0_i32 : i32, i32
  }
  func.func @transform_1(%arg0: i32) -> (i32, i32) {
    %c0_i32 = arith.constant 0 : i32
    %c0_i32_0 = arith.constant 0 : i32
    return %arg0, %c0_i32 : i32, i32
  }
  func.func @transform_2(%arg0: i32) -> (i32, i32) {
    %c0_i32 = arith.constant 0 : i32
    %c0_i32_0 = arith.constant 0 : i32
    %c0_i32_1 = arith.constant 0 : i32
    return %c0_i32, %c0_i32_0 : i32, i32
  }
  func.func @transform_3(%arg0: i32) -> (i32, i32) {
    %c0_i32 = arith.constant 0 : i32
    %c0_i32_0 = arith.constant 0 : i32
    %c0_i32_1 = arith.constant 0 : i32
    return %c0_i32, %c0_i32_0 : i32, i32
  }
  func.func @transform_4(%arg0: i32) -> (i32, i32) {
    %c0_i32 = arith.constant 0 : i32
    %c0_i32_0 = arith.constant 0 : i32
    %c0_i32_1 = arith.constant 0 : i32
    return %c0_i32, %c0_i32_0 : i32, i32
  }
  func.func @transform_5(%arg0: i32) -> (i32, i32) {
    %c0_i32 = arith.constant 0 : i32
    %c0_i32_0 = arith.constant 0 : i32
    %c0_i32_1 = arith.constant 0 : i32
    return %c0_i32, %c0_i32_0 : i32, i32
  }
  func.func @transform_6(%arg0: i32) -> (i32, i32) {
    %c0_i32 = arith.constant 0 : i32
    %c0_i32_0 = arith.constant 0 : i32
    return %arg0, %c0_i32 : i32, i32
  }
}

module attributes {stable_mosaic.version = 11 : i64} {
  func.func @_matmul2_kernel(%arg0: i32, %arg1: memref<6x68xf32, #tpu.memory_space<vmem>>, %arg2: memref<68x68xf32, #tpu.memory_space<vmem>>, %arg3: memref<1x68xf32, #tpu.memory_space<vmem>>, %arg4: memref<68x204xf32, #tpu.memory_space<vmem>>, %arg5: memref<1x204xf32, #tpu.memory_space<vmem>>, %arg6: memref<6x204xf32, #tpu.memory_space<vmem>>) attributes {dimension_semantics = [#tpu.dimension_semantics<parallel>], iteration_bounds = array<i64: 1>, scalar_prefetch = 0 : i64, scratch_operands = 0 : i64, tpu.core_type = #tpu.core_type<tc>, window_params = [{transform_indices = @transform_0, window_bounds = array<i64: 6, 68>}, {pipeline_mode = #tpu.pipeline_mode<synchronous>, transform_indices = @transform_1, window_bounds = array<i64: 68, 68>}, {pipeline_mode = #tpu.pipeline_mode<synchronous>, transform_indices = @transform_2, window_bounds = array<i64: 1, 68>}, {pipeline_mode = #tpu.pipeline_mode<synchronous>, transform_indices = @transform_3, window_bounds = array<i64: 68, 204>}, {pipeline_mode = #tpu.pipeline_mode<synchronous>, transform_indices = @transform_4, window_bounds = array<i64: 1, 204>}, {transform_indices = @transform_5, window_bounds = array<i64: 6, 204>}]} {
    %c0 = arith.constant 0 : index
    %c0_0 = arith.constant 0 : index
    %0 = vector.load %arg1[%c0, %c0_0] : memref<6x68xf32, #tpu.memory_space<vmem>>, vector<6x68xf32>
    %c0_1 = arith.constant 0 : index
    %c0_2 = arith.constant 0 : index
    %1 = vector.load %arg2[%c0_1, %c0_2] : memref<68x68xf32, #tpu.memory_space<vmem>>, vector<68x68xf32>
    %c0_3 = arith.constant 0 : index
    %c0_4 = arith.constant 0 : index
    %2 = vector.load %arg3[%c0_3, %c0_4] : memref<1x68xf32, #tpu.memory_space<vmem>>, vector<1x68xf32>
    %3 = arith.truncf %0 : vector<6x68xf32> to vector<6x68xbf16>
    %4 = arith.truncf %1 : vector<68x68xf32> to vector<68x68xbf16>
    %cst = arith.constant dense<0.000000e+00> : vector<6x68xf32>
    %5 = tpu.matmul %3, %4, %cst {dimension_numbers = #tpu.dot_dimension_numbers<[1], [0], [0], [1], [0, 0, 1, 1], [], []>} : vector<6x68xbf16>, vector<68x68xbf16>, vector<6x68xf32> -> vector<6x68xf32>
    %6 = vector.broadcast %2 : vector<1x68xf32> to vector<6x68xf32>
    %7 = arith.addf %5, %6 : vector<6x68xf32>
    %c0_5 = arith.constant 0 : index
    %c0_6 = arith.constant 0 : index
    %8 = vector.load %arg4[%c0_5, %c0_6] : memref<68x204xf32, #tpu.memory_space<vmem>>, vector<68x204xf32>
    %c0_7 = arith.constant 0 : index
    %c0_8 = arith.constant 0 : index
    %9 = vector.load %arg5[%c0_7, %c0_8] : memref<1x204xf32, #tpu.memory_space<vmem>>, vector<1x204xf32>
    %10 = arith.truncf %7 : vector<6x68xf32> to vector<6x68xbf16>
    %11 = arith.truncf %8 : vector<68x204xf32> to vector<68x204xbf16>
    %cst_9 = arith.constant dense<0.000000e+00> : vector<6x204xf32>
    %12 = tpu.matmul %10, %11, %cst_9 {dimension_numbers = #tpu.dot_dimension_numbers<[1], [0], [0], [1], [0, 0, 1, 1], [], []>} : vector<6x68xbf16>, vector<68x204xbf16>, vector<6x204xf32> -> vector<6x204xf32>
    %13 = vector.broadcast %9 : vector<1x204xf32> to vector<6x204xf32>
    %14 = arith.addf %12, %13 : vector<6x204xf32>
    %c0_10 = arith.constant 0 : index
    %c0_11 = arith.constant 0 : index
    %15 = vector.load %arg6[%c0_10, %c0_11] : memref<6x204xf32, #tpu.memory_space<vmem>>, vector<6x204xf32>
    tpu.vector_store %arg6[%c0_10, %c0_11], %14 {strides = array<i32>} : memref<6x204xf32, #tpu.memory_space<vmem>>, vector<6x204xf32>,
    return
  }
  func.func @transform_0(%arg0: i32) -> (i32, i32) {
    %c0_i32 = arith.constant 0 : i32
    %c0_i32_0 = arith.constant 0 : i32
    return %arg0, %c0_i32 : i32, i32
  }
  func.func @transform_1(%arg0: i32) -> (i32, i32) {
    %c0_i32 = arith.constant 0 : i32
    %c0_i32_0 = arith.constant 0 : i32
    %c0_i32_1 = arith.constant 0 : i32
    return %c0_i32, %c0_i32_0 : i32, i32
  }
  func.func @transform_2(%arg0: i32) -> (i32, i32) {
    %c0_i32 = arith.constant 0 : i32
    %c0_i32_0 = arith.constant 0 : i32
    %c0_i32_1 = arith.constant 0 : i32
    return %c0_i32, %c0_i32_0 : i32, i32
  }
  func.func @transform_3(%arg0: i32) -> (i32, i32) {
    %c0_i32 = arith.constant 0 : i32
    %c0_i32_0 = arith.constant 0 : i32
    %c0_i32_1 = arith.constant 0 : i32
    return %c0_i32, %c0_i32_0 : i32, i32
  }
  func.func @transform_4(%arg0: i32) -> (i32, i32) {
    %c0_i32 = arith.constant 0 : i32
    %c0_i32_0 = arith.constant 0 : i32
    %c0_i32_1 = arith.constant 0 : i32
    return %c0_i32, %c0_i32_0 : i32, i32
  }
  func.func @transform_5(%arg0: i32) -> (i32, i32) {
    %c0_i32 = arith.constant 0 : i32
    %c0_i32_0 = arith.constant 0 : i32
    return %arg0, %c0_i32 : i32, i32
  }
}

module attributes {stable_mosaic.version = 11 : i64} {
  func.func @_matmul2_kernel(%arg0: i32, %arg1: memref<6x68xf32, #tpu.memory_space<vmem>>, %arg2: memref<68x68xf32, #tpu.memory_space<vmem>>, %arg3: memref<1x68xf32, #tpu.memory_space<vmem>>, %arg4: memref<68x68xf32, #tpu.memory_space<vmem>>, %arg5: memref<1x68xf32, #tpu.memory_space<vmem>>, %arg6: memref<6x68xf32, #tpu.memory_space<vmem>>) attributes {dimension_semantics = [#tpu.dimension_semantics<parallel>], iteration_bounds = array<i64: 1>, scalar_prefetch = 0 : i64, scratch_operands = 0 : i64, tpu.core_type = #tpu.core_type<tc>, window_params = [{transform_indices = @transform_0, window_bounds = array<i64: 6, 68>}, {pipeline_mode = #tpu.pipeline_mode<synchronous>, transform_indices = @transform_1, window_bounds = array<i64: 68, 68>}, {pipeline_mode = #tpu.pipeline_mode<synchronous>, transform_indices = @transform_2, window_bounds = array<i64: 1, 68>}, {pipeline_mode = #tpu.pipeline_mode<synchronous>, transform_indices = @transform_3, window_bounds = array<i64: 68, 68>}, {pipeline_mode = #tpu.pipeline_mode<synchronous>, transform_indices = @transform_4, window_bounds = array<i64: 1, 68>}, {transform_indices = @transform_5, window_bounds = array<i64: 6, 68>}]} {
    %c0 = arith.constant 0 : index
    %c0_0 = arith.constant 0 : index
    %0 = vector.load %arg1[%c0, %c0_0] : memref<6x68xf32, #tpu.memory_space<vmem>>, vector<6x68xf32>
    %c0_1 = arith.constant 0 : index
    %c0_2 = arith.constant 0 : index
    %1 = vector.load %arg2[%c0_1, %c0_2] : memref<68x68xf32, #tpu.memory_space<vmem>>, vector<68x68xf32>
    %c0_3 = arith.constant 0 : index
    %c0_4 = arith.constant 0 : index
    %2 = vector.load %arg3[%c0_3, %c0_4] : memref<1x68xf32, #tpu.memory_space<vmem>>, vector<1x68xf32>
    %3 = arith.truncf %0 : vector<6x68xf32> to vector<6x68xbf16>
    %4 = arith.truncf %1 : vector<68x68xf32> to vector<68x68xbf16>
    %cst = arith.constant dense<0.000000e+00> : vector<6x68xf32>
    %5 = tpu.matmul %3, %4, %cst {dimension_numbers = #tpu.dot_dimension_numbers<[1], [0], [0], [1], [0, 0, 1, 1], [], []>} : vector<6x68xbf16>, vector<68x68xbf16>, vector<6x68xf32> -> vector<6x68xf32>
    %6 = vector.broadcast %2 : vector<1x68xf32> to vector<6x68xf32>
    %7 = arith.addf %5, %6 : vector<6x68xf32>
    %c0_5 = arith.constant 0 : index
    %c0_6 = arith.constant 0 : index
    %8 = vector.load %arg4[%c0_5, %c0_6] : memref<68x68xf32, #tpu.memory_space<vmem>>, vector<68x68xf32>
    %c0_7 = arith.constant 0 : index
    %c0_8 = arith.constant 0 : index
    %9 = vector.load %arg5[%c0_7, %c0_8] : memref<1x68xf32, #tpu.memory_space<vmem>>, vector<1x68xf32>
    %10 = arith.truncf %7 : vector<6x68xf32> to vector<6x68xbf16>
    %11 = arith.truncf %8 : vector<68x68xf32> to vector<68x68xbf16>
    %cst_9 = arith.constant dense<0.000000e+00> : vector<6x68xf32>
    %12 = tpu.matmul %10, %11, %cst_9 {dimension_numbers = #tpu.dot_dimension_numbers<[1], [0], [0], [1], [0, 0, 1, 1], [], []>} : vector<6x68xbf16>, vector<68x68xbf16>, vector<6x68xf32> -> vector<6x68xf32>
    %13 = vector.broadcast %9 : vector<1x68xf32> to vector<6x68xf32>
    %14 = arith.addf %12, %13 : vector<6x68xf32>
    %c0_10 = arith.constant 0 : index
    %c0_11 = arith.constant 0 : index
    %15 = vector.load %arg6[%c0_10, %c0_11] : memref<6x68xf32, #tpu.memory_space<vmem>>, vector<6x68xf32>
    tpu.vector_store %arg6[%c0_10, %c0_11], %14 {strides = array<i32>} : memref<6x68xf32, #tpu.memory_space<vmem>>, vector<6x68xf32>,
    return
  }
  func.func @transform_0(%arg0: i32) -> (i32, i32) {
    %c0_i32 = arith.constant 0 : i32
    %c0_i32_0 = arith.constant 0 : i32
    return %arg0, %c0_i32 : i32, i32
  }
  func.func @transform_1(%arg0: i32) -> (i32, i32) {
    %c0_i32 = arith.constant 0 : i32
    %c0_i32_0 = arith.constant 0 : i32
    %c0_i32_1 = arith.constant 0 : i32
    return %c0_i32, %c0_i32_0 : i32, i32
  }
  func.func @transform_2(%arg0: i32) -> (i32, i32) {
    %c0_i32 = arith.constant 0 : i32
    %c0_i32_0 = arith.constant 0 : i32
    %c0_i32_1 = arith.constant 0 : i32
    return %c0_i32, %c0_i32_0 : i32, i32
  }
  func.func @transform_3(%arg0: i32) -> (i32, i32) {
    %c0_i32 = arith.constant 0 : i32
    %c0_i32_0 = arith.constant 0 : i32
    %c0_i32_1 = arith.constant 0 : i32
    return %c0_i32, %c0_i32_0 : i32, i32
  }
  func.func @transform_4(%arg0: i32) -> (i32, i32) {
    %c0_i32 = arith.constant 0 : i32
    %c0_i32_0 = arith.constant 0 : i32
    %c0_i32_1 = arith.constant 0 : i32
    return %c0_i32, %c0_i32_0 : i32, i32
  }
  func.func @transform_5(%arg0: i32) -> (i32, i32) {
    %c0_i32 = arith.constant 0 : i32
    %c0_i32_0 = arith.constant 0 : i32
    return %arg0, %c0_i32 : i32, i32
  }
}

module attributes {stable_mosaic.version = 11 : i64} {
  func.func @_attention_kernel(%arg0: i32, %arg1: memref<8x3x17xf32, #tpu.memory_space<vmem>>, %arg2: memref<8x3x17xf32, #tpu.memory_space<vmem>>, %arg3: memref<8x3x17xf32, #tpu.memory_space<vmem>>, %arg4: memref<8x3x17xf32, #tpu.memory_space<vmem>>) attributes {dimension_semantics = [#tpu.dimension_semantics<parallel>], iteration_bounds = array<i64: 1>, scalar_prefetch = 0 : i64, scratch_operands = 0 : i64, tpu.core_type = #tpu.core_type<tc>, window_params = [{transform_indices = @transform_0, window_bounds = array<i64: 8, 3, 17>}, {transform_indices = @transform_1, window_bounds = array<i64: 8, 3, 17>}, {transform_indices = @transform_2, window_bounds = array<i64: 8, 3, 17>}, {transform_indices = @transform_3, window_bounds = array<i64: 8, 3, 17>}]} {
    %c0 = arith.constant 0 : index
    %c0_0 = arith.constant 0 : index
    %c0_1 = arith.constant 0 : index
    %0 = vector.load %arg1[%c0, %c0_0, %c0_1] : memref<8x3x17xf32, #tpu.memory_space<vmem>>, vector<8x3x17xf32>
    %1 = arith.truncf %0 : vector<8x3x17xf32> to vector<8x3x17xbf16>
    %c0_2 = arith.constant 0 : index
    %c0_3 = arith.constant 0 : index
    %c0_4 = arith.constant 0 : index
    %2 = vector.load %arg2[%c0_2, %c0_3, %c0_4] : memref<8x3x17xf32, #tpu.memory_space<vmem>>, vector<8x3x17xf32>
    %3 = arith.truncf %2 : vector<8x3x17xf32> to vector<8x3x17xbf16>
    %c0_5 = arith.constant 0 : index
    %c0_6 = arith.constant 0 : index
    %c0_7 = arith.constant 0 : index
    %4 = vector.load %arg3[%c0_5, %c0_6, %c0_7] : memref<8x3x17xf32, #tpu.memory_space<vmem>>, vector<8x3x17xf32>
    %5 = arith.truncf %4 : vector<8x3x17xf32> to vector<8x3x17xbf16>
    "tpu.trace_start"() <{level = 10 : i32, message = "bqd,bkd->bqk"}> : () -> ()
    %cst = arith.constant dense<0.000000e+00> : vector<8x3x3xf32>
    %6 = tpu.matmul %1, %3, %cst {dimension_numbers = #tpu.dot_dimension_numbers<[2], [2], [1], [1], [0, 0, 0, 1, 1, 1], [0], [0]>} : vector<8x3x17xbf16>, vector<8x3x17xbf16>, vector<8x3x3xf32> -> vector<8x3x3xf32>
    "tpu.trace_stop"() : () -> ()
    %cst_8 = arith.constant 0.242535621 : f32
    %7 = vector.broadcast %cst_8 : f32 to vector<8x3x3xf32>
    %8 = arith.mulf %6, %7 : vector<8x3x3xf32>
    %cst_9 = arith.constant dense<0xFF800000> : vector<8x3xf32>
    %9 = vector.multi_reduction <maximumf>, %8, %cst_9 [2] : vector<8x3x3xf32> to vector<8x3xf32>
    %10 = vector.shape_cast %9 : vector<8x3xf32> to vector<8x3x1xf32>
    %11 = vector.broadcast %10 : vector<8x3x1xf32> to vector<8x3x3xf32>
    %12 = arith.subf %8, %11 : vector<8x3x3xf32>
    %13 = math.exp %12 : vector<8x3x3xf32>
    %cst_10 = arith.constant dense<0.000000e+00> : vector<8x3xf32>
    %14 = vector.multi_reduction <add>, %13, %cst_10 [2] : vector<8x3x3xf32> to vector<8x3xf32>
    %15 = vector.shape_cast %14 : vector<8x3xf32> to vector<8x3x1xf32>
    %16 = tpu.reciprocal %15 {approx = true} : vector<8x3x1xf32> -> vector<8x3x1xf32>
    %17 = vector.broadcast %16 : vector<8x3x1xf32> to vector<8x3x3xf32>
    %18 = arith.mulf %13, %17 : vector<8x3x3xf32>
    %19 = arith.truncf %18 : vector<8x3x3xf32> to vector<8x3x3xbf16>
    "tpu.trace_start"() <{level = 10 : i32, message = "bqk,bkd->bqd"}> : () -> ()
    %cst_11 = arith.constant dense<0.000000e+00> : vector<8x3x17xf32>
    %20 = tpu.matmul %19, %5, %cst_11 {dimension_numbers = #tpu.dot_dimension_numbers<[2], [1], [1], [2], [0, 0, 0, 1, 1, 2], [0], [0]>} : vector<8x3x3xbf16>, vector<8x3x17xbf16>, vector<8x3x17xf32> -> vector<8x3x17xf32>
    "tpu.trace_stop"() : () -> ()
    %c0_12 = arith.constant 0 : index
    %c0_13 = arith.constant 0 : index
    %c0_14 = arith.constant 0 : index
    %21 = vector.load %arg4[%c0_12, %c0_13, %c0_14] : memref<8x3x17xf32, #tpu.memory_space<vmem>>, vector<8x3x17xf32>
    tpu.vector_store %arg4[%c0_12, %c0_13, %c0_14], %20 {strides = array<i32>} : memref<8x3x17xf32, #tpu.memory_space<vmem>>, vector<8x3x17xf32>,
    return
  }
  func.func @transform_0(%arg0: i32) -> (i32, i32, i32) {
    %c0_i32 = arith.constant 0 : i32
    %c0_i32_0 = arith.constant 0 : i32
    %c0_i32_1 = arith.constant 0 : i32
    return %arg0, %c0_i32, %c0_i32_0 : i32, i32, i32
  }
  func.func @transform_1(%arg0: i32) -> (i32, i32, i32) {
    %c0_i32 = arith.constant 0 : i32
    %c0_i32_0 = arith.constant 0 : i32
    %c0_i32_1 = arith.constant 0 : i32
    return %arg0, %c0_i32, %c0_i32_0 : i32, i32, i32
  }
  func.func @transform_2(%arg0: i32) -> (i32, i32, i32) {
    %c0_i32 = arith.constant 0 : i32
    %c0_i32_0 = arith.constant 0 : i32
    %c0_i32_1 = arith.constant 0 : i32
    return %arg0, %c0_i32, %c0_i32_0 : i32, i32, i32
  }
  func.func @transform_3(%arg0: i32) -> (i32, i32, i32) {
    %c0_i32 = arith.constant 0 : i32
    %c0_i32_0 = arith.constant 0 : i32
    %c0_i32_1 = arith.constant 0 : i32
    return %arg0, %c0_i32, %c0_i32_0 : i32, i32, i32
  }
}

module attributes {stable_mosaic.version = 11 : i64} {
  func.func @_ln_linear_kernel(%arg0: i32, %arg1: memref<6x68xf32, #tpu.memory_space<vmem>>, %arg2: memref<1x68xf32, #tpu.memory_space<vmem>>, %arg3: memref<1x68xf32, #tpu.memory_space<vmem>>, %arg4: memref<68x3xf32, #tpu.memory_space<vmem>>, %arg5: memref<1x3xf32, #tpu.memory_space<vmem>>, %arg6: memref<6x3xf32, #tpu.memory_space<vmem>>) attributes {dimension_semantics = [#tpu.dimension_semantics<parallel>], iteration_bounds = array<i64: 1>, scalar_prefetch = 0 : i64, scratch_operands = 0 : i64, tpu.core_type = #tpu.core_type<tc>, window_params = [{transform_indices = @transform_0, window_bounds = array<i64: 6, 68>}, {pipeline_mode = #tpu.pipeline_mode<synchronous>, transform_indices = @transform_1, window_bounds = array<i64: 1, 68>}, {pipeline_mode = #tpu.pipeline_mode<synchronous>, transform_indices = @transform_2, window_bounds = array<i64: 1, 68>}, {pipeline_mode = #tpu.pipeline_mode<synchronous>, transform_indices = @transform_3, window_bounds = array<i64: 68, 3>}, {pipeline_mode = #tpu.pipeline_mode<synchronous>, transform_indices = @transform_4, window_bounds = array<i64: 1, 3>}, {transform_indices = @transform_5, window_bounds = array<i64: 6, 3>}]} {
    %c0 = arith.constant 0 : index
    %c0_0 = arith.constant 0 : index
    %0 = vector.load %arg1[%c0, %c0_0] : memref<6x68xf32, #tpu.memory_space<vmem>>, vector<6x68xf32>
    %c0_1 = arith.constant 0 : index
    %c0_2 = arith.constant 0 : index
    %1 = vector.load %arg2[%c0_1, %c0_2] : memref<1x68xf32, #tpu.memory_space<vmem>>, vector<1x68xf32>
    %c0_3 = arith.constant 0 : index
    %c0_4 = arith.constant 0 : index
    %2 = vector.load %arg3[%c0_3, %c0_4] : memref<1x68xf32, #tpu.memory_space<vmem>>, vector<1x68xf32>
    %cst = arith.constant dense<0.000000e+00> : vector<6xf32>
    %3 = vector.multi_reduction <add>, %0, %cst [1] : vector<6x68xf32> to vector<6xf32>
    %4 = vector.shape_cast %3 : vector<6xf32> to vector<6x1xf32>
    %cst_5 = arith.constant 6.800000e+01 : f32
    %5 = vector.broadcast %cst_5 : f32 to vector<6x1xf32>
    %6 = arith.divf %4, %5 : vector<6x1xf32>
    %7 = vector.broadcast %6 : vector<6x1xf32> to vector<6x68xf32>
    %8 = arith.subf %0, %7 : vector<6x68xf32>
    %9 = arith.mulf %8, %8 : vector<6x68xf32>
    %cst_6 = arith.constant dense<0.000000e+00> : vector<6xf32>
    %10 = vector.multi_reduction <add>, %9, %cst_6 [1] : vector<6x68xf32> to vector<6xf32>
    %11 = vector.shape_cast %10 : vector<6xf32> to vector<6x1xf32>
    %cst_7 = arith.constant 6.800000e+01 : f32
    %12 = vector.broadcast %cst_7 : f32 to vector<6x1xf32>
    %13 = arith.divf %11, %12 : vector<6x1xf32>
    %cst_8 = arith.constant 9.99999974E-6 : f32
    %14 = vector.broadcast %cst_8 : f32 to vector<6x1xf32>
    %15 = arith.addf %13, %14 : vector<6x1xf32>
    %16 = math.rsqrt %15 : vector<6x1xf32>
    %17 = vector.broadcast %16 : vector<6x1xf32> to vector<6x68xf32>
    %18 = arith.mulf %8, %17 : vector<6x68xf32>
    %19 = vector.broadcast %1 : vector<1x68xf32> to vector<6x68xf32>
    %20 = arith.mulf %18, %19 : vector<6x68xf32>
    %21 = vector.broadcast %2 : vector<1x68xf32> to vector<6x68xf32>
    %22 = arith.addf %20, %21 : vector<6x68xf32>
    %c0_9 = arith.constant 0 : index
    %c0_10 = arith.constant 0 : index
    %23 = vector.load %arg4[%c0_9, %c0_10] : memref<68x3xf32, #tpu.memory_space<vmem>>, vector<68x3xf32>
    %c0_11 = arith.constant 0 : index
    %c0_12 = arith.constant 0 : index
    %24 = vector.load %arg5[%c0_11, %c0_12] : memref<1x3xf32, #tpu.memory_space<vmem>>, vector<1x3xf32>
    %25 = arith.truncf %22 : vector<6x68xf32> to vector<6x68xbf16>
    %26 = arith.truncf %23 : vector<68x3xf32> to vector<68x3xbf16>
    %cst_13 = arith.constant dense<0.000000e+00> : vector<6x3xf32>
    %27 = tpu.matmul %25, %26, %cst_13 {dimension_numbers = #tpu.dot_dimension_numbers<[1], [0], [0], [1], [0, 0, 1, 1], [], []>} : vector<6x68xbf16>, vector<68x3xbf16>, vector<6x3xf32> -> vector<6x3xf32>
    %28 = vector.broadcast %24 : vector<1x3xf32> to vector<6x3xf32>
    %29 = arith.addf %27, %28 : vector<6x3xf32>
    %30 = arith.negf %29 : vector<6x3xf32>
    %31 = math.exp %30 : vector<6x3xf32>
    %cst_14 = arith.constant 1.000000e+00 : f32
    %32 = vector.broadcast %cst_14 : f32 to vector<6x3xf32>
    %33 = arith.addf %32, %31 : vector<6x3xf32>
    %34 = arith.divf %32, %33 : vector<6x3xf32>
    %c0_15 = arith.constant 0 : index
    %c0_16 = arith.constant 0 : index
    %35 = vector.load %arg6[%c0_15, %c0_16] : memref<6x3xf32, #tpu.memory_space<vmem>>, vector<6x3xf32>
    tpu.vector_store %arg6[%c0_15, %c0_16], %34 {strides = array<i32>} : memref<6x3xf32, #tpu.memory_space<vmem>>, vector<6x3xf32>,
    return
  }
  func.func @transform_0(%arg0: i32) -> (i32, i32) {
    %c0_i32 = arith.constant 0 : i32
    %c0_i32_0 = arith.constant 0 : i32
    return %arg0, %c0_i32 : i32, i32
  }
  func.func @transform_1(%arg0: i32) -> (i32, i32) {
    %c0_i32 = arith.constant 0 : i32
    %c0_i32_0 = arith.constant 0 : i32
    %c0_i32_1 = arith.constant 0 : i32
    return %c0_i32, %c0_i32_0 : i32, i32
  }
  func.func @transform_2(%arg0: i32) -> (i32, i32) {
    %c0_i32 = arith.constant 0 : i32
    %c0_i32_0 = arith.constant 0 : i32
    %c0_i32_1 = arith.constant 0 : i32
    return %c0_i32, %c0_i32_0 : i32, i32
  }
  func.func @transform_3(%arg0: i32) -> (i32, i32) {
    %c0_i32 = arith.constant 0 : i32
    %c0_i32_0 = arith.constant 0 : i32
    %c0_i32_1 = arith.constant 0 : i32
    return %c0_i32, %c0_i32_0 : i32, i32
  }
  func.func @transform_4(%arg0: i32) -> (i32, i32) {
    %c0_i32 = arith.constant 0 : i32
    %c0_i32_0 = arith.constant 0 : i32
    %c0_i32_1 = arith.constant 0 : i32
    return %c0_i32, %c0_i32_0 : i32, i32
  }
  func.func @transform_5(%arg0: i32) -> (i32, i32) {
    %c0_i32 = arith.constant 0 : i32
    %c0_i32_0 = arith.constant 0 : i32
    return %arg0, %c0_i32 : i32, i32
  }
}

</mosaic_0001>

<bundles_post_ra>
// kernel: meant_forward.15
= control target key start
LH: loop header
LB: loop body
LE: loop exit
PB: predicated region body
PF: predicated region fallthrough
CT: control target
= control target key end

     0   :  { %vm36_vm0 = vcmask 261120   ;;  %vm55_vm1 = vcmask 259072   ;;  %vm342_vm2 = vcmask 785408   ;;  %vm349_vm3 = vcmask 783360   ;;  %s598_s0 = inlined_call_operand.vmem [shape: f32[54,32], index: 0, kind: input, shape index: {}]   ;;  %s599_s3 = inlined_call_operand.vmem [shape: f32[32,32], index: 3, kind: input, shape index: {}]   ;;  %s600_s1 = inlined_call_operand.vmem [shape: f32[1,32], index: 1, kind: input, shape index: {}]   ;;  %s601_s2 = inlined_call_operand.vmem [shape: f32[1,32], index: 2, kind: input, shape index: {}]   ;;  %s602_s5 = inlined_call_operand.vmem [shape: f32[32,96], index: 5, kind: input, shape index: {}]   ;;  %s603_s4 = inlined_call_operand.vmem [shape: f32[1,32], index: 4, kind: input, shape index: {}]   ;;  %s604_s6 = inlined_call_operand.vmem [shape: f32[1,96], index: 6, kind: input, shape index: {}]   ;;  %s605_s7 = inlined_call_operand.vmem [shape: f32[54,96], index: 7, kind: output, shape index: {}]  }
   0x1   :  { %v27_v0 = vld [vmem:[%s598_s0] sm:$0xff]  ;;  %v29_v1 = vld [vmem:[%s598_s0 + $0x10] sm:$0xff]  ;;  %v28_v2 = vld [vmem:[%s598_s0 + $0x8] sm:$0xff] }
   0x2   :  { %v37_v3 = vsel %vm36_vm0, %v27_v0, 0.0  ;;  %v43_v4 = vsel %vm36_vm0, %v29_v1, 0.0  ;;  %v30_v5 = vld [vmem:[%s598_s0 + $0x18] sm:$0xff]  ;;  %v40_v6 = vsel %vm36_vm0, %v28_v2, 0.0  ;;  %v31_v8 = vld [vmem:[%s598_s0 + $0x20] sm:$0xff]  ;;  %v32_v9 = vld [vmem:[%s598_s0 + $0x28] sm:$0xff] }
   0x3   :  { %38 = vadd.xlane.f32.xlu0 %v37_v3  ;;  %44 = vadd.xlane.f32.xlu1 %v43_v4  ;;  %v46_v7 = vsel %vm36_vm0, %v30_v5, 0.0  ;;  %v49_v10 = vsel %vm36_vm0, %v31_v8, 0.0  ;;  %v52_v11 = vsel %vm36_vm0, %v32_v9, 0.0  ;;  %v33_v12 = vld [vmem:[%s598_s0 + $0x30] sm:$0x3f]  ;;  %v156_v49 = vld [vmem:[%s599_s3] sm:$0xff] }
   0x4   :  { %v56_v13 = vsel %vm55_vm1, %v33_v12, 0.0  ;;  %v157_v50 = vld [vmem:[%s599_s3 + $0x8] sm:$0xff]  ;;  %v158_v52 = vld [vmem:[%s599_s3 + $0x10] sm:$0xff]  ;;  %v159_v53 = vld [vmem:[%s599_s3 + $0x18] sm:$0xff] }
   0x5   :  { %v165_v51 = vpack.c.bf16 %v157_v50, %v156_v49  ;;  %v166_v54 = vpack.c.bf16 %v159_v53, %v158_v52  ;;  %v251_v49 = vld [vmem:[%s602_s5 + $0x10] sm:$0xff]  ;;  %v252_v50 = vld [vmem:[%s602_s5 + $0x18] sm:$0xff]  ;;  %v357_v53 = vld [vmem:[%s603_s4] ss:$0 sm:$0xff] }
   0x7   :  { %41 = vadd.xlane.f32.xlu0 %v40_v6  ;;  %47 = vadd.xlane.f32.xlu1 %v46_v7 }
   0x8   :  { %379 = vmatprep.subr.bf16.mxu0 %v165_v51 }
   0x9   :  { %380 = vmatpush3.bf16.msra.mxu0 %v165_v51  ;;  %v259_v51 = vpack.c.bf16 %v252_v50, %v251_v49 }
   0xa   :  { %381 = vmatprep.subr.bf16.mxu0 %v166_v54 }
   0xb   :  { %50 = vadd.xlane.f32.xlu0 %v49_v10  ;;  %53 = vadd.xlane.f32.xlu1 %v52_v11 }
   0xd   :  { %382 = vmatpush3.bf16.msra.mxu0 %v166_v54 }
   0xf   :  { %57 = vadd.xlane.f32.xlu0 %v56_v13 }
  0x90   :  { %v39_v14 = vpop.xlane.xlu0 %38  ;;  %v45_v15 = vpop.xlane.xlu1 %44 }
  0x91   :  { %v60_v16 = vmul.f32 0.03125, %v39_v14  ;;  %v62_v17 = vmul.f32 0.03125, %v45_v15  ;;  %v355_v14 = vld [vmem:[%s600_s1] ss:$0 sm:$0xff] }
  0x93   :  { %v485_v18 = vsub.f32 %v27_v0, %v60_v16  ;;  %v487_v19 = vsub.f32 %v29_v1, %v62_v17 }
  0x94   :  { %v42_v20 = vpop.xlane.xlu0 %41  ;;  %v48_v21 = vpop.xlane.xlu1 %47 }
  0x95   :  { %v61_v22 = vmul.f32 0.03125, %v42_v20  ;;  %v63_v23 = vmul.f32 0.03125, %v48_v21  ;;  %v74_v24 = vmul.f32 %v485_v18, %v485_v18  ;;  %v76_v25 = vmul.f32 %v487_v19, %v487_v19  ;;  %v356_v21 = vld [vmem:[%s601_s2] ss:$0 sm:$0xff] }
  0x97   :  { %v493_v26 = vsub.f32 %v28_v2, %v61_v22  ;;  %v495_v27 = vsub.f32 %v30_v5, %v63_v23  ;;  %v81_v28 = vsel %vm36_vm0, %v74_v24, 0.0  ;;  %v87_v31 = vsel %vm36_vm0, %v76_v25, 0.0 }
  0x98   :  { %82 = vadd.xlane.f32.xlu1 %v81_v28  ;;  %v51_v29 = vpop.xlane.xlu0 %50  ;;  %v54_v30 = vpop.xlane.xlu1 %53 }
  0x99   :  { %v64_v32 = vmul.f32 0.03125, %v51_v29  ;;  %v65_v33 = vmul.f32 0.03125, %v54_v30  ;;  %v75_v34 = vmul.f32 %v493_v26, %v493_v26  ;;  %v77_v35 = vmul.f32 %v495_v27, %v495_v27 }
  0x9b   :  { %v503_v36 = vsub.f32 %v31_v8, %v64_v32  ;;  %v505_v37 = vsub.f32 %v32_v9, %v65_v33  ;;  %v84_v38 = vsel %vm36_vm0, %v75_v34, 0.0  ;;  %v90_v41 = vsel %vm36_vm0, %v77_v35, 0.0 }
  0x9c   :  { %88 = vadd.xlane.f32.xlu1 %v87_v31  ;;  %85 = vadd.xlane.f32.xlu0 %v84_v38  ;;  %v58_v39 = vpop.xlane.xlu0 %57 }
  0x9d   :  { %v66_v40 = vmul.f32 0.03125, %v58_v39  ;;  %v78_v42 = vmul.f32 %v503_v36, %v503_v36  ;;  %v79_v43 = vmul.f32 %v505_v37, %v505_v37 }
  0x9f   :  { %v513_v44 = vsub.f32 %v33_v12, %v66_v40  ;;  %v93_v45 = vsel %vm36_vm0, %v78_v42, 0.0  ;;  %v96_v46 = vsel %vm36_vm0, %v79_v43, 0.0 }
  0xa0   :  { %91 = vadd.xlane.f32.xlu0 %v90_v41  ;;  %94 = vadd.xlane.f32.xlu1 %v93_v45 }
  0xa1   :  { %v80_v47 = vmul.f32 %v513_v44, %v513_v44 }
  0xa3   :  { %v99_v48 = vsel %vm55_vm1, %v80_v47, 0.0 }
  0xa4   :  { %97 = vadd.xlane.f32.xlu0 %v96_v46  ;;  %100 = vadd.xlane.f32.xlu1 %v99_v48 }
 0x125   :  { %v83_v55 = vpop.xlane.xlu1 %82 }
 0x126   :  { %v102_v56 = vmul.f32 0.03125, %v83_v55 }
 0x128   :  { %v109_v57 = vadd.f32 1e-05, %v102_v56 }
 0x129   :  { %v89_v58 = vpop.xlane.xlu1 %88  ;;  %v86_v59 = vpop.xlane.xlu0 %85 }
 0x12a   :  { %403 = vrsqrt.f32 %v109_v57  ;;  %v104_v60 = vmul.f32 0.03125, %v89_v58  ;;  %v103_v61 = vmul.f32 0.03125, %v86_v59 }
 0x12c   :  { %v111_v62 = vadd.f32 1e-05, %v104_v60  ;;  %v110_v63 = vadd.f32 1e-05, %v103_v61 }
 0x12d   :  { %v95_v0 = vpop.xlane.xlu1 %94  ;;  %v92_v1 = vpop.xlane.xlu0 %91 }
 0x12e   :  { %405 = vrsqrt.f32 %v111_v62  ;;  %v106_v2 = vmul.f32 0.03125, %v95_v0  ;;  %v105_v3 = vmul.f32 0.03125, %v92_v1 }
 0x12f   :  { %407 = vrsqrt.f32 %v110_v63 }
 0x130   :  { %v113_v4 = vadd.f32 1e-05, %v106_v2  ;;  %v112_v5 = vadd.f32 1e-05, %v105_v3 }
 0x131   :  { %v101_v6 = vpop.xlane.xlu1 %100  ;;  %v98_v7 = vpop.xlane.xlu0 %97 }
 0x132   :  { %409 = vrsqrt.f32 %v113_v4  ;;  %v108_v8 = vmul.f32 0.03125, %v101_v6  ;;  %v107_v9 = vmul.f32 0.03125, %v98_v7 }
 0x133   :  { %411 = vrsqrt.f32 %v112_v5 }
 0x134   :  { %v404_v10 = vpop.eup %403  ;;  %v115_v11 = vadd.f32 1e-05, %v108_v8  ;;  %v114_v12 = vadd.f32 1e-05, %v107_v9  ;;  %v362_v8 = vld [vmem:[%s604_s6] ss:$0 sm:$0xff] }
 0x135   :  { %v123_v13 = vmul.f32 %v404_v10, %v485_v18 }
 0x136   :  { %413 = vrsqrt.f32 %v115_v11 }
 0x137   :  { %415 = vrsqrt.f32 %v114_v12  ;;  %v136_v17 = vmul.f32 %v355_v14, %v123_v13 }
 0x138   :  { %v406_v15 = vpop.eup %405 }
 0x139   :  { %v408_v16 = vpop.eup %407  ;;  %v125_v20 = vmul.f32 %v406_v15, %v487_v19  ;;  %v149_v25 = vadd.f32 %v356_v21, %v136_v17 }
 0x13a   :  { %v124_v22 = vmul.f32 %v408_v16, %v493_v26 }
 0x13b   :  { %v138_v31 = vmul.f32 %v355_v14, %v125_v20 }
 0x13c   :  { %v410_v23 = vpop.eup %409  ;;  %v137_v24 = vmul.f32 %v355_v14, %v124_v22 }
 0x13d   :  { %v412_v18 = vpop.eup %411  ;;  %v127_v28 = vmul.f32 %v410_v23, %v503_v36  ;;  %v151_v26 = vadd.f32 %v356_v21, %v138_v31 }
 0x13e   :  { %v126_v29 = vmul.f32 %v412_v18, %v495_v27  ;;  %v150_v30 = vadd.f32 %v356_v21, %v137_v24 }
 0x13f   :  { %v140_v40 = vmul.f32 %v355_v14, %v127_v28 }
 0x140   :  { %v414_v32 = vpop.eup %413  ;;  %v161_v33 = vpack.c.bf16 %v150_v30, %v149_v25  ;;  %v139_v34 = vmul.f32 %v355_v14, %v126_v29 }
 0x141   :  { %v416_v19 = vpop.eup %415  ;;  %v129_v35 = vmul.f32 %v414_v32, %v513_v44  ;;  %v153_v27 = vadd.f32 %v356_v21, %v140_v40  ;;  %v250_v44 = vld [vmem:[%s602_s5 + $0x8] sm:$0xff] }
 0x142   :  { %v128_v38 = vmul.f32 %v416_v19, %v505_v37  ;;  %383 = vmatprep.mubr.msk.bf16.mxu0 %vm36_vm0, %v161_v33  ;;  %v152_v39 = vadd.f32 %v356_v21, %v139_v34  ;;  %v249_v37 = vld [vmem:[%s602_s5] sm:$0xff] }
 0x143   :  { %v142_v36 = vmul.f32 %v355_v14, %v129_v35  ;;  %v258_v48 = vpack.c.bf16 %v250_v44, %v249_v37 }
 0x144   :  { %v162_v41 = vpack.c.bf16 %v152_v39, %v151_v26  ;;  %v141_v42 = vmul.f32 %v355_v14, %v128_v38 }
 0x145   :  { %v155_v46 = vadd.f32 %v356_v21, %v142_v36  ;;  %391 = vmatprep.subr.bf16.mxu1 %v258_v48 }
 0x146   :  { %384 = vmatmul.mubr.msk.bf16.vlgmr.msra.gmra.mrb[0].mxu0 %vm36_vm0, %v162_v41  ;;  %v154_v43 = vadd.f32 %v356_v21, %v141_v42  ;;  %392 = vmatpush3.bf16.msra.mxu1 %v258_v48 }
 0x147   :  { %v164_v47 = vpack.c.bf16 %v155_v46, %v155_v46  ;;  %393 = vmatprep.subr.bf16.mxu1 %v259_v51 }
 0x148   :  { %v163_v45 = vpack.c.bf16 %v154_v43, %v153_v27 }
 0x14a   :  { %387 = vmatprep.mubr.msk.bf16.mxu0 %vm36_vm0, %v163_v45  ;;  %394 = vmatpush3.bf16.msra.mxu1 %v259_v51 }
 0x14e   :  { %388 = vmatmul.mubr.msk.bf16.gmra.mrb[4].mxu0 %vm36_vm0, %v164_v47 }
 0x219   :  { %v385_v52 = vpop.f32.mrb[0].mxu0 }
 0x21a   :  { %v219_v54 = vpop.f32.mrb[1].mxu0  ;;  %v228_v56 = vadd.f32 %v385_v52, %v357_v53 }
 0x21b   :  { %v386_v55 = vpop.f32.mrb[2].mxu0  ;;  %v220_v59 = vadd.f32 %v357_v53, %v219_v54 }
 0x21c   :  { %v231_v57 = vadd.f32 %v386_v55, %v357_v53  ;;  %v222_v58 = vpop.f32.mrb[3].mxu0 }
 0x21d   :  { %v223_v60 = vadd.f32 %v357_v53, %v222_v58 }
 0x21e   :  { %v255_v61 = vpack.c.bf16 %v231_v57, %v228_v56 }
 0x21f   :  { %v254_v62 = vpack.c.bf16 %v223_v60, %v220_v59 }
 0x221   :  { %v389_v63 = vpop.f32.mrb[4].mxu0  ;;  %395 = vmatprep.mubr.msk.bf16.mxu1 %vm36_vm0, %v254_v62 }
 0x222   :  { %v235_v0 = vpop.f32.mrb[5].mxu0  ;;  %396 = vmatmul.mubr.msk.bf16.vlgmr.msra.gmra.mrb[0].mxu1 %vm36_vm0, %v255_v61  ;;  %v244_v2 = vadd.f32 %v389_v63, %v357_v53 }
 0x223   :  { %v390_v1 = vpop.f32.mrb[6].mxu0  ;;  %v236_v4 = vadd.f32 %v357_v53, %v235_v0 }
 0x224   :  { %v238_v3 = vpop.f32.mrb[7].mxu0  ;;  %v257_v7 = vpack.c.bf16 %v244_v2, %v244_v2 }
 0x225   :  { %v239_v5 = vadd.f32 %v357_v53, %v238_v3 }
 0x227   :  { %v256_v6 = vpack.c.bf16 %v239_v5, %v236_v4 }
 0x229   :  { %399 = vmatprep.mubr.msk.bf16.mxu1 %vm36_vm0, %v256_v6 }
 0x22a   :  { %400 = vmatmul.mubr.msk.bf16.gmra.mrb[4].mxu1 %vm36_vm0, %v257_v7 }
 0x2f5   :  { %v397_v9 = vpop.f32.mrb[0].mxu1 }
 0x2f6   :  { %v321_v10 = vadd.f32 %v397_v9, %v362_v8  ;;  %v312_v11 = vpop.f32.mrb[1].mxu1 }
 0x2f7   :  { %v313_v12 = vadd.f32 %v362_v8, %v312_v11  ;;  %v398_v13 = vpop.f32.mrb[2].mxu1 }
 0x2f8   :  { %345 = vst.msk [vmem:[%s605_s7 + $0x10] sm:$0xff] %vm342_vm2, %v321_v10  ;;  %v324_v14 = vadd.f32 %v398_v13, %v362_v8  ;;  %v315_v15 = vpop.f32.mrb[3].mxu1 }
 0x2f9   :  { %343 = vst.msk [vmem:[%s605_s7] sm:$0xff] %vm342_vm2, %v313_v12  ;;  %v316_v16 = vadd.f32 %v362_v8, %v315_v15 }
 0x2fa   :  { %346 = vst.msk [vmem:[%s605_s7 + $0x18] sm:$0xff] %vm342_vm2, %v324_v14 }
 0x2fb   :  { %344 = vst.msk [vmem:[%s605_s7 + $0x8] sm:$0xff] %vm342_vm2, %v316_v16 }
 0x2fd   :  { %v401_v17 = vpop.f32.mrb[4].mxu1 }
 0x2fe   :  { %v337_v20 = vadd.f32 %v401_v17, %v362_v8  ;;  %v328_v21 = vpop.f32.mrb[5].mxu1 }
 0x2ff   :  { %v329_v22 = vadd.f32 %v362_v8, %v328_v21  ;;  %v402_v23 = vpop.f32.mrb[6].mxu1 }
 0x300   :  { %350 = vst.msk [vmem:[%s605_s7 + $0x30] sm:$0x3f] %vm349_vm3, %v337_v20  ;;  %v331_v24 = vpop.f32.mrb[7].mxu1 }
 0x301   :  { %347 = vst.msk [vmem:[%s605_s7 + $0x20] sm:$0xff] %vm342_vm2, %v329_v22  ;;  %v332_v18 = vadd.f32 %v362_v8, %v331_v24 }
 0x303   :  { %348 = vst.msk [vmem:[%s605_s7 + $0x28] sm:$0xff] %vm342_vm2, %v332_v18 }

// kernel: meant_forward.18
= control target key start
LH: loop header
LB: loop body
LE: loop exit
PB: predicated region body
PF: predicated region fallthrough
CT: control target
= control target key end

     0   :  { %vm30_vm0 = vcmask 261120   ;;  %vm49_vm1 = vcmask 259072   ;;  %s450_s0 = inlined_call_operand.vmem [shape: f32[54,32], index: 0, kind: input, shape index: {}]   ;;  %s451_s3 = inlined_call_operand.vmem [shape: f32[32,32], index: 3, kind: input, shape index: {}]   ;;  %s452_s1 = inlined_call_operand.vmem [shape: f32[1,32], index: 1, kind: input, shape index: {}]   ;;  %s453_s2 = inlined_call_operand.vmem [shape: f32[1,32], index: 2, kind: input, shape index: {}]   ;;  %s454_s4 = inlined_call_operand.vmem [shape: f32[1,32], index: 4, kind: input, shape index: {}]   ;;  %s455_s5 = inlined_call_operand.vmem [shape: f32[54,32], index: 5, kind: output, shape index: {}]  }
   0x1   :  { %v21_v0 = vld [vmem:[%s450_s0] sm:$0xff]  ;;  %v22_v2 = vld [vmem:[%s450_s0 + $0x8] sm:$0xff]  ;;  %v23_v8 = vld [vmem:[%s450_s0 + $0x10] sm:$0xff] }
   0x2   :  { %v25_v1 = vld [vmem:[%s450_s0 + $0x20] sm:$0xff]  ;;  %v31_v3 = vsel %vm30_vm0, %v21_v0, 0.0  ;;  %v26_v5 = vld [vmem:[%s450_s0 + $0x28] sm:$0xff]  ;;  %v34_v6 = vsel %vm30_vm0, %v22_v2, 0.0  ;;  %v24_v9 = vld [vmem:[%s450_s0 + $0x18] sm:$0xff]  ;;  %v37_v10 = vsel %vm30_vm0, %v23_v8, 0.0 }
   0x3   :  { %v43_v4 = vsel %vm30_vm0, %v25_v1, 0.0  ;;  %32 = vadd.xlane.f32.xlu0 %v31_v3  ;;  %v46_v7 = vsel %vm30_vm0, %v26_v5, 0.0  ;;  %v40_v11 = vsel %vm30_vm0, %v24_v9, 0.0  ;;  %v27_v12 = vld [vmem:[%s450_s0 + $0x30] sm:$0x3f]  ;;  %v150_v49 = vld [vmem:[%s451_s3] sm:$0xff] }
   0x4   :  { %44 = vadd.xlane.f32.xlu1 %v43_v4  ;;  %v50_v13 = vsel %vm49_vm1, %v27_v12, 0.0  ;;  %v151_v50 = vld [vmem:[%s451_s3 + $0x8] sm:$0xff]  ;;  %v152_v52 = vld [vmem:[%s451_s3 + $0x10] sm:$0xff]  ;;  %v153_v53 = vld [vmem:[%s451_s3 + $0x18] sm:$0xff] }
   0x5   :  { %v159_v51 = vpack.c.bf16 %v151_v50, %v150_v49  ;;  %v160_v54 = vpack.c.bf16 %v153_v53, %v152_v52 }
   0x7   :  { %35 = vadd.xlane.f32.xlu0 %v34_v6  ;;  %267 = vmatprep.subr.bf16.mxu0 %v159_v51 }
   0x8   :  { %47 = vadd.xlane.f32.xlu1 %v46_v7  ;;  %279 = vmatprep.subr.bf16.mxu1 %v159_v51 }
   0x9   :  { %268 = vmatpush3.bf16.msra.mxu0 %v159_v51  ;;  %281 = vmatpush3.bf16.msra.mxu1 %v159_v51 }
   0xa   :  { %269 = vmatprep.subr.bf16.mxu0 %v160_v54  ;;  %280 = vmatprep.subr.bf16.mxu1 %v160_v54 }
   0xb   :  { %38 = vadd.xlane.f32.xlu0 %v37_v10 }
   0xc   :  { %41 = vadd.xlane.f32.xlu1 %v40_v11 }
   0xd   :  { %270 = vmatpush3.bf16.msra.mxu0 %v160_v54  ;;  %282 = vmatpush3.bf16.msra.mxu1 %v160_v54 }
   0xf   :  { %51 = vadd.xlane.f32.xlu0 %v50_v13 }
  0x90   :  { %v33_v14 = vpop.xlane.xlu0 %32 }
  0x91   :  { %v45_v15 = vpop.xlane.xlu1 %44  ;;  %v54_v16 = vmul.f32 0.03125, %v33_v14  ;;  %v254_v14 = vld [vmem:[%s452_s1] ss:$0 sm:$0xff] }
  0x92   :  { %v58_v17 = vmul.f32 0.03125, %v45_v15 }
  0x93   :  { %v355_v18 = vsub.f32 %v21_v0, %v54_v16 }
  0x94   :  { %v357_v19 = vsub.f32 %v25_v1, %v58_v17  ;;  %v36_v20 = vpop.xlane.xlu0 %35 }
  0x95   :  { %v48_v21 = vpop.xlane.xlu1 %47  ;;  %v55_v22 = vmul.f32 0.03125, %v36_v20  ;;  %v68_v24 = vmul.f32 %v355_v18, %v355_v18  ;;  %v255_v20 = vld [vmem:[%s453_s2] ss:$0 sm:$0xff] }
  0x96   :  { %v59_v23 = vmul.f32 0.03125, %v48_v21  ;;  %v72_v25 = vmul.f32 %v357_v19, %v357_v19 }
  0x97   :  { %v363_v26 = vsub.f32 %v22_v2, %v55_v22  ;;  %v75_v28 = vsel %vm30_vm0, %v68_v24, 0.0 }
  0x98   :  { %v365_v27 = vsub.f32 %v26_v5, %v59_v23  ;;  %76 = vadd.xlane.f32.xlu1 %v75_v28  ;;  %v39_v29 = vpop.xlane.xlu0 %38  ;;  %v87_v31 = vsel %vm30_vm0, %v72_v25, 0.0 }
  0x99   :  { %v42_v30 = vpop.xlane.xlu1 %41  ;;  %v56_v32 = vmul.f32 0.03125, %v39_v29  ;;  %v69_v34 = vmul.f32 %v363_v26, %v363_v26 }
  0x9a   :  { %v57_v33 = vmul.f32 0.03125, %v42_v30  ;;  %v73_v35 = vmul.f32 %v365_v27, %v365_v27 }
  0x9b   :  { %v373_v36 = vsub.f32 %v23_v8, %v56_v32  ;;  %v78_v38 = vsel %vm30_vm0, %v69_v34, 0.0 }
  0x9c   :  { %v375_v37 = vsub.f32 %v24_v9, %v57_v33  ;;  %88 = vadd.xlane.f32.xlu1 %v87_v31  ;;  %79 = vadd.xlane.f32.xlu0 %v78_v38  ;;  %v52_v39 = vpop.xlane.xlu0 %51  ;;  %v90_v41 = vsel %vm30_vm0, %v73_v35, 0.0 }
  0x9d   :  { %v60_v40 = vmul.f32 0.03125, %v52_v39  ;;  %v70_v42 = vmul.f32 %v373_v36, %v373_v36 }
  0x9e   :  { %v71_v43 = vmul.f32 %v375_v37, %v375_v37 }
  0x9f   :  { %v383_v44 = vsub.f32 %v27_v12, %v60_v40  ;;  %v81_v45 = vsel %vm30_vm0, %v70_v42, 0.0 }
  0xa0   :  { %91 = vadd.xlane.f32.xlu0 %v90_v41  ;;  %82 = vadd.xlane.f32.xlu1 %v81_v45  ;;  %v84_v46 = vsel %vm30_vm0, %v71_v43, 0.0 }
  0xa1   :  { %v74_v47 = vmul.f32 %v383_v44, %v383_v44 }
  0xa3   :  { %v93_v48 = vsel %vm49_vm1, %v74_v47, 0.0 }
  0xa4   :  { %85 = vadd.xlane.f32.xlu0 %v84_v46  ;;  %94 = vadd.xlane.f32.xlu1 %v93_v48 }
 0x125   :  { %v77_v55 = vpop.xlane.xlu1 %76 }
 0x126   :  { %v96_v56 = vmul.f32 0.03125, %v77_v55 }
 0x128   :  { %v103_v57 = vadd.f32 1e-05, %v96_v56 }
 0x129   :  { %v89_v58 = vpop.xlane.xlu1 %88  ;;  %v80_v59 = vpop.xlane.xlu0 %79 }
 0x12a   :  { %283 = vrsqrt.f32 %v103_v57  ;;  %v100_v60 = vmul.f32 0.03125, %v89_v58  ;;  %v97_v61 = vmul.f32 0.03125, %v80_v59 }
 0x12c   :  { %v107_v62 = vadd.f32 1e-05, %v100_v60  ;;  %v104_v63 = vadd.f32 1e-05, %v97_v61 }
 0x12d   :  { %v83_v0 = vpop.xlane.xlu1 %82  ;;  %v92_v1 = vpop.xlane.xlu0 %91 }
 0x12e   :  { %285 = vrsqrt.f32 %v107_v62  ;;  %v98_v2 = vmul.f32 0.03125, %v83_v0  ;;  %v101_v3 = vmul.f32 0.03125, %v92_v1 }
 0x12f   :  { %287 = vrsqrt.f32 %v104_v63 }
 0x130   :  { %v105_v4 = vadd.f32 1e-05, %v98_v2  ;;  %v108_v5 = vadd.f32 1e-05, %v101_v3 }
 0x131   :  { %v95_v6 = vpop.xlane.xlu1 %94  ;;  %v86_v7 = vpop.xlane.xlu0 %85 }
 0x132   :  { %289 = vrsqrt.f32 %v105_v4  ;;  %v102_v8 = vmul.f32 0.03125, %v95_v6  ;;  %v99_v9 = vmul.f32 0.03125, %v86_v7 }
 0x133   :  { %291 = vrsqrt.f32 %v108_v5 }
 0x134   :  { %v284_v10 = vpop.eup %283  ;;  %v109_v11 = vadd.f32 1e-05, %v102_v8  ;;  %v106_v12 = vadd.f32 1e-05, %v99_v9 }
 0x135   :  { %v117_v13 = vmul.f32 %v284_v10, %v355_v18 }
 0x136   :  { %293 = vrsqrt.f32 %v109_v11 }
 0x137   :  { %295 = vrsqrt.f32 %v106_v12  ;;  %v130_v17 = vmul.f32 %v254_v14, %v117_v13 }
 0x138   :  { %v286_v15 = vpop.eup %285 }
 0x139   :  { %v288_v16 = vpop.eup %287  ;;  %v121_v22 = vmul.f32 %v286_v15, %v357_v19  ;;  %v143_v25 = vadd.f32 %v255_v20, %v130_v17 }
 0x13a   :  { %v118_v21 = vmul.f32 %v288_v16, %v363_v26 }
 0x13b   :  { %v134_v31 = vmul.f32 %v254_v14, %v121_v22 }
 0x13c   :  { %v290_v23 = vpop.eup %289  ;;  %v131_v24 = vmul.f32 %v254_v14, %v118_v21 }
 0x13d   :  { %v292_v18 = vpop.eup %291  ;;  %v119_v28 = vmul.f32 %v290_v23, %v373_v36  ;;  %v147_v19 = vadd.f32 %v255_v20, %v134_v31 }
 0x13e   :  { %v144_v29 = vadd.f32 %v255_v20, %v131_v24  ;;  %v122_v30 = vmul.f32 %v292_v18, %v365_v27 }
 0x13f   :  { %v132_v40 = vmul.f32 %v254_v14, %v119_v28 }
 0x140   :  { %v294_v32 = vpop.eup %293  ;;  %v155_v33 = vpack.c.bf16 %v144_v29, %v143_v25  ;;  %v135_v34 = vmul.f32 %v254_v14, %v122_v30 }
 0x141   :  { %v296_v35 = vpop.eup %295  ;;  %v123_v38 = vmul.f32 %v294_v32, %v383_v44  ;;  %v145_v27 = vadd.f32 %v255_v20, %v132_v40 }
 0x142   :  { %v120_v26 = vmul.f32 %v296_v35, %v375_v37  ;;  %271 = vmatprep.mubr.msk.bf16.mxu0 %vm30_vm0, %v155_v33  ;;  %v148_v39 = vadd.f32 %v255_v20, %v135_v34  ;;  %v256_v37 = vld [vmem:[%s454_s4] ss:$0 sm:$0xff] }
 0x143   :  { %v136_v41 = vmul.f32 %v254_v14, %v123_v38 }
 0x144   :  { %v157_v42 = vpack.c.bf16 %v148_v39, %v147_v19  ;;  %v133_v36 = vmul.f32 %v254_v14, %v120_v26 }
 0x145   :  { %v149_v43 = vadd.f32 %v255_v20, %v136_v41 }
 0x146   :  { %275 = vmatprep.mubr.msk.bf16.mxu1 %vm30_vm0, %v157_v42  ;;  %v146_v45 = vadd.f32 %v255_v20, %v133_v36 }
 0x147   :  { %v158_v46 = vpack.c.bf16 %v149_v43, %v149_v43 }
 0x148   :  { %v156_v47 = vpack.c.bf16 %v146_v45, %v145_v27 }
 0x149   :  { %276 = vmatmul.mubr.msk.bf16.vlgmr.msra.gmra.mrb[0].mxu1 %vm30_vm0, %v158_v46 }
 0x14a   :  { %272 = vmatmul.mubr.msk.bf16.vlgmr.msra.gmra.mrb[0].mxu0 %vm30_vm0, %v156_v47 }
 0x21c   :  { %v277_v44 = vpop.f32.mrb[0].mxu1 }
 0x21d   :  { %v273_v48 = vpop.f32.mrb[0].mxu0  ;;  %v238_v49 = vadd.f32 %v277_v44, %v256_v37  ;;  %v229_v50 = vpop.f32.mrb[1].mxu1 }
 0x21e   :  { %v222_v51 = vadd.f32 %v273_v48, %v256_v37  ;;  %v213_v52 = vpop.f32.mrb[1].mxu0  ;;  %v230_v53 = vadd.f32 %v256_v37, %v229_v50  ;;  %v278_v54 = vpop.f32.mrb[2].mxu1 }
 0x21f   :  { %249 = vst.msk [vmem:[%s455_s5 + $0x30] sm:$0x3f] %vm49_vm1, %v238_v49  ;;  %v214_v55 = vadd.f32 %v256_v37, %v213_v52  ;;  %v274_v56 = vpop.f32.mrb[2].mxu0  ;;  %v232_v57 = vpop.f32.mrb[3].mxu1 }
 0x220   :  { %245 = vst.msk [vmem:[%s455_s5 + $0x10] sm:$0xff] %vm30_vm0, %v222_v51  ;;  %247 = vst.msk [vmem:[%s455_s5 + $0x20] sm:$0xff] %vm30_vm0, %v230_v53  ;;  %v225_v58 = vadd.f32 %v274_v56, %v256_v37  ;;  %v216_v59 = vpop.f32.mrb[3].mxu0  ;;  %v233_v60 = vadd.f32 %v256_v37, %v232_v57 }
 0x221   :  { %243 = vst.msk [vmem:[%s455_s5] sm:$0xff] %vm30_vm0, %v214_v55  ;;  %v217_v61 = vadd.f32 %v256_v37, %v216_v59 }
 0x222   :  { %246 = vst.msk [vmem:[%s455_s5 + $0x18] sm:$0xff] %vm30_vm0, %v225_v58  ;;  %248 = vst.msk [vmem:[%s455_s5 + $0x28] sm:$0xff] %vm30_vm0, %v233_v60 }
 0x223   :  { %244 = vst.msk [vmem:[%s455_s5 + $0x8] sm:$0xff] %vm30_vm0, %v217_v61 }

// kernel: meant_forward.17
= control target key start
LH: loop header
LB: loop body
LE: loop exit
PB: predicated region body
PF: predicated region fallthrough
CT: control target
= control target key end

     0   :  { %vm54_vm0 = vcmask 261120   ;;  %vm151_vm1 = vcmask 259072   ;;  %s640_s2 = inlined_call_operand.vmem [shape: f32[32,32], index: 2, kind: input, shape index: {}]   ;;  %s641_s0 = inlined_call_operand.vmem [shape: f32[54,32], index: 0, kind: input, shape index: {}]   ;;  %s642_s3 = inlined_call_operand.vmem [shape: f32[1,32], index: 3, kind: input, shape index: {}]   ;;  %s643_s6 = inlined_call_operand.vmem [shape: f32[32,32], index: 6, kind: input, shape index: {}]   ;;  %s644_s4 = inlined_call_operand.vmem [shape: f32[1,32], index: 4, kind: input, shape index: {}]   ;;  %s645_s5 = inlined_call_operand.vmem [shape: f32[1,32], index: 5, kind: input, shape index: {}]   ;;  %s646_s7 = inlined_call_operand.vmem [shape: f32[1,32], index: 7, kind: input, shape index: {}]   ;;  %s647_s1 = inlined_call_operand.vmem [shape: f32[54,32], index: 1, kind: input, shape index: {}]   ;;  %s648_s8 = inlined_call_operand.vmem [shape: f32[54,32], index: 8, kind: output, shape index: {}]  }
   0x1   :  { %v37_v0 = vld [vmem:[%s640_s2] sm:$0xff]  ;;  %v38_v1 = vld [vmem:[%s640_s2 + $0x8] sm:$0xff]  ;;  %v39_v2 = vld [vmem:[%s640_s2 + $0x10] sm:$0xff] }
   0x2   :  { %v46_v3 = vpack.c.bf16 %v38_v1, %v37_v0  ;;  %v40_v4 = vld [vmem:[%s640_s2 + $0x18] sm:$0xff]  ;;  %v30_v5 = vld [vmem:[%s641_s0] sm:$0xff]  ;;  %v31_v6 = vld [vmem:[%s641_s0 + $0x8] sm:$0xff] }
   0x3   :  { %v47_v7 = vpack.c.bf16 %v40_v4, %v39_v2  ;;  %v42_v8 = vpack.c.bf16 %v31_v6, %v30_v5  ;;  %v32_v9 = vld [vmem:[%s641_s0 + $0x10] sm:$0xff]  ;;  %v33_v10 = vld [vmem:[%s641_s0 + $0x18] sm:$0xff]  ;;  %v34_v11 = vld [vmem:[%s641_s0 + $0x20] sm:$0xff] }
   0x4   :  { %394 = vmatprep.subr.bf16.mxu0 %v46_v3  ;;  %v35_v12 = vld [vmem:[%s641_s0 + $0x28] sm:$0xff]  ;;  %v43_v13 = vpack.c.bf16 %v33_v10, %v32_v9  ;;  %v36_v15 = vld [vmem:[%s641_s0 + $0x30] sm:$0x3f]  ;;  %v370_v17 = vld [vmem:[%s642_s3] ss:$0 sm:$0xff] }
   0x5   :  { %395 = vmatpush3.bf16.msra.mxu0 %v46_v3  ;;  %398 = vmatprep.mubr.msk.bf16.mxu0 %vm54_vm0, %v42_v8  ;;  %v44_v14 = vpack.c.bf16 %v35_v12, %v34_v11  ;;  %v45_v16 = vpack.c.bf16 %v36_v15, %v36_v15  ;;  %v252_v11 = vld [vmem:[%s643_s6] sm:$0xff]  ;;  %v253_v12 = vld [vmem:[%s643_s6 + $0x8] sm:$0xff]  ;;  %v255_v15 = vld [vmem:[%s643_s6 + $0x18] sm:$0xff] }
   0x6   :  { %396 = vmatprep.subr.bf16.mxu0 %v47_v7 }
   0x9   :  { %397 = vmatpush3.bf16.msra.mxu0 %v47_v7 }
   0xc   :  { %399 = vmatmul.mubr.msk.bf16.vlgmr.msra.gmra.mrb[0].mxu0 %vm54_vm0, %v43_v13  ;;  %v261_v13 = vpack.c.bf16 %v253_v12, %v252_v11 }
   0xd   :  { %402 = vmatprep.mubr.msk.bf16.mxu0 %vm54_vm0, %v44_v14  ;;  %v254_v14 = vld [vmem:[%s643_s6 + $0x10] sm:$0xff] }
   0xe   :  { %406 = vmatprep.subr.bf16.mxu1 %v261_v13 }
   0xf   :  { %407 = vmatpush3.bf16.msra.mxu1 %v261_v13  ;;  %v345_v13 = vld [vmem:[%s647_s1] sm:$0xff] }
  0x14   :  { %403 = vmatmul.mubr.msk.bf16.gmra.mrb[4].mxu0 %vm54_vm0, %v45_v16  ;;  %v262_v16 = vpack.c.bf16 %v255_v15, %v254_v14 }
  0x16   :  { %408 = vmatprep.subr.bf16.mxu1 %v262_v16 }
  0x17   :  { %409 = vmatpush3.bf16.msra.mxu1 %v262_v16  ;;  %v348_v16 = vld [vmem:[%s647_s1 + $0x18] sm:$0xff] }
  0xdf   :  { %v400_v18 = vpop.f32.mrb[0].mxu0 }
  0xe0   :  { %v110_v19 = vadd.f32 %v400_v18, %v370_v17  ;;  %v101_v20 = vpop.f32.mrb[1].mxu0 }
  0xe1   :  { %v102_v21 = vadd.f32 %v370_v17, %v101_v20  ;;  %v401_v22 = vpop.f32.mrb[2].mxu0 }
  0xe2   :  { %v113_v23 = vadd.f32 %v401_v22, %v370_v17  ;;  %v104_v24 = vpop.f32.mrb[3].mxu0  ;;  %v139_v25 = vsel %vm54_vm0, %v110_v19, 0.0 }
  0xe3   :  { %v105_v26 = vadd.f32 %v370_v17, %v104_v24  ;;  %140 = vadd.xlane.f32.xlu1 %v139_v25  ;;  %v133_v27 = vsel %vm54_vm0, %v102_v21, 0.0 }
  0xe4   :  { %134 = vadd.xlane.f32.xlu0 %v133_v27  ;;  %v142_v28 = vsel %vm54_vm0, %v113_v23, 0.0 }
  0xe5   :  { %v136_v30 = vsel %vm54_vm0, %v105_v26, 0.0 }
  0xe7   :  { %143 = vadd.xlane.f32.xlu1 %v142_v28  ;;  %v404_v29 = vpop.f32.mrb[4].mxu0 }
  0xe8   :  { %v117_v31 = vpop.f32.mrb[5].mxu0  ;;  %137 = vadd.xlane.f32.xlu0 %v136_v30  ;;  %v126_v32 = vadd.f32 %v404_v29, %v370_v17 }
  0xe9   :  { %v118_v33 = vadd.f32 %v370_v17, %v117_v31  ;;  %v405_v34 = vpop.f32.mrb[6].mxu0 }
  0xea   :  { %v120_v35 = vpop.f32.mrb[7].mxu0  ;;  %v152_v39 = vsel %vm151_vm1, %v126_v32, 0.0 }
  0xeb   :  { %v121_v36 = vadd.f32 %v370_v17, %v120_v35  ;;  %v145_v37 = vsel %vm54_vm0, %v118_v33, 0.0 }
  0xec   :  { %146 = vadd.xlane.f32.xlu0 %v145_v37 }
  0xed   :  { %v148_v38 = vsel %vm54_vm0, %v121_v36, 0.0 }
  0xee   :  { %149 = vadd.xlane.f32.xlu1 %v148_v38 }
  0xf0   :  { %153 = vadd.xlane.f32.xlu0 %v152_v39 }
 0x170   :  { %v141_v40 = vpop.xlane.xlu1 %140 }
 0x171   :  { %v158_v41 = vmul.f32 0.03125, %v141_v40  ;;  %v135_v42 = vpop.xlane.xlu0 %134  ;;  %v375_v40 = vld [vmem:[%s644_s4] ss:$0 sm:$0xff] }
 0x172   :  { %v156_v43 = vmul.f32 0.03125, %v135_v42 }
 0x173   :  { %v524_v44 = vsub.f32 %v110_v19, %v158_v41 }
 0x174   :  { %v526_v45 = vsub.f32 %v102_v21, %v156_v43  ;;  %v144_v46 = vpop.xlane.xlu1 %143 }
 0x175   :  { %v159_v47 = vmul.f32 0.03125, %v144_v46  ;;  %v138_v48 = vpop.xlane.xlu0 %137  ;;  %v172_v51 = vmul.f32 %v524_v44, %v524_v44 }
 0x176   :  { %v157_v49 = vmul.f32 0.03125, %v138_v48  ;;  %v170_v50 = vmul.f32 %v526_v45, %v526_v45 }
 0x177   :  { %v532_v52 = vsub.f32 %v113_v23, %v159_v47  ;;  %v183_v59 = vsel %vm54_vm0, %v172_v51, 0.0  ;;  %v376_v47 = vld [vmem:[%s645_s5] ss:$0 sm:$0xff] }
 0x178   :  { %v534_v53 = vsub.f32 %v105_v26, %v157_v49  ;;  %v177_v54 = vsel %vm54_vm0, %v170_v50, 0.0 }
 0x179   :  { %178 = vadd.xlane.f32.xlu1 %v177_v54  ;;  %v147_v55 = vpop.xlane.xlu0 %146  ;;  %v173_v63 = vmul.f32 %v532_v52, %v532_v52 }
 0x17a   :  { %v160_v56 = vmul.f32 0.03125, %v147_v55  ;;  %v171_v57 = vmul.f32 %v534_v53, %v534_v53 }
 0x17b   :  { %v150_v58 = vpop.xlane.xlu1 %149  ;;  %v186_v5 = vsel %vm54_vm0, %v173_v63, 0.0 }
 0x17c   :  { %v540_v60 = vsub.f32 %v118_v33, %v160_v56  ;;  %v161_v61 = vmul.f32 0.03125, %v150_v58  ;;  %v180_v62 = vsel %vm54_vm0, %v171_v57, 0.0 }
 0x17d   :  { %184 = vadd.xlane.f32.xlu1 %v183_v59  ;;  %181 = vadd.xlane.f32.xlu0 %v180_v62  ;;  %v154_v0 = vpop.xlane.xlu0 %153 }
 0x17e   :  { %v545_v1 = vsub.f32 %v121_v36, %v161_v61  ;;  %v162_v2 = vmul.f32 0.03125, %v154_v0  ;;  %v174_v3 = vmul.f32 %v540_v60, %v540_v60 }
 0x180   :  { %v549_v4 = vsub.f32 %v126_v32, %v162_v2  ;;  %v189_v6 = vsel %vm54_vm0, %v174_v3, 0.0  ;;  %v175_v7 = vmul.f32 %v545_v1, %v545_v1 }
 0x181   :  { %187 = vadd.xlane.f32.xlu0 %v186_v5  ;;  %190 = vadd.xlane.f32.xlu1 %v189_v6 }
 0x182   :  { %v176_v8 = vmul.f32 %v549_v4, %v549_v4  ;;  %v192_v9 = vsel %vm54_vm0, %v175_v7, 0.0 }
 0x184   :  { %v195_v10 = vsel %vm151_vm1, %v176_v8, 0.0 }
 0x185   :  { %193 = vadd.xlane.f32.xlu0 %v192_v9  ;;  %196 = vadd.xlane.f32.xlu1 %v195_v10  ;;  %v347_v10 = vld [vmem:[%s647_s1 + $0x10] sm:$0xff] }
 0x206   :  { %v179_v17 = vpop.xlane.xlu1 %178 }
 0x207   :  { %v198_v18 = vmul.f32 0.03125, %v179_v17 }
 0x209   :  { %v205_v19 = vadd.f32 1e-05, %v198_v18 }
 0x20a   :  { %v185_v20 = vpop.xlane.xlu1 %184  ;;  %v182_v21 = vpop.xlane.xlu0 %181 }
 0x20b   :  { %418 = vrsqrt.f32 %v205_v19  ;;  %v200_v22 = vmul.f32 0.03125, %v185_v20  ;;  %v199_v23 = vmul.f32 0.03125, %v182_v21  ;;  %v346_v20 = vld [vmem:[%s647_s1 + $0x8] sm:$0xff] }
 0x20d   :  { %v207_v24 = vadd.f32 1e-05, %v200_v22  ;;  %v206_v25 = vadd.f32 1e-05, %v199_v23 }
 0x20e   :  { %v191_v26 = vpop.xlane.xlu1 %190  ;;  %v188_v27 = vpop.xlane.xlu0 %187 }
 0x20f   :  { %420 = vrsqrt.f32 %v207_v24  ;;  %v202_v28 = vmul.f32 0.03125, %v191_v26  ;;  %v201_v29 = vmul.f32 0.03125, %v188_v27  ;;  %v351_v26 = vld [vmem:[%s647_s1 + $0x30] sm:$0x3f] }
 0x210   :  { %422 = vrsqrt.f32 %v206_v25 }
 0x211   :  { %v209_v30 = vadd.f32 1e-05, %v202_v28  ;;  %v208_v31 = vadd.f32 1e-05, %v201_v29  ;;  %v349_v29 = vld [vmem:[%s647_s1 + $0x20] sm:$0xff] }
 0x212   :  { %v197_v32 = vpop.xlane.xlu1 %196  ;;  %v194_v33 = vpop.xlane.xlu0 %193 }
 0x213   :  { %424 = vrsqrt.f32 %v209_v30  ;;  %v204_v34 = vmul.f32 0.03125, %v197_v32  ;;  %v203_v35 = vmul.f32 0.03125, %v194_v33 }
 0x214   :  { %426 = vrsqrt.f32 %v208_v31 }
 0x215   :  { %v419_v36 = vpop.eup %418  ;;  %v211_v37 = vadd.f32 1e-05, %v204_v34  ;;  %v210_v38 = vadd.f32 1e-05, %v203_v35  ;;  %v350_v34 = vld [vmem:[%s647_s1 + $0x28] sm:$0xff] }
 0x216   :  { %v219_v39 = vmul.f32 %v419_v36, %v526_v45 }
 0x217   :  { %428 = vrsqrt.f32 %v211_v37 }
 0x218   :  { %430 = vrsqrt.f32 %v210_v38  ;;  %v232_v43 = vmul.f32 %v375_v40, %v219_v39 }
 0x219   :  { %v421_v41 = vpop.eup %420 }
 0x21a   :  { %v423_v42 = vpop.eup %422  ;;  %v221_v46 = vmul.f32 %v421_v41, %v524_v44  ;;  %v245_v51 = vadd.f32 %v376_v47, %v232_v43 }
 0x21b   :  { %v220_v48 = vmul.f32 %v423_v42, %v534_v53 }
 0x21c   :  { %v234_v57 = vmul.f32 %v375_v40, %v221_v46 }
 0x21d   :  { %v425_v49 = vpop.eup %424  ;;  %v233_v50 = vmul.f32 %v375_v40, %v220_v48 }
 0x21e   :  { %v427_v45 = vpop.eup %426  ;;  %v223_v54 = vmul.f32 %v425_v49, %v540_v60  ;;  %v247_v53 = vadd.f32 %v376_v47, %v234_v57 }
 0x21f   :  { %v222_v55 = vmul.f32 %v427_v45, %v532_v52  ;;  %v246_v56 = vadd.f32 %v376_v47, %v233_v50 }
 0x220   :  { %v236_v2 = vmul.f32 %v375_v40, %v223_v54 }
 0x221   :  { %v429_v58 = vpop.eup %428  ;;  %v257_v59 = vpack.c.bf16 %v246_v56, %v245_v51  ;;  %v235_v61 = vmul.f32 %v375_v40, %v222_v55 }
 0x222   :  { %v431_v44 = vpop.eup %430  ;;  %v225_v62 = vmul.f32 %v429_v58, %v549_v4  ;;  %v249_v52 = vadd.f32 %v376_v47, %v236_v2 }
 0x223   :  { %v224_v63 = vmul.f32 %v431_v44, %v545_v1  ;;  %410 = vmatprep.mubr.msk.bf16.mxu1 %vm54_vm0, %v257_v59  ;;  %v248_v0 = vadd.f32 %v376_v47, %v235_v61  ;;  %v377_v1 = vld [vmem:[%s646_s7] ss:$0 sm:$0xff] }
 0x224   :  { %v238_v60 = vmul.f32 %v375_v40, %v225_v62 }
 0x225   :  { %v258_v3 = vpack.c.bf16 %v248_v0, %v247_v53  ;;  %v237_v5 = vmul.f32 %v375_v40, %v224_v63 }
 0x226   :  { %v251_v8 = vadd.f32 %v376_v47, %v238_v60 }
 0x227   :  { %411 = vmatmul.mubr.msk.bf16.vlgmr.msra.gmra.mrb[0].mxu1 %vm54_vm0, %v258_v3  ;;  %v250_v6 = vadd.f32 %v376_v47, %v237_v5 }
 0x228   :  { %v260_v9 = vpack.c.bf16 %v251_v8, %v251_v8 }
 0x229   :  { %v259_v7 = vpack.c.bf16 %v250_v6, %v249_v52 }
 0x22b   :  { %414 = vmatprep.mubr.msk.bf16.mxu1 %vm54_vm0, %v259_v7 }
 0x22f   :  { %415 = vmatmul.mubr.msk.bf16.gmra.mrb[4].mxu1 %vm54_vm0, %v260_v9 }
 0x2fa   :  { %v412_v4 = vpop.f32.mrb[0].mxu1 }
 0x2fb   :  { %v324_v11 = vadd.f32 %v412_v4, %v377_v1  ;;  %v315_v12 = vpop.f32.mrb[1].mxu1 }
 0x2fc   :  { %v316_v14 = vadd.f32 %v377_v1, %v315_v12  ;;  %v413_v15 = vpop.f32.mrb[2].mxu1 }
 0x2fd   :  { %v354_v17 = vadd.f32 %v347_v10, %v324_v11  ;;  %v327_v18 = vadd.f32 %v413_v15, %v377_v1  ;;  %v318_v19 = vpop.f32.mrb[3].mxu1 }
 0x2fe   :  { %v352_v21 = vadd.f32 %v345_v13, %v316_v14  ;;  %v319_v22 = vadd.f32 %v377_v1, %v318_v19 }
 0x2ff   :  { %361 = vst.msk [vmem:[%s648_s8 + $0x10] sm:$0xff] %vm54_vm0, %v354_v17  ;;  %v355_v23 = vadd.f32 %v348_v16, %v327_v18 }
 0x300   :  { %359 = vst.msk [vmem:[%s648_s8] sm:$0xff] %vm54_vm0, %v352_v21  ;;  %v353_v24 = vadd.f32 %v346_v20, %v319_v22 }
 0x301   :  { %362 = vst.msk [vmem:[%s648_s8 + $0x18] sm:$0xff] %vm54_vm0, %v355_v23 }
 0x302   :  { %360 = vst.msk [vmem:[%s648_s8 + $0x8] sm:$0xff] %vm54_vm0, %v353_v24  ;;  %v416_v25 = vpop.f32.mrb[4].mxu1 }
 0x303   :  { %v340_v27 = vadd.f32 %v416_v25, %v377_v1  ;;  %v331_v28 = vpop.f32.mrb[5].mxu1 }
 0x304   :  { %v332_v30 = vadd.f32 %v377_v1, %v331_v28  ;;  %v417_v31 = vpop.f32.mrb[6].mxu1 }
 0x305   :  { %v358_v32 = vadd.f32 %v351_v26, %v340_v27  ;;  %v334_v33 = vpop.f32.mrb[7].mxu1 }
 0x306   :  { %v356_v35 = vadd.f32 %v349_v29, %v332_v30  ;;  %v335_v36 = vadd.f32 %v377_v1, %v334_v33 }
 0x307   :  { %365 = vst.msk [vmem:[%s648_s8 + $0x30] sm:$0x3f] %vm151_vm1, %v358_v32 }
 0x308   :  { %363 = vst.msk [vmem:[%s648_s8 + $0x20] sm:$0xff] %vm54_vm0, %v356_v35  ;;  %v357_v37 = vadd.f32 %v350_v34, %v335_v36 }
 0x30a   :  { %364 = vst.msk [vmem:[%s648_s8 + $0x28] sm:$0xff] %vm54_vm0, %v357_v37 }

// kernel: meant_forward.19
= control target key start
LH: loop header
LB: loop body
LE: loop exit
PB: predicated region body
PF: predicated region fallthrough
CT: control target
= control target key end

     0   :  { %vm33_vm0 = vcmask 261120   ;;  %vm52_vm1 = vcmask 259072   ;;  %s493_s0 = inlined_call_operand.vmem [shape: f32[54,32], index: 0, kind: input, shape index: {}]   ;;  %s494_s4 = inlined_call_operand.vmem [shape: f32[32,32], index: 4, kind: input, shape index: {}]   ;;  %s495_s2 = inlined_call_operand.vmem [shape: f32[1,32], index: 2, kind: input, shape index: {}]   ;;  %s496_s3 = inlined_call_operand.vmem [shape: f32[1,32], index: 3, kind: input, shape index: {}]   ;;  %s497_s5 = inlined_call_operand.vmem [shape: f32[1,32], index: 5, kind: input, shape index: {}]   ;;  %s498_s1 = inlined_call_operand.vmem [shape: f32[54,32], index: 1, kind: input, shape index: {}]   ;;  %s499_s6 = inlined_call_operand.vmem [shape: f32[54,32], index: 6, kind: output, shape index: {}]  }
   0x1   :  { %v24_v0 = vld [vmem:[%s493_s0] sm:$0xff]  ;;  %v25_v2 = vld [vmem:[%s493_s0 + $0x8] sm:$0xff]  ;;  %v26_v8 = vld [vmem:[%s493_s0 + $0x10] sm:$0xff] }
   0x2   :  { %v28_v1 = vld [vmem:[%s493_s0 + $0x20] sm:$0xff]  ;;  %v34_v3 = vsel %vm33_vm0, %v24_v0, 0.0  ;;  %v29_v5 = vld [vmem:[%s493_s0 + $0x28] sm:$0xff]  ;;  %v37_v6 = vsel %vm33_vm0, %v25_v2, 0.0  ;;  %v27_v9 = vld [vmem:[%s493_s0 + $0x18] sm:$0xff]  ;;  %v40_v10 = vsel %vm33_vm0, %v26_v8, 0.0 }
   0x3   :  { %v46_v4 = vsel %vm33_vm0, %v28_v1, 0.0  ;;  %35 = vadd.xlane.f32.xlu0 %v34_v3  ;;  %v49_v7 = vsel %vm33_vm0, %v29_v5, 0.0  ;;  %v43_v11 = vsel %vm33_vm0, %v27_v9, 0.0  ;;  %v30_v12 = vld [vmem:[%s493_s0 + $0x30] sm:$0x3f]  ;;  %v153_v49 = vld [vmem:[%s494_s4] sm:$0xff] }
   0x4   :  { %47 = vadd.xlane.f32.xlu1 %v46_v4  ;;  %v53_v13 = vsel %vm52_vm1, %v30_v12, 0.0  ;;  %v154_v50 = vld [vmem:[%s494_s4 + $0x8] sm:$0xff]  ;;  %v155_v52 = vld [vmem:[%s494_s4 + $0x10] sm:$0xff]  ;;  %v156_v53 = vld [vmem:[%s494_s4 + $0x18] sm:$0xff] }
   0x5   :  { %v162_v51 = vpack.c.bf16 %v154_v50, %v153_v49  ;;  %v163_v54 = vpack.c.bf16 %v156_v53, %v155_v52  ;;  %v248_v50 = vld [vmem:[%s498_s1 + $0x10] sm:$0xff]  ;;  %v250_v53 = vld [vmem:[%s498_s1 + $0x20] sm:$0xff] }
   0x7   :  { %38 = vadd.xlane.f32.xlu0 %v37_v6  ;;  %284 = vmatprep.subr.bf16.mxu0 %v162_v51 }
   0x8   :  { %50 = vadd.xlane.f32.xlu1 %v49_v7  ;;  %296 = vmatprep.subr.bf16.mxu1 %v162_v51 }
   0x9   :  { %285 = vmatpush3.bf16.msra.mxu0 %v162_v51  ;;  %298 = vmatpush3.bf16.msra.mxu1 %v162_v51 }
   0xa   :  { %286 = vmatprep.subr.bf16.mxu0 %v163_v54  ;;  %297 = vmatprep.subr.bf16.mxu1 %v163_v54 }
   0xb   :  { %41 = vadd.xlane.f32.xlu0 %v40_v10 }
   0xc   :  { %44 = vadd.xlane.f32.xlu1 %v43_v11 }
   0xd   :  { %287 = vmatpush3.bf16.msra.mxu0 %v163_v54  ;;  %299 = vmatpush3.bf16.msra.mxu1 %v163_v54 }
   0xf   :  { %54 = vadd.xlane.f32.xlu0 %v53_v13 }
  0x90   :  { %v36_v14 = vpop.xlane.xlu0 %35 }
  0x91   :  { %v48_v15 = vpop.xlane.xlu1 %47  ;;  %v57_v16 = vmul.f32 0.03125, %v36_v14  ;;  %v271_v14 = vld [vmem:[%s495_s2] ss:$0 sm:$0xff] }
  0x92   :  { %v61_v17 = vmul.f32 0.03125, %v48_v15 }
  0x93   :  { %v377_v18 = vsub.f32 %v24_v0, %v57_v16 }
  0x94   :  { %v379_v19 = vsub.f32 %v28_v1, %v61_v17  ;;  %v39_v20 = vpop.xlane.xlu0 %38 }
  0x95   :  { %v51_v21 = vpop.xlane.xlu1 %50  ;;  %v58_v22 = vmul.f32 0.03125, %v39_v20  ;;  %v71_v24 = vmul.f32 %v377_v18, %v377_v18  ;;  %v272_v20 = vld [vmem:[%s496_s3] ss:$0 sm:$0xff] }
  0x96   :  { %v62_v23 = vmul.f32 0.03125, %v51_v21  ;;  %v75_v25 = vmul.f32 %v379_v19, %v379_v19 }
  0x97   :  { %v385_v26 = vsub.f32 %v25_v2, %v58_v22  ;;  %v78_v28 = vsel %vm33_vm0, %v71_v24, 0.0 }
  0x98   :  { %v387_v27 = vsub.f32 %v29_v5, %v62_v23  ;;  %79 = vadd.xlane.f32.xlu1 %v78_v28  ;;  %v42_v29 = vpop.xlane.xlu0 %41  ;;  %v90_v31 = vsel %vm33_vm0, %v75_v25, 0.0 }
  0x99   :  { %v45_v30 = vpop.xlane.xlu1 %44  ;;  %v59_v32 = vmul.f32 0.03125, %v42_v29  ;;  %v72_v34 = vmul.f32 %v385_v26, %v385_v26 }
  0x9a   :  { %v60_v33 = vmul.f32 0.03125, %v45_v30  ;;  %v76_v35 = vmul.f32 %v387_v27, %v387_v27 }
  0x9b   :  { %v395_v36 = vsub.f32 %v26_v8, %v59_v32  ;;  %v81_v38 = vsel %vm33_vm0, %v72_v34, 0.0 }
  0x9c   :  { %v397_v37 = vsub.f32 %v27_v9, %v60_v33  ;;  %91 = vadd.xlane.f32.xlu1 %v90_v31  ;;  %82 = vadd.xlane.f32.xlu0 %v81_v38  ;;  %v55_v39 = vpop.xlane.xlu0 %54  ;;  %v93_v41 = vsel %vm33_vm0, %v76_v35, 0.0 }
  0x9d   :  { %v63_v40 = vmul.f32 0.03125, %v55_v39  ;;  %v73_v42 = vmul.f32 %v395_v36, %v395_v36 }
  0x9e   :  { %v74_v43 = vmul.f32 %v397_v37, %v397_v37 }
  0x9f   :  { %v405_v44 = vsub.f32 %v30_v12, %v63_v40  ;;  %v84_v45 = vsel %vm33_vm0, %v73_v42, 0.0 }
  0xa0   :  { %94 = vadd.xlane.f32.xlu0 %v93_v41  ;;  %85 = vadd.xlane.f32.xlu1 %v84_v45  ;;  %v87_v46 = vsel %vm33_vm0, %v74_v43, 0.0 }
  0xa1   :  { %v77_v47 = vmul.f32 %v405_v44, %v405_v44 }
  0xa3   :  { %v96_v48 = vsel %vm52_vm1, %v77_v47, 0.0 }
  0xa4   :  { %88 = vadd.xlane.f32.xlu0 %v87_v46  ;;  %97 = vadd.xlane.f32.xlu1 %v96_v48  ;;  %v252_v48 = vld [vmem:[%s498_s1 + $0x30] sm:$0x3f] }
 0x125   :  { %v80_v55 = vpop.xlane.xlu1 %79 }
 0x126   :  { %v99_v56 = vmul.f32 0.03125, %v80_v55 }
 0x128   :  { %v106_v57 = vadd.f32 1e-05, %v99_v56  ;;  %v246_v56 = vld [vmem:[%s498_s1] sm:$0xff] }
 0x129   :  { %v92_v58 = vpop.xlane.xlu1 %91  ;;  %v83_v59 = vpop.xlane.xlu0 %82 }
 0x12a   :  { %300 = vrsqrt.f32 %v106_v57  ;;  %v103_v60 = vmul.f32 0.03125, %v92_v58  ;;  %v100_v61 = vmul.f32 0.03125, %v83_v59 }
 0x12c   :  { %v110_v62 = vadd.f32 1e-05, %v103_v60  ;;  %v107_v63 = vadd.f32 1e-05, %v100_v61 }
 0x12d   :  { %v86_v0 = vpop.xlane.xlu1 %85  ;;  %v95_v1 = vpop.xlane.xlu0 %94 }
 0x12e   :  { %302 = vrsqrt.f32 %v110_v62  ;;  %v101_v2 = vmul.f32 0.03125, %v86_v0  ;;  %v104_v3 = vmul.f32 0.03125, %v95_v1  ;;  %v249_v62 = vld [vmem:[%s498_s1 + $0x18] sm:$0xff]  ;;  %v251_v0 = vld [vmem:[%s498_s1 + $0x28] sm:$0xff] }
 0x12f   :  { %304 = vrsqrt.f32 %v107_v63 }
 0x130   :  { %v108_v4 = vadd.f32 1e-05, %v101_v2  ;;  %v111_v5 = vadd.f32 1e-05, %v104_v3 }
 0x131   :  { %v98_v6 = vpop.xlane.xlu1 %97  ;;  %v89_v7 = vpop.xlane.xlu0 %88 }
 0x132   :  { %306 = vrsqrt.f32 %v108_v4  ;;  %v105_v8 = vmul.f32 0.03125, %v98_v6  ;;  %v102_v9 = vmul.f32 0.03125, %v89_v7 }
 0x133   :  { %308 = vrsqrt.f32 %v111_v5  ;;  %v247_v5 = vld [vmem:[%s498_s1 + $0x8] sm:$0xff] }
 0x134   :  { %v301_v10 = vpop.eup %300  ;;  %v112_v11 = vadd.f32 1e-05, %v105_v8  ;;  %v109_v12 = vadd.f32 1e-05, %v102_v9 }
 0x135   :  { %v120_v13 = vmul.f32 %v301_v10, %v377_v18 }
 0x136   :  { %310 = vrsqrt.f32 %v112_v11 }
 0x137   :  { %312 = vrsqrt.f32 %v109_v12  ;;  %v133_v17 = vmul.f32 %v271_v14, %v120_v13 }
 0x138   :  { %v303_v15 = vpop.eup %302 }
 0x139   :  { %v305_v16 = vpop.eup %304  ;;  %v124_v22 = vmul.f32 %v303_v15, %v379_v19  ;;  %v146_v25 = vadd.f32 %v272_v20, %v133_v17 }
 0x13a   :  { %v121_v21 = vmul.f32 %v305_v16, %v385_v26 }
 0x13b   :  { %v137_v31 = vmul.f32 %v271_v14, %v124_v22 }
 0x13c   :  { %v307_v23 = vpop.eup %306  ;;  %v134_v24 = vmul.f32 %v271_v14, %v121_v21 }
 0x13d   :  { %v309_v18 = vpop.eup %308  ;;  %v122_v28 = vmul.f32 %v307_v23, %v395_v36  ;;  %v150_v19 = vadd.f32 %v272_v20, %v137_v31 }
 0x13e   :  { %v147_v29 = vadd.f32 %v272_v20, %v134_v24  ;;  %v125_v30 = vmul.f32 %v309_v18, %v387_v27 }
 0x13f   :  { %v135_v40 = vmul.f32 %v271_v14, %v122_v28 }
 0x140   :  { %v311_v32 = vpop.eup %310  ;;  %v158_v33 = vpack.c.bf16 %v147_v29, %v146_v25  ;;  %v138_v34 = vmul.f32 %v271_v14, %v125_v30 }
 0x141   :  { %v313_v35 = vpop.eup %312  ;;  %v126_v38 = vmul.f32 %v311_v32, %v405_v44  ;;  %v148_v27 = vadd.f32 %v272_v20, %v135_v40 }
 0x142   :  { %v123_v26 = vmul.f32 %v313_v35, %v397_v37  ;;  %288 = vmatprep.mubr.msk.bf16.mxu0 %vm33_vm0, %v158_v33  ;;  %v151_v39 = vadd.f32 %v272_v20, %v138_v34  ;;  %v273_v37 = vld [vmem:[%s497_s5] ss:$0 sm:$0xff] }
 0x143   :  { %v139_v41 = vmul.f32 %v271_v14, %v126_v38 }
 0x144   :  { %v160_v42 = vpack.c.bf16 %v151_v39, %v150_v19  ;;  %v136_v36 = vmul.f32 %v271_v14, %v123_v26 }
 0x145   :  { %v152_v43 = vadd.f32 %v272_v20, %v139_v41 }
 0x146   :  { %292 = vmatprep.mubr.msk.bf16.mxu1 %vm33_vm0, %v160_v42  ;;  %v149_v45 = vadd.f32 %v272_v20, %v136_v36 }
 0x147   :  { %v161_v46 = vpack.c.bf16 %v152_v43, %v152_v43 }
 0x148   :  { %v159_v47 = vpack.c.bf16 %v149_v45, %v148_v27 }
 0x149   :  { %293 = vmatmul.mubr.msk.bf16.vlgmr.msra.gmra.mrb[0].mxu1 %vm33_vm0, %v161_v46 }
 0x14a   :  { %289 = vmatmul.mubr.msk.bf16.vlgmr.msra.gmra.mrb[0].mxu0 %vm33_vm0, %v159_v47 }
 0x21c   :  { %v294_v44 = vpop.f32.mrb[0].mxu1 }
 0x21d   :  { %v290_v49 = vpop.f32.mrb[0].mxu0  ;;  %v241_v51 = vadd.f32 %v294_v44, %v273_v37  ;;  %v232_v52 = vpop.f32.mrb[1].mxu1 }
 0x21e   :  { %v225_v54 = vadd.f32 %v290_v49, %v273_v37  ;;  %v216_v55 = vpop.f32.mrb[1].mxu0  ;;  %v233_v57 = vadd.f32 %v273_v37, %v232_v52  ;;  %v295_v58 = vpop.f32.mrb[2].mxu1 }
 0x21f   :  { %v259_v59 = vadd.f32 %v252_v48, %v241_v51  ;;  %v217_v60 = vadd.f32 %v273_v37, %v216_v55  ;;  %v291_v61 = vpop.f32.mrb[2].mxu0  ;;  %v235_v63 = vpop.f32.mrb[3].mxu1 }
 0x220   :  { %v255_v1 = vadd.f32 %v248_v50, %v225_v54  ;;  %v257_v2 = vadd.f32 %v250_v53, %v233_v57  ;;  %v228_v3 = vadd.f32 %v291_v61, %v273_v37  ;;  %v219_v4 = vpop.f32.mrb[3].mxu0  ;;  %v236_v6 = vadd.f32 %v273_v37, %v235_v63 }
 0x221   :  { %266 = vst.msk [vmem:[%s499_s6 + $0x30] sm:$0x3f] %vm52_vm1, %v259_v59  ;;  %v253_v7 = vadd.f32 %v246_v56, %v217_v60  ;;  %v220_v8 = vadd.f32 %v273_v37, %v219_v4 }
 0x222   :  { %262 = vst.msk [vmem:[%s499_s6 + $0x10] sm:$0xff] %vm33_vm0, %v255_v1  ;;  %264 = vst.msk [vmem:[%s499_s6 + $0x20] sm:$0xff] %vm33_vm0, %v257_v2  ;;  %v256_v9 = vadd.f32 %v249_v62, %v228_v3  ;;  %v258_v10 = vadd.f32 %v251_v0, %v236_v6 }
 0x223   :  { %260 = vst.msk [vmem:[%s499_s6] sm:$0xff] %vm33_vm0, %v253_v7  ;;  %v254_v11 = vadd.f32 %v247_v5, %v220_v8 }
 0x224   :  { %263 = vst.msk [vmem:[%s499_s6 + $0x18] sm:$0xff] %vm33_vm0, %v256_v9  ;;  %265 = vst.msk [vmem:[%s499_s6 + $0x28] sm:$0xff] %vm33_vm0, %v258_v10 }
 0x225   :  { %261 = vst.msk [vmem:[%s499_s6 + $0x8] sm:$0xff] %vm33_vm0, %v254_v11 }

// kernel: meant_forward.16
= control target key start
LH: loop header
LB: loop body
LE: loop exit
PB: predicated region body
PF: predicated region fallthrough
CT: control target
= control target key end

     0   :  { %s2253_s12 = smov 0   ;;  %s2802_s0 = inlined_call_operand.vmem [shape: f32[24,9,8], index: 0, kind: input, shape index: {}]   ;;  %s2803_s1 = inlined_call_operand.vmem [shape: f32[24,9,8], index: 1, kind: input, shape index: {}]   ;;  %s2804_s2 = inlined_call_operand.vmem [shape: f32[24,9,8], index: 2, kind: input, shape index: {}]   ;;  %s2805_s3 = inlined_call_operand.vmem [shape: f32[24,9,8], index: 3, kind: output, shape index: {}]  }
   0x1 LB: > { %s1880_s13 = sadd.s32 4294967295, %s2228_s12   ;;  %p1884_p0 = scmp.ge.s32.totalorder %s2228_s12, 1  ;;  %s2228_s12 = sphi %s2253_s12, %s13_s12  }
   0x2   : > { %p163_p1 = scmp.lt.s32.totalorder %s2228_s12, 3 }
   0x4   : > { %p164_p2 = pnand %p1884_p0, %p163_p1 }
   0x5   : > { %s201_s14 = smul.u32 (!%p164_p2), 12, %s1880_s13  ;;  %v2230_v0 = vmov (!%p164_p2), 0.0   ;;  %vm2231_vm0 = vmmov (!%p164_p2), 0   ;;  %vm338_vm1 = vcmask (!%p164_p2), 64512   ;;  %vm927_vm2 = vcmask (!%p164_p2), 72704  }
   0x6   : > { %167 = sbr.rel (%p164_p2) target bundleno = 820 (0x334), region = 32  ;;  %1971 = vmatprep.subr.bf16.mxu0 (!%p164_p2), %v2230_v0  ;;  %1977 = vmatprep.subr.bf16.mxu1 (!%p164_p2), %v2230_v0  ;;  %vm931_vm3 = vcmask (!%p164_p2), 65536   ;;  %vm1208_vm4 = vcmask (!%p164_p2), 1043456   ;;  %vm1209_vm5 = vcmask (!%p164_p2), 1044480   ;;  %vm1774_vm6 = vcmask (!%p164_p2), 57344  }
   0x7   : > { %p202_p3 = scmp.lt.s32.totalorder (!%p164_p2), %s201_s14, 23  ;;  %1973 = vmatprep.mubr.msk.bf16.mxu0 (!%p164_p2), %vm2231_vm0, %v2230_v0  ;;  %1979 = vmatprep.mubr.msk.bf16.mxu1 (!%p164_p2), %vm2231_vm0, %v2230_v0 }
   0xd   : > { %s2807_s14 = smov (!%p202_p3, %s201_s14), 23 }
   0xe   : > { %s2267_s15 = sshll.u32 %s2807_s14, 4 }
   0xf   : > { %s2273_s18 = scalar_lea.vmem %s2803_s1, %s2267_s15  ;;  %s2283_s21 = scalar_lea.vmem %s2802_s0, %s2267_s15 }
  0x10   : > { %v266_v1 = vld [vmem:[%s2273_s18] sm:$0xff]  ;;  %v267_v2 = vld [vmem:[%s2273_s18 + $0x8] sm:$0x1]  ;;  %v268_v3 = vld [vmem:[%s2273_s18 + $0x10] sm:$0xff]  ;;  %s2566_s24 = scalar_lea.vmem %s2804_s2, %s2267_s15  ;;  %s2749_s27 = scalar_lea.vmem %s2805_s3, %s2267_s15 }
  0x11   : > { %v290_v4 = vpack.c.bf16 %v267_v2, %v266_v1  ;;  %v269_v5 = vld [vmem:[%s2273_s18 + $0x18] sm:$0x1]  ;;  %v270_v7 = vld [vmem:[%s2273_s18 + $0x20] sm:$0xff]  ;;  %v271_v9 = vld [vmem:[%s2273_s18 + $0x28] sm:$0x1] }
  0x12   : > { %v291_v6 = vpack.c.bf16 %v269_v5, %v268_v3  ;;  %v272_v10 = vld [vmem:[%s2273_s18 + $0x30] sm:$0xff]  ;;  %v273_v11 = vld [vmem:[%s2273_s18 + $0x38] sm:$0x1]  ;;  %v230_v13 = vld [vmem:[%s2283_s21] sm:$0xff]  ;;  %v292_v17 = vpack.c.bf16 %v271_v9, %v270_v7 }
  0x13   : > { %v343_v8 = vsel %vm338_vm1, %v290_v4, 0  ;;  %v231_v14 = vld [vmem:[%s2283_s21 + $0x8] sm:$0x1]  ;;  %v232_v15 = vld [vmem:[%s2283_s21 + $0x10] sm:$0xff]  ;;  %v233_v16 = vld [vmem:[%s2283_s21 + $0x18] sm:$0x1]  ;;  %v293_v18 = vpack.c.bf16 %v273_v11, %v272_v10 }
  0x14   : > { %1972 = vmatpush3.bf16.xpose.msra.mxu0 %v343_v8  ;;  %v390_v12 = vsel %vm338_vm1, %v291_v6, 0  ;;  %v254_v19 = vpack.c.bf16 %v231_v14, %v230_v13  ;;  %v255_v20 = vpack.c.bf16 %v233_v16, %v232_v15  ;;  %v437_v21 = vsel %vm338_vm1, %v292_v17, 0  ;;  %v274_v23 = vld [vmem:[%s2273_s18 + $0x40] sm:$0xff]  ;;  %v275_v24 = vld [vmem:[%s2273_s18 + $0x48] sm:$0x1]  ;;  %v276_v25 = vld [vmem:[%s2273_s18 + $0x50] sm:$0xff] }
  0x15   : > { %1978 = vmatpush3.bf16.xpose.msra.mxu1 %v390_v12  ;;  %1983 = vmatprep.subr.bf16.mxu0 %v2230_v0  ;;  %v484_v22 = vsel %vm338_vm1, %v293_v18, 0  ;;  %v277_v26 = vld [vmem:[%s2273_s18 + $0x58] sm:$0x1]  ;;  %v234_v27 = vld [vmem:[%s2283_s21 + $0x20] sm:$0xff]  ;;  %v235_v28 = vld [vmem:[%s2283_s21 + $0x28] sm:$0x1]  ;;  %v294_v29 = vpack.c.bf16 %v275_v24, %v274_v23 }
  0x16   : > { %1989 = vmatprep.subr.bf16.mxu1 %v2230_v0  ;;  %v236_v30 = vld [vmem:[%s2283_s21 + $0x30] sm:$0xff]  ;;  %v237_v31 = vld [vmem:[%s2283_s21 + $0x38] sm:$0x1]  ;;  %v295_v32 = vpack.c.bf16 %v277_v26, %v276_v25  ;;  %v256_v33 = vpack.c.bf16 %v235_v28, %v234_v27  ;;  %v278_v37 = vld [vmem:[%s2273_s18 + $0x60] sm:$0xff] }
  0x17   : > { %v257_v34 = vpack.c.bf16 %v237_v31, %v236_v30  ;;  %v531_v35 = vsel %vm338_vm1, %v294_v29, 0  ;;  %v279_v38 = vld [vmem:[%s2273_s18 + $0x68] sm:$0x1]  ;;  %v280_v39 = vld [vmem:[%s2273_s18 + $0x70] sm:$0xff]  ;;  %v281_v40 = vld [vmem:[%s2273_s18 + $0x78] sm:$0x1] }
  0x18   : > { %v578_v36 = vsel %vm338_vm1, %v295_v32, 0  ;;  %v238_v41 = vld [vmem:[%s2283_s21 + $0x40] sm:$0xff]  ;;  %v239_v42 = vld [vmem:[%s2283_s21 + $0x48] sm:$0x1]  ;;  %v296_v43 = vpack.c.bf16 %v279_v38, %v278_v37  ;;  %v240_v44 = vld [vmem:[%s2283_s21 + $0x50] sm:$0xff]  ;;  %v297_v46 = vpack.c.bf16 %v281_v40, %v280_v39 }
  0x19   : > { %v241_v45 = vld [vmem:[%s2283_s21 + $0x58] sm:$0x1]  ;;  %v258_v47 = vpack.c.bf16 %v239_v42, %v238_v41  ;;  %v282_v51 = vld [vmem:[%s2273_s18 + $0x80] sm:$0xff]  ;;  %v283_v52 = vld [vmem:[%s2273_s18 + $0x88] sm:$0x1] }
  0x1a   : > { %v259_v48 = vpack.c.bf16 %v241_v45, %v240_v44  ;;  %v625_v49 = vsel %vm338_vm1, %v296_v43, 0  ;;  %v672_v50 = vsel %vm338_vm1, %v297_v46, 0  ;;  %v284_v53 = vld [vmem:[%s2273_s18 + $0x90] sm:$0xff]  ;;  %v285_v54 = vld [vmem:[%s2273_s18 + $0x98] sm:$0x1]  ;;  %v242_v55 = vld [vmem:[%s2283_s21 + $0x60] sm:$0xff]  ;;  %v298_v57 = vpack.c.bf16 %v283_v52, %v282_v51 }
  0x1b   : > { %1974 = vmatmul.mubr.msk.bf16.vlgmr.msra.gmra.mrb[0].mxu0 %vm338_vm1, %v254_v19  ;;  %v243_v56 = vld [vmem:[%s2283_s21 + $0x68] sm:$0x1]  ;;  %v244_v58 = vld [vmem:[%s2283_s21 + $0x70] sm:$0xff]  ;;  %v245_v59 = vld [vmem:[%s2283_s21 + $0x78] sm:$0x1]  ;;  %v299_v60 = vpack.c.bf16 %v285_v54, %v284_v53 }
  0x1c   : > { %1980 = vmatmul.mubr.msk.bf16.vlgmr.msra.gmra.mrb[0].mxu1 %vm338_vm1, %v255_v20  ;;  %1984 = vmatpush3.bf16.xpose.msra.mxu0 %v437_v21  ;;  %v260_v61 = vpack.c.bf16 %v243_v56, %v242_v55  ;;  %v261_v62 = vpack.c.bf16 %v245_v59, %v244_v58  ;;  %v719_v63 = vsel %vm338_vm1, %v298_v57, 0  ;;  %v286_v2 = vld [vmem:[%s2273_s18 + $0xa0] sm:$0xff]  ;;  %v287_v3 = vld [vmem:[%s2273_s18 + $0xa8] sm:$0x1]  ;;  %v288_v4 = vld [vmem:[%s2273_s18 + $0xb0] sm:$0xff] }
  0x1d   : > { %1990 = vmatpush3.bf16.xpose.msra.mxu1 %v484_v22  ;;  %1985 = vmatprep.mubr.msk.bf16.mxu0 %vm2231_vm0, %v2230_v0  ;;  %v766_v1 = vsel %vm338_vm1, %v299_v60, 0  ;;  %v289_v5 = vld [vmem:[%s2273_s18 + $0xb8] sm:$0x1]  ;;  %v246_v6 = vld [vmem:[%s2283_s21 + $0x80] sm:$0xff]  ;;  %v247_v7 = vld [vmem:[%s2283_s21 + $0x88] sm:$0x1]  ;;  %v300_v8 = vpack.c.bf16 %v287_v3, %v286_v2 }
  0x1e   : > { %1995 = vmatprep.subr.bf16.mxu0 %v2230_v0  ;;  %1991 = vmatprep.mubr.msk.bf16.mxu1 %vm2231_vm0, %v2230_v0  ;;  %v248_v9 = vld [vmem:[%s2283_s21 + $0x90] sm:$0xff]  ;;  %v249_v10 = vld [vmem:[%s2283_s21 + $0x98] sm:$0x1]  ;;  %v301_v11 = vpack.c.bf16 %v289_v5, %v288_v4  ;;  %v262_v12 = vpack.c.bf16 %v247_v7, %v246_v6  ;;  %v250_v16 = vld [vmem:[%s2283_s21 + $0xa0] sm:$0xff] }
  0x1f   : > { %2001 = vmatprep.subr.bf16.mxu1 %v2230_v0  ;;  %v263_v13 = vpack.c.bf16 %v249_v10, %v248_v9  ;;  %v813_v14 = vsel %vm338_vm1, %v300_v8, 0  ;;  %v251_v17 = vld [vmem:[%s2283_s21 + $0xa8] sm:$0x1]  ;;  %v252_v18 = vld [vmem:[%s2283_s21 + $0xb0] sm:$0xff]  ;;  %v253_v19 = vld [vmem:[%s2283_s21 + $0xb8] sm:$0x1] }
  0x20   : > { %v860_v15 = vsel %vm338_vm1, %v301_v11, 0  ;;  %v264_v20 = vpack.c.bf16 %v251_v17, %v250_v16  ;;  %v265_v21 = vpack.c.bf16 %v253_v19, %v252_v18 }
  0x23   : > { %1986 = vmatmul.mubr.msk.bf16.vlgmr.msra.gmra.mrb[4].mxu0 %vm338_vm1, %v256_v33 }
  0x24   : > { %1996 = vmatpush3.bf16.xpose.msra.mxu0 %v531_v35  ;;  %1992 = vmatmul.mubr.msk.bf16.vlgmr.msra.gmra.mrb[4].mxu1 %vm338_vm1, %v257_v34 }
  0x25   : > { %2002 = vmatpush3.bf16.xpose.msra.mxu1 %v578_v36  ;;  %1997 = vmatprep.mubr.msk.bf16.mxu0 %vm2231_vm0, %v2230_v0 }
  0x26   : > { %2007 = vmatprep.subr.bf16.mxu0 %v2230_v0  ;;  %2003 = vmatprep.mubr.msk.bf16.mxu1 %vm2231_vm0, %v2230_v0 }
  0x27   : > { %2013 = vmatprep.subr.bf16.mxu1 %v2230_v0 }
  0x2b   : > { %1998 = vmatmul.mubr.msk.bf16.vlgmr.msra.gmra.mrb[8].mxu0 %vm338_vm1, %v258_v47 }
  0x2c   : > { %2008 = vmatpush3.bf16.xpose.msra.mxu0 %v625_v49  ;;  %2004 = vmatmul.mubr.msk.bf16.vlgmr.msra.gmra.mrb[8].mxu1 %vm338_vm1, %v259_v48 }
  0x2d   : > { %2014 = vmatpush3.bf16.xpose.msra.mxu1 %v672_v50  ;;  %2009 = vmatprep.mubr.msk.bf16.mxu0 %vm2231_vm0, %v2230_v0 }
  0x2e   : > { %2019 = vmatprep.subr.bf16.mxu0 %v2230_v0  ;;  %2015 = vmatprep.mubr.msk.bf16.mxu1 %vm2231_vm0, %v2230_v0 }
  0x2f   : > { %2025 = vmatprep.subr.bf16.mxu1 %v2230_v0 }
  0x33   : > { %2010 = vmatmul.mubr.msk.bf16.vlgmr.msra.gmra.mrb[12].mxu0 %vm338_vm1, %v260_v61 }
  0x34   : > { %2020 = vmatpush3.bf16.xpose.msra.mxu0 %v719_v63  ;;  %2016 = vmatmul.mubr.msk.bf16.vlgmr.msra.gmra.mrb[12].mxu1 %vm338_vm1, %v261_v62 }
  0x35   : > { %2026 = vmatpush3.bf16.xpose.msra.mxu1 %v766_v1  ;;  %2021 = vmatprep.mubr.msk.bf16.mxu0 %vm2231_vm0, %v2230_v0 }
  0x36   : > { %2031 = vmatprep.subr.bf16.mxu0 %v2230_v0  ;;  %2027 = vmatprep.mubr.msk.bf16.mxu1 %vm2231_vm0, %v2230_v0 }
  0x37   : > { %2037 = vmatprep.subr.bf16.mxu1 %v2230_v0 }
  0x3b   : > { %2022 = vmatmul.mubr.msk.bf16.vlgmr.msra.gmra.mrb[16].mxu0 %vm338_vm1, %v262_v12 }
  0x3c   : > { %2032 = vmatpush3.bf16.xpose.msra.mxu0 %v813_v14  ;;  %2028 = vmatmul.mubr.msk.bf16.vlgmr.msra.gmra.mrb[16].mxu1 %vm338_vm1, %v263_v13 }
  0x3d   : > { %2038 = vmatpush3.bf16.xpose.msra.mxu1 %v860_v15  ;;  %2033 = vmatprep.mubr.msk.bf16.mxu0 %vm2231_vm0, %v2230_v0 }
  0x3e   : > { %2039 = vmatprep.mubr.msk.bf16.mxu1 %vm2231_vm0, %v2230_v0  ;;  %2043 = vmatprep.subr.bf16.mxu0 %v2230_v0 }
  0x3f   : > { %2049 = vmatprep.subr.bf16.mxu1 %v2230_v0 }
  0x43   : > { %2034 = vmatmul.mubr.msk.bf16.vlgmr.msra.gmra.mrb[20].mxu0 %vm338_vm1, %v264_v20 }
  0x44   : > { %2040 = vmatmul.mubr.msk.bf16.vlgmr.msra.gmra.mrb[20].mxu1 %vm338_vm1, %v265_v21  ;;  %2045 = vmatprep.mubr.msk.bf16.mxu0 %vm2231_vm0, %v2230_v0 }
  0x45   : > { %2051 = vmatprep.mubr.msk.bf16.mxu1 %vm2231_vm0, %v2230_v0 }
  0xee   : > { %v379_v22 = vpop.f32.mrb[0].mxu0 }
  0xef   : > { %v2389_v23 = vmul.f32 0.35355338, %v379_v22  ;;  %v426_v24 = vpop.f32.mrb[0].mxu1  ;;  %v1975_v25 = vpop.f32.mrb[1].mxu0 }
  0xf0   : > { %v2391_v26 = vmul.f32 0.35355338, %v426_v24  ;;  %v382_v27 = vpop.f32.mrb[2].mxu0  ;;  %v1981_v28 = vpop.f32.mrb[1].mxu1 }
  0xf1   : > { %v2393_v29 = vmul.f32 0.35355338, %v382_v27  ;;  %v1976_v30 = vpop.f32.mrb[3].mxu0  ;;  %v429_v31 = vpop.f32.mrb[2].mxu1  ;;  %v928_v32 = vsel %vm927_vm2, %v2389_v23, -inf }
  0xf2   : > { %v2397_v33 = vmul.f32 0.35355338, %v429_v31  ;;  %v935_v34 = vsel %vm927_vm2, %v2391_v26, -inf  ;;  %v1982_v35 = vpop.f32.mrb[3].mxu1  ;;  %929 = vmax.xlane.f32.xlu0 %v928_v32 }
  0xf3   : > { %936 = vmax.xlane.f32.xlu1 %v935_v34  ;;  %v932_v37 = vsel %vm931_vm3, %v2393_v29, -inf }
  0xf4   : > { %v938_v36 = vsel %vm931_vm3, %v2397_v33, -inf }
  0xf6   : > { %933 = vmax.xlane.f32.xlu0 %v932_v37  ;;  %v473_v38 = vpop.f32.mrb[4].mxu0 }
  0xf7   : > { %939 = vmax.xlane.f32.xlu1 %v938_v36  ;;  %v2405_v39 = vmul.f32 0.35355338, %v473_v38  ;;  %v1987_v40 = vpop.f32.mrb[5].mxu0  ;;  %v520_v41 = vpop.f32.mrb[4].mxu1 }
  0xf8   : > { %v476_v42 = vpop.f32.mrb[6].mxu0  ;;  %v2407_v43 = vmul.f32 0.35355338, %v520_v41  ;;  %v1993_v44 = vpop.f32.mrb[5].mxu1 }
  0xf9   : > { %v2409_v45 = vmul.f32 0.35355338, %v476_v42  ;;  %v1988_v46 = vpop.f32.mrb[7].mxu0  ;;  %v941_v47 = vsel %vm927_vm2, %v2405_v39, -inf  ;;  %v523_v48 = vpop.f32.mrb[6].mxu1 }
  0xfa   : > { %942 = vmax.xlane.f32.xlu0 %v941_v47  ;;  %v2413_v49 = vmul.f32 0.35355338, %v523_v48  ;;  %v1994_v50 = vpop.f32.mrb[7].mxu1  ;;  %v947_v52 = vsel %vm927_vm2, %v2407_v43, -inf }
  0xfb   : > { %v944_v51 = vsel %vm931_vm3, %v2409_v45, -inf }
  0xfc   : > { %945 = vmax.xlane.f32.xlu1 %v944_v51  ;;  %v950_v53 = vsel %vm931_vm3, %v2413_v49, -inf }
  0xfe   : > { %948 = vmax.xlane.f32.xlu0 %v947_v52  ;;  %v567_v54 = vpop.f32.mrb[8].mxu0 }
  0xff   : > { %v2421_v55 = vmul.f32 0.35355338, %v567_v54  ;;  %v1999_v56 = vpop.f32.mrb[9].mxu0  ;;  %v614_v57 = vpop.f32.mrb[8].mxu1 }
 0x100   : > { %951 = vmax.xlane.f32.xlu1 %v950_v53  ;;  %v570_v58 = vpop.f32.mrb[10].mxu0  ;;  %v2423_v59 = vmul.f32 0.35355338, %v614_v57  ;;  %v2005_v60 = vpop.f32.mrb[9].mxu1 }
 0x101   : > { %v2425_v61 = vmul.f32 0.35355338, %v570_v58  ;;  %v2000_v62 = vpop.f32.mrb[11].mxu0  ;;  %v953_v63 = vsel %vm927_vm2, %v2421_v55, -inf  ;;  %v617_v1 = vpop.f32.mrb[10].mxu1 }
 0x102   : > { %954 = vmax.xlane.f32.xlu0 %v953_v63  ;;  %v2429_v2 = vmul.f32 0.35355338, %v617_v1  ;;  %v2006_v3 = vpop.f32.mrb[11].mxu1  ;;  %v959_v5 = vsel %vm927_vm2, %v2423_v59, -inf }
 0x103   : > { %v956_v4 = vsel %vm931_vm3, %v2425_v61, -inf }
 0x104   : > { %957 = vmax.xlane.f32.xlu1 %v956_v4  ;;  %v962_v6 = vsel %vm931_vm3, %v2429_v2, -inf }
 0x106   : > { %960 = vmax.xlane.f32.xlu0 %v959_v5  ;;  %v661_v7 = vpop.f32.mrb[12].mxu0 }
 0x107   : > { %v2437_v8 = vmul.f32 0.35355338, %v661_v7  ;;  %v2011_v9 = vpop.f32.mrb[13].mxu0  ;;  %v708_v10 = vpop.f32.mrb[12].mxu1 }
 0x108   : > { %963 = vmax.xlane.f32.xlu1 %v962_v6  ;;  %v664_v11 = vpop.f32.mrb[14].mxu0  ;;  %v2439_v12 = vmul.f32 0.35355338, %v708_v10  ;;  %v2017_v13 = vpop.f32.mrb[13].mxu1 }
 0x109   : > { %v2441_v14 = vmul.f32 0.35355338, %v664_v11  ;;  %v2012_v15 = vpop.f32.mrb[15].mxu0  ;;  %v965_v16 = vsel %vm927_vm2, %v2437_v8, -inf  ;;  %v711_v17 = vpop.f32.mrb[14].mxu1 }
 0x10a   : > { %966 = vmax.xlane.f32.xlu0 %v965_v16  ;;  %v2445_v18 = vmul.f32 0.35355338, %v711_v17  ;;  %v2018_v19 = vpop.f32.mrb[15].mxu1  ;;  %v971_v21 = vsel %vm927_vm2, %v2439_v12, -inf }
 0x10b   : > { %v968_v20 = vsel %vm931_vm3, %v2441_v14, -inf }
 0x10c   : > { %969 = vmax.xlane.f32.xlu1 %v968_v20  ;;  %v974_v22 = vsel %vm931_vm3, %v2445_v18, -inf }
 0x10e   : > { %972 = vmax.xlane.f32.xlu0 %v971_v21  ;;  %v755_v24 = vpop.f32.mrb[16].mxu0 }
 0x10f   : > { %v2453_v25 = vmul.f32 0.35355338, %v755_v24  ;;  %v2023_v27 = vpop.f32.mrb[17].mxu0  ;;  %v802_v28 = vpop.f32.mrb[16].mxu1 }
 0x110   : > { %975 = vmax.xlane.f32.xlu1 %v974_v22  ;;  %v758_v30 = vpop.f32.mrb[18].mxu0  ;;  %v2455_v31 = vmul.f32 0.35355338, %v802_v28  ;;  %v2029_v32 = vpop.f32.mrb[17].mxu1 }
 0x111   : > { %v2457_v34 = vmul.f32 0.35355338, %v758_v30  ;;  %v2024_v35 = vpop.f32.mrb[19].mxu0  ;;  %v977_v36 = vsel %vm927_vm2, %v2453_v25, -inf  ;;  %v805_v37 = vpop.f32.mrb[18].mxu1 }
 0x112   : > { %978 = vmax.xlane.f32.xlu0 %v977_v36  ;;  %v2461_v38 = vmul.f32 0.35355338, %v805_v37  ;;  %v2030_v40 = vpop.f32.mrb[19].mxu1  ;;  %v983_v42 = vsel %vm927_vm2, %v2455_v31, -inf }
 0x113   : > { %v980_v41 = vsel %vm931_vm3, %v2457_v34, -inf }
 0x114   : > { %981 = vmax.xlane.f32.xlu1 %v980_v41  ;;  %v986_v44 = vsel %vm931_vm3, %v2461_v38, -inf }
 0x116   : > { %984 = vmax.xlane.f32.xlu0 %v983_v42  ;;  %v849_v46 = vpop.f32.mrb[20].mxu0 }
 0x117   : > { %v2469_v47 = vmul.f32 0.35355338, %v849_v46  ;;  %v2035_v48 = vpop.f32.mrb[21].mxu0  ;;  %v896_v50 = vpop.f32.mrb[20].mxu1 }
 0x118   : > { %987 = vmax.xlane.f32.xlu1 %v986_v44  ;;  %v852_v51 = vpop.f32.mrb[22].mxu0  ;;  %v2471_v52 = vmul.f32 0.35355338, %v896_v50  ;;  %v2041_v53 = vpop.f32.mrb[21].mxu1 }
 0x119   : > { %v2473_v54 = vmul.f32 0.35355338, %v852_v51  ;;  %v2036_v56 = vpop.f32.mrb[23].mxu0  ;;  %v989_v57 = vsel %vm927_vm2, %v2469_v47, -inf  ;;  %v899_v58 = vpop.f32.mrb[22].mxu1 }
 0x11a   : > { %990 = vmax.xlane.f32.xlu0 %v989_v57  ;;  %v2477_v60 = vmul.f32 0.35355338, %v899_v58  ;;  %v2042_v62 = vpop.f32.mrb[23].mxu1  ;;  %v995_v1 = vsel %vm927_vm2, %v2471_v52, -inf }
 0x11b   : > { %v992_v63 = vsel %vm931_vm3, %v2473_v54, -inf }
 0x11c   : > { %993 = vmax.xlane.f32.xlu1 %v992_v63  ;;  %v998_v3 = vsel %vm931_vm3, %v2477_v60, -inf }
 0x11e   : > { %996 = vmax.xlane.f32.xlu0 %v995_v1 }
 0x120   : > { %999 = vmax.xlane.f32.xlu1 %v998_v3 }
 0x17f   : > { %v930_v4 = vpop.xlane.xlu0 %929 }
 0x180   : > { %v937_v5 = vpop.xlane.xlu1 %936  ;;  %v1001_v6 = vsub.f32 %v2389_v23, %v930_v4 }
 0x181   : > { %v1003_v7 = vsub.f32 %v2391_v26, %v937_v5 }
 0x182   : > { %v1025_v9 = vmul.f32 1.442695, %v1001_v6 }
 0x183   : > { %v1029_v10 = vmul.f32 1.442695, %v1003_v7  ;;  %v934_v11 = vpop.xlane.xlu0 %933 }
 0x184   : > { %2126 = vpow2.f32 %v1025_v9  ;;  %v940_v13 = vpop.xlane.xlu1 %939  ;;  %v1002_v15 = vsub.f32 %v2393_v29, %v934_v11 }
 0x185   : > { %v1004_v16 = vsub.f32 %v2397_v33, %v940_v13  ;;  %2128 = vpow2.f32 %v1029_v10 }
 0x186   : > { %v1027_v17 = vmul.f32 1.442695, %v1002_v15 }
 0x187   : > { %v1031_v19 = vmul.f32 1.442695, %v1004_v16  ;;  %v943_v20 = vpop.xlane.xlu0 %942 }
 0x188   : > { %2130 = vpow2.f32 %v1027_v17  ;;  %v1005_v21 = vsub.f32 %v2405_v39, %v943_v20 }
 0x189   : > { %v946_v22 = vpop.xlane.xlu1 %945  ;;  %2132 = vpow2.f32 %v1031_v19 }
 0x18a   : > { %v1033_v23 = vmul.f32 1.442695, %v1005_v21  ;;  %v1006_v26 = vsub.f32 %v2409_v45, %v946_v22 }
 0x18b   : > { %v949_v24 = vpop.xlane.xlu0 %948 }
 0x18c   : > { %2134 = vpow2.f32 %v1033_v23  ;;  %v1035_v27 = vmul.f32 1.442695, %v1006_v26  ;;  %v1007_v28 = vsub.f32 %v2407_v43, %v949_v24 }
 0x18d   : > { %v952_v29 = vpop.xlane.xlu1 %951 }
 0x18e   : > { %v2492_v30 = vpop.eup %2126  ;;  %2136 = vpow2.f32 %v1035_v27  ;;  %v1037_v33 = vmul.f32 1.442695, %v1007_v28  ;;  %v1008_v32 = vsub.f32 %v2413_v49, %v952_v29 }
 0x18f   : > { %v955_v35 = vpop.xlane.xlu0 %954  ;;  %v1073_v39 = vsel %vm927_vm2, %v2492_v30, 0.0  ;;  %v2497_v36 = vpop.eup %2128 }
 0x190   : > { %2138 = vpow2.f32 %v1037_v33  ;;  %v1039_v45 = vmul.f32 1.442695, %v1008_v32  ;;  %v1009_v37 = vsub.f32 %v2421_v55, %v955_v35  ;;  %1074 = vadd.xlane.f32.xlu0 %v1073_v39  ;;  %v1079_v49 = vsel %vm927_vm2, %v2497_v36, 0.0 }
 0x191   : > { %v958_v40 = vpop.xlane.xlu1 %957 }
 0x192   : > { %v2500_v43 = vpop.eup %2130  ;;  %2140 = vpow2.f32 %v1039_v45  ;;  %v1041_v41 = vmul.f32 1.442695, %v1009_v37  ;;  %v1010_v42 = vsub.f32 %v2425_v61, %v958_v40 }
 0x193   : > { %v961_v44 = vpop.xlane.xlu0 %960  ;;  %v1076_v46 = vsel %vm931_vm3, %v2500_v43, 0.0  ;;  %v2507_v48 = vpop.eup %2132 }
 0x194   : > { %2142 = vpow2.f32 %v1041_v41  ;;  %v1043_v50 = vmul.f32 1.442695, %v1010_v42  ;;  %v1011_v55 = vsub.f32 %v2423_v59, %v961_v44  ;;  %1080 = vadd.xlane.f32.xlu0 %v1079_v49  ;;  %1077 = vadd.xlane.f32.xlu1 %v1076_v46  ;;  %v1082_v62 = vsel %vm931_vm3, %v2507_v48, 0.0 }
 0x195   : > { %v964_v51 = vpop.xlane.xlu1 %963 }
 0x196   : > { %v2510_v53 = vpop.eup %2134  ;;  %2144 = vpow2.f32 %v1043_v50  ;;  %v1045_v61 = vmul.f32 1.442695, %v1011_v55  ;;  %v1012_v56 = vsub.f32 %v2429_v2, %v964_v51  ;;  %v303_v51 = vld [vmem:[%s2566_s24 + $0x8] sm:$0x1] }
 0x197   : > { %v967_v57 = vpop.xlane.xlu0 %966  ;;  %v1085_v58 = vsel %vm927_vm2, %v2510_v53, 0.0 }
 0x198   : > { %v2517_v63 = vpop.eup %2136  ;;  %2146 = vpow2.f32 %v1045_v61  ;;  %v1047_v59 = vmul.f32 1.442695, %v1012_v56  ;;  %v1013_v1 = vsub.f32 %v2437_v8, %v967_v57  ;;  %1086 = vadd.xlane.f32.xlu0 %v1085_v58  ;;  %1083 = vadd.xlane.f32.xlu1 %v1082_v62 }
 0x199   : > { %v970_v3 = vpop.xlane.xlu1 %969  ;;  %v1088_v9 = vsel %vm931_vm3, %v2517_v63, 0.0 }
 0x19a   : > { %v2520_v4 = vpop.eup %2138  ;;  %2148 = vpow2.f32 %v1047_v59  ;;  %v1049_v2 = vmul.f32 1.442695, %v1013_v1  ;;  %v1014_v5 = vsub.f32 %v2441_v14, %v970_v3 }
 0x19b   : > { %v973_v6 = vpop.xlane.xlu0 %972  ;;  %v1091_v7 = vsel %vm927_vm2, %v2520_v4, 0.0 }
 0x19c   : > { %v2527_v10 = vpop.eup %2140  ;;  %2150 = vpow2.f32 %v1049_v2  ;;  %v1051_v8 = vmul.f32 1.442695, %v1014_v5  ;;  %v1015_v11 = vsub.f32 %v2439_v12, %v973_v6  ;;  %1092 = vadd.xlane.f32.xlu0 %v1091_v7  ;;  %1089 = vadd.xlane.f32.xlu1 %v1088_v9 }
 0x19d   : > { %v976_v13 = vpop.xlane.xlu1 %975  ;;  %v1094_v20 = vsel %vm931_vm3, %v2527_v10, 0.0 }
 0x19e   : > { %v2530_v15 = vpop.eup %2142  ;;  %2152 = vpow2.f32 %v1051_v8  ;;  %v1053_v14 = vmul.f32 1.442695, %v1015_v11  ;;  %v1016_v16 = vsub.f32 %v2445_v18, %v976_v13  ;;  %v304_v8 = vld [vmem:[%s2566_s24 + $0x10] sm:$0xff]  ;;  %v305_v11 = vld [vmem:[%s2566_s24 + $0x18] sm:$0x1] }
 0x19f   : > { %v979_v17 = vpop.xlane.xlu0 %978  ;;  %v1097_v19 = vsel %vm927_vm2, %v2530_v15, 0.0 }
 0x1a0   : > { %v2537_v21 = vpop.eup %2144  ;;  %2154 = vpow2.f32 %v1053_v14  ;;  %v1055_v12 = vmul.f32 1.442695, %v1016_v16  ;;  %v1017_v22 = vsub.f32 %v2453_v25, %v979_v17  ;;  %1098 = vadd.xlane.f32.xlu0 %v1097_v19  ;;  %1095 = vadd.xlane.f32.xlu1 %v1094_v20  ;;  %v327_v14 = vpack.c.bf16 %v305_v11, %v304_v8  ;;  %v306_v20 = vld [vmem:[%s2566_s24 + $0x20] sm:$0xff]  ;;  %v319_v11 = vld [vmem:[%s2566_s24 + $0x88] sm:$0x1] }
 0x1a1   : > { %v982_v23 = vpop.xlane.xlu1 %981  ;;  %v1100_v29 = vsel %vm931_vm3, %v2537_v21, 0.0  ;;  %v318_v8 = vld [vmem:[%s2566_s24 + $0x80] sm:$0xff] }
 0x1a2   : > { %v2540_v26 = vpop.eup %2146  ;;  %2156 = vpow2.f32 %v1055_v12  ;;  %v1057_v18 = vmul.f32 1.442695, %v1017_v22  ;;  %v1018_v24 = vsub.f32 %v2457_v34, %v982_v23  ;;  %v307_v12 = vld [vmem:[%s2566_s24 + $0x28] sm:$0x1] }
 0x1a3   : > { %v985_v27 = vpop.xlane.xlu0 %984  ;;  %v1103_v28 = vsel %vm927_vm2, %v2540_v26, 0.0 }
 0x1a4   : > { %v2547_v33 = vpop.eup %2148  ;;  %2158 = vpow2.f32 %v1057_v18  ;;  %v1059_v25 = vmul.f32 1.442695, %v1018_v24  ;;  %v1019_v32 = vsub.f32 %v2455_v31, %v985_v27  ;;  %1104 = vadd.xlane.f32.xlu0 %v1103_v28  ;;  %1101 = vadd.xlane.f32.xlu1 %v1100_v29  ;;  %v328_v18 = vpack.c.bf16 %v307_v12, %v306_v20  ;;  %v308_v29 = vld [vmem:[%s2566_s24 + $0x30] sm:$0xff]  ;;  %v322_v12 = vld [vmem:[%s2566_s24 + $0xa0] sm:$0xff] }
 0x1a5   : > { %v988_v35 = vpop.xlane.xlu1 %987  ;;  %v1106_v41 = vsel %vm931_vm3, %v2547_v33, 0.0 }
 0x1a6   : > { %v2550_v39 = vpop.eup %2150  ;;  %2160 = vpow2.f32 %v1059_v25  ;;  %v1061_v34 = vmul.f32 1.442695, %v1019_v32  ;;  %v1020_v45 = vsub.f32 %v2461_v38, %v988_v35  ;;  %v309_v25 = vld [vmem:[%s2566_s24 + $0x38] sm:$0x1] }
 0x1a7   : > { %v991_v37 = vpop.xlane.xlu0 %990  ;;  %v1109_v40 = vsel %vm927_vm2, %v2550_v39, 0.0 }
 0x1a8   : > { %v2557_v42 = vpop.eup %2152  ;;  %2162 = vpow2.f32 %v1061_v34  ;;  %v1063_v31 = vmul.f32 1.442695, %v1020_v45  ;;  %v1021_v44 = vsub.f32 %v2469_v47, %v991_v37  ;;  %1110 = vadd.xlane.f32.xlu0 %v1109_v40  ;;  %1107 = vadd.xlane.f32.xlu1 %v1106_v41  ;;  %v302_v47 = vld [vmem:[%s2566_s24] sm:$0xff]  ;;  %v329_v34 = vpack.c.bf16 %v309_v25, %v308_v29  ;;  %v324_v29 = vld [vmem:[%s2566_s24 + $0xb0] sm:$0xff]  ;;  %v325_v25 = vld [vmem:[%s2566_s24 + $0xb8] sm:$0x1] }
 0x1a9   : > { %v994_v49 = vpop.xlane.xlu1 %993  ;;  %v1112_v46 = vsel %vm931_vm3, %v2557_v42, 0.0  ;;  %v326_v57 = vpack.c.bf16 %v303_v51, %v302_v47  ;;  %v310_v41 = vld [vmem:[%s2566_s24 + $0x40] sm:$0xff]  ;;  %v312_v47 = vld [vmem:[%s2566_s24 + $0x50] sm:$0xff]  ;;  %v313_v51 = vld [vmem:[%s2566_s24 + $0x58] sm:$0x1] }
 0x1aa   : > { %v2568_v38 = vpop.eup %2154  ;;  %2164 = vpow2.f32 %v1063_v31  ;;  %v1065_v50 = vmul.f32 1.442695, %v1021_v44  ;;  %v1022_v55 = vsub.f32 %v2473_v54, %v994_v49  ;;  %v2232_v54 = vmov 65535   ;;  %v311_v31 = vld [vmem:[%s2566_s24 + $0x48] sm:$0x1] }
 0x1ab   : > { %v997_v61 = vpop.xlane.xlu0 %996  ;;  %v1115_v56 = vsel %vm927_vm2, %v2568_v38, 0.0  ;;  %v1210_v1 = vsel %vm1208_vm4, 4294967295, %v2232_v54 }
 0x1ac   : > { %v2575_v58 = vpop.eup %2156  ;;  %2166 = vpow2.f32 %v1065_v50  ;;  %v1067_v62 = vmul.f32 1.442695, %v1022_v55  ;;  %v1023_v59 = vsub.f32 %v2471_v52, %v997_v61  ;;  %1116 = vadd.xlane.f32.xlu0 %v1115_v56  ;;  %1113 = vadd.xlane.f32.xlu1 %v1112_v46  ;;  %v2578_v2 = vsel %vm1209_vm5, %v1210_v1, 0 }
 0x1ad   : > { %v1000_v3 = vpop.xlane.xlu1 %999  ;;  %v1213_v9 = vand.u32 %v2578_v2, %v326_v57  ;;  %v1118_v13 = vsel %vm931_vm3, %v2575_v58, 0.0  ;;  %v2606_v27 = vand.u32 %v2578_v2, %v328_v18  ;;  %v2619_v37 = vand.u32 %v2578_v2, %v329_v34 }
 0x1ae   : > { %v2580_v5 = vpop.eup %2158  ;;  %2168 = vpow2.f32 %v1067_v62  ;;  %v1069_v6 = vmul.f32 1.442695, %v1023_v59  ;;  %v1024_v7 = vsub.f32 %v2477_v60, %v1000_v3  ;;  %v1260_v60 = vand.u32 %v2578_v2, %v327_v14  ;;  %v314_v62 = vld [vmem:[%s2566_s24 + $0x60] sm:$0xff]  ;;  %v315_v59 = vld [vmem:[%s2566_s24 + $0x68] sm:$0x1]  ;;  %v316_v3 = vld [vmem:[%s2566_s24 + $0x70] sm:$0xff] }
 0x1af   : > { %v1121_v52 = vsel %vm927_vm2, %v2580_v5, 0.0  ;;  %2044 = vmatpush3.bf16.msra.mxu0 %v1213_v9  ;;  %v330_v46 = vpack.c.bf16 %v311_v31, %v310_v41  ;;  %v331_v56 = vpack.c.bf16 %v313_v51, %v312_v47  ;;  %v332_v54 = vpack.c.bf16 %v315_v59, %v314_v62  ;;  %v320_v14 = vld [vmem:[%s2566_s24 + $0x90] sm:$0xff] }
 0x1b0   : > { %v2590_v16 = vpop.eup %2160  ;;  %2170 = vpow2.f32 %v1069_v6  ;;  %v1071_v17 = vmul.f32 1.442695, %v1024_v7  ;;  %1122 = vadd.xlane.f32.xlu0 %v1121_v52  ;;  %1119 = vadd.xlane.f32.xlu1 %v1118_v13  ;;  %v317_v6 = vld [vmem:[%s2566_s24 + $0x78] sm:$0x1]  ;;  %v334_v52 = vpack.c.bf16 %v319_v11, %v318_v8 }
 0x1b1   : > { %2055 = vmatprep.subr.bf16.mxu0 %v2230_v0  ;;  %v1124_v23 = vsel %vm931_vm3, %v2590_v16, 0.0  ;;  %2050 = vmatpush3.bf16.msra.mxu1 %v1260_v60  ;;  %v2632_v55 = vand.u32 %v2578_v2, %v330_v46  ;;  %v2639_v57 = vand.u32 %v2578_v2, %v331_v56  ;;  %v2644_v1 = vand.u32 %v2578_v2, %v332_v54 }
 0x1b2   : > { %v2593_v19 = vpop.eup %2162  ;;  %2172 = vpow2.f32 %v1071_v17  ;;  %2061 = vmatprep.subr.bf16.mxu1 %v2230_v0  ;;  %v333_v7 = vpack.c.bf16 %v317_v6, %v316_v3  ;;  %v2654_v13 = vand.u32 %v2578_v2, %v334_v52  ;;  %v321_v17 = vld [vmem:[%s2566_s24 + $0x98] sm:$0x1] }
 0x1b3   : > { %v1127_v22 = vsel %vm927_vm2, %v2593_v19, 0.0  ;;  %v335_v60 = vpack.c.bf16 %v321_v17, %v320_v14 }
 0x1b4   : > { %v2602_v24 = vpop.eup %2164  ;;  %1128 = vadd.xlane.f32.xlu0 %v1127_v22  ;;  %1125 = vadd.xlane.f32.xlu1 %v1124_v23  ;;  %v2649_v9 = vand.u32 %v2578_v2, %v333_v7  ;;  %v323_v22 = vld [vmem:[%s2566_s24 + $0xa8] sm:$0x1] }
 0x1b5   : > { %v1130_v35 = vsel %vm931_vm3, %v2602_v24, 0.0  ;;  %v2659_v20 = vand.u32 %v2578_v2, %v335_v60  ;;  %v336_v23 = vpack.c.bf16 %v323_v22, %v322_v12 }
 0x1b6   : > { %v2608_v28 = vpop.eup %2166 }
 0x1b7   : > { %v1133_v32 = vsel %vm927_vm2, %v2608_v28, 0.0  ;;  %v2664_v18 = vand.u32 %v2578_v2, %v336_v23 }
 0x1b8   : > { %v2616_v45 = vpop.eup %2168  ;;  %1134 = vadd.xlane.f32.xlu0 %v1133_v32  ;;  %1131 = vadd.xlane.f32.xlu1 %v1130_v35  ;;  %v337_v32 = vpack.c.bf16 %v325_v25, %v324_v29 }
 0x1b9   : > { %v1136_v49 = vsel %vm931_vm3, %v2616_v45, 0.0 }
 0x1ba   : > { %v2621_v40 = vpop.eup %2170  ;;  %v2669_v35 = vand.u32 %v2578_v2, %v337_v32 }
 0x1bb   : > { %v1139_v44 = vsel %vm927_vm2, %v2621_v40, 0.0 }
 0x1bc   : > { %v2629_v50 = vpop.eup %2172  ;;  %1140 = vadd.xlane.f32.xlu0 %v1139_v44  ;;  %1137 = vadd.xlane.f32.xlu1 %v1136_v49 }
 0x1bd   : > { %v1142_v61 = vsel %vm931_vm3, %v2629_v50, 0.0 }
 0x1c0   : > { %1143 = vadd.xlane.f32.xlu1 %v1142_v61 }
 0x21d   : > { %v1075_v34 = vpop.xlane.xlu0 %1074 }
 0x21e   : > { %2174 = vrcp.f32 %v1075_v34 }
 0x221   : > { %v1081_v41 = vpop.xlane.xlu0 %1080  ;;  %v1078_v31 = vpop.xlane.xlu1 %1077 }
 0x222   : > { %2176 = vrcp.f32 %v1078_v31 }
 0x223   : > { %2178 = vrcp.f32 %v1081_v41 }
 0x225   : > { %v1087_v44 = vpop.xlane.xlu0 %1086  ;;  %v1084_v49 = vpop.xlane.xlu1 %1083 }
 0x226   : > { %2180 = vrcp.f32 %v1084_v49 }
 0x227   : > { %2182 = vrcp.f32 %v1087_v44 }
 0x228   : > { %v2175_v51 = vpop.eup %2174 }
 0x229   : > { %v1093_v46 = vpop.xlane.xlu0 %1092  ;;  %v1090_v47 = vpop.xlane.xlu1 %1089  ;;  %v1169_v2 = vmul.f32 %v2175_v51, %v2492_v30 }
 0x22a   : > { %2184 = vrcp.f32 %v1090_v47 }
 0x22b   : > { %2186 = vrcp.f32 %v1093_v46 }
 0x22c   : > { %v2177_v61 = vpop.eup %2176 }
 0x22d   : > { %v1099_v56 = vpop.xlane.xlu0 %1098  ;;  %v1096_v62 = vpop.xlane.xlu1 %1095  ;;  %v1170_v59 = vmul.f32 %v2177_v61, %v2500_v43 }
 0x22e   : > { %v2179_v54 = vpop.eup %2178  ;;  %2188 = vrcp.f32 %v1096_v62 }
 0x22f   : > { %v1193_v3 = vpack.c.bf16 %v1170_v59, %v1169_v2  ;;  %2190 = vrcp.f32 %v1099_v56  ;;  %v1171_v11 = vmul.f32 %v2179_v54, %v2497_v36 }
 0x230   : > { %v2181_v6 = vpop.eup %2180 }
 0x231   : > { %v1105_v7 = vpop.xlane.xlu0 %1104  ;;  %v1102_v8 = vpop.xlane.xlu1 %1101  ;;  %v1172_v52 = vmul.f32 %v2181_v6, %v2507_v48  ;;  %2046 = vmatmul.mubr.msk.bf16.vlgmr.msra.gmra.mrb[24].mxu0 %vm927_vm2, %v1193_v3 }
 0x232   : > { %v2183_v14 = vpop.eup %2182  ;;  %2192 = vrcp.f32 %v1102_v8  ;;  %2056 = vmatpush3.bf16.msra.mxu0 %v2606_v27  ;;  %2057 = vmatprep.mubr.msk.bf16.mxu0 %vm2231_vm0, %v2230_v0 }
 0x233   : > { %v1194_v30 = vpack.c.bf16 %v1172_v52, %v1171_v11  ;;  %2067 = vmatprep.subr.bf16.mxu0 %v2230_v0  ;;  %2194 = vrcp.f32 %v1105_v7  ;;  %v1173_v36 = vmul.f32 %v2183_v14, %v2510_v53 }
 0x234   : > { %v2185_v43 = vpop.eup %2184 }
 0x235   : > { %v1111_v17 = vpop.xlane.xlu0 %1110  ;;  %v1108_v60 = vpop.xlane.xlu1 %1107  ;;  %v1174_v48 = vmul.f32 %v2185_v43, %v2517_v63  ;;  %2052 = vmatmul.mubr.msk.bf16.vlgmr.msra.gmra.mrb[24].mxu1 %vm927_vm2, %v1194_v30 }
 0x236   : > { %v2187_v12 = vpop.eup %2186  ;;  %2062 = vmatpush3.bf16.msra.mxu1 %v2619_v37  ;;  %2196 = vrcp.f32 %v1108_v60  ;;  %2063 = vmatprep.mubr.msk.bf16.mxu1 %vm2231_vm0, %v2230_v0 }
 0x237   : > { %v1195_v27 = vpack.c.bf16 %v1174_v48, %v1173_v36  ;;  %2073 = vmatprep.subr.bf16.mxu1 %v2230_v0  ;;  %2198 = vrcp.f32 %v1111_v17  ;;  %v1175_v53 = vmul.f32 %v2187_v12, %v2520_v4 }
 0x238   : > { %v2189_v22 = vpop.eup %2188 }
 0x239   : > { %v1117_v23 = vpop.xlane.xlu0 %1116  ;;  %v1114_v29 = vpop.xlane.xlu1 %1113  ;;  %v1176_v63 = vmul.f32 %v2189_v22, %v2527_v10  ;;  %2058 = vmatmul.mubr.msk.bf16.vlgmr.msra.gmra.mrb[28].mxu0 %vm927_vm2, %v1195_v27 }
 0x23a   : > { %v2191_v25 = vpop.eup %2190  ;;  %2200 = vrcp.f32 %v1114_v29  ;;  %2068 = vmatpush3.bf16.msra.mxu0 %v2632_v55  ;;  %2069 = vmatprep.mubr.msk.bf16.mxu0 %vm2231_vm0, %v2230_v0 }
 0x23b   : > { %v1196_v37 = vpack.c.bf16 %v1176_v63, %v1175_v53  ;;  %2079 = vmatprep.subr.bf16.mxu0 %v2230_v0  ;;  %2202 = vrcp.f32 %v1117_v23  ;;  %v1177_v4 = vmul.f32 %v2191_v25, %v2530_v15 }
 0x23c   : > { %v2193_v32 = vpop.eup %2192 }
 0x23d   : > { %v1123_v34 = vpop.xlane.xlu0 %1122  ;;  %v1120_v41 = vpop.xlane.xlu1 %1119  ;;  %v1178_v10 = vmul.f32 %v2193_v32, %v2537_v21  ;;  %2064 = vmatmul.mubr.msk.bf16.vlgmr.msra.gmra.mrb[28].mxu1 %vm927_vm2, %v1196_v37 }
 0x23e   : > { %v2195_v31 = vpop.eup %2194  ;;  %2074 = vmatpush3.bf16.msra.mxu1 %v2639_v57  ;;  %2204 = vrcp.f32 %v1120_v41  ;;  %2075 = vmatprep.mubr.msk.bf16.mxu1 %vm2231_vm0, %v2230_v0 }
 0x23f   : > { %v1197_v55 = vpack.c.bf16 %v1178_v10, %v1177_v4  ;;  %2085 = vmatprep.subr.bf16.mxu1 %v2230_v0  ;;  %2206 = vrcp.f32 %v1123_v34  ;;  %v1179_v15 = vmul.f32 %v2195_v31, %v2540_v26 }
 0x240   : > { %v2197_v44 = vpop.eup %2196 }
 0x241   : > { %v1129_v49 = vpop.xlane.xlu0 %1128  ;;  %v1126_v46 = vpop.xlane.xlu1 %1125  ;;  %v1180_v21 = vmul.f32 %v2197_v44, %v2547_v33  ;;  %2070 = vmatmul.mubr.msk.bf16.vlgmr.msra.gmra.mrb[32].mxu0 %vm927_vm2, %v1197_v55 }
 0x242   : > { %v2199_v47 = vpop.eup %2198  ;;  %2208 = vrcp.f32 %v1126_v46  ;;  %2080 = vmatpush3.bf16.msra.mxu0 %v2644_v1  ;;  %2081 = vmatprep.mubr.msk.bf16.mxu0 %vm2231_vm0, %v2230_v0 }
 0x243   : > { %v1198_v57 = vpack.c.bf16 %v1180_v21, %v1179_v15  ;;  %2091 = vmatprep.subr.bf16.mxu0 %v2230_v0  ;;  %2210 = vrcp.f32 %v1129_v49  ;;  %v1181_v26 = vmul.f32 %v2199_v47, %v2550_v39 }
 0x244   : > { %v2201_v51 = vpop.eup %2200 }
 0x245   : > { %v1135_v61 = vpop.xlane.xlu0 %1134  ;;  %v1132_v56 = vpop.xlane.xlu1 %1131  ;;  %v1182_v33 = vmul.f32 %v2201_v51, %v2557_v42  ;;  %2076 = vmatmul.mubr.msk.bf16.vlgmr.msra.gmra.mrb[32].mxu1 %vm927_vm2, %v1198_v57 }
 0x246   : > { %v2203_v62 = vpop.eup %2202  ;;  %2086 = vmatpush3.bf16.msra.mxu1 %v2649_v9  ;;  %2212 = vrcp.f32 %v1132_v56  ;;  %2087 = vmatprep.mubr.msk.bf16.mxu1 %vm2231_vm0, %v2230_v0 }
 0x247   : > { %v1199_v1 = vpack.c.bf16 %v1182_v33, %v1181_v26  ;;  %2097 = vmatprep.subr.bf16.mxu1 %v2230_v0  ;;  %2214 = vrcp.f32 %v1135_v61  ;;  %v1183_v39 = vmul.f32 %v2203_v62, %v2568_v38 }
 0x248   : > { %v2205_v2 = vpop.eup %2204 }
 0x249   : > { %v1141_v59 = vpop.xlane.xlu0 %1140  ;;  %v1138_v54 = vpop.xlane.xlu1 %1137  ;;  %v1184_v42 = vmul.f32 %v2205_v2, %v2575_v58  ;;  %2082 = vmatmul.mubr.msk.bf16.vlgmr.msra.gmra.mrb[36].mxu0 %vm927_vm2, %v1199_v1 }
 0x24a   : > { %v2207_v3 = vpop.eup %2206  ;;  %2216 = vrcp.f32 %v1138_v54  ;;  %2092 = vmatpush3.bf16.msra.mxu0 %v2654_v13  ;;  %2093 = vmatprep.mubr.msk.bf16.mxu0 %vm2231_vm0, %v2230_v0 }
 0x24b   : > { %2218 = vrcp.f32 %v1141_v59  ;;  %v1200_v9 = vpack.c.bf16 %v1184_v42, %v1183_v39  ;;  %2103 = vmatprep.subr.bf16.mxu0 %v2230_v0  ;;  %v1185_v8 = vmul.f32 %v2207_v3, %v2580_v5 }
 0x24c   : > { %v2209_v6 = vpop.eup %2208 }
 0x24d   : > { %v1144_v7 = vpop.xlane.xlu1 %1143  ;;  %v1186_v38 = vmul.f32 %v2209_v6, %v2590_v16  ;;  %2088 = vmatmul.mubr.msk.bf16.vlgmr.msra.gmra.mrb[36].mxu1 %vm927_vm2, %v1200_v9  ;;  %v2211_v58 = vpop.eup %2210 }
 0x24e   : > { %2220 = vrcp.f32 %v1144_v7  ;;  %2098 = vmatpush3.bf16.msra.mxu1 %v2659_v20  ;;  %2099 = vmatprep.mubr.msk.bf16.mxu1 %vm2231_vm0, %v2230_v0  ;;  %v1187_v52 = vmul.f32 %v2211_v58, %v2593_v19 }
 0x24f   : > { %v1201_v13 = vpack.c.bf16 %v1186_v38, %v1185_v8  ;;  %2109 = vmatprep.subr.bf16.mxu1 %v2230_v0 }
 0x250   : > { %v2213_v11 = vpop.eup %2212 }
 0x251   : > { %v1188_v14 = vmul.f32 %v2213_v11, %v2602_v24  ;;  %2094 = vmatmul.mubr.msk.bf16.vlgmr.msra.gmra.mrb[40].mxu0 %vm927_vm2, %v1201_v13  ;;  %v2215_v5 = vpop.eup %2214 }
 0x252   : > { %2104 = vmatpush3.bf16.msra.mxu0 %v2664_v18  ;;  %2105 = vmatprep.mubr.msk.bf16.mxu0 %vm2231_vm0, %v2230_v0  ;;  %v1189_v43 = vmul.f32 %v2215_v5, %v2608_v28 }
 0x253   : > { %v1202_v16 = vpack.c.bf16 %v1188_v14, %v1187_v52 }
 0x254   : > { %v2217_v20 = vpop.eup %2216 }
 0x255   : > { %v2219_v30 = vpop.eup %2218  ;;  %v1190_v17 = vmul.f32 %v2217_v20, %v2616_v45  ;;  %2100 = vmatmul.mubr.msk.bf16.vlgmr.msra.gmra.mrb[40].mxu1 %vm927_vm2, %v1202_v16 }
 0x256   : > { %2110 = vmatpush3.bf16.msra.mxu1 %v2669_v35  ;;  %2111 = vmatprep.mubr.msk.bf16.mxu1 %vm2231_vm0, %v2230_v0  ;;  %v1191_v18 = vmul.f32 %v2219_v30, %v2621_v40 }
 0x257   : > { %v1203_v24 = vpack.c.bf16 %v1190_v17, %v1189_v43 }
 0x258   : > { %v2221_v19 = vpop.eup %2220 }
 0x259   : > { %v1192_v60 = vmul.f32 %v2221_v19, %v2629_v50  ;;  %2106 = vmatmul.mubr.msk.bf16.vlgmr.msra.gmra.mrb[44].mxu0 %vm927_vm2, %v1203_v24 }
 0x25b   : > { %v1204_v36 = vpack.c.bf16 %v1192_v60, %v1191_v18 }
 0x25d   : > { %2112 = vmatmul.mubr.msk.bf16.vlgmr.msra.gmra.mrb[44].mxu1 %vm927_vm2, %v1204_v36 }
 0x304   : > { %v1249_v0 = vpop.f32.mrb[24].mxu0 }
 0x305   : > { %1773 = vst.msk [vmem:[%s2749_s27] sm:$0xff] %vm338_vm1, %v1249_v0  ;;  %v2047_v28 = vpop.f32.mrb[25].mxu0 }
 0x306   : > { %v1252_v45 = vpop.f32.mrb[26].mxu0 }
 0x307   : > { %1775 = vst.msk [vmem:[%s2749_s27 + $0x8] sm:$0x1] %vm1774_vm6, %v1252_v45  ;;  %v2048_v40 = vpop.f32.mrb[27].mxu0 }
 0x308   : > { %v1296_v50 = vpop.f32.mrb[24].mxu1 }
 0x309   : > { %1776 = vst.msk [vmem:[%s2749_s27 + $0x10] sm:$0xff] %vm338_vm1, %v1296_v50  ;;  %v2053_v35 = vpop.f32.mrb[25].mxu1 }
 0x30a   : > { %v1299_v48 = vpop.f32.mrb[26].mxu1 }
 0x30b   : > { %1777 = vst.msk [vmem:[%s2749_s27 + $0x18] sm:$0x1] %vm1774_vm6, %v1299_v48  ;;  %v2054_v12 = vpop.f32.mrb[27].mxu1 }
 0x30c   : > { %v1343_v27 = vpop.f32.mrb[28].mxu0 }
 0x30d   : > { %1778 = vst.msk [vmem:[%s2749_s27 + $0x20] sm:$0xff] %vm338_vm1, %v1343_v27  ;;  %v2059_v22 = vpop.f32.mrb[29].mxu0 }
 0x30e   : > { %v1346_v23 = vpop.f32.mrb[30].mxu0 }
 0x30f   : > { %1779 = vst.msk [vmem:[%s2749_s27 + $0x28] sm:$0x1] %vm1774_vm6, %v1346_v23  ;;  %v2060_v29 = vpop.f32.mrb[31].mxu0 }
 0x310   : > { %v1390_v53 = vpop.f32.mrb[28].mxu1 }
 0x311   : > { %1780 = vst.msk [vmem:[%s2749_s27 + $0x30] sm:$0xff] %vm338_vm1, %v1390_v53  ;;  %v2065_v63 = vpop.f32.mrb[29].mxu1 }
 0x312   : > { %v1393_v25 = vpop.f32.mrb[30].mxu1 }
 0x313   : > { %1781 = vst.msk [vmem:[%s2749_s27 + $0x38] sm:$0x1] %vm1774_vm6, %v1393_v25  ;;  %v2066_v37 = vpop.f32.mrb[31].mxu1 }
 0x314   : > { %v1437_v32 = vpop.f32.mrb[32].mxu0 }
 0x315   : > { %1782 = vst.msk [vmem:[%s2749_s27 + $0x40] sm:$0xff] %vm338_vm1, %v1437_v32  ;;  %v2071_v34 = vpop.f32.mrb[33].mxu0 }
 0x316   : > { %v1440_v41 = vpop.f32.mrb[34].mxu0 }
 0x317   : > { %1783 = vst.msk [vmem:[%s2749_s27 + $0x48] sm:$0x1] %vm1774_vm6, %v1440_v41  ;;  %v2072_v4 = vpop.f32.mrb[35].mxu0 }
 0x318   : > { %v1484_v10 = vpop.f32.mrb[32].mxu1 }
 0x319   : > { %1784 = vst.msk [vmem:[%s2749_s27 + $0x50] sm:$0xff] %vm338_vm1, %v1484_v10  ;;  %v2077_v31 = vpop.f32.mrb[33].mxu1 }
 0x31a   : > { %v1487_v55 = vpop.f32.mrb[34].mxu1 }
 0x31b   : > { %1785 = vst.msk [vmem:[%s2749_s27 + $0x58] sm:$0x1] %vm1774_vm6, %v1487_v55  ;;  %v2078_v44 = vpop.f32.mrb[35].mxu1 }
 0x31c   : > { %v1531_v49 = vpop.f32.mrb[36].mxu0 }
 0x31d   : > { %1786 = vst.msk [vmem:[%s2749_s27 + $0x60] sm:$0xff] %vm338_vm1, %v1531_v49  ;;  %v2083_v46 = vpop.f32.mrb[37].mxu0 }
 0x31e   : > { %v1534_v15 = vpop.f32.mrb[38].mxu0 }
 0x31f   : > { %1787 = vst.msk [vmem:[%s2749_s27 + $0x68] sm:$0x1] %vm1774_vm6, %v1534_v15  ;;  %v2084_v21 = vpop.f32.mrb[39].mxu0 }
 0x320   : > { %v1578_v47 = vpop.f32.mrb[36].mxu1 }
 0x321   : > { %1788 = vst.msk [vmem:[%s2749_s27 + $0x70] sm:$0xff] %vm338_vm1, %v1578_v47  ;;  %v2089_v57 = vpop.f32.mrb[37].mxu1 }
 0x322   : > { %v1581_v51 = vpop.f32.mrb[38].mxu1 }
 0x323   : > { %1789 = vst.msk [vmem:[%s2749_s27 + $0x78] sm:$0x1] %vm1774_vm6, %v1581_v51  ;;  %v2090_v61 = vpop.f32.mrb[39].mxu1 }
 0x324   : > { %v1625_v56 = vpop.f32.mrb[40].mxu0 }
 0x325   : > { %1790 = vst.msk [vmem:[%s2749_s27 + $0x80] sm:$0xff] %vm338_vm1, %v1625_v56  ;;  %v2095_v26 = vpop.f32.mrb[41].mxu0 }
 0x326   : > { %v1628_v33 = vpop.f32.mrb[42].mxu0 }
 0x327   : > { %1791 = vst.msk [vmem:[%s2749_s27 + $0x88] sm:$0x1] %vm1774_vm6, %v1628_v33  ;;  %v2096_v62 = vpop.f32.mrb[43].mxu0 }
 0x328   : > { %v1672_v1 = vpop.f32.mrb[40].mxu1 }
 0x329   : > { %1792 = vst.msk [vmem:[%s2749_s27 + $0x90] sm:$0xff] %vm338_vm1, %v1672_v1  ;;  %v2101_v2 = vpop.f32.mrb[41].mxu1 }
 0x32a   : > { %v1675_v59 = vpop.f32.mrb[42].mxu1 }
 0x32b   : > { %1793 = vst.msk [vmem:[%s2749_s27 + $0x98] sm:$0x1] %vm1774_vm6, %v1675_v59  ;;  %v2102_v54 = vpop.f32.mrb[43].mxu1 }
 0x32c   : > { %v1719_v39 = vpop.f32.mrb[44].mxu0 }
 0x32d   : > { %1794 = vst.msk [vmem:[%s2749_s27 + $0xa0] sm:$0xff] %vm338_vm1, %v1719_v39  ;;  %v2107_v42 = vpop.f32.mrb[45].mxu0 }
 0x32e   : > { %v1722_v3 = vpop.f32.mrb[46].mxu0 }
 0x32f   : > { %1795 = vst.msk [vmem:[%s2749_s27 + $0xa8] sm:$0x1] %vm1774_vm6, %v1722_v3  ;;  %v2108_v9 = vpop.f32.mrb[47].mxu0 }
 0x330   : > { %v1766_v6 = vpop.f32.mrb[44].mxu1 }
 0x331   : > { %1796 = vst.msk [vmem:[%s2749_s27 + $0xb0] sm:$0xff] %vm338_vm1, %v1766_v6  ;;  %v2113_v7 = vpop.f32.mrb[45].mxu1 }
 0x332   : > { %v1769_v8 = vpop.f32.mrb[46].mxu1 }
 0x333   : > { %1797 = vst.msk [vmem:[%s2749_s27 + $0xb8] sm:$0x1] %vm1774_vm6, %v1769_v8  ;;  %v2114_v38 = vpop.f32.mrb[47].mxu1 }
 0x334 PF: > { %s13_s12 = sadd.s32 1, %s2228_s12  }
 0x335   : > { %p10_p4 = scmp.ge.s32.totalorder %s13_s12, 4  }
 0x337   :  { %12 = sbr.rel (!%p10_p4) target bundleno = 1 (0x1), region = 68 }

// kernel: meant_forward.20
= control target key start
LH: loop header
LB: loop body
LE: loop exit
PB: predicated region body
PF: predicated region fallthrough
CT: control target
= control target key end

     0   :  { %vm128_vm0 = vcmask 261120   ;;  %s327_s1 = inlined_call_operand.vmem [shape: f32[256,32], index: 1, kind: input, shape index: {}]   ;;  %s328_s0 = inlined_call_operand.vmem [shape: f32[24,256], index: 0, kind: input, shape index: {}]   ;;  %s329_s2 = inlined_call_operand.vmem [shape: f32[1,32], index: 2, kind: input, shape index: {}]   ;;  %s330_s3 = inlined_call_operand.vmem [shape: f32[24,32], index: 3, kind: output, shape index: {}]  }
   0x1   :  { %v37_v0 = vld [vmem:[%s327_s1 + $0x80] sm:$0xff]  ;;  %v38_v1 = vld [vmem:[%s327_s1 + $0x88] sm:$0xff]  ;;  %v39_v5 = vld [vmem:[%s327_s1 + $0x90] sm:$0xff] }
   0x2   :  { %v21_v2 = vld [vmem:[%s327_s1] sm:$0xff]  ;;  %v66_v3 = vpack.c.bf16 %v38_v1, %v37_v0  ;;  %v22_v4 = vld [vmem:[%s327_s1 + $0x8] sm:$0xff]  ;;  %v40_v6 = vld [vmem:[%s327_s1 + $0x98] sm:$0xff] }
   0x3   :  { %v58_v7 = vpack.c.bf16 %v22_v4, %v21_v2  ;;  %v67_v8 = vpack.c.bf16 %v40_v6, %v39_v5  ;;  %v23_v9 = vld [vmem:[%s327_s1 + $0x10] sm:$0xff]  ;;  %v24_v10 = vld [vmem:[%s327_s1 + $0x18] sm:$0xff]  ;;  %v41_v11 = vld [vmem:[%s327_s1 + $0xa0] sm:$0xff] }
   0x4   :  { %137 = vmatprep.subr.bf16.mxu0 %v66_v3  ;;  %165 = vmatprep.subr.bf16.mxu1 %v66_v3  ;;  %v42_v12 = vld [vmem:[%s327_s1 + $0xa8] sm:$0xff]  ;;  %v59_v13 = vpack.c.bf16 %v24_v10, %v23_v9  ;;  %v25_v15 = vld [vmem:[%s327_s1 + $0x20] sm:$0xff]  ;;  %v43_v17 = vld [vmem:[%s327_s1 + $0xb0] sm:$0xff] }
   0x5   :  { %138 = vmatpush3.bf16.msra.mxu0 %v58_v7  ;;  %173 = vmatpush3.bf16.msra.mxu1 %v58_v7  ;;  %v68_v14 = vpack.c.bf16 %v42_v12, %v41_v11  ;;  %v26_v16 = vld [vmem:[%s327_s1 + $0x28] sm:$0xff]  ;;  %v44_v18 = vld [vmem:[%s327_s1 + $0xb8] sm:$0xff]  ;;  %v27_v21 = vld [vmem:[%s327_s1 + $0x30] sm:$0xff] }
   0x6   :  { %139 = vmatprep.subr.bf16.mxu0 %v67_v8  ;;  %166 = vmatprep.subr.bf16.mxu1 %v67_v8  ;;  %v60_v19 = vpack.c.bf16 %v26_v16, %v25_v15  ;;  %v69_v20 = vpack.c.bf16 %v44_v18, %v43_v17  ;;  %v28_v22 = vld [vmem:[%s327_s1 + $0x38] sm:$0xff]  ;;  %v45_v23 = vld [vmem:[%s327_s1 + $0xc0] sm:$0xff]  ;;  %v46_v24 = vld [vmem:[%s327_s1 + $0xc8] sm:$0xff] }
   0x7   :  { %v16_v25 = vld [vmem:[%s328_s0 + $0x8] sm:$0xff]  ;;  %v18_v26 = vld [vmem:[%s328_s0 + $0x18] sm:$0xff]  ;;  %v61_v28 = vpack.c.bf16 %v28_v22, %v27_v21  ;;  %v70_v31 = vpack.c.bf16 %v46_v24, %v45_v23  ;;  %v29_v32 = vld [vmem:[%s327_s1 + $0x40] sm:$0xff] }
   0x8   :  { %v20_v27 = vld [vmem:[%s328_s0 + $0x28] sm:$0xff]  ;;  %v55_v29 = vpack.c.bf16 %v18_v26, %v16_v25  ;;  %v47_v34 = vld [vmem:[%s327_s1 + $0xd0] sm:$0xff]  ;;  %v48_v35 = vld [vmem:[%s327_s1 + $0xd8] sm:$0xff] }
   0x9   :  { %140 = vmatpush3.bf16.msra.mxu0 %v59_v13  ;;  %174 = vmatpush3.bf16.msra.mxu1 %v59_v13  ;;  %v57_v30 = vpack.c.bf16 %v20_v27, %v20_v27  ;;  %v30_v33 = vld [vmem:[%s327_s1 + $0x48] sm:$0xff]  ;;  %v71_v37 = vpack.c.bf16 %v48_v35, %v47_v34  ;;  %v31_v38 = vld [vmem:[%s327_s1 + $0x50] sm:$0xff]  ;;  %v32_v39 = vld [vmem:[%s327_s1 + $0x58] sm:$0xff] }
   0xa   :  { %141 = vmatprep.subr.bf16.mxu0 %v68_v14  ;;  %167 = vmatprep.subr.bf16.mxu1 %v68_v14  ;;  %v62_v36 = vpack.c.bf16 %v30_v33, %v29_v32  ;;  %v49_v40 = vld [vmem:[%s327_s1 + $0xe0] sm:$0xff]  ;;  %v50_v41 = vld [vmem:[%s327_s1 + $0xe8] sm:$0xff]  ;;  %v63_v42 = vpack.c.bf16 %v32_v39, %v31_v38  ;;  %v51_v46 = vld [vmem:[%s327_s1 + $0xf0] sm:$0xff] }
   0xb   :  { %112 = vmatprep.mubr.bf16.mxu0 %v55_v29  ;;  %120 = vmatprep.mubr.bf16.mxu1 %v57_v30  ;;  %v72_v43 = vpack.c.bf16 %v50_v41, %v49_v40  ;;  %v33_v44 = vld [vmem:[%s327_s1 + $0x60] sm:$0xff]  ;;  %v34_v45 = vld [vmem:[%s327_s1 + $0x68] sm:$0xff]  ;;  %v52_v47 = vld [vmem:[%s327_s1 + $0xf8] sm:$0xff] }
   0xc   :  { %v64_v48 = vpack.c.bf16 %v34_v45, %v33_v44  ;;  %v73_v49 = vpack.c.bf16 %v52_v47, %v51_v46  ;;  %v35_v50 = vld [vmem:[%s327_s1 + $0x70] sm:$0xff]  ;;  %v36_v51 = vld [vmem:[%s327_s1 + $0x78] sm:$0xff]  ;;  %v15_v53 = vld [vmem:[%s328_s0] sm:$0xff] }
   0xd   :  { %142 = vmatpush3.bf16.msra.mxu0 %v60_v19  ;;  %175 = vmatpush3.bf16.msra.mxu1 %v60_v19  ;;  %v65_v52 = vpack.c.bf16 %v36_v51, %v35_v50  ;;  %v17_v54 = vld [vmem:[%s328_s0 + $0x10] sm:$0xff]  ;;  %v19_v55 = vld [vmem:[%s328_s0 + $0x20] sm:$0xff] }
   0xe   :  { %143 = vmatprep.subr.bf16.mxu0 %v69_v20  ;;  %168 = vmatprep.subr.bf16.mxu1 %v69_v20  ;;  %v54_v56 = vpack.c.bf16 %v17_v54, %v15_v53  ;;  %v56_v57 = vpack.c.bf16 %v19_v55, %v19_v55  ;;  %v136_v60 = vld [vmem:[%s329_s2] ss:$0 sm:$0xff] }
  0x11   :  { %144 = vmatpush3.bf16.msra.mxu0 %v61_v28  ;;  %176 = vmatpush3.bf16.msra.mxu1 %v61_v28 }
  0x12   :  { %145 = vmatprep.subr.bf16.mxu0 %v70_v31  ;;  %169 = vmatprep.subr.bf16.mxu1 %v70_v31 }
  0x15   :  { %146 = vmatpush3.bf16.msra.mxu0 %v62_v36  ;;  %177 = vmatpush3.bf16.msra.mxu1 %v62_v36 }
  0x16   :  { %147 = vmatprep.subr.bf16.mxu0 %v71_v37  ;;  %170 = vmatprep.subr.bf16.mxu1 %v71_v37 }
  0x19   :  { %148 = vmatpush3.bf16.msra.mxu0 %v63_v42  ;;  %178 = vmatpush3.bf16.msra.mxu1 %v63_v42 }
  0x1a   :  { %149 = vmatprep.subr.bf16.mxu0 %v72_v43  ;;  %171 = vmatprep.subr.bf16.mxu1 %v72_v43 }
  0x1d   :  { %150 = vmatpush3.bf16.msra.mxu0 %v64_v48  ;;  %179 = vmatpush3.bf16.msra.mxu1 %v64_v48 }
  0x1e   :  { %151 = vmatprep.subr.bf16.mxu0 %v73_v49  ;;  %172 = vmatprep.subr.bf16.mxu1 %v73_v49 }
  0x21   :  { %152 = vmatpush3.bf16.msra.mxu0 %v65_v52  ;;  %180 = vmatpush3.bf16.msra.mxu1 %v65_v52 }
  0x24   :  { %113 = vmatmul.mubr.bf16.vlgmr.msra.gmra.mrb[0].mxu0 %v54_v56  ;;  %121 = vmatmul.mubr.bf16.vlgmr.msra.gmra.mrb[0].mxu1 %v56_v57 }
  0xf7   :  { %v153_v58 = vpop.f32.mrb[0].mxu0  ;;  %v159_v59 = vpop.f32.mrb[0].mxu1 }
  0xf8   :  { %v154_v61 = vpop.f32.mrb[1].mxu0  ;;  %v160_v62 = vpop.f32.mrb[1].mxu1 }
  0xf9   :  { %v155_v63 = vadd.f32 %v154_v61, %v153_v58  ;;  %v161_v0 = vadd.f32 %v160_v62, %v159_v59  ;;  %v156_v1 = vpop.f32.mrb[2].mxu0  ;;  %v162_v2 = vpop.f32.mrb[2].mxu1 }
  0xfa   :  { %v157_v3 = vpop.f32.mrb[3].mxu0  ;;  %v163_v4 = vpop.f32.mrb[3].mxu1 }
  0xfb   :  { %v115_v5 = vadd.f32 %v155_v63, %v136_v60  ;;  %v123_v6 = vadd.f32 %v161_v0, %v136_v60  ;;  %v158_v7 = vadd.f32 %v157_v3, %v156_v1 }
  0xfd   :  { %129 = vst.msk [vmem:[%s330_s3] sm:$0xff] %vm128_vm0, %v115_v5  ;;  %131 = vst.msk [vmem:[%s330_s3 + $0x10] sm:$0xff] %vm128_vm0, %v123_v6  ;;  %v118_v8 = vadd.f32 %v158_v7, %v136_v60 }
  0xff   :  { %130 = vst.msk [vmem:[%s330_s3 + $0x8] sm:$0xff] %vm128_vm0, %v118_v8 }

// kernel: meant_forward.21
= control target key start
LH: loop header
LB: loop body
LE: loop exit
PB: predicated region body
PF: predicated region fallthrough
CT: control target
= control target key end

     0   :  { %vm33_vm0 = vcmask 261120   ;;  %vm43_vm1 = vcmask 259072   ;;  %vm248_vm2 = vcmask 785408   ;;  %vm252_vm3 = vcmask 783360   ;;  %s410_s0 = inlined_call_operand.vmem [shape: f32[30,32], index: 0, kind: input, shape index: {}]   ;;  %s411_s3 = inlined_call_operand.vmem [shape: f32[32,32], index: 3, kind: input, shape index: {}]   ;;  %s412_s1 = inlined_call_operand.vmem [shape: f32[1,32], index: 1, kind: input, shape index: {}]   ;;  %s413_s2 = inlined_call_operand.vmem [shape: f32[1,32], index: 2, kind: input, shape index: {}]   ;;  %s414_s5 = inlined_call_operand.vmem [shape: f32[32,96], index: 5, kind: input, shape index: {}]   ;;  %s415_s4 = inlined_call_operand.vmem [shape: f32[1,32], index: 4, kind: input, shape index: {}]   ;;  %s416_s6 = inlined_call_operand.vmem [shape: f32[1,96], index: 6, kind: input, shape index: {}]   ;;  %s417_s7 = inlined_call_operand.vmem [shape: f32[30,96], index: 7, kind: output, shape index: {}]  }
   0x1   :  { %v27_v0 = vld [vmem:[%s410_s0] sm:$0xff]  ;;  %v29_v1 = vld [vmem:[%s410_s0 + $0x10] sm:$0xff]  ;;  %v28_v2 = vld [vmem:[%s410_s0 + $0x8] sm:$0xff] }
   0x2   :  { %v34_v3 = vsel %vm33_vm0, %v27_v0, 0.0  ;;  %v40_v4 = vsel %vm33_vm0, %v29_v1, 0.0  ;;  %v30_v5 = vld [vmem:[%s410_s0 + $0x18] sm:$0x3f]  ;;  %v37_v6 = vsel %vm33_vm0, %v28_v2, 0.0  ;;  %v108_v28 = vld [vmem:[%s411_s3] sm:$0xff] }
   0x3   :  { %35 = vadd.xlane.f32.xlu0 %v34_v3  ;;  %41 = vadd.xlane.f32.xlu1 %v40_v4  ;;  %v44_v7 = vsel %vm43_vm1, %v30_v5, 0.0  ;;  %v109_v29 = vld [vmem:[%s411_s3 + $0x8] sm:$0xff]  ;;  %v110_v31 = vld [vmem:[%s411_s3 + $0x10] sm:$0xff]  ;;  %v111_v32 = vld [vmem:[%s411_s3 + $0x18] sm:$0xff] }
   0x4   :  { %v115_v30 = vpack.c.bf16 %v109_v29, %v108_v28  ;;  %v116_v33 = vpack.c.bf16 %v111_v32, %v110_v31  ;;  %v258_v48 = vld [vmem:[%s412_s1] ss:$0 sm:$0xff]  ;;  %v179_v3 = vld [vmem:[%s414_s5 + $0x8] sm:$0xff] }
   0x5   :  { %v259_v54 = vld [vmem:[%s413_s2] ss:$0 sm:$0xff] }
   0x6   :  { %274 = vmatprep.subr.bf16.mxu0 %v115_v30 }
   0x7   :  { %38 = vadd.xlane.f32.xlu0 %v37_v6  ;;  %45 = vadd.xlane.f32.xlu1 %v44_v7  ;;  %v181_v6 = vld [vmem:[%s414_s5 + $0x18] sm:$0xff] }
   0x8   :  { %275 = vmatpush3.bf16.msra.mxu0 %v115_v30 }
   0x9   :  { %276 = vmatprep.subr.bf16.mxu0 %v116_v33 }
   0xc   :  { %277 = vmatpush3.bf16.msra.mxu0 %v116_v33 }
  0x90   :  { %v36_v8 = vpop.xlane.xlu0 %35  ;;  %v42_v9 = vpop.xlane.xlu1 %41 }
  0x91   :  { %v48_v10 = vmul.f32 0.03125, %v36_v8  ;;  %v50_v11 = vmul.f32 0.03125, %v42_v9  ;;  %v260_v9 = vld [vmem:[%s415_s4] ss:$0 sm:$0xff] }
  0x93   :  { %v52_v12 = vsub.f32 %v27_v0, %v48_v10  ;;  %v54_v13 = vsub.f32 %v29_v1, %v50_v11 }
  0x94   :  { %v39_v14 = vpop.xlane.xlu0 %38  ;;  %v46_v15 = vpop.xlane.xlu1 %45 }
  0x95   :  { %v49_v16 = vmul.f32 0.03125, %v39_v14  ;;  %v51_v17 = vmul.f32 0.03125, %v46_v15  ;;  %v56_v18 = vmul.f32 %v52_v12, %v52_v12  ;;  %v58_v19 = vmul.f32 %v54_v13, %v54_v13 }
  0x97   :  { %v53_v20 = vsub.f32 %v28_v2, %v49_v16  ;;  %v55_v21 = vsub.f32 %v30_v5, %v51_v17  ;;  %v60_v22 = vsel %vm33_vm0, %v56_v18, 0.0  ;;  %v66_v23 = vsel %vm33_vm0, %v58_v19, 0.0  ;;  %v178_v2 = vld [vmem:[%s414_s5] sm:$0xff]  ;;  %v180_v5 = vld [vmem:[%s414_s5 + $0x10] sm:$0xff] }
  0x98   :  { %61 = vadd.xlane.f32.xlu0 %v60_v22  ;;  %v185_v4 = vpack.c.bf16 %v179_v3, %v178_v2  ;;  %v186_v7 = vpack.c.bf16 %v181_v6, %v180_v5  ;;  %v263_v19 = vld [vmem:[%s416_s6] ss:$0 sm:$0xff] }
  0x99   :  { %v57_v24 = vmul.f32 %v53_v20, %v53_v20  ;;  %v59_v25 = vmul.f32 %v55_v21, %v55_v21 }
  0x9a   :  { %282 = vmatprep.subr.bf16.mxu1 %v185_v4 }
  0x9b   :  { %v63_v26 = vsel %vm33_vm0, %v57_v24, 0.0  ;;  %v69_v27 = vsel %vm43_vm1, %v59_v25, 0.0  ;;  %283 = vmatpush3.bf16.msra.mxu1 %v185_v4 }
  0x9c   :  { %67 = vadd.xlane.f32.xlu0 %v66_v23  ;;  %64 = vadd.xlane.f32.xlu1 %v63_v26 }
  0x9d   :  { %284 = vmatprep.subr.bf16.mxu1 %v186_v7 }
  0x9f   :  { %285 = vmatpush3.bf16.msra.mxu1 %v186_v7 }
  0xa0   :  { %70 = vadd.xlane.f32.xlu1 %v69_v27 }
 0x125   :  { %v62_v34 = vpop.xlane.xlu0 %61 }
 0x126   :  { %v72_v35 = vmul.f32 0.03125, %v62_v34 }
 0x128   :  { %v76_v36 = vadd.f32 1e-05, %v72_v35 }
 0x129   :  { %v65_v37 = vpop.xlane.xlu1 %64  ;;  %v68_v38 = vpop.xlane.xlu0 %67 }
 0x12a   :  { %290 = vrsqrt.f32 %v76_v36  ;;  %v73_v39 = vmul.f32 0.03125, %v65_v37  ;;  %v74_v40 = vmul.f32 0.03125, %v68_v38 }
 0x12c   :  { %v77_v41 = vadd.f32 1e-05, %v73_v39  ;;  %v78_v42 = vadd.f32 1e-05, %v74_v40 }
 0x12d   :  { %v71_v43 = vpop.xlane.xlu1 %70 }
 0x12e   :  { %292 = vrsqrt.f32 %v77_v41  ;;  %v75_v44 = vmul.f32 0.03125, %v71_v43 }
 0x12f   :  { %294 = vrsqrt.f32 %v78_v42 }
 0x130   :  { %v79_v45 = vadd.f32 1e-05, %v75_v44 }
 0x132   :  { %296 = vrsqrt.f32 %v79_v45 }
 0x134   :  { %v291_v46 = vpop.eup %290 }
 0x135   :  { %v84_v47 = vmul.f32 %v291_v46, %v52_v12 }
 0x137   :  { %v94_v52 = vmul.f32 %v258_v48, %v84_v47 }
 0x138   :  { %v293_v49 = vpop.eup %292 }
 0x139   :  { %v295_v50 = vpop.eup %294  ;;  %v85_v51 = vmul.f32 %v293_v49, %v53_v20  ;;  %v104_v58 = vadd.f32 %v259_v54, %v94_v52 }
 0x13a   :  { %v86_v53 = vmul.f32 %v295_v50, %v54_v13 }
 0x13b   :  { %v95_v55 = vmul.f32 %v258_v48, %v85_v51 }
 0x13c   :  { %v297_v56 = vpop.eup %296  ;;  %v96_v60 = vmul.f32 %v258_v48, %v86_v53 }
 0x13d   :  { %v87_v57 = vmul.f32 %v297_v56, %v55_v21  ;;  %v105_v59 = vadd.f32 %v259_v54, %v95_v55 }
 0x13e   :  { %v106_v63 = vadd.f32 %v259_v54, %v96_v60 }
 0x13f   :  { %v113_v61 = vpack.c.bf16 %v105_v59, %v104_v58  ;;  %v97_v62 = vmul.f32 %v258_v48, %v87_v57 }
 0x141   :  { %278 = vmatprep.mubr.msk.bf16.mxu0 %vm33_vm0, %v113_v61  ;;  %v107_v0 = vadd.f32 %v259_v54, %v97_v62 }
 0x143   :  { %v114_v1 = vpack.c.bf16 %v107_v0, %v106_v63 }
 0x145   :  { %279 = vmatmul.mubr.msk.bf16.vlgmr.msra.gmra.mrb[0].mxu0 %vm33_vm0, %v114_v1 }
 0x218   :  { %v280_v8 = vpop.f32.mrb[0].mxu0 }
 0x219   :  { %v163_v10 = vpop.f32.mrb[1].mxu0  ;;  %v172_v12 = vadd.f32 %v280_v8, %v260_v9 }
 0x21a   :  { %v281_v11 = vpop.f32.mrb[2].mxu0  ;;  %v164_v15 = vadd.f32 %v260_v9, %v163_v10 }
 0x21b   :  { %v175_v13 = vadd.f32 %v281_v11, %v260_v9  ;;  %v166_v14 = vpop.f32.mrb[3].mxu0 }
 0x21c   :  { %v167_v16 = vadd.f32 %v260_v9, %v166_v14 }
 0x21d   :  { %v184_v17 = vpack.c.bf16 %v175_v13, %v172_v12 }
 0x21e   :  { %v183_v18 = vpack.c.bf16 %v167_v16, %v164_v15 }
 0x220   :  { %286 = vmatprep.mubr.msk.bf16.mxu1 %vm33_vm0, %v183_v18 }
 0x221   :  { %287 = vmatmul.mubr.msk.bf16.vlgmr.msra.gmra.mrb[0].mxu1 %vm33_vm0, %v184_v17 }
 0x2f4   :  { %v288_v20 = vpop.f32.mrb[0].mxu1 }
 0x2f5   :  { %v242_v21 = vadd.f32 %v288_v20, %v263_v19  ;;  %v233_v22 = vpop.f32.mrb[1].mxu1 }
 0x2f6   :  { %v234_v23 = vadd.f32 %v263_v19, %v233_v22  ;;  %v289_v24 = vpop.f32.mrb[2].mxu1 }
 0x2f7   :  { %251 = vst.msk [vmem:[%s417_s7 + $0x10] sm:$0xff] %vm248_vm2, %v242_v21  ;;  %v245_v25 = vadd.f32 %v289_v24, %v263_v19  ;;  %v236_v26 = vpop.f32.mrb[3].mxu1 }
 0x2f8   :  { %249 = vst.msk [vmem:[%s417_s7] sm:$0xff] %vm248_vm2, %v234_v23  ;;  %v237_v27 = vadd.f32 %v263_v19, %v236_v26 }
 0x2f9   :  { %253 = vst.msk [vmem:[%s417_s7 + $0x18] sm:$0x3f] %vm252_vm3, %v245_v25 }
 0x2fa   :  { %250 = vst.msk [vmem:[%s417_s7 + $0x8] sm:$0xff] %vm248_vm2, %v237_v27 }

// kernel: meant_forward.23
= control target key start
LH: loop header
LB: loop body
LE: loop exit
PB: predicated region body
PF: predicated region fallthrough
CT: control target
= control target key end

     0   :  { %vm49_vm0 = vcmask 261120   ;;  %vm116_vm1 = vcmask 259072   ;;  %s440_s2 = inlined_call_operand.vmem [shape: f32[32,32], index: 2, kind: input, shape index: {}]   ;;  %s441_s0 = inlined_call_operand.vmem [shape: f32[30,32], index: 0, kind: input, shape index: {}]   ;;  %s442_s3 = inlined_call_operand.vmem [shape: f32[1,32], index: 3, kind: input, shape index: {}]   ;;  %s443_s6 = inlined_call_operand.vmem [shape: f32[32,32], index: 6, kind: input, shape index: {}]   ;;  %s444_s4 = inlined_call_operand.vmem [shape: f32[1,32], index: 4, kind: input, shape index: {}]   ;;  %s445_s5 = inlined_call_operand.vmem [shape: f32[1,32], index: 5, kind: input, shape index: {}]   ;;  %s446_s7 = inlined_call_operand.vmem [shape: f32[1,32], index: 7, kind: input, shape index: {}]   ;;  %s447_s1 = inlined_call_operand.vmem [shape: f32[30,32], index: 1, kind: input, shape index: {}]   ;;  %s448_s8 = inlined_call_operand.vmem [shape: f32[30,32], index: 8, kind: output, shape index: {}]  }
   0x1   :  { %v34_v0 = vld [vmem:[%s440_s2] sm:$0xff]  ;;  %v35_v1 = vld [vmem:[%s440_s2 + $0x8] sm:$0xff]  ;;  %v36_v2 = vld [vmem:[%s440_s2 + $0x10] sm:$0xff] }
   0x2   :  { %v41_v3 = vpack.c.bf16 %v35_v1, %v34_v0  ;;  %v37_v4 = vld [vmem:[%s440_s2 + $0x18] sm:$0xff]  ;;  %v30_v5 = vld [vmem:[%s441_s0] sm:$0xff]  ;;  %v31_v6 = vld [vmem:[%s441_s0 + $0x8] sm:$0xff] }
   0x3   :  { %v42_v7 = vpack.c.bf16 %v37_v4, %v36_v2  ;;  %v39_v8 = vpack.c.bf16 %v31_v6, %v30_v5  ;;  %v32_v9 = vld [vmem:[%s441_s0 + $0x10] sm:$0xff]  ;;  %v33_v10 = vld [vmem:[%s441_s0 + $0x18] sm:$0x3f]  ;;  %v267_v12 = vld [vmem:[%s442_s3] ss:$0 sm:$0xff] }
   0x4   :  { %283 = vmatprep.subr.bf16.mxu0 %v41_v3  ;;  %v40_v11 = vpack.c.bf16 %v33_v10, %v32_v9  ;;  %v181_v45 = vld [vmem:[%s443_s6] sm:$0xff]  ;;  %v182_v46 = vld [vmem:[%s443_s6 + $0x8] sm:$0xff]  ;;  %v183_v48 = vld [vmem:[%s443_s6 + $0x10] sm:$0xff] }
   0x5   :  { %284 = vmatpush3.bf16.msra.mxu0 %v41_v3  ;;  %287 = vmatprep.mubr.msk.bf16.mxu0 %vm49_vm0, %v39_v8  ;;  %v188_v47 = vpack.c.bf16 %v182_v46, %v181_v45  ;;  %v184_v49 = vld [vmem:[%s443_s6 + $0x18] sm:$0xff]  ;;  %v270_v1 = vld [vmem:[%s444_s4] ss:$0 sm:$0xff] }
   0x6   :  { %285 = vmatprep.subr.bf16.mxu0 %v42_v7  ;;  %v189_v50 = vpack.c.bf16 %v184_v49, %v183_v48 }
   0x7   :  { %291 = vmatprep.subr.bf16.mxu1 %v188_v47 }
   0x8   :  { %292 = vmatpush3.bf16.msra.mxu1 %v188_v47 }
   0x9   :  { %286 = vmatpush3.bf16.msra.mxu0 %v42_v7  ;;  %293 = vmatprep.subr.bf16.mxu1 %v189_v50  ;;  %v271_v7 = vld [vmem:[%s445_s5] ss:$0 sm:$0xff] }
   0xc   :  { %288 = vmatmul.mubr.msk.bf16.vlgmr.msra.gmra.mrb[0].mxu0 %vm49_vm0, %v40_v11  ;;  %294 = vmatpush3.bf16.msra.mxu1 %v189_v50 }
  0xdf   :  { %v289_v13 = vpop.f32.mrb[0].mxu0 }
  0xe0   :  { %v99_v14 = vadd.f32 %v289_v13, %v267_v12  ;;  %v90_v15 = vpop.f32.mrb[1].mxu0 }
  0xe1   :  { %v91_v16 = vadd.f32 %v267_v12, %v90_v15  ;;  %v290_v17 = vpop.f32.mrb[2].mxu0 }
  0xe2   :  { %v102_v18 = vadd.f32 %v290_v17, %v267_v12  ;;  %v93_v19 = vpop.f32.mrb[3].mxu0  ;;  %v113_v20 = vsel %vm49_vm0, %v99_v14, 0.0 }
  0xe3   :  { %v94_v21 = vadd.f32 %v267_v12, %v93_v19  ;;  %114 = vadd.xlane.f32.xlu1 %v113_v20  ;;  %v107_v22 = vsel %vm49_vm0, %v91_v16, 0.0  ;;  %v272_v19 = vld [vmem:[%s446_s7] ss:$0 sm:$0xff] }
  0xe4   :  { %108 = vadd.xlane.f32.xlu0 %v107_v22  ;;  %v117_v23 = vsel %vm116_vm1, %v102_v18, 0.0 }
  0xe5   :  { %v110_v24 = vsel %vm49_vm0, %v94_v21, 0.0 }
  0xe7   :  { %118 = vadd.xlane.f32.xlu1 %v117_v23 }
  0xe8   :  { %111 = vadd.xlane.f32.xlu0 %v110_v24  ;;  %v251_v24 = vld [vmem:[%s447_s1] sm:$0xff] }
 0x170   :  { %v115_v25 = vpop.xlane.xlu1 %114 }
 0x171   :  { %v123_v26 = vmul.f32 0.03125, %v115_v25  ;;  %v109_v27 = vpop.xlane.xlu0 %108 }
 0x172   :  { %v121_v28 = vmul.f32 0.03125, %v109_v27  ;;  %v254_v27 = vld [vmem:[%s447_s1 + $0x18] sm:$0x3f] }
 0x173   :  { %v127_v29 = vsub.f32 %v99_v14, %v123_v26 }
 0x174   :  { %v125_v30 = vsub.f32 %v91_v16, %v121_v28  ;;  %v119_v31 = vpop.xlane.xlu1 %118 }
 0x175   :  { %v124_v32 = vmul.f32 0.03125, %v119_v31  ;;  %v112_v33 = vpop.xlane.xlu0 %111  ;;  %v131_v39 = vmul.f32 %v127_v29, %v127_v29  ;;  %v252_v31 = vld [vmem:[%s447_s1 + $0x8] sm:$0xff] }
 0x176   :  { %v122_v34 = vmul.f32 0.03125, %v112_v33  ;;  %v129_v35 = vmul.f32 %v125_v30, %v125_v30 }
 0x177   :  { %v128_v36 = vsub.f32 %v102_v18, %v124_v32  ;;  %v139_v41 = vsel %vm49_vm0, %v131_v39, 0.0 }
 0x178   :  { %v126_v37 = vsub.f32 %v94_v21, %v122_v34  ;;  %v133_v38 = vsel %vm49_vm0, %v129_v35, 0.0  ;;  %v253_v21 = vld [vmem:[%s447_s1 + $0x10] sm:$0xff] }
 0x179   :  { %134 = vadd.xlane.f32.xlu0 %v133_v38  ;;  %v132_v43 = vmul.f32 %v128_v36, %v128_v36 }
 0x17a   :  { %v130_v40 = vmul.f32 %v126_v37, %v126_v37 }
 0x17b   :  { %v142_v44 = vsel %vm116_vm1, %v132_v43, 0.0 }
 0x17c   :  { %v136_v42 = vsel %vm49_vm0, %v130_v40, 0.0 }
 0x17d   :  { %140 = vadd.xlane.f32.xlu0 %v139_v41  ;;  %137 = vadd.xlane.f32.xlu1 %v136_v42 }
 0x181   :  { %143 = vadd.xlane.f32.xlu1 %v142_v44 }
 0x206   :  { %v135_v51 = vpop.xlane.xlu0 %134 }
 0x207   :  { %v145_v52 = vmul.f32 0.03125, %v135_v51 }
 0x209   :  { %v149_v53 = vadd.f32 1e-05, %v145_v52 }
 0x20a   :  { %v138_v54 = vpop.xlane.xlu1 %137  ;;  %v141_v55 = vpop.xlane.xlu0 %140 }
 0x20b   :  { %299 = vrsqrt.f32 %v149_v53  ;;  %v146_v56 = vmul.f32 0.03125, %v138_v54  ;;  %v147_v57 = vmul.f32 0.03125, %v141_v55 }
 0x20d   :  { %v150_v58 = vadd.f32 1e-05, %v146_v56  ;;  %v151_v59 = vadd.f32 1e-05, %v147_v57 }
 0x20e   :  { %v144_v60 = vpop.xlane.xlu1 %143 }
 0x20f   :  { %301 = vrsqrt.f32 %v150_v58  ;;  %v148_v61 = vmul.f32 0.03125, %v144_v60 }
 0x210   :  { %303 = vrsqrt.f32 %v151_v59 }
 0x211   :  { %v152_v62 = vadd.f32 1e-05, %v148_v61 }
 0x213   :  { %305 = vrsqrt.f32 %v152_v62 }
 0x215   :  { %v300_v63 = vpop.eup %299 }
 0x216   :  { %v157_v0 = vmul.f32 %v300_v63, %v125_v30 }
 0x218   :  { %v167_v5 = vmul.f32 %v270_v1, %v157_v0 }
 0x219   :  { %v302_v2 = vpop.eup %301 }
 0x21a   :  { %v304_v3 = vpop.eup %303  ;;  %v158_v4 = vmul.f32 %v302_v2, %v126_v37  ;;  %v177_v11 = vadd.f32 %v271_v7, %v167_v5 }
 0x21b   :  { %v159_v6 = vmul.f32 %v304_v3, %v127_v29 }
 0x21c   :  { %v168_v8 = vmul.f32 %v270_v1, %v158_v4 }
 0x21d   :  { %v306_v9 = vpop.eup %305  ;;  %v169_v13 = vmul.f32 %v270_v1, %v159_v6 }
 0x21e   :  { %v160_v10 = vmul.f32 %v306_v9, %v128_v36  ;;  %v178_v12 = vadd.f32 %v271_v7, %v168_v8 }
 0x21f   :  { %v179_v16 = vadd.f32 %v271_v7, %v169_v13 }
 0x220   :  { %v186_v14 = vpack.c.bf16 %v178_v12, %v177_v11  ;;  %v170_v15 = vmul.f32 %v270_v1, %v160_v10 }
 0x222   :  { %295 = vmatprep.mubr.msk.bf16.mxu1 %vm49_vm0, %v186_v14  ;;  %v180_v17 = vadd.f32 %v271_v7, %v170_v15 }
 0x224   :  { %v187_v18 = vpack.c.bf16 %v180_v17, %v179_v16 }
 0x226   :  { %296 = vmatmul.mubr.msk.bf16.vlgmr.msra.gmra.mrb[0].mxu1 %vm49_vm0, %v187_v18 }
 0x2f9   :  { %v297_v20 = vpop.f32.mrb[0].mxu1 }
 0x2fa   :  { %v245_v22 = vadd.f32 %v297_v20, %v272_v19  ;;  %v236_v23 = vpop.f32.mrb[1].mxu1 }
 0x2fb   :  { %v237_v25 = vadd.f32 %v272_v19, %v236_v23  ;;  %v298_v26 = vpop.f32.mrb[2].mxu1 }
 0x2fc   :  { %v257_v28 = vadd.f32 %v253_v21, %v245_v22  ;;  %v248_v29 = vadd.f32 %v298_v26, %v272_v19  ;;  %v239_v30 = vpop.f32.mrb[3].mxu1 }
 0x2fd   :  { %v255_v32 = vadd.f32 %v251_v24, %v237_v25  ;;  %v240_v33 = vadd.f32 %v272_v19, %v239_v30 }
 0x2fe   :  { %261 = vst.msk [vmem:[%s448_s8 + $0x10] sm:$0xff] %vm49_vm0, %v257_v28  ;;  %v258_v34 = vadd.f32 %v254_v27, %v248_v29 }
 0x2ff   :  { %259 = vst.msk [vmem:[%s448_s8] sm:$0xff] %vm49_vm0, %v255_v32  ;;  %v256_v35 = vadd.f32 %v252_v31, %v240_v33 }
 0x300   :  { %262 = vst.msk [vmem:[%s448_s8 + $0x18] sm:$0x3f] %vm116_vm1, %v258_v34 }
 0x301   :  { %260 = vst.msk [vmem:[%s448_s8 + $0x8] sm:$0xff] %vm49_vm0, %v256_v35 }

// kernel: meant_forward.22
= control target key start
LH: loop header
LB: loop body
LE: loop exit
PB: predicated region body
PF: predicated region fallthrough
CT: control target
= control target key end

     0   :  { %s1968_s12 = smov 0   ;;  %s2314_s0 = inlined_call_operand.vmem [shape: f32[24,5,8], index: 0, kind: input, shape index: {}]   ;;  %s2315_s1 = inlined_call_operand.vmem [shape: f32[24,5,8], index: 1, kind: input, shape index: {}]   ;;  %s2316_s2 = inlined_call_operand.vmem [shape: f32[24,5,8], index: 2, kind: input, shape index: {}]   ;;  %s2317_s3 = inlined_call_operand.vmem [shape: f32[24,5,8], index: 3, kind: output, shape index: {}]  }
   0x1 LB: > { %s1651_s13 = sadd.s32 4294967295, %s1943_s12   ;;  %p1655_p0 = scmp.ge.s32.totalorder %s1943_s12, 1  ;;  %s1943_s12 = sphi %s1968_s12, %s13_s12  }
   0x2   : > { %p160_p1 = scmp.lt.s32.totalorder %s1943_s12, 3 }
   0x4   : > { %p161_p2 = pnand %p1655_p0, %p160_p1 }
   0x5   : > { %s194_s14 = smul.u32 (!%p161_p2), 12, %s1651_s13  ;;  %v1945_v0 = vmov (!%p161_p2), 0.0   ;;  %vm1946_vm0 = vmmov (!%p161_p2), 0   ;;  %vm291_vm1 = vcmask (!%p161_p2), 64512   ;;  %vm856_vm2 = vcmask (!%p161_p2), 36864  }
   0x6   : > { %164 = sbr.rel (%p161_p2) target bundleno = 816 (0x330), region = 32  ;;  %1734 = vmatprep.subr.bf16.mxu0 (!%p161_p2), %v1945_v0  ;;  %1740 = vmatprep.subr.bf16.mxu1 (!%p161_p2), %v1945_v0  ;;  %vm1005_vm3 = vcmask (!%p161_p2), 1041408   ;;  %vm1006_vm4 = vcmask (!%p161_p2), 1042432   ;;  %vm1001_vm5 = vcmask (!%p161_p2), 39936   ;;  %vm1558_vm6 = vcmask (!%p161_p2), 61440  }
   0x7   : > { %p195_p3 = scmp.lt.s32.totalorder (!%p161_p2), %s194_s14, 23  ;;  %1736 = vmatprep.mubr.msk.bf16.mxu0 (!%p161_p2), %vm1946_vm0, %v1945_v0  ;;  %1742 = vmatprep.mubr.msk.bf16.mxu1 (!%p161_p2), %vm1946_vm0, %v1945_v0 }
   0xd   : > { %s2319_s14 = smov (!%p195_p3, %s194_s14), 23 }
   0xe   : > { %s1982_s15 = sshll.u32 %s2319_s14, 3 }
   0xf   : > { %s1988_s18 = scalar_lea.vmem %s2315_s1, %s1982_s15  ;;  %s1996_s21 = scalar_lea.vmem %s2314_s0, %s1982_s15 }
  0x10   : > { %v243_v1 = vld [vmem:[%s1988_s18] sm:$0x1f]  ;;  %v244_v2 = vld [vmem:[%s1988_s18 + $0x8] sm:$0x1f]  ;;  %v245_v5 = vld [vmem:[%s1988_s18 + $0x10] sm:$0x1f]  ;;  %s2166_s24 = scalar_lea.vmem %s2316_s2, %s1982_s15  ;;  %s2285_s27 = scalar_lea.vmem %s2317_s3, %s1982_s15 }
  0x11   : > { %v255_v3 = vpack.c.bf16 %v243_v1, %v243_v1  ;;  %v256_v4 = vpack.c.bf16 %v244_v2, %v244_v2  ;;  %v246_v6 = vld [vmem:[%s1988_s18 + $0x18] sm:$0x1f]  ;;  %v219_v9 = vld [vmem:[%s1996_s21] sm:$0x1f]  ;;  %v220_v10 = vld [vmem:[%s1996_s21 + $0x8] sm:$0x1f]  ;;  %v257_v11 = vpack.c.bf16 %v245_v5, %v245_v5 }
  0x12   : > { %v258_v12 = vpack.c.bf16 %v246_v6, %v246_v6  ;;  %v231_v13 = vpack.c.bf16 %v219_v9, %v219_v9  ;;  %v232_v14 = vpack.c.bf16 %v220_v10, %v220_v10  ;;  %v247_v17 = vld [vmem:[%s1988_s18 + $0x20] sm:$0x1f]  ;;  %v248_v18 = vld [vmem:[%s1988_s18 + $0x28] sm:$0x1f]  ;;  %v221_v19 = vld [vmem:[%s1996_s21 + $0x10] sm:$0x1f] }
  0x13   : > { %v296_v7 = vsel %vm291_vm1, %v255_v3, 0  ;;  %v342_v8 = vsel %vm291_vm1, %v256_v4, 0  ;;  %v388_v15 = vsel %vm291_vm1, %v257_v11, 0  ;;  %v222_v20 = vld [vmem:[%s1996_s21 + $0x18] sm:$0x1f]  ;;  %v259_v21 = vpack.c.bf16 %v247_v17, %v247_v17 }
  0x14   : > { %1735 = vmatpush3.bf16.xpose.msra.mxu0 %v296_v7  ;;  %1741 = vmatpush3.bf16.xpose.msra.mxu1 %v342_v8  ;;  %v434_v16 = vsel %vm291_vm1, %v258_v12, 0  ;;  %v260_v22 = vpack.c.bf16 %v248_v18, %v248_v18  ;;  %v233_v23 = vpack.c.bf16 %v221_v19, %v221_v19  ;;  %v234_v24 = vpack.c.bf16 %v222_v20, %v222_v20  ;;  %v249_v27 = vld [vmem:[%s1988_s18 + $0x30] sm:$0x1f]  ;;  %v250_v28 = vld [vmem:[%s1988_s18 + $0x38] sm:$0x1f] }
  0x15   : > { %1746 = vmatprep.subr.bf16.mxu0 %v1945_v0  ;;  %1752 = vmatprep.subr.bf16.mxu1 %v1945_v0  ;;  %v480_v25 = vsel %vm291_vm1, %v259_v21, 0  ;;  %v223_v29 = vld [vmem:[%s1996_s21 + $0x20] sm:$0x1f]  ;;  %v224_v30 = vld [vmem:[%s1996_s21 + $0x28] sm:$0x1f]  ;;  %v261_v31 = vpack.c.bf16 %v249_v27, %v249_v27  ;;  %v262_v32 = vpack.c.bf16 %v250_v28, %v250_v28 }
  0x16   : > { %v526_v26 = vsel %vm291_vm1, %v260_v22, 0  ;;  %v235_v33 = vpack.c.bf16 %v223_v29, %v223_v29  ;;  %v236_v34 = vpack.c.bf16 %v224_v30, %v224_v30  ;;  %v251_v37 = vld [vmem:[%s1988_s18 + $0x40] sm:$0x1f]  ;;  %v252_v38 = vld [vmem:[%s1988_s18 + $0x48] sm:$0x1f] }
  0x17   : > { %v572_v35 = vsel %vm291_vm1, %v261_v31, 0  ;;  %v618_v36 = vsel %vm291_vm1, %v262_v32, 0  ;;  %v225_v39 = vld [vmem:[%s1996_s21 + $0x30] sm:$0x1f]  ;;  %v226_v40 = vld [vmem:[%s1996_s21 + $0x38] sm:$0x1f]  ;;  %v263_v41 = vpack.c.bf16 %v251_v37, %v251_v37  ;;  %v264_v42 = vpack.c.bf16 %v252_v38, %v252_v38 }
  0x18   : > { %v237_v43 = vpack.c.bf16 %v225_v39, %v225_v39  ;;  %v238_v44 = vpack.c.bf16 %v226_v40, %v226_v40  ;;  %v253_v47 = vld [vmem:[%s1988_s18 + $0x50] sm:$0x1f]  ;;  %v254_v48 = vld [vmem:[%s1988_s18 + $0x58] sm:$0x1f]  ;;  %v227_v49 = vld [vmem:[%s1996_s21 + $0x40] sm:$0x1f] }
  0x19   : > { %v664_v45 = vsel %vm291_vm1, %v263_v41, 0  ;;  %v710_v46 = vsel %vm291_vm1, %v264_v42, 0  ;;  %v228_v50 = vld [vmem:[%s1996_s21 + $0x48] sm:$0x1f]  ;;  %v265_v51 = vpack.c.bf16 %v253_v47, %v253_v47  ;;  %v266_v52 = vpack.c.bf16 %v254_v48, %v254_v48  ;;  %v229_v57 = vld [vmem:[%s1996_s21 + $0x50] sm:$0x1f] }
  0x1a   : > { %v239_v53 = vpack.c.bf16 %v227_v49, %v227_v49  ;;  %v240_v54 = vpack.c.bf16 %v228_v50, %v228_v50  ;;  %v230_v58 = vld [vmem:[%s1996_s21 + $0x58] sm:$0x1f]  ;;  %v241_v59 = vpack.c.bf16 %v229_v57, %v229_v57 }
  0x1b   : > { %1737 = vmatmul.mubr.msk.bf16.vlgmr.msra.gmra.mrb[0].mxu0 %vm291_vm1, %v231_v13  ;;  %1743 = vmatmul.mubr.msk.bf16.vlgmr.msra.gmra.mrb[0].mxu1 %vm291_vm1, %v232_v14  ;;  %v756_v55 = vsel %vm291_vm1, %v265_v51, 0  ;;  %v802_v56 = vsel %vm291_vm1, %v266_v52, 0  ;;  %v242_v60 = vpack.c.bf16 %v230_v58, %v230_v58 }
  0x1c   : > { %1747 = vmatpush3.bf16.xpose.msra.mxu0 %v388_v15  ;;  %1753 = vmatpush3.bf16.xpose.msra.mxu1 %v434_v16 }
  0x1d   : > { %1748 = vmatprep.mubr.msk.bf16.mxu0 %vm1946_vm0, %v1945_v0  ;;  %1754 = vmatprep.mubr.msk.bf16.mxu1 %vm1946_vm0, %v1945_v0 }
  0x1e   : > { %1758 = vmatprep.subr.bf16.mxu0 %v1945_v0  ;;  %1764 = vmatprep.subr.bf16.mxu1 %v1945_v0 }
  0x23   : > { %1749 = vmatmul.mubr.msk.bf16.vlgmr.msra.gmra.mrb[4].mxu0 %vm291_vm1, %v233_v23  ;;  %1755 = vmatmul.mubr.msk.bf16.vlgmr.msra.gmra.mrb[4].mxu1 %vm291_vm1, %v234_v24 }
  0x24   : > { %1759 = vmatpush3.bf16.xpose.msra.mxu0 %v480_v25  ;;  %1765 = vmatpush3.bf16.xpose.msra.mxu1 %v526_v26 }
  0x25   : > { %1760 = vmatprep.mubr.msk.bf16.mxu0 %vm1946_vm0, %v1945_v0  ;;  %1766 = vmatprep.mubr.msk.bf16.mxu1 %vm1946_vm0, %v1945_v0 }
  0x26   : > { %1770 = vmatprep.subr.bf16.mxu0 %v1945_v0  ;;  %1776 = vmatprep.subr.bf16.mxu1 %v1945_v0 }
  0x2b   : > { %1761 = vmatmul.mubr.msk.bf16.vlgmr.msra.gmra.mrb[8].mxu0 %vm291_vm1, %v235_v33  ;;  %1767 = vmatmul.mubr.msk.bf16.vlgmr.msra.gmra.mrb[8].mxu1 %vm291_vm1, %v236_v34 }
  0x2c   : > { %1771 = vmatpush3.bf16.xpose.msra.mxu0 %v572_v35  ;;  %1777 = vmatpush3.bf16.xpose.msra.mxu1 %v618_v36 }
  0x2d   : > { %1772 = vmatprep.mubr.msk.bf16.mxu0 %vm1946_vm0, %v1945_v0  ;;  %1778 = vmatprep.mubr.msk.bf16.mxu1 %vm1946_vm0, %v1945_v0 }
  0x2e   : > { %1782 = vmatprep.subr.bf16.mxu0 %v1945_v0  ;;  %1788 = vmatprep.subr.bf16.mxu1 %v1945_v0 }
  0x33   : > { %1773 = vmatmul.mubr.msk.bf16.vlgmr.msra.gmra.mrb[12].mxu0 %vm291_vm1, %v237_v43  ;;  %1779 = vmatmul.mubr.msk.bf16.vlgmr.msra.gmra.mrb[12].mxu1 %vm291_vm1, %v238_v44 }
  0x34   : > { %1783 = vmatpush3.bf16.xpose.msra.mxu0 %v664_v45  ;;  %1789 = vmatpush3.bf16.xpose.msra.mxu1 %v710_v46 }
  0x35   : > { %1784 = vmatprep.mubr.msk.bf16.mxu0 %vm1946_vm0, %v1945_v0  ;;  %1790 = vmatprep.mubr.msk.bf16.mxu1 %vm1946_vm0, %v1945_v0 }
  0x36   : > { %1794 = vmatprep.subr.bf16.mxu0 %v1945_v0  ;;  %1800 = vmatprep.subr.bf16.mxu1 %v1945_v0 }
  0x3b   : > { %1785 = vmatmul.mubr.msk.bf16.vlgmr.msra.gmra.mrb[16].mxu0 %vm291_vm1, %v239_v53  ;;  %1791 = vmatmul.mubr.msk.bf16.vlgmr.msra.gmra.mrb[16].mxu1 %vm291_vm1, %v240_v54 }
  0x3c   : > { %1795 = vmatpush3.bf16.xpose.msra.mxu0 %v756_v55  ;;  %1801 = vmatpush3.bf16.xpose.msra.mxu1 %v802_v56 }
  0x3d   : > { %1796 = vmatprep.mubr.msk.bf16.mxu0 %vm1946_vm0, %v1945_v0  ;;  %1802 = vmatprep.mubr.msk.bf16.mxu1 %vm1946_vm0, %v1945_v0 }
  0x3e   : > { %1806 = vmatprep.subr.bf16.mxu0 %v1945_v0  ;;  %1812 = vmatprep.subr.bf16.mxu1 %v1945_v0 }
  0x43   : > { %1797 = vmatmul.mubr.msk.bf16.vlgmr.msra.gmra.mrb[20].mxu0 %vm291_vm1, %v241_v59  ;;  %1803 = vmatmul.mubr.msk.bf16.vlgmr.msra.gmra.mrb[20].mxu1 %vm291_vm1, %v242_v60 }
  0x44   : > { %1808 = vmatprep.mubr.msk.bf16.mxu0 %vm1946_vm0, %v1945_v0  ;;  %1814 = vmatprep.mubr.msk.bf16.mxu1 %vm1946_vm0, %v1945_v0 }
  0xee   : > { %v332_v61 = vpop.f32.mrb[0].mxu0  ;;  %v378_v62 = vpop.f32.mrb[0].mxu1 }
  0xef   : > { %v2080_v63 = vmul.f32 0.35355338, %v332_v61  ;;  %v1738_v1 = vpop.f32.mrb[1].mxu0  ;;  %v2082_v2 = vmul.f32 0.35355338, %v378_v62  ;;  %v1744_v3 = vpop.f32.mrb[1].mxu1 }
  0xf0   : > { %v335_v4 = vpop.f32.mrb[2].mxu0  ;;  %v381_v5 = vpop.f32.mrb[2].mxu1 }
  0xf1   : > { %v1739_v6 = vpop.f32.mrb[3].mxu0  ;;  %v857_v7 = vsel %vm856_vm2, %v2080_v63, -inf  ;;  %v1745_v8 = vpop.f32.mrb[3].mxu1  ;;  %v860_v9 = vsel %vm856_vm2, %v2082_v2, -inf }
  0xf2   : > { %858 = vmax.xlane.f32.xlu0 %v857_v7 }
  0xf6   : > { %861 = vmax.xlane.f32.xlu0 %v860_v9  ;;  %v424_v10 = vpop.f32.mrb[4].mxu0  ;;  %v470_v11 = vpop.f32.mrb[4].mxu1 }
  0xf7   : > { %v2088_v12 = vmul.f32 0.35355338, %v424_v10  ;;  %v1750_v13 = vpop.f32.mrb[5].mxu0  ;;  %v2090_v14 = vmul.f32 0.35355338, %v470_v11  ;;  %v1756_v15 = vpop.f32.mrb[5].mxu1 }
  0xf8   : > { %v427_v16 = vpop.f32.mrb[6].mxu0  ;;  %v473_v17 = vpop.f32.mrb[6].mxu1 }
  0xf9   : > { %v1751_v18 = vpop.f32.mrb[7].mxu0  ;;  %v863_v19 = vsel %vm856_vm2, %v2088_v12, -inf  ;;  %v1757_v20 = vpop.f32.mrb[7].mxu1  ;;  %v866_v21 = vsel %vm856_vm2, %v2090_v14, -inf }
  0xfa   : > { %864 = vmax.xlane.f32.xlu1 %v863_v19 }
  0xfe   : > { %v562_v22 = vpop.f32.mrb[8].mxu1  ;;  %867 = vmax.xlane.f32.xlu1 %v866_v21  ;;  %v516_v23 = vpop.f32.mrb[8].mxu0 }
  0xff   : > { %v2096_v24 = vmul.f32 0.35355338, %v562_v22  ;;  %v2098_v25 = vmul.f32 0.35355338, %v516_v23  ;;  %v1762_v26 = vpop.f32.mrb[9].mxu0  ;;  %v1768_v27 = vpop.f32.mrb[9].mxu1 }
 0x100   : > { %v565_v28 = vpop.f32.mrb[10].mxu1  ;;  %v519_v29 = vpop.f32.mrb[10].mxu0 }
 0x101   : > { %v872_v30 = vsel %vm856_vm2, %v2096_v24, -inf  ;;  %v869_v31 = vsel %vm856_vm2, %v2098_v25, -inf  ;;  %v1763_v32 = vpop.f32.mrb[11].mxu0  ;;  %v1769_v33 = vpop.f32.mrb[11].mxu1 }
 0x102   : > { %873 = vmax.xlane.f32.xlu1 %v872_v30  ;;  %870 = vmax.xlane.f32.xlu0 %v869_v31 }
 0x106   : > { %v608_v34 = vpop.f32.mrb[12].mxu0  ;;  %v654_v35 = vpop.f32.mrb[12].mxu1 }
 0x107   : > { %v2104_v36 = vmul.f32 0.35355338, %v608_v34  ;;  %v2106_v37 = vmul.f32 0.35355338, %v654_v35  ;;  %v1774_v38 = vpop.f32.mrb[13].mxu0  ;;  %v1780_v39 = vpop.f32.mrb[13].mxu1 }
 0x108   : > { %v657_v40 = vpop.f32.mrb[14].mxu1  ;;  %v611_v41 = vpop.f32.mrb[14].mxu0 }
 0x109   : > { %v878_v42 = vsel %vm856_vm2, %v2106_v37, -inf  ;;  %v875_v43 = vsel %vm856_vm2, %v2104_v36, -inf  ;;  %v1775_v44 = vpop.f32.mrb[15].mxu0  ;;  %v1781_v45 = vpop.f32.mrb[15].mxu1 }
 0x10a   : > { %879 = vmax.xlane.f32.xlu1 %v878_v42  ;;  %876 = vmax.xlane.f32.xlu0 %v875_v43 }
 0x10e   : > { %v700_v46 = vpop.f32.mrb[16].mxu0  ;;  %v746_v47 = vpop.f32.mrb[16].mxu1 }
 0x10f   : > { %v2112_v48 = vmul.f32 0.35355338, %v700_v46  ;;  %v2114_v49 = vmul.f32 0.35355338, %v746_v47  ;;  %v1786_v50 = vpop.f32.mrb[17].mxu0  ;;  %v1792_v51 = vpop.f32.mrb[17].mxu1 }
 0x110   : > { %v749_v52 = vpop.f32.mrb[18].mxu1  ;;  %v703_v53 = vpop.f32.mrb[18].mxu0 }
 0x111   : > { %v884_v54 = vsel %vm856_vm2, %v2114_v49, -inf  ;;  %v881_v55 = vsel %vm856_vm2, %v2112_v48, -inf  ;;  %v1787_v56 = vpop.f32.mrb[19].mxu0  ;;  %v1793_v57 = vpop.f32.mrb[19].mxu1 }
 0x112   : > { %885 = vmax.xlane.f32.xlu1 %v884_v54  ;;  %882 = vmax.xlane.f32.xlu0 %v881_v55  ;;  %v1947_v56 = vmov 65535  }
 0x113   : > { %v1007_v57 = vsel %vm1005_vm3, 4294967295, %v1947_v56 }
 0x116   : > { %v792_v58 = vpop.f32.mrb[20].mxu0  ;;  %v838_v59 = vpop.f32.mrb[20].mxu1 }
 0x117   : > { %v2120_v60 = vmul.f32 0.35355338, %v792_v58  ;;  %v2122_v61 = vmul.f32 0.35355338, %v838_v59  ;;  %v1798_v62 = vpop.f32.mrb[21].mxu0  ;;  %v1804_v1 = vpop.f32.mrb[21].mxu1 }
 0x118   : > { %v841_v3 = vpop.f32.mrb[22].mxu1  ;;  %v795_v4 = vpop.f32.mrb[22].mxu0  ;;  %v1008_v1 = vsel %vm1006_vm4, %v1007_v57, 0 }
 0x119   : > { %v890_v5 = vsel %vm856_vm2, %v2122_v61, -inf  ;;  %v887_v6 = vsel %vm856_vm2, %v2120_v60, -inf  ;;  %v1799_v7 = vpop.f32.mrb[23].mxu0  ;;  %v1805_v8 = vpop.f32.mrb[23].mxu1 }
 0x11a   : > { %891 = vmax.xlane.f32.xlu1 %v890_v5  ;;  %888 = vmax.xlane.f32.xlu0 %v887_v6  ;;  %v268_v6 = vld [vmem:[%s2166_s24 + $0x8] sm:$0x1f]  ;;  %v269_v8 = vld [vmem:[%s2166_s24 + $0x10] sm:$0x1f] }
 0x11b   : > { %v280_v7 = vpack.c.bf16 %v268_v6, %v268_v6 }
 0x17f   : > { %v859_v9 = vpop.xlane.xlu0 %858 }
 0x180   : > { %v893_v10 = vsub.f32 %v2080_v63, %v859_v9 }
 0x182   : > { %v905_v11 = vmul.f32 1.442695, %v893_v10 }
 0x183   : > { %v862_v13 = vpop.xlane.xlu0 %861 }
 0x184   : > { %1889 = vpow2.f32 %v905_v11  ;;  %v894_v15 = vsub.f32 %v2082_v2, %v862_v13  ;;  %v281_v11 = vpack.c.bf16 %v269_v8, %v269_v8 }
 0x186   : > { %v907_v16 = vmul.f32 1.442695, %v894_v15  ;;  %v1102_v15 = vand.u32 %v1008_v1, %v281_v11 }
 0x187   : > { %v865_v17 = vpop.xlane.xlu1 %864 }
 0x188   : > { %1891 = vpow2.f32 %v907_v16  ;;  %v895_v18 = vsub.f32 %v2088_v12, %v865_v17  ;;  %v270_v16 = vld [vmem:[%s2166_s24 + $0x18] sm:$0x1f] }
 0x189   : > { %v282_v17 = vpack.c.bf16 %v270_v16, %v270_v16 }
 0x18a   : > { %v909_v19 = vmul.f32 1.442695, %v895_v18 }
 0x18b   : > { %v868_v20 = vpop.xlane.xlu1 %867  ;;  %v1148_v18 = vand.u32 %v1008_v1, %v282_v17 }
 0x18c   : > { %1893 = vpow2.f32 %v909_v19  ;;  %v896_v21 = vsub.f32 %v2090_v14, %v868_v20  ;;  %v271_v20 = vld [vmem:[%s2166_s24 + $0x20] sm:$0x1f] }
 0x18e   : > { %v2132_v22 = vpop.eup %1889  ;;  %v911_v23 = vmul.f32 1.442695, %v896_v21 }
 0x18f   : > { %v874_v26 = vpop.xlane.xlu1 %873  ;;  %v871_v63 = vpop.xlane.xlu0 %870  ;;  %v929_v27 = vsel %vm856_vm2, %v2132_v22, 0.0 }
 0x190   : > { %1895 = vpow2.f32 %v911_v23  ;;  %v898_v2 = vsub.f32 %v2096_v24, %v874_v26  ;;  %v897_v28 = vsub.f32 %v2098_v25, %v871_v63  ;;  %930 = vadd.xlane.f32.xlu0 %v929_v27  ;;  %v283_v26 = vpack.c.bf16 %v271_v20, %v271_v20 }
 0x192   : > { %v2138_v12 = vpop.eup %1891  ;;  %v915_v29 = vmul.f32 1.442695, %v898_v2  ;;  %v913_v30 = vmul.f32 1.442695, %v897_v28  ;;  %v1194_v27 = vand.u32 %v1008_v1, %v283_v26  ;;  %v272_v2 = vld [vmem:[%s2166_s24 + $0x28] sm:$0x1f] }
 0x193   : > { %v932_v14 = vsel %vm856_vm2, %v2138_v12, 0.0  ;;  %v284_v28 = vpack.c.bf16 %v272_v2, %v272_v2 }
 0x194   : > { %1897 = vpow2.f32 %v915_v29  ;;  %933 = vadd.xlane.f32.xlu1 %v932_v14 }
 0x195   : > { %1899 = vpow2.f32 %v913_v30  ;;  %v2202_v29 = vand.u32 %v1008_v1, %v284_v28  ;;  %v273_v30 = vld [vmem:[%s2166_s24 + $0x30] sm:$0x1f] }
 0x196   : > { %v2142_v31 = vpop.eup %1893  ;;  %v285_v14 = vpack.c.bf16 %v273_v30, %v273_v30 }
 0x197   : > { %v880_v32 = vpop.xlane.xlu1 %879  ;;  %v877_v33 = vpop.xlane.xlu0 %876  ;;  %v935_v24 = vsel %vm856_vm2, %v2142_v31, 0.0 }
 0x198   : > { %v900_v25 = vsub.f32 %v2106_v37, %v880_v32  ;;  %v899_v34 = vsub.f32 %v2104_v36, %v877_v33  ;;  %936 = vadd.xlane.f32.xlu0 %v935_v24  ;;  %v2205_v32 = vand.u32 %v1008_v1, %v285_v14  ;;  %v274_v33 = vld [vmem:[%s2166_s24 + $0x38] sm:$0x1f] }
 0x199   : > { %v286_v24 = vpack.c.bf16 %v274_v33, %v274_v33 }
 0x19a   : > { %v2148_v35 = vpop.eup %1895  ;;  %v919_v38 = vmul.f32 1.442695, %v900_v25  ;;  %v917_v39 = vmul.f32 1.442695, %v899_v34  ;;  %v275_v34 = vld [vmem:[%s2166_s24 + $0x40] sm:$0x1f] }
 0x19b   : > { %v938_v40 = vsel %vm856_vm2, %v2148_v35, 0.0  ;;  %v2208_v25 = vand.u32 %v1008_v1, %v286_v24 }
 0x19c   : > { %1901 = vpow2.f32 %v919_v38  ;;  %939 = vadd.xlane.f32.xlu1 %v938_v40  ;;  %v287_v38 = vpack.c.bf16 %v275_v34, %v275_v34  ;;  %v276_v40 = vld [vmem:[%s2166_s24 + $0x48] sm:$0x1f] }
 0x19d   : > { %1903 = vpow2.f32 %v917_v39 }
 0x19e   : > { %v2152_v41 = vpop.eup %1897  ;;  %v2211_v39 = vand.u32 %v1008_v1, %v287_v38 }
 0x19f   : > { %v2154_v42 = vpop.eup %1899  ;;  %v886_v43 = vpop.xlane.xlu1 %885  ;;  %v944_v36 = vsel %vm856_vm2, %v2152_v41, 0.0 }
 0x1a0   : > { %v883_v37 = vpop.xlane.xlu0 %882  ;;  %v902_v44 = vsub.f32 %v2114_v49, %v886_v43  ;;  %945 = vadd.xlane.f32.xlu1 %v944_v36  ;;  %v941_v46 = vsel %vm856_vm2, %v2154_v42, 0.0  ;;  %v267_v49 = vld [vmem:[%s2166_s24] sm:$0x1f]  ;;  %v288_v43 = vpack.c.bf16 %v276_v40, %v276_v40  ;;  %v277_v36 = vld [vmem:[%s2166_s24 + $0x50] sm:$0x1f] }
 0x1a1   : > { %v901_v45 = vsub.f32 %v2112_v48, %v883_v37  ;;  %942 = vadd.xlane.f32.xlu0 %v941_v46  ;;  %v279_v55 = vpack.c.bf16 %v267_v49, %v267_v49  ;;  %v278_v46 = vld [vmem:[%s2166_s24 + $0x58] sm:$0x1f] }
 0x1a2   : > { %v923_v47 = vmul.f32 1.442695, %v902_v44  ;;  %v2214_v37 = vand.u32 %v1008_v1, %v288_v43  ;;  %v289_v44 = vpack.c.bf16 %v277_v36, %v277_v36 }
 0x1a3   : > { %v921_v50 = vmul.f32 1.442695, %v901_v45  ;;  %v1010_v3 = vand.u32 %v1008_v1, %v279_v55 }
 0x1a4   : > { %1905 = vpow2.f32 %v923_v47  ;;  %v2217_v45 = vand.u32 %v1008_v1, %v289_v44  ;;  %v290_v47 = vpack.c.bf16 %v278_v46, %v278_v46 }
 0x1a5   : > { %1907 = vpow2.f32 %v921_v50  ;;  %1807 = vmatpush3.bf16.msra.mxu0 %v1010_v3 }
 0x1a6   : > { %v2168_v51 = vpop.eup %1901  ;;  %1818 = vmatprep.subr.bf16.mxu0 %v1945_v0  ;;  %v2220_v50 = vand.u32 %v1008_v1, %v290_v47 }
 0x1a7   : > { %v2171_v48 = vpop.eup %1903  ;;  %v892_v52 = vpop.xlane.xlu1 %891  ;;  %v950_v54 = vsel %vm856_vm2, %v2168_v51, 0.0 }
 0x1a8   : > { %v889_v53 = vpop.xlane.xlu0 %888  ;;  %v904_v58 = vsub.f32 %v2122_v61, %v892_v52  ;;  %951 = vadd.xlane.f32.xlu1 %v950_v54  ;;  %v947_v62 = vsel %vm856_vm2, %v2171_v48, 0.0  ;;  %v1056_v61 = vand.u32 %v1008_v1, %v280_v7 }
 0x1a9   : > { %v903_v59 = vsub.f32 %v2120_v60, %v889_v53  ;;  %948 = vadd.xlane.f32.xlu0 %v947_v62 }
 0x1aa   : > { %v927_v4 = vmul.f32 1.442695, %v904_v58  ;;  %1813 = vmatpush3.bf16.msra.mxu1 %v1056_v61 }
 0x1ab   : > { %v925_v5 = vmul.f32 1.442695, %v903_v59  ;;  %1824 = vmatprep.subr.bf16.mxu1 %v1945_v0 }
 0x1ac   : > { %1909 = vpow2.f32 %v927_v4 }
 0x1ad   : > { %1911 = vpow2.f32 %v925_v5 }
 0x1ae   : > { %v2181_v60 = vpop.eup %1905 }
 0x1af   : > { %v2184_v9 = vpop.eup %1907  ;;  %v956_v10 = vsel %vm856_vm2, %v2181_v60, 0.0 }
 0x1b0   : > { %957 = vadd.xlane.f32.xlu1 %v956_v10  ;;  %v953_v13 = vsel %vm856_vm2, %v2184_v9, 0.0 }
 0x1b1   : > { %954 = vadd.xlane.f32.xlu0 %v953_v13 }
 0x1b6   : > { %v2192_v19 = vpop.eup %1909 }
 0x1b7   : > { %v2195_v21 = vpop.eup %1911  ;;  %v962_v23 = vsel %vm856_vm2, %v2192_v19, 0.0 }
 0x1b8   : > { %963 = vadd.xlane.f32.xlu1 %v962_v23  ;;  %v959_v63 = vsel %vm856_vm2, %v2195_v21, 0.0 }
 0x1b9   : > { %960 = vadd.xlane.f32.xlu0 %v959_v63 }
 0x21d   : > { %v931_v49 = vpop.xlane.xlu0 %930 }
 0x21e   : > { %1913 = vrcp.f32 %v931_v49 }
 0x221   : > { %v934_v52 = vpop.xlane.xlu1 %933 }
 0x222   : > { %1915 = vrcp.f32 %v934_v52 }
 0x225   : > { %v937_v53 = vpop.xlane.xlu0 %936 }
 0x226   : > { %1917 = vrcp.f32 %v937_v53 }
 0x228   : > { %v1914_v54 = vpop.eup %1913 }
 0x229   : > { %v977_v55 = vmul.f32 %v1914_v54, %v2132_v22  ;;  %v940_v56 = vpop.xlane.xlu1 %939 }
 0x22a   : > { %1919 = vrcp.f32 %v940_v56 }
 0x22b   : > { %v989_v57 = vpack.c.bf16 %v977_v55, %v977_v55 }
 0x22c   : > { %v1916_v58 = vpop.eup %1915 }
 0x22d   : > { %v978_v59 = vmul.f32 %v1916_v58, %v2138_v12  ;;  %v946_v62 = vpop.xlane.xlu1 %945  ;;  %1809 = vmatmul.mubr.msk.bf16.vlgmr.msra.gmra.mrb[24].mxu0 %vm1001_vm5, %v989_v57 }
 0x22e   : > { %1921 = vrcp.f32 %v946_v62  ;;  %v943_v1 = vpop.xlane.xlu0 %942  ;;  %1819 = vmatpush3.bf16.msra.mxu0 %v1102_v15  ;;  %1820 = vmatprep.mubr.msk.bf16.mxu0 %vm1946_vm0, %v1945_v0 }
 0x22f   : > { %1923 = vrcp.f32 %v943_v1  ;;  %v990_v3 = vpack.c.bf16 %v978_v59, %v978_v59  ;;  %1830 = vmatprep.subr.bf16.mxu0 %v1945_v0 }
 0x230   : > { %v1918_v22 = vpop.eup %1917 }
 0x231   : > { %v979_v4 = vmul.f32 %v1918_v22, %v2142_v31  ;;  %1815 = vmatmul.mubr.msk.bf16.vlgmr.msra.gmra.mrb[24].mxu1 %vm1001_vm5, %v990_v3 }
 0x232   : > { %1825 = vmatpush3.bf16.msra.mxu1 %v1148_v18  ;;  %1826 = vmatprep.mubr.msk.bf16.mxu1 %vm1946_vm0, %v1945_v0 }
 0x233   : > { %v991_v12 = vpack.c.bf16 %v979_v4, %v979_v4  ;;  %1836 = vmatprep.subr.bf16.mxu1 %v1945_v0 }
 0x234   : > { %v1920_v5 = vpop.eup %1919 }
 0x235   : > { %v980_v6 = vmul.f32 %v1920_v5, %v2148_v35  ;;  %v952_v7 = vpop.xlane.xlu1 %951  ;;  %1821 = vmatmul.mubr.msk.bf16.vlgmr.msra.gmra.mrb[28].mxu0 %vm1001_vm5, %v991_v12 }
 0x236   : > { %1925 = vrcp.f32 %v952_v7  ;;  %v949_v61 = vpop.xlane.xlu0 %948  ;;  %1831 = vmatpush3.bf16.msra.mxu0 %v1194_v27  ;;  %1832 = vmatprep.mubr.msk.bf16.mxu0 %vm1946_vm0, %v1945_v0 }
 0x237   : > { %1927 = vrcp.f32 %v949_v61  ;;  %v992_v31 = vpack.c.bf16 %v980_v6, %v980_v6  ;;  %1842 = vmatprep.subr.bf16.mxu0 %v1945_v0 }
 0x238   : > { %v1922_v8 = vpop.eup %1921 }
 0x239   : > { %v1924_v10 = vpop.eup %1923  ;;  %1827 = vmatmul.mubr.msk.bf16.vlgmr.msra.gmra.mrb[28].mxu1 %vm1001_vm5, %v992_v31  ;;  %v982_v35 = vmul.f32 %v1922_v8, %v2152_v41 }
 0x23a   : > { %v981_v11 = vmul.f32 %v1924_v10, %v2154_v42  ;;  %1837 = vmatpush3.bf16.msra.mxu1 %v2202_v29  ;;  %1838 = vmatprep.mubr.msk.bf16.mxu1 %vm1946_vm0, %v1945_v0 }
 0x23b   : > { %1848 = vmatprep.subr.bf16.mxu1 %v1945_v0  ;;  %v994_v17 = vpack.c.bf16 %v982_v35, %v982_v35 }
 0x23c   : > { %v993_v13 = vpack.c.bf16 %v981_v11, %v981_v11 }
 0x23d   : > { %v958_v15 = vpop.xlane.xlu1 %957 }
 0x23e   : > { %1929 = vrcp.f32 %v958_v15  ;;  %1833 = vmatmul.mubr.msk.bf16.vlgmr.msra.gmra.mrb[32].mxu0 %vm1001_vm5, %v993_v13  ;;  %v955_v16 = vpop.xlane.xlu0 %954 }
 0x23f   : > { %1931 = vrcp.f32 %v955_v16  ;;  %1843 = vmatpush3.bf16.msra.mxu0 %v2205_v32  ;;  %1844 = vmatprep.mubr.msk.bf16.mxu0 %vm1946_vm0, %v1945_v0 }
 0x240   : > { %v1926_v42 = vpop.eup %1925  ;;  %1854 = vmatprep.subr.bf16.mxu0 %v1945_v0 }
 0x241   : > { %v1928_v18 = vpop.eup %1927  ;;  %1839 = vmatmul.mubr.msk.bf16.vlgmr.msra.gmra.mrb[32].mxu1 %vm1001_vm5, %v994_v17  ;;  %v984_v20 = vmul.f32 %v1926_v42, %v2168_v51 }
 0x242   : > { %v983_v41 = vmul.f32 %v1928_v18, %v2171_v48  ;;  %1849 = vmatpush3.bf16.msra.mxu1 %v2208_v25  ;;  %1850 = vmatprep.mubr.msk.bf16.mxu1 %vm1946_vm0, %v1945_v0 }
 0x243   : > { %1860 = vmatprep.subr.bf16.mxu1 %v1945_v0  ;;  %v996_v27 = vpack.c.bf16 %v984_v20, %v984_v20 }
 0x244   : > { %v995_v23 = vpack.c.bf16 %v983_v41, %v983_v41 }
 0x245   : > { %v964_v26 = vpop.xlane.xlu1 %963 }
 0x246   : > { %1933 = vrcp.f32 %v964_v26  ;;  %1845 = vmatmul.mubr.msk.bf16.vlgmr.msra.gmra.mrb[36].mxu0 %vm1001_vm5, %v995_v23  ;;  %v961_v63 = vpop.xlane.xlu0 %960 }
 0x247   : > { %1935 = vrcp.f32 %v961_v63  ;;  %1855 = vmatpush3.bf16.msra.mxu0 %v2211_v39  ;;  %1856 = vmatprep.mubr.msk.bf16.mxu0 %vm1946_vm0, %v1945_v0 }
 0x248   : > { %v1930_v48 = vpop.eup %1929  ;;  %1866 = vmatprep.subr.bf16.mxu0 %v1945_v0 }
 0x249   : > { %v1932_v2 = vpop.eup %1931  ;;  %1851 = vmatmul.mubr.msk.bf16.vlgmr.msra.gmra.mrb[36].mxu1 %vm1001_vm5, %v996_v27  ;;  %v986_v28 = vmul.f32 %v1930_v48, %v2181_v60 }
 0x24a   : > { %v985_v51 = vmul.f32 %v1932_v2, %v2184_v9  ;;  %1861 = vmatpush3.bf16.msra.mxu1 %v2214_v37  ;;  %1862 = vmatprep.mubr.msk.bf16.mxu1 %vm1946_vm0, %v1945_v0 }
 0x24b   : > { %1872 = vmatprep.subr.bf16.mxu1 %v1945_v0  ;;  %v998_v30 = vpack.c.bf16 %v986_v28, %v986_v28 }
 0x24c   : > { %v997_v29 = vpack.c.bf16 %v985_v51, %v985_v51 }
 0x24e   : > { %1857 = vmatmul.mubr.msk.bf16.vlgmr.msra.gmra.mrb[40].mxu0 %vm1001_vm5, %v997_v29 }
 0x24f   : > { %1867 = vmatpush3.bf16.msra.mxu0 %v2217_v45  ;;  %1868 = vmatprep.mubr.msk.bf16.mxu0 %vm1946_vm0, %v1945_v0 }
 0x250   : > { %v1934_v9 = vpop.eup %1933 }
 0x251   : > { %v1936_v14 = vpop.eup %1935  ;;  %1863 = vmatmul.mubr.msk.bf16.vlgmr.msra.gmra.mrb[40].mxu1 %vm1001_vm5, %v998_v30  ;;  %v988_v60 = vmul.f32 %v1934_v9, %v2192_v19 }
 0x252   : > { %v987_v32 = vmul.f32 %v1936_v14, %v2195_v21  ;;  %1873 = vmatpush3.bf16.msra.mxu1 %v2220_v50  ;;  %1874 = vmatprep.mubr.msk.bf16.mxu1 %vm1946_vm0, %v1945_v0 }
 0x253   : > { %v1000_v24 = vpack.c.bf16 %v988_v60, %v988_v60 }
 0x254   : > { %v999_v33 = vpack.c.bf16 %v987_v32, %v987_v32 }
 0x256   : > { %1869 = vmatmul.mubr.msk.bf16.vlgmr.msra.gmra.mrb[44].mxu0 %vm1001_vm5, %v999_v33 }
 0x259   : > { %1875 = vmatmul.mubr.msk.bf16.vlgmr.msra.gmra.mrb[44].mxu1 %vm1001_vm5, %v1000_v24 }
 0x300   : > { %v1046_v21 = vpop.f32.mrb[24].mxu0 }
 0x301   : > { %1559 = vst.msk [vmem:[%s2285_s27] sm:$0x1f] %vm1558_vm6, %v1046_v21  ;;  %v1810_v0 = vpop.f32.mrb[25].mxu0 }
 0x302   : > { %v1049_v19 = vpop.f32.mrb[26].mxu0 }
 0x303   : > { %v1811_v25 = vpop.f32.mrb[27].mxu0 }
 0x304   : > { %v1092_v34 = vpop.f32.mrb[24].mxu1 }
 0x305   : > { %1560 = vst.msk [vmem:[%s2285_s27 + $0x8] sm:$0x1f] %vm1558_vm6, %v1092_v34  ;;  %v1816_v38 = vpop.f32.mrb[25].mxu1 }
 0x306   : > { %v1095_v39 = vpop.f32.mrb[26].mxu1 }
 0x307   : > { %v1817_v40 = vpop.f32.mrb[27].mxu1 }
 0x308   : > { %v1138_v43 = vpop.f32.mrb[28].mxu0 }
 0x309   : > { %1561 = vst.msk [vmem:[%s2285_s27 + $0x10] sm:$0x1f] %vm1558_vm6, %v1138_v43  ;;  %v1822_v37 = vpop.f32.mrb[29].mxu0 }
 0x30a   : > { %v1141_v36 = vpop.f32.mrb[30].mxu0 }
 0x30b   : > { %v1823_v44 = vpop.f32.mrb[31].mxu0 }
 0x30c   : > { %v1184_v45 = vpop.f32.mrb[28].mxu1 }
 0x30d   : > { %1562 = vst.msk [vmem:[%s2285_s27 + $0x18] sm:$0x1f] %vm1558_vm6, %v1184_v45  ;;  %v1828_v46 = vpop.f32.mrb[29].mxu1 }
 0x30e   : > { %v1187_v47 = vpop.f32.mrb[30].mxu1 }
 0x30f   : > { %v1829_v50 = vpop.f32.mrb[31].mxu1 }
 0x311   : > { %v1230_v49 = vpop.f32.mrb[32].mxu0 }
 0x312   : > { %1563 = vst.msk [vmem:[%s2285_s27 + $0x20] sm:$0x1f] %vm1558_vm6, %v1230_v49  ;;  %v1834_v52 = vpop.f32.mrb[33].mxu0 }
 0x313   : > { %v1233_v53 = vpop.f32.mrb[34].mxu0 }
 0x314   : > { %v1835_v54 = vpop.f32.mrb[35].mxu0  ;;  %v1276_v55 = vpop.f32.mrb[32].mxu1 }
 0x315   : > { %1564 = vst.msk [vmem:[%s2285_s27 + $0x28] sm:$0x1f] %vm1558_vm6, %v1276_v55  ;;  %v1840_v56 = vpop.f32.mrb[33].mxu1 }
 0x316   : > { %v1279_v57 = vpop.f32.mrb[34].mxu1 }
 0x317   : > { %v1841_v58 = vpop.f32.mrb[35].mxu1 }
 0x319   : > { %v1322_v59 = vpop.f32.mrb[36].mxu0 }
 0x31a   : > { %1565 = vst.msk [vmem:[%s2285_s27 + $0x30] sm:$0x1f] %vm1558_vm6, %v1322_v59  ;;  %v1846_v62 = vpop.f32.mrb[37].mxu0 }
 0x31b   : > { %v1325_v1 = vpop.f32.mrb[38].mxu0 }
 0x31c   : > { %v1847_v3 = vpop.f32.mrb[39].mxu0  ;;  %v1368_v22 = vpop.f32.mrb[36].mxu1 }
 0x31d   : > { %1566 = vst.msk [vmem:[%s2285_s27 + $0x38] sm:$0x1f] %vm1558_vm6, %v1368_v22  ;;  %v1852_v4 = vpop.f32.mrb[37].mxu1 }
 0x31e   : > { %v1371_v12 = vpop.f32.mrb[38].mxu1 }
 0x31f   : > { %v1853_v5 = vpop.f32.mrb[39].mxu1 }
 0x321   : > { %v1414_v6 = vpop.f32.mrb[40].mxu0 }
 0x322   : > { %1567 = vst.msk [vmem:[%s2285_s27 + $0x40] sm:$0x1f] %vm1558_vm6, %v1414_v6  ;;  %v1858_v7 = vpop.f32.mrb[41].mxu0 }
 0x323   : > { %v1417_v61 = vpop.f32.mrb[42].mxu0 }
 0x324   : > { %v1859_v31 = vpop.f32.mrb[43].mxu0  ;;  %v1460_v8 = vpop.f32.mrb[40].mxu1 }
 0x325   : > { %1568 = vst.msk [vmem:[%s2285_s27 + $0x48] sm:$0x1f] %vm1558_vm6, %v1460_v8  ;;  %v1864_v10 = vpop.f32.mrb[41].mxu1 }
 0x326   : > { %v1463_v11 = vpop.f32.mrb[42].mxu1 }
 0x327   : > { %v1865_v35 = vpop.f32.mrb[43].mxu1 }
 0x329   : > { %v1506_v13 = vpop.f32.mrb[44].mxu0 }
 0x32a   : > { %1569 = vst.msk [vmem:[%s2285_s27 + $0x50] sm:$0x1f] %vm1558_vm6, %v1506_v13  ;;  %v1870_v15 = vpop.f32.mrb[45].mxu0 }
 0x32b   : > { %v1509_v16 = vpop.f32.mrb[46].mxu0 }
 0x32c   : > { %v1871_v17 = vpop.f32.mrb[47].mxu0  ;;  %v1552_v42 = vpop.f32.mrb[44].mxu1 }
 0x32d   : > { %1570 = vst.msk [vmem:[%s2285_s27 + $0x58] sm:$0x1f] %vm1558_vm6, %v1552_v42  ;;  %v1876_v18 = vpop.f32.mrb[45].mxu1 }
 0x32e   : > { %v1555_v41 = vpop.f32.mrb[46].mxu1 }
 0x32f   : > { %v1877_v20 = vpop.f32.mrb[47].mxu1 }
 0x330 PF: > { %s13_s12 = sadd.s32 1, %s1943_s12  }
 0x331   : > { %p10_p4 = scmp.ge.s32.totalorder %s13_s12, 4  }
 0x333   :  { %12 = sbr.rel (!%p10_p4) target bundleno = 1 (0x1), region = 68 }

// kernel: meant_forward.24
= control target key start
LH: loop header
LB: loop body
LE: loop exit
PB: predicated region body
PF: predicated region fallthrough
CT: control target
= control target key end

     0   :  { %vm27_vm0 = vcmask 261120   ;;  %vm37_vm1 = vcmask 259072   ;;  %s294_s0 = inlined_call_operand.vmem [shape: f32[30,32], index: 0, kind: input, shape index: {}]   ;;  %s295_s3 = inlined_call_operand.vmem [shape: f32[32,32], index: 3, kind: input, shape index: {}]   ;;  %s296_s1 = inlined_call_operand.vmem [shape: f32[1,32], index: 1, kind: input, shape index: {}]   ;;  %s297_s2 = inlined_call_operand.vmem [shape: f32[1,32], index: 2, kind: input, shape index: {}]   ;;  %s298_s4 = inlined_call_operand.vmem [shape: f32[1,32], index: 4, kind: input, shape index: {}]   ;;  %s299_s5 = inlined_call_operand.vmem [shape: f32[30,32], index: 5, kind: output, shape index: {}]  }
   0x1   :  { %v21_v0 = vld [vmem:[%s294_s0] sm:$0xff]  ;;  %v23_v1 = vld [vmem:[%s294_s0 + $0x10] sm:$0xff]  ;;  %v22_v2 = vld [vmem:[%s294_s0 + $0x8] sm:$0xff] }
   0x2   :  { %v28_v3 = vsel %vm27_vm0, %v21_v0, 0.0  ;;  %v34_v4 = vsel %vm27_vm0, %v23_v1, 0.0  ;;  %v24_v5 = vld [vmem:[%s294_s0 + $0x18] sm:$0x3f]  ;;  %v31_v6 = vsel %vm27_vm0, %v22_v2, 0.0  ;;  %v102_v28 = vld [vmem:[%s295_s3] sm:$0xff] }
   0x3   :  { %29 = vadd.xlane.f32.xlu0 %v28_v3  ;;  %35 = vadd.xlane.f32.xlu1 %v34_v4  ;;  %v38_v7 = vsel %vm37_vm1, %v24_v5, 0.0  ;;  %v103_v29 = vld [vmem:[%s295_s3 + $0x8] sm:$0xff]  ;;  %v104_v31 = vld [vmem:[%s295_s3 + $0x10] sm:$0xff]  ;;  %v105_v32 = vld [vmem:[%s295_s3 + $0x18] sm:$0xff] }
   0x4   :  { %v109_v30 = vpack.c.bf16 %v103_v29, %v102_v28  ;;  %v110_v33 = vpack.c.bf16 %v105_v32, %v104_v31  ;;  %v180_v48 = vld [vmem:[%s296_s1] ss:$0 sm:$0xff] }
   0x5   :  { %v181_v54 = vld [vmem:[%s297_s2] ss:$0 sm:$0xff] }
   0x6   :  { %189 = vmatprep.subr.bf16.mxu0 %v109_v30 }
   0x7   :  { %32 = vadd.xlane.f32.xlu0 %v31_v6  ;;  %39 = vadd.xlane.f32.xlu1 %v38_v7 }
   0x8   :  { %190 = vmatpush3.bf16.msra.mxu0 %v109_v30 }
   0x9   :  { %191 = vmatprep.subr.bf16.mxu0 %v110_v33 }
   0xc   :  { %192 = vmatpush3.bf16.msra.mxu0 %v110_v33 }
  0x90   :  { %v30_v8 = vpop.xlane.xlu0 %29  ;;  %v36_v9 = vpop.xlane.xlu1 %35 }
  0x91   :  { %v42_v10 = vmul.f32 0.03125, %v30_v8  ;;  %v44_v11 = vmul.f32 0.03125, %v36_v9 }
  0x93   :  { %v46_v12 = vsub.f32 %v21_v0, %v42_v10  ;;  %v48_v13 = vsub.f32 %v23_v1, %v44_v11 }
  0x94   :  { %v33_v14 = vpop.xlane.xlu0 %32  ;;  %v40_v15 = vpop.xlane.xlu1 %39 }
  0x95   :  { %v43_v16 = vmul.f32 0.03125, %v33_v14  ;;  %v45_v17 = vmul.f32 0.03125, %v40_v15  ;;  %v50_v18 = vmul.f32 %v46_v12, %v46_v12  ;;  %v52_v19 = vmul.f32 %v48_v13, %v48_v13 }
  0x97   :  { %v47_v20 = vsub.f32 %v22_v2, %v43_v16  ;;  %v49_v21 = vsub.f32 %v24_v5, %v45_v17  ;;  %v54_v22 = vsel %vm27_vm0, %v50_v18, 0.0  ;;  %v60_v23 = vsel %vm27_vm0, %v52_v19, 0.0  ;;  %v182_v2 = vld [vmem:[%s298_s4] ss:$0 sm:$0xff] }
  0x98   :  { %55 = vadd.xlane.f32.xlu0 %v54_v22 }
  0x99   :  { %v51_v24 = vmul.f32 %v47_v20, %v47_v20  ;;  %v53_v25 = vmul.f32 %v49_v21, %v49_v21 }
  0x9b   :  { %v57_v26 = vsel %vm27_vm0, %v51_v24, 0.0  ;;  %v63_v27 = vsel %vm37_vm1, %v53_v25, 0.0 }
  0x9c   :  { %61 = vadd.xlane.f32.xlu0 %v60_v23  ;;  %58 = vadd.xlane.f32.xlu1 %v57_v26 }
  0xa0   :  { %64 = vadd.xlane.f32.xlu1 %v63_v27 }
 0x125   :  { %v56_v34 = vpop.xlane.xlu0 %55 }
 0x126   :  { %v66_v35 = vmul.f32 0.03125, %v56_v34 }
 0x128   :  { %v70_v36 = vadd.f32 1e-05, %v66_v35 }
 0x129   :  { %v59_v37 = vpop.xlane.xlu1 %58  ;;  %v62_v38 = vpop.xlane.xlu0 %61 }
 0x12a   :  { %197 = vrsqrt.f32 %v70_v36  ;;  %v67_v39 = vmul.f32 0.03125, %v59_v37  ;;  %v68_v40 = vmul.f32 0.03125, %v62_v38 }
 0x12c   :  { %v71_v41 = vadd.f32 1e-05, %v67_v39  ;;  %v72_v42 = vadd.f32 1e-05, %v68_v40 }
 0x12d   :  { %v65_v43 = vpop.xlane.xlu1 %64 }
 0x12e   :  { %199 = vrsqrt.f32 %v71_v41  ;;  %v69_v44 = vmul.f32 0.03125, %v65_v43 }
 0x12f   :  { %201 = vrsqrt.f32 %v72_v42 }
 0x130   :  { %v73_v45 = vadd.f32 1e-05, %v69_v44 }
 0x132   :  { %203 = vrsqrt.f32 %v73_v45 }
 0x134   :  { %v198_v46 = vpop.eup %197 }
 0x135   :  { %v78_v47 = vmul.f32 %v198_v46, %v46_v12 }
 0x137   :  { %v88_v52 = vmul.f32 %v180_v48, %v78_v47 }
 0x138   :  { %v200_v49 = vpop.eup %199 }
 0x139   :  { %v202_v50 = vpop.eup %201  ;;  %v79_v51 = vmul.f32 %v200_v49, %v47_v20  ;;  %v98_v58 = vadd.f32 %v181_v54, %v88_v52 }
 0x13a   :  { %v80_v53 = vmul.f32 %v202_v50, %v48_v13 }
 0x13b   :  { %v89_v55 = vmul.f32 %v180_v48, %v79_v51 }
 0x13c   :  { %v204_v56 = vpop.eup %203  ;;  %v90_v60 = vmul.f32 %v180_v48, %v80_v53 }
 0x13d   :  { %v81_v57 = vmul.f32 %v204_v56, %v49_v21  ;;  %v99_v59 = vadd.f32 %v181_v54, %v89_v55 }
 0x13e   :  { %v100_v63 = vadd.f32 %v181_v54, %v90_v60 }
 0x13f   :  { %v107_v61 = vpack.c.bf16 %v99_v59, %v98_v58  ;;  %v91_v62 = vmul.f32 %v180_v48, %v81_v57 }
 0x141   :  { %193 = vmatprep.mubr.msk.bf16.mxu0 %vm27_vm0, %v107_v61  ;;  %v101_v0 = vadd.f32 %v181_v54, %v91_v62 }
 0x143   :  { %v108_v1 = vpack.c.bf16 %v101_v0, %v100_v63 }
 0x145   :  { %194 = vmatmul.mubr.msk.bf16.vlgmr.msra.gmra.mrb[0].mxu0 %vm27_vm0, %v108_v1 }
 0x218   :  { %v195_v3 = vpop.f32.mrb[0].mxu0 }
 0x219   :  { %v166_v4 = vadd.f32 %v195_v3, %v182_v2  ;;  %v157_v5 = vpop.f32.mrb[1].mxu0 }
 0x21a   :  { %v158_v6 = vadd.f32 %v182_v2, %v157_v5  ;;  %v196_v7 = vpop.f32.mrb[2].mxu0 }
 0x21b   :  { %174 = vst.msk [vmem:[%s299_s5 + $0x10] sm:$0xff] %vm27_vm0, %v166_v4  ;;  %v169_v8 = vadd.f32 %v196_v7, %v182_v2  ;;  %v160_v9 = vpop.f32.mrb[3].mxu0 }
 0x21c   :  { %172 = vst.msk [vmem:[%s299_s5] sm:$0xff] %vm27_vm0, %v158_v6  ;;  %v161_v10 = vadd.f32 %v182_v2, %v160_v9 }
 0x21d   :  { %175 = vst.msk [vmem:[%s299_s5 + $0x18] sm:$0x3f] %vm37_vm1, %v169_v8 }
 0x21e   :  { %173 = vst.msk [vmem:[%s299_s5 + $0x8] sm:$0xff] %vm27_vm0, %v161_v10 }

// kernel: meant_forward.25
= control target key start
LH: loop header
LB: loop body
LE: loop exit
PB: predicated region body
PF: predicated region fallthrough
CT: control target
= control target key end

     0   :  { %vm30_vm0 = vcmask 261120   ;;  %vm40_vm1 = vcmask 259072   ;;  %s322_s0 = inlined_call_operand.vmem [shape: f32[30,32], index: 0, kind: input, shape index: {}]   ;;  %s323_s4 = inlined_call_operand.vmem [shape: f32[32,32], index: 4, kind: input, shape index: {}]   ;;  %s324_s2 = inlined_call_operand.vmem [shape: f32[1,32], index: 2, kind: input, shape index: {}]   ;;  %s325_s3 = inlined_call_operand.vmem [shape: f32[1,32], index: 3, kind: input, shape index: {}]   ;;  %s326_s5 = inlined_call_operand.vmem [shape: f32[1,32], index: 5, kind: input, shape index: {}]   ;;  %s327_s1 = inlined_call_operand.vmem [shape: f32[30,32], index: 1, kind: input, shape index: {}]   ;;  %s328_s6 = inlined_call_operand.vmem [shape: f32[30,32], index: 6, kind: output, shape index: {}]  }
   0x1   :  { %v24_v0 = vld [vmem:[%s322_s0] sm:$0xff]  ;;  %v26_v1 = vld [vmem:[%s322_s0 + $0x10] sm:$0xff]  ;;  %v25_v2 = vld [vmem:[%s322_s0 + $0x8] sm:$0xff] }
   0x2   :  { %v31_v3 = vsel %vm30_vm0, %v24_v0, 0.0  ;;  %v37_v4 = vsel %vm30_vm0, %v26_v1, 0.0  ;;  %v27_v5 = vld [vmem:[%s322_s0 + $0x18] sm:$0x3f]  ;;  %v34_v6 = vsel %vm30_vm0, %v25_v2, 0.0  ;;  %v105_v28 = vld [vmem:[%s323_s4] sm:$0xff] }
   0x3   :  { %32 = vadd.xlane.f32.xlu0 %v31_v3  ;;  %38 = vadd.xlane.f32.xlu1 %v37_v4  ;;  %v41_v7 = vsel %vm40_vm1, %v27_v5, 0.0  ;;  %v106_v29 = vld [vmem:[%s323_s4 + $0x8] sm:$0xff]  ;;  %v107_v31 = vld [vmem:[%s323_s4 + $0x10] sm:$0xff]  ;;  %v108_v32 = vld [vmem:[%s323_s4 + $0x18] sm:$0xff] }
   0x4   :  { %v112_v30 = vpack.c.bf16 %v106_v29, %v105_v28  ;;  %v113_v33 = vpack.c.bf16 %v108_v32, %v107_v31  ;;  %v191_v48 = vld [vmem:[%s324_s2] ss:$0 sm:$0xff]  ;;  %v177_v4 = vld [vmem:[%s327_s1 + $0x10] sm:$0xff] }
   0x5   :  { %v192_v54 = vld [vmem:[%s325_s3] ss:$0 sm:$0xff] }
   0x6   :  { %200 = vmatprep.subr.bf16.mxu0 %v112_v30 }
   0x7   :  { %35 = vadd.xlane.f32.xlu0 %v34_v6  ;;  %42 = vadd.xlane.f32.xlu1 %v41_v7  ;;  %v175_v7 = vld [vmem:[%s327_s1] sm:$0xff] }
   0x8   :  { %201 = vmatpush3.bf16.msra.mxu0 %v112_v30 }
   0x9   :  { %202 = vmatprep.subr.bf16.mxu0 %v113_v33 }
   0xc   :  { %203 = vmatpush3.bf16.msra.mxu0 %v113_v33 }
  0x90   :  { %v33_v8 = vpop.xlane.xlu0 %32  ;;  %v39_v9 = vpop.xlane.xlu1 %38 }
  0x91   :  { %v45_v10 = vmul.f32 0.03125, %v33_v8  ;;  %v47_v11 = vmul.f32 0.03125, %v39_v9 }
  0x93   :  { %v49_v12 = vsub.f32 %v24_v0, %v45_v10  ;;  %v51_v13 = vsub.f32 %v26_v1, %v47_v11  ;;  %v178_v10 = vld [vmem:[%s327_s1 + $0x18] sm:$0x3f] }
  0x94   :  { %v36_v14 = vpop.xlane.xlu0 %35  ;;  %v43_v15 = vpop.xlane.xlu1 %42 }
  0x95   :  { %v46_v16 = vmul.f32 0.03125, %v36_v14  ;;  %v48_v17 = vmul.f32 0.03125, %v43_v15  ;;  %v53_v18 = vmul.f32 %v49_v12, %v49_v12  ;;  %v55_v19 = vmul.f32 %v51_v13, %v51_v13  ;;  %v176_v14 = vld [vmem:[%s327_s1 + $0x8] sm:$0xff] }
  0x97   :  { %v50_v20 = vsub.f32 %v25_v2, %v46_v16  ;;  %v52_v21 = vsub.f32 %v27_v5, %v48_v17  ;;  %v57_v22 = vsel %vm30_vm0, %v53_v18, 0.0  ;;  %v63_v23 = vsel %vm30_vm0, %v55_v19, 0.0  ;;  %v193_v2 = vld [vmem:[%s326_s5] ss:$0 sm:$0xff] }
  0x98   :  { %58 = vadd.xlane.f32.xlu0 %v57_v22 }
  0x99   :  { %v54_v24 = vmul.f32 %v50_v20, %v50_v20  ;;  %v56_v25 = vmul.f32 %v52_v21, %v52_v21 }
  0x9b   :  { %v60_v26 = vsel %vm30_vm0, %v54_v24, 0.0  ;;  %v66_v27 = vsel %vm40_vm1, %v56_v25, 0.0 }
  0x9c   :  { %64 = vadd.xlane.f32.xlu0 %v63_v23  ;;  %61 = vadd.xlane.f32.xlu1 %v60_v26 }
  0xa0   :  { %67 = vadd.xlane.f32.xlu1 %v66_v27 }
 0x125   :  { %v59_v34 = vpop.xlane.xlu0 %58 }
 0x126   :  { %v69_v35 = vmul.f32 0.03125, %v59_v34 }
 0x128   :  { %v73_v36 = vadd.f32 1e-05, %v69_v35 }
 0x129   :  { %v62_v37 = vpop.xlane.xlu1 %61  ;;  %v65_v38 = vpop.xlane.xlu0 %64 }
 0x12a   :  { %208 = vrsqrt.f32 %v73_v36  ;;  %v70_v39 = vmul.f32 0.03125, %v62_v37  ;;  %v71_v40 = vmul.f32 0.03125, %v65_v38 }
 0x12c   :  { %v74_v41 = vadd.f32 1e-05, %v70_v39  ;;  %v75_v42 = vadd.f32 1e-05, %v71_v40 }
 0x12d   :  { %v68_v43 = vpop.xlane.xlu1 %67 }
 0x12e   :  { %210 = vrsqrt.f32 %v74_v41  ;;  %v72_v44 = vmul.f32 0.03125, %v68_v43 }
 0x12f   :  { %212 = vrsqrt.f32 %v75_v42 }
 0x130   :  { %v76_v45 = vadd.f32 1e-05, %v72_v44 }
 0x132   :  { %214 = vrsqrt.f32 %v76_v45 }
 0x134   :  { %v209_v46 = vpop.eup %208 }
 0x135   :  { %v81_v47 = vmul.f32 %v209_v46, %v49_v12 }
 0x137   :  { %v91_v52 = vmul.f32 %v191_v48, %v81_v47 }
 0x138   :  { %v211_v49 = vpop.eup %210 }
 0x139   :  { %v213_v50 = vpop.eup %212  ;;  %v82_v51 = vmul.f32 %v211_v49, %v50_v20  ;;  %v101_v58 = vadd.f32 %v192_v54, %v91_v52 }
 0x13a   :  { %v83_v53 = vmul.f32 %v213_v50, %v51_v13 }
 0x13b   :  { %v92_v55 = vmul.f32 %v191_v48, %v82_v51 }
 0x13c   :  { %v215_v56 = vpop.eup %214  ;;  %v93_v60 = vmul.f32 %v191_v48, %v83_v53 }
 0x13d   :  { %v84_v57 = vmul.f32 %v215_v56, %v52_v21  ;;  %v102_v59 = vadd.f32 %v192_v54, %v92_v55 }
 0x13e   :  { %v103_v63 = vadd.f32 %v192_v54, %v93_v60 }
 0x13f   :  { %v110_v61 = vpack.c.bf16 %v102_v59, %v101_v58  ;;  %v94_v62 = vmul.f32 %v191_v48, %v84_v57 }
 0x141   :  { %204 = vmatprep.mubr.msk.bf16.mxu0 %vm30_vm0, %v110_v61  ;;  %v104_v0 = vadd.f32 %v192_v54, %v94_v62 }
 0x143   :  { %v111_v1 = vpack.c.bf16 %v104_v0, %v103_v63 }
 0x145   :  { %205 = vmatmul.mubr.msk.bf16.vlgmr.msra.gmra.mrb[0].mxu0 %vm30_vm0, %v111_v1 }
 0x218   :  { %v206_v3 = vpop.f32.mrb[0].mxu0 }
 0x219   :  { %v169_v5 = vadd.f32 %v206_v3, %v193_v2  ;;  %v160_v6 = vpop.f32.mrb[1].mxu0 }
 0x21a   :  { %v161_v8 = vadd.f32 %v193_v2, %v160_v6  ;;  %v207_v9 = vpop.f32.mrb[2].mxu0 }
 0x21b   :  { %v181_v11 = vadd.f32 %v177_v4, %v169_v5  ;;  %v172_v12 = vadd.f32 %v207_v9, %v193_v2  ;;  %v163_v13 = vpop.f32.mrb[3].mxu0 }
 0x21c   :  { %v179_v15 = vadd.f32 %v175_v7, %v161_v8  ;;  %v164_v16 = vadd.f32 %v193_v2, %v163_v13 }
 0x21d   :  { %185 = vst.msk [vmem:[%s328_s6 + $0x10] sm:$0xff] %vm30_vm0, %v181_v11  ;;  %v182_v17 = vadd.f32 %v178_v10, %v172_v12 }
 0x21e   :  { %183 = vst.msk [vmem:[%s328_s6] sm:$0xff] %vm30_vm0, %v179_v15  ;;  %v180_v18 = vadd.f32 %v176_v14, %v164_v16 }
 0x21f   :  { %186 = vst.msk [vmem:[%s328_s6 + $0x18] sm:$0x3f] %vm40_vm1, %v182_v17 }
 0x220   :  { %184 = vst.msk [vmem:[%s328_s6 + $0x8] sm:$0xff] %vm30_vm0, %v180_v18 }

// kernel: meant_forward.26
= control target key start
LH: loop header
LB: loop body
LE: loop exit
PB: predicated region body
PF: predicated region fallthrough
CT: control target
= control target key end

     0   :  { %v217_v0 = vmov 0.0   ;;  %vm218_vm0 = vmmov 0   ;;  %vm48_vm1 = vcmask 1041408   ;;  %vm44_vm2 = vcmask 556032   ;;  %s351_s1 = inlined_call_operand.vmem [shape: f32[68,68], index: 1, kind: input, shape index: {}]   ;;  %s352_s3 = inlined_call_operand.vmem [shape: f32[68,204], index: 3, kind: input, shape index: {}]   ;;  %s353_s0 = inlined_call_operand.vmem [shape: f32[6,68], index: 0, kind: input, shape index: {}]   ;;  %s354_s2 = inlined_call_operand.vmem [shape: f32[1,68], index: 2, kind: input, shape index: {}]   ;;  %s355_s4 = inlined_call_operand.vmem [shape: f32[1,204], index: 4, kind: input, shape index: {}]   ;;  %s356_s5 = inlined_call_operand.vmem [shape: f32[6,204], index: 5, kind: output, shape index: {}]  }
   0x1   :  { %200 = vmatprep.subr.bf16.mxu0 %v217_v0  ;;  %v22_v1 = vld [vmem:[%s351_s1] sm:$0xff]  ;;  %v23_v2 = vld [vmem:[%s351_s1 + $0x8] sm:$0xff]  ;;  %v24_v3 = vld [vmem:[%s351_s1 + $0x10] sm:$0xff]  ;;  %210 = vmatprep.mubr.msk.bf16.mxu0 %vm218_vm0, %v217_v0  ;;  %v219_v47 = vmov 0   ;;  %v123_v55 = vlaneseq  ;;  %vm184_vm3 = vcmask 619520  }
   0x2   :  { %v33_v4 = vpack.c.bf16 %v23_v2, %v22_v1  ;;  %v25_v5 = vld [vmem:[%s351_s1 + $0x18] sm:$0xff]  ;;  %v26_v6 = vld [vmem:[%s351_s1 + $0x20] sm:$0xff]  ;;  %v27_v8 = vld [vmem:[%s351_s1 + $0x28] sm:$0xff]  ;;  %174 = vmatprep.mubr.bf16.mxu1 %v219_v47 }
   0x3   :  { %v34_v7 = vpack.c.bf16 %v25_v5, %v24_v3  ;;  %v93_v9 = vld [vmem:[%s352_s3 + $0x8] sm:$0xff]  ;;  %v95_v10 = vld [vmem:[%s352_s3 + $0x18] sm:$0xff]  ;;  %v92_v12 = vld [vmem:[%s352_s3] sm:$0xff]  ;;  %v35_v22 = vpack.c.bf16 %v27_v8, %v26_v6  ;;  %v124_v56 = vshrl.u32 %v123_v55, 7 }
   0x4   :  { %201 = vmatpush3.bf16.msra.mxu0 %v33_v4  ;;  %v113_v11 = vpack.c.bf16 %v95_v10, %v93_v9  ;;  %v94_v13 = vld [vmem:[%s352_s3 + $0x10] sm:$0xff]  ;;  %v97_v14 = vld [vmem:[%s352_s3 + $0x28] sm:$0xff]  ;;  %v99_v16 = vld [vmem:[%s352_s3 + $0x38] sm:$0xff] }
   0x5   :  { %202 = vmatprep.subr.bf16.mxu0 %v217_v0  ;;  %v112_v15 = vpack.c.bf16 %v94_v13, %v92_v12  ;;  %v96_v17 = vld [vmem:[%s352_s3 + $0x20] sm:$0xff]  ;;  %v98_v18 = vld [vmem:[%s352_s3 + $0x30] sm:$0xff]  ;;  %v115_v19 = vpack.c.bf16 %v99_v16, %v97_v14  ;;  %v101_v20 = vld [vmem:[%s352_s3 + $0x48] sm:$0xff]  ;;  %v125_v57 = vsub.s32 0, %v124_v56  ;;  %v129_v59 = vsub.s32 1, %v124_v56 }
   0x6   :  { %142 = vmatprep.subr.bf16.mxu1 %v113_v11  ;;  %v103_v21 = vld [vmem:[%s352_s3 + $0x58] sm:$0xff]  ;;  %v28_v23 = vld [vmem:[%s351_s1 + $0x30] sm:$0xff]  ;;  %v114_v24 = vpack.c.bf16 %v98_v18, %v96_v17  ;;  %v100_v27 = vld [vmem:[%s352_s3 + $0x40] sm:$0xff] }
   0x7   :  { %143 = vmatpush1.bf16.msra.mxu1 %v112_v15  ;;  %v29_v25 = vld [vmem:[%s351_s1 + $0x38] sm:$0xff]  ;;  %v117_v26 = vpack.c.bf16 %v103_v21, %v101_v20  ;;  %v102_v28 = vld [vmem:[%s352_s3 + $0x50] sm:$0xff]  ;;  %v30_v29 = vld [vmem:[%s351_s1 + $0x40] sm:$0xf] }
   0x8   :  { %203 = vmatpush3.bf16.msra.mxu0 %v34_v7  ;;  %144 = vmatprep.subr.bf16.mxu1 %v115_v19  ;;  %v105_v30 = vld [vmem:[%s352_s3 + $0x68] sm:$0xff]  ;;  %v107_v31 = vld [vmem:[%s352_s3 + $0x78] sm:$0xff]  ;;  %v36_v32 = vpack.c.bf16 %v29_v25, %v28_v23  ;;  %v116_v33 = vpack.c.bf16 %v102_v28, %v100_v27  ;;  %v37_v34 = vpack.c.bf16 %v30_v29, %v30_v29  ;;  %v104_v36 = vld [vmem:[%s352_s3 + $0x60] sm:$0xff] }
   0x9   :  { %204 = vmatprep.subr.bf16.mxu0 %v217_v0  ;;  %v119_v35 = vpack.c.bf16 %v107_v31, %v105_v30  ;;  %v106_v37 = vld [vmem:[%s352_s3 + $0x70] sm:$0xff]  ;;  %v21_v38 = vld [vmem:[%s353_s0] sm:$0x3f]  ;;  %v109_v42 = vld [vmem:[%s352_s3 + $0x88] sm:$0xf] }
   0xa   :  { %v118_v39 = vpack.c.bf16 %v106_v37, %v104_v36  ;;  %v50_v40 = vsel %vm48_vm1, %v37_v34, 0  ;;  %v32_v41 = vpack.c.bf16 %v21_v38, %v21_v38  ;;  %v108_v43 = vld [vmem:[%s352_s3 + $0x80] sm:$0xf]  ;;  %v121_v44 = vpack.c.bf16 %v109_v42, %v109_v42 }
   0xb   :  { %145 = vmatpush1.bf16.msra.mxu1 %v114_v24  ;;  %v120_v45 = vpack.c.bf16 %v108_v43, %v108_v43  ;;  %v190_v48 = vld [vmem:[%s354_s2] ss:$0 sm:$0xff] }
   0xc   :  { %205 = vmatpush3.bf16.msra.mxu0 %v35_v22  ;;  %146 = vmatprep.subr.bf16.mxu1 %v117_v26  ;;  %v110_v58 = vld [vmem:[%s355_s4] sm:$0x3] }
   0xd   :  { %206 = vmatprep.subr.bf16.mxu0 %v217_v0  ;;  %v137_v46 = vsel %vm48_vm1, %v120_v45, 0  ;;  %v126_v60 = vrot.slane %v110_v58, %v125_v57  ;;  %v130_v61 = vrot.slane %v110_v58, %v129_v59 }
   0xf   :  { %147 = vmatpush1.bf16.msra.mxu1 %v116_v33 }
  0x10   :  { %207 = vmatpush3.bf16.msra.mxu0 %v36_v32  ;;  %148 = vmatprep.subr.bf16.mxu1 %v119_v35 }
  0x11   :  { %208 = vmatprep.subr.bf16.mxu0 %v217_v0 }
  0x13   :  { %149 = vmatpush1.bf16.msra.mxu1 %v118_v39 }
  0x14   :  { %209 = vmatpush3.bf16.msra.mxu0 %v50_v40  ;;  %192 = vmatprep.subr.msk.bf16.mxu1 %vm48_vm1, %v121_v44 }
  0x17   :  { %211 = vmatmul.mubr.msk.bf16.vlgmr.msra.gmra.mrb[0].mxu0 %vm44_vm2, %v32_v41  ;;  %151 = vmatpush1.bf16.msra.mxu1 %v137_v46 }
  0xea   :  { %v86_v49 = vpop.f32.mrb[0].mxu0 }
  0xeb   :  { %v87_v50 = vadd.f32 %v190_v48, %v86_v49  ;;  %v212_v51 = vpop.f32.mrb[1].mxu0 }
  0xec   :  { %v89_v52 = vpop.f32.mrb[2].mxu0 }
  0xed   :  { %v111_v53 = vpack.c.bf16 %v87_v50, %v87_v50  ;;  %v213_v54 = vpop.f32.mrb[3].mxu0 }
  0xef   :  { %193 = vmatmul.mubr.msk.bf16.vlgmr.msra.gmra.mrb[0].mxu1 %vm44_vm2, %v111_v53 }
 0x1c2   :  { %v176_v62 = vpop.f32.mrb[0].mxu1 }
 0x1c3   :  { %v177_v63 = vadd.f32 %v176_v62, %v126_v60  ;;  %v178_v0 = vpop.f32.mrb[1].mxu1 }
 0x1c4   :  { %v179_v1 = vadd.f32 %v178_v0, %v130_v61  ;;  %v180_v2 = vpop.f32.mrb[2].mxu1 }
 0x1c5   :  { %183 = vst [vmem:[%s356_s5] sm:$0x3f] %v177_v63  ;;  %v181_v3 = vpop.f32.mrb[3].mxu1 }
 0x1c6   :  { %185 = vst.msk [vmem:[%s356_s5 + $0x8] sm:$0x3f] %vm184_vm3, %v179_v1 }

// kernel: meant_forward.28
= control target key start
LH: loop header
LB: loop body
LE: loop exit
PB: predicated region body
PF: predicated region fallthrough
CT: control target
= control target key end

     0   :  { %v212_v0 = vmov 0.0   ;;  %vm213_vm0 = vmmov 0   ;;  %vm48_vm1 = vcmask 1041408   ;;  %vm44_vm2 = vcmask 556032   ;;  %s312_s1 = inlined_call_operand.vmem [shape: f32[68,68], index: 1, kind: input, shape index: {}]   ;;  %s313_s3 = inlined_call_operand.vmem [shape: f32[68,68], index: 3, kind: input, shape index: {}]   ;;  %s314_s0 = inlined_call_operand.vmem [shape: f32[6,68], index: 0, kind: input, shape index: {}]   ;;  %s315_s2 = inlined_call_operand.vmem [shape: f32[1,68], index: 2, kind: input, shape index: {}]   ;;  %s316_s4 = inlined_call_operand.vmem [shape: f32[1,68], index: 4, kind: input, shape index: {}]   ;;  %s317_s5 = inlined_call_operand.vmem [shape: f32[6,68], index: 5, kind: output, shape index: {}]  }
   0x1   :  { %182 = vmatprep.subr.bf16.mxu0 %v212_v0  ;;  %v22_v1 = vld [vmem:[%s312_s1] sm:$0xff]  ;;  %v23_v2 = vld [vmem:[%s312_s1 + $0x8] sm:$0xff]  ;;  %v24_v3 = vld [vmem:[%s312_s1 + $0x10] sm:$0xff]  ;;  %192 = vmatprep.mubr.msk.bf16.mxu0 %vm213_vm0, %v212_v0  ;;  %vm160_vm3 = vcmask 553984  }
   0x2   :  { %v33_v4 = vpack.c.bf16 %v23_v2, %v22_v1  ;;  %v25_v5 = vld [vmem:[%s312_s1 + $0x18] sm:$0xff]  ;;  %196 = vmatprep.subr.bf16.mxu1 %v212_v0  ;;  %206 = vmatprep.mubr.msk.bf16.mxu1 %vm213_vm0, %v212_v0  ;;  %v26_v7 = vld [vmem:[%s312_s1 + $0x20] sm:$0xff]  ;;  %v93_v9 = vld [vmem:[%s313_s3 + $0x8] sm:$0xff] }
   0x3   :  { %v34_v6 = vpack.c.bf16 %v25_v5, %v24_v3  ;;  %v92_v8 = vld [vmem:[%s313_s3] sm:$0xff]  ;;  %v27_v10 = vld [vmem:[%s312_s1 + $0x28] sm:$0xff]  ;;  %v94_v12 = vld [vmem:[%s313_s3 + $0x10] sm:$0xff] }
   0x4   :  { %183 = vmatpush3.bf16.msra.mxu0 %v33_v4  ;;  %v103_v11 = vpack.c.bf16 %v93_v9, %v92_v8  ;;  %v95_v13 = vld [vmem:[%s313_s3 + $0x18] sm:$0xff]  ;;  %v35_v15 = vpack.c.bf16 %v27_v10, %v26_v7  ;;  %v96_v16 = vld [vmem:[%s313_s3 + $0x20] sm:$0xff]  ;;  %v97_v17 = vld [vmem:[%s313_s3 + $0x28] sm:$0xff] }
   0x5   :  { %184 = vmatprep.subr.bf16.mxu0 %v212_v0  ;;  %v104_v14 = vpack.c.bf16 %v95_v13, %v94_v12  ;;  %v28_v18 = vld [vmem:[%s312_s1 + $0x30] sm:$0xff]  ;;  %v29_v19 = vld [vmem:[%s312_s1 + $0x38] sm:$0xff]  ;;  %v30_v20 = vld [vmem:[%s312_s1 + $0x40] sm:$0xf]  ;;  %v105_v21 = vpack.c.bf16 %v97_v17, %v96_v16 }
   0x6   :  { %197 = vmatpush3.bf16.msra.mxu1 %v103_v11  ;;  %v36_v22 = vpack.c.bf16 %v29_v19, %v28_v18  ;;  %v98_v23 = vld [vmem:[%s313_s3 + $0x30] sm:$0xff]  ;;  %v99_v24 = vld [vmem:[%s313_s3 + $0x38] sm:$0xff]  ;;  %v37_v25 = vpack.c.bf16 %v30_v20, %v30_v20  ;;  %v21_v27 = vld [vmem:[%s314_s0] sm:$0x3f] }
   0x7   :  { %198 = vmatprep.subr.bf16.mxu1 %v212_v0  ;;  %v106_v26 = vpack.c.bf16 %v99_v24, %v98_v23  ;;  %v32_v29 = vpack.c.bf16 %v21_v27, %v21_v27  ;;  %v100_v30 = vld [vmem:[%s313_s3 + $0x40] sm:$0xf] }
   0x8   :  { %185 = vmatpush3.bf16.msra.mxu0 %v34_v6  ;;  %v50_v28 = vsel %vm48_vm1, %v37_v25, 0  ;;  %v107_v31 = vpack.c.bf16 %v100_v30, %v100_v30  ;;  %v166_v33 = vld [vmem:[%s315_s2] ss:$0 sm:$0xff] }
   0x9   :  { %186 = vmatprep.subr.bf16.mxu0 %v212_v0  ;;  %v168_v40 = vld [vmem:[%s316_s4] ss:$0 sm:$0xff] }
   0xa   :  { %199 = vmatpush3.bf16.msra.mxu1 %v104_v14  ;;  %v118_v32 = vsel %vm48_vm1, %v107_v31, 0 }
   0xb   :  { %200 = vmatprep.subr.bf16.mxu1 %v212_v0 }
   0xc   :  { %187 = vmatpush3.bf16.msra.mxu0 %v35_v15 }
   0xd   :  { %188 = vmatprep.subr.bf16.mxu0 %v212_v0 }
   0xe   :  { %201 = vmatpush3.bf16.msra.mxu1 %v105_v21 }
   0xf   :  { %202 = vmatprep.subr.bf16.mxu1 %v212_v0 }
  0x10   :  { %189 = vmatpush3.bf16.msra.mxu0 %v36_v22 }
  0x11   :  { %190 = vmatprep.subr.bf16.mxu0 %v212_v0 }
  0x12   :  { %203 = vmatpush3.bf16.msra.mxu1 %v106_v26 }
  0x13   :  { %204 = vmatprep.subr.bf16.mxu1 %v212_v0 }
  0x14   :  { %191 = vmatpush3.bf16.msra.mxu0 %v50_v28 }
  0x16   :  { %205 = vmatpush3.bf16.msra.mxu1 %v118_v32 }
  0x17   :  { %193 = vmatmul.mubr.msk.bf16.vlgmr.msra.gmra.mrb[0].mxu0 %vm44_vm2, %v32_v29 }
  0xea   :  { %v86_v34 = vpop.f32.mrb[0].mxu0 }
  0xeb   :  { %v87_v35 = vadd.f32 %v166_v33, %v86_v34  ;;  %v194_v36 = vpop.f32.mrb[1].mxu0 }
  0xec   :  { %v89_v37 = vpop.f32.mrb[2].mxu0 }
  0xed   :  { %v102_v38 = vpack.c.bf16 %v87_v35, %v87_v35  ;;  %v195_v39 = vpop.f32.mrb[3].mxu0 }
  0xef   :  { %207 = vmatmul.mubr.msk.bf16.vlgmr.msra.gmra.mrb[0].mxu1 %vm44_vm2, %v102_v38 }
 0x1c2   :  { %v154_v41 = vpop.f32.mrb[0].mxu1 }
 0x1c3   :  { %v155_v42 = vadd.f32 %v168_v40, %v154_v41  ;;  %v208_v43 = vpop.f32.mrb[1].mxu1 }
 0x1c4   :  { %v157_v44 = vpop.f32.mrb[2].mxu1 }
 0x1c5   :  { %161 = vst.msk [vmem:[%s317_s5] sm:$0x3f] %vm160_vm3, %v155_v42  ;;  %v209_v45 = vpop.f32.mrb[3].mxu1 }

// kernel: meant_forward.29
= control target key start
LH: loop header
LB: loop body
LE: loop exit
PB: predicated region body
PF: predicated region fallthrough
CT: control target
= control target key end

     0   :  { %vm24_vm0 = vcmask 553984   ;;  %v168_v10 = vmov 0.0   ;;  %vm79_vm1 = vcmask 1041408   ;;  %vm169_vm2 = vmmov 0   ;;  %s242_s0 = inlined_call_operand.vmem [shape: f32[6,68], index: 0, kind: input, shape index: {}]   ;;  %s243_s3 = inlined_call_operand.vmem [shape: f32[68,3], index: 3, kind: input, shape index: {}]   ;;  %s244_s1 = inlined_call_operand.vmem [shape: f32[1,68], index: 1, kind: input, shape index: {}]   ;;  %s245_s2 = inlined_call_operand.vmem [shape: f32[1,68], index: 2, kind: input, shape index: {}]   ;;  %s246_s4 = inlined_call_operand.vmem [shape: f32[1,3], index: 4, kind: input, shape index: {}]   ;;  %s247_s5 = inlined_call_operand.vmem [shape: f32[6,3], index: 5, kind: output, shape index: {}]  }
   0x1   :  { %v21_v0 = vld [vmem:[%s242_s0] sm:$0x3f]  ;;  %v54_v8 = vld [vmem:[%s243_s3 + $0x8] sm:$0xff]  ;;  %146 = vmatprep.subr.bf16.mxu0 %v168_v10  ;;  %v55_v11 = vld [vmem:[%s243_s3 + $0x10] sm:$0xff]  ;;  %156 = vmatprep.mubr.msk.bf16.mxu0 %vm169_vm2, %v168_v10  ;;  %vm75_vm3 = vcmask 556032   ;;  %vm129_vm4 = vcmask 21504  }
   0x2   :  { %v25_v1 = vsel %vm24_vm0, %v21_v0, 0.0  ;;  %v53_v7 = vld [vmem:[%s243_s3] sm:$0xff]  ;;  %v56_v12 = vld [vmem:[%s243_s3 + $0x18] sm:$0xff]  ;;  %v58_v15 = vld [vmem:[%s243_s3 + $0x28] sm:$0xff] }
   0x3   :  { %26 = vadd.xlane.f32.xlu0 %v25_v1  ;;  %v64_v9 = vpack.c.bf16 %v54_v8, %v53_v7  ;;  %v65_v13 = vpack.c.bf16 %v56_v12, %v55_v11  ;;  %v57_v14 = vld [vmem:[%s243_s3 + $0x20] sm:$0xff]  ;;  %v59_v17 = vld [vmem:[%s243_s3 + $0x30] sm:$0xff]  ;;  %v60_v18 = vld [vmem:[%s243_s3 + $0x38] sm:$0xff] }
   0x4   :  { %v66_v16 = vpack.c.bf16 %v58_v15, %v57_v14  ;;  %v67_v19 = vpack.c.bf16 %v60_v18, %v59_v17  ;;  %v61_v20 = vld [vmem:[%s243_s3 + $0x40] sm:$0xf] }
   0x5   :  { %147 = vmatpush3.bf16.msra.mxu0 %v64_v9  ;;  %v68_v21 = vpack.c.bf16 %v61_v20, %v61_v20  ;;  %v135_v27 = vld [vmem:[%s244_s1] ss:$0 sm:$0xff] }
   0x6   :  { %148 = vmatprep.subr.bf16.mxu0 %v168_v10  ;;  %v136_v29 = vld [vmem:[%s245_s2] ss:$0 sm:$0xff] }
   0x7   :  { %v81_v22 = vsel %vm79_vm1, %v68_v21, 0  ;;  %v137_v33 = vld [vmem:[%s246_s4] ss:$0 sm:$0xff] }
   0x9   :  { %149 = vmatpush3.bf16.msra.mxu0 %v65_v13 }
   0xa   :  { %150 = vmatprep.subr.bf16.mxu0 %v168_v10 }
   0xd   :  { %151 = vmatpush3.bf16.msra.mxu0 %v66_v16 }
   0xe   :  { %152 = vmatprep.subr.bf16.mxu0 %v168_v10 }
  0x11   :  { %153 = vmatpush3.bf16.msra.mxu0 %v67_v19 }
  0x12   :  { %154 = vmatprep.subr.bf16.mxu0 %v168_v10 }
  0x15   :  { %155 = vmatpush3.bf16.msra.mxu0 %v81_v22 }
  0x90   :  { %v27_v2 = vpop.xlane.xlu0 %26 }
  0x91   :  { %v29_v3 = vmul.f32 0.014705882, %v27_v2 }
  0x93   :  { %v30_v4 = vsub.f32 %v21_v0, %v29_v3 }
  0x95   :  { %v31_v5 = vmul.f32 %v30_v4, %v30_v4 }
  0x97   :  { %v32_v6 = vsel %vm24_vm0, %v31_v5, 0.0 }
  0x98   :  { %33 = vadd.xlane.f32.xlu0 %v32_v6 }
 0x125   :  { %v34_v23 = vpop.xlane.xlu0 %33 }
 0x126   :  { %v35_v24 = vmul.f32 0.014705882, %v34_v23 }
 0x128   :  { %v36_v25 = vadd.f32 1e-05, %v35_v24 }
 0x12a   :  { %162 = vrsqrt.f32 %v36_v25 }
 0x134   :  { %v163_v26 = vpop.eup %162 }
 0x135   :  { %v38_v28 = vmul.f32 %v163_v26, %v30_v4 }
 0x137   :  { %v45_v30 = vmul.f32 %v135_v27, %v38_v28 }
 0x139   :  { %v52_v31 = vadd.f32 %v136_v29, %v45_v30 }
 0x13b   :  { %v63_v32 = vpack.c.bf16 %v52_v31, %v52_v31 }
 0x13d   :  { %157 = vmatmul.mubr.msk.bf16.vlgmr.msra.gmra.mrb[0].mxu0 %vm75_vm3, %v63_v32 }
 0x210   :  { %v117_v34 = vpop.f32.mrb[0].mxu0 }
 0x211   :  { %v118_v35 = vadd.f32 %v137_v33, %v117_v34  ;;  %v158_v36 = vpop.f32.mrb[1].mxu0 }
 0x212   :  { %v120_v37 = vpop.f32.mrb[2].mxu0 }
 0x213   :  { %v139_v38 = vmul.f32 -1.442695, %v118_v35  ;;  %v159_v39 = vpop.f32.mrb[3].mxu0 }
 0x215   :  { %164 = vpow2.f32 %v139_v38 }
 0x21f   :  { %v165_v40 = vpop.eup %164 }
 0x220   :  { %v126_v41 = vadd.f32 1.0, %v165_v40 }
 0x222   :  { %166 = vrcp.f32 %v126_v41 }
 0x22c   :  { %v167_v42 = vpop.eup %166 }
 0x22d   :  { %130 = vst.msk [vmem:[%s247_s5] sm:$0x3f] %vm129_vm4, %v167_v42 }

// kernel: meant_forward.27
= control target key start
LH: loop header
LB: loop body
LE: loop exit
PB: predicated region body
PF: predicated region fallthrough
CT: control target
= control target key end

     0   :  { %v1102_v0 = vmov 0.0   ;;  %vm63_vm0 = vcmask 138240   ;;  %vm1103_vm1 = vmmov 0   ;;  %vm440_vm2 = vcmask 18432   ;;  %s1349_s1 = inlined_call_operand.vmem [shape: f32[8,3,17], index: 1, kind: input, shape index: {}]   ;;  %s1350_s0 = inlined_call_operand.vmem [shape: f32[8,3,17], index: 0, kind: input, shape index: {}]   ;;  %s1351_s2 = inlined_call_operand.vmem [shape: f32[8,3,17], index: 2, kind: input, shape index: {}]   ;;  %s1352_s3 = inlined_call_operand.vmem [shape: f32[8,3,17], index: 3, kind: output, shape index: {}]  }
   0x1   :  { %971 = vmatprep.subr.bf16.mxu0 %v1102_v0  ;;  %977 = vmatprep.subr.bf16.mxu1 %v1102_v0  ;;  %v31_v1 = vld [vmem:[%s1349_s1] sm:$0x7]  ;;  %v32_v2 = vld [vmem:[%s1349_s1 + $0x4] sm:$0x7]  ;;  %v33_v5 = vld [vmem:[%s1349_s1 + $0x8] sm:$0x7] }
   0x2   :  { %v39_v3 = vpack.c.bf16 %v31_v1, %v31_v1  ;;  %v40_v4 = vpack.c.bf16 %v32_v2, %v32_v2  ;;  %973 = vmatprep.mubr.msk.bf16.mxu0 %vm1103_vm1, %v1102_v0  ;;  %979 = vmatprep.mubr.msk.bf16.mxu1 %vm1103_vm1, %v1102_v0  ;;  %v34_v6 = vld [vmem:[%s1349_s1 + $0xc] sm:$0x7]  ;;  %v15_v9 = vld [vmem:[%s1350_s0] sm:$0x7]  ;;  %v16_v10 = vld [vmem:[%s1350_s0 + $0x4] sm:$0x7]  ;;  %v41_v11 = vpack.c.bf16 %v33_v5, %v33_v5 }
   0x3   :  { %v42_v12 = vpack.c.bf16 %v34_v6, %v34_v6  ;;  %v23_v13 = vpack.c.bf16 %v15_v9, %v15_v9  ;;  %v24_v14 = vpack.c.bf16 %v16_v10, %v16_v10  ;;  %v35_v17 = vld [vmem:[%s1349_s1 + $0x10] sm:$0x7]  ;;  %v36_v18 = vld [vmem:[%s1349_s1 + $0x14] sm:$0x7]  ;;  %v17_v19 = vld [vmem:[%s1350_s0 + $0x8] sm:$0x7] }
   0x4   :  { %v68_v7 = vsel %vm63_vm0, %v39_v3, 0  ;;  %v114_v8 = vsel %vm63_vm0, %v40_v4, 0  ;;  %v160_v15 = vsel %vm63_vm0, %v41_v11, 0  ;;  %v18_v20 = vld [vmem:[%s1350_s0 + $0xc] sm:$0x7]  ;;  %v43_v21 = vpack.c.bf16 %v35_v17, %v35_v17 }
   0x5   :  { %972 = vmatpush3.bf16.xpose.msra.mxu0 %v68_v7  ;;  %978 = vmatpush3.bf16.xpose.msra.mxu1 %v114_v8  ;;  %v206_v16 = vsel %vm63_vm0, %v42_v12, 0  ;;  %v44_v22 = vpack.c.bf16 %v36_v18, %v36_v18  ;;  %v25_v23 = vpack.c.bf16 %v17_v19, %v17_v19  ;;  %v26_v24 = vpack.c.bf16 %v18_v20, %v18_v20  ;;  %v37_v27 = vld [vmem:[%s1349_s1 + $0x18] sm:$0x7]  ;;  %v38_v28 = vld [vmem:[%s1349_s1 + $0x1c] sm:$0x7] }
   0x6   :  { %983 = vmatprep.subr.bf16.mxu0 %v1102_v0  ;;  %989 = vmatprep.subr.bf16.mxu1 %v1102_v0  ;;  %v252_v25 = vsel %vm63_vm0, %v43_v21, 0  ;;  %v19_v29 = vld [vmem:[%s1350_s0 + $0x10] sm:$0x7]  ;;  %v20_v30 = vld [vmem:[%s1350_s0 + $0x14] sm:$0x7]  ;;  %v45_v31 = vpack.c.bf16 %v37_v27, %v37_v27  ;;  %v46_v32 = vpack.c.bf16 %v38_v28, %v38_v28  ;;  %vm541_vm3 = vcmask 1040384  }
   0x7   :  { %v298_v26 = vsel %vm63_vm0, %v44_v22, 0  ;;  %v27_v33 = vpack.c.bf16 %v19_v29, %v19_v29  ;;  %v28_v34 = vpack.c.bf16 %v20_v30, %v20_v30  ;;  %v21_v37 = vld [vmem:[%s1350_s0 + $0x18] sm:$0x7]  ;;  %v22_v38 = vld [vmem:[%s1350_s0 + $0x1c] sm:$0x7]  ;;  %vm542_vm4 = vcmask 1041408  }
   0x8   :  { %v344_v35 = vsel %vm63_vm0, %v45_v31, 0  ;;  %v390_v36 = vsel %vm63_vm0, %v46_v32, 0  ;;  %v29_v39 = vpack.c.bf16 %v21_v37, %v21_v37  ;;  %v30_v40 = vpack.c.bf16 %v22_v38, %v22_v38 }
   0x9   :  { %vm537_vm5 = vcmask 23552   ;;  %vm910_vm6 = vcmask 133120  }
   0xc   :  { %974 = vmatmul.mubr.msk.bf16.vlgmr.msra.gmra.mrb[0].mxu0 %vm63_vm0, %v23_v13  ;;  %980 = vmatmul.mubr.msk.bf16.vlgmr.msra.gmra.mrb[0].mxu1 %vm63_vm0, %v24_v14 }
   0xd   :  { %984 = vmatpush3.bf16.xpose.msra.mxu0 %v160_v15  ;;  %990 = vmatpush3.bf16.xpose.msra.mxu1 %v206_v16 }
   0xe   :  { %985 = vmatprep.mubr.msk.bf16.mxu0 %vm1103_vm1, %v1102_v0  ;;  %991 = vmatprep.mubr.msk.bf16.mxu1 %vm1103_vm1, %v1102_v0 }
   0xf   :  { %995 = vmatprep.subr.bf16.mxu0 %v1102_v0  ;;  %1001 = vmatprep.subr.bf16.mxu1 %v1102_v0 }
  0x14   :  { %986 = vmatmul.mubr.msk.bf16.vlgmr.msra.gmra.mrb[4].mxu0 %vm63_vm0, %v25_v23  ;;  %992 = vmatmul.mubr.msk.bf16.vlgmr.msra.gmra.mrb[4].mxu1 %vm63_vm0, %v26_v24 }
  0x15   :  { %996 = vmatpush3.bf16.xpose.msra.mxu0 %v252_v25  ;;  %1002 = vmatpush3.bf16.xpose.msra.mxu1 %v298_v26 }
  0x16   :  { %997 = vmatprep.mubr.msk.bf16.mxu0 %vm1103_vm1, %v1102_v0  ;;  %1003 = vmatprep.mubr.msk.bf16.mxu1 %vm1103_vm1, %v1102_v0 }
  0x17   :  { %1007 = vmatprep.subr.bf16.mxu0 %v1102_v0  ;;  %1013 = vmatprep.subr.bf16.mxu1 %v1102_v0 }
  0x1c   :  { %998 = vmatmul.mubr.msk.bf16.vlgmr.msra.gmra.mrb[8].mxu0 %vm63_vm0, %v27_v33  ;;  %1004 = vmatmul.mubr.msk.bf16.vlgmr.msra.gmra.mrb[8].mxu1 %vm63_vm0, %v28_v34 }
  0x1d   :  { %1008 = vmatpush3.bf16.xpose.msra.mxu0 %v344_v35  ;;  %1014 = vmatpush3.bf16.xpose.msra.mxu1 %v390_v36 }
  0x1e   :  { %1009 = vmatprep.mubr.msk.bf16.mxu0 %vm1103_vm1, %v1102_v0  ;;  %1015 = vmatprep.mubr.msk.bf16.mxu1 %vm1103_vm1, %v1102_v0 }
  0x1f   :  { %1019 = vmatprep.subr.bf16.mxu0 %v1102_v0  ;;  %1025 = vmatprep.subr.bf16.mxu1 %v1102_v0 }
  0x24   :  { %1010 = vmatmul.mubr.msk.bf16.vlgmr.msra.gmra.mrb[12].mxu0 %vm63_vm0, %v29_v39  ;;  %1016 = vmatmul.mubr.msk.bf16.vlgmr.msra.gmra.mrb[12].mxu1 %vm63_vm0, %v30_v40 }
  0x25   :  { %1021 = vmatprep.mubr.msk.bf16.mxu0 %vm1103_vm1, %v1102_v0  ;;  %1027 = vmatprep.mubr.msk.bf16.mxu1 %vm1103_vm1, %v1102_v0 }
  0xdf   :  { %v104_v41 = vpop.f32.mrb[0].mxu0  ;;  %v150_v42 = vpop.f32.mrb[0].mxu1 }
  0xe0   :  { %v432_v43 = vmul.f32 0.24253562, %v104_v41  ;;  %v975_v44 = vpop.f32.mrb[1].mxu0  ;;  %v433_v45 = vmul.f32 0.24253562, %v150_v42  ;;  %v981_v46 = vpop.f32.mrb[1].mxu1 }
  0xe1   :  { %v107_v47 = vpop.f32.mrb[2].mxu0  ;;  %v153_v48 = vpop.f32.mrb[2].mxu1 }
  0xe2   :  { %v976_v49 = vpop.f32.mrb[3].mxu0  ;;  %v441_v50 = vsel %vm440_vm2, %v432_v43, -inf  ;;  %v982_v51 = vpop.f32.mrb[3].mxu1  ;;  %v444_v52 = vsel %vm440_vm2, %v433_v45, -inf }
  0xe3   :  { %442 = vmax.xlane.f32.xlu0 %v441_v50 }
  0xe7   :  { %445 = vmax.xlane.f32.xlu0 %v444_v52  ;;  %v196_v53 = vpop.f32.mrb[4].mxu0  ;;  %v242_v54 = vpop.f32.mrb[4].mxu1 }
  0xe8   :  { %v434_v55 = vmul.f32 0.24253562, %v196_v53  ;;  %v987_v56 = vpop.f32.mrb[5].mxu0  ;;  %v435_v57 = vmul.f32 0.24253562, %v242_v54  ;;  %v993_v58 = vpop.f32.mrb[5].mxu1 }
  0xe9   :  { %v199_v59 = vpop.f32.mrb[6].mxu0  ;;  %v245_v60 = vpop.f32.mrb[6].mxu1 }
  0xea   :  { %v988_v61 = vpop.f32.mrb[7].mxu0  ;;  %v447_v62 = vsel %vm440_vm2, %v434_v55, -inf  ;;  %v994_v63 = vpop.f32.mrb[7].mxu1  ;;  %v450_v1 = vsel %vm440_vm2, %v435_v57, -inf }
  0xeb   :  { %448 = vmax.xlane.f32.xlu1 %v447_v62  ;;  %v47_v63 = vld [vmem:[%s1351_s2] sm:$0x7] }
  0xef   :  { %v334_v2 = vpop.f32.mrb[8].mxu1  ;;  %451 = vmax.xlane.f32.xlu1 %v450_v1  ;;  %v288_v3 = vpop.f32.mrb[8].mxu0 }
  0xf0   :  { %v437_v4 = vmul.f32 0.24253562, %v334_v2  ;;  %v436_v5 = vmul.f32 0.24253562, %v288_v3  ;;  %v999_v6 = vpop.f32.mrb[9].mxu0  ;;  %v1005_v7 = vpop.f32.mrb[9].mxu1  ;;  %v55_v3 = vpack.c.bf16 %v47_v63, %v47_v63 }
  0xf1   :  { %v337_v8 = vpop.f32.mrb[10].mxu1  ;;  %v291_v9 = vpop.f32.mrb[10].mxu0 }
  0xf2   :  { %v456_v10 = vsel %vm440_vm2, %v437_v4, -inf  ;;  %v453_v11 = vsel %vm440_vm2, %v436_v5, -inf  ;;  %v1000_v12 = vpop.f32.mrb[11].mxu0  ;;  %v1006_v13 = vpop.f32.mrb[11].mxu1  ;;  %v48_v9 = vld [vmem:[%s1351_s2 + $0x4] sm:$0x7] }
  0xf3   :  { %457 = vmax.xlane.f32.xlu1 %v456_v10  ;;  %454 = vmax.xlane.f32.xlu0 %v453_v11  ;;  %v56_v10 = vpack.c.bf16 %v48_v9, %v48_v9  ;;  %v49_v12 = vld [vmem:[%s1351_s2 + $0x8] sm:$0x7] }
  0xf4   :  { %v57_v13 = vpack.c.bf16 %v49_v12, %v49_v12 }
  0xf7   :  { %v380_v14 = vpop.f32.mrb[12].mxu0  ;;  %v426_v15 = vpop.f32.mrb[12].mxu1 }
  0xf8   :  { %v438_v16 = vmul.f32 0.24253562, %v380_v14  ;;  %v439_v17 = vmul.f32 0.24253562, %v426_v15  ;;  %v1011_v18 = vpop.f32.mrb[13].mxu0  ;;  %v1017_v19 = vpop.f32.mrb[13].mxu1 }
  0xf9   :  { %v429_v20 = vpop.f32.mrb[14].mxu1  ;;  %v383_v21 = vpop.f32.mrb[14].mxu0  ;;  %v50_v15 = vld [vmem:[%s1351_s2 + $0xc] sm:$0x7]  ;;  %v51_v18 = vld [vmem:[%s1351_s2 + $0x10] sm:$0x7] }
  0xfa   :  { %v462_v22 = vsel %vm440_vm2, %v439_v17, -inf  ;;  %v459_v23 = vsel %vm440_vm2, %v438_v16, -inf  ;;  %v1012_v24 = vpop.f32.mrb[15].mxu0  ;;  %v1018_v25 = vpop.f32.mrb[15].mxu1  ;;  %v59_v19 = vpack.c.bf16 %v51_v18, %v51_v18  ;;  %v52_v21 = vld [vmem:[%s1351_s2 + $0x14] sm:$0x7] }
  0xfb   :  { %463 = vmax.xlane.f32.xlu1 %v462_v22  ;;  %460 = vmax.xlane.f32.xlu0 %v459_v23  ;;  %v60_v22 = vpack.c.bf16 %v52_v21, %v52_v21  ;;  %v53_v24 = vld [vmem:[%s1351_s2 + $0x18] sm:$0x7] }
  0xfc   :  { %v61_v25 = vpack.c.bf16 %v53_v24, %v53_v24 }
 0x170   :  { %v443_v26 = vpop.xlane.xlu0 %442 }
 0x171   :  { %v465_v27 = vsub.f32 %v432_v43, %v443_v26 }
 0x173   :  { %v473_v28 = vmul.f32 1.442695, %v465_v27  ;;  %v54_v27 = vld [vmem:[%s1351_s2 + $0x1c] sm:$0x7] }
 0x174   :  { %v446_v29 = vpop.xlane.xlu0 %445 }
 0x175   :  { %1070 = vpow2.f32 %v473_v28  ;;  %v466_v30 = vsub.f32 %v433_v45, %v446_v29  ;;  %v62_v28 = vpack.c.bf16 %v54_v27, %v54_v27 }
 0x177   :  { %v475_v31 = vmul.f32 1.442695, %v466_v30 }
 0x178   :  { %v449_v32 = vpop.xlane.xlu1 %448 }
 0x179   :  { %1072 = vpow2.f32 %v475_v31  ;;  %v467_v33 = vsub.f32 %v434_v55, %v449_v32 }
 0x17b   :  { %v477_v34 = vmul.f32 1.442695, %v467_v33 }
 0x17c   :  { %v452_v35 = vpop.xlane.xlu1 %451 }
 0x17d   :  { %1074 = vpow2.f32 %v477_v34  ;;  %v468_v36 = vsub.f32 %v435_v57, %v452_v35 }
 0x17f   :  { %v1227_v37 = vpop.eup %1070  ;;  %v479_v38 = vmul.f32 1.442695, %v468_v36 }
 0x180   :  { %v458_v39 = vpop.xlane.xlu1 %457  ;;  %v455_v40 = vpop.xlane.xlu0 %454  ;;  %v489_v41 = vsel %vm440_vm2, %v1227_v37, 0.0 }
 0x181   :  { %1076 = vpow2.f32 %v479_v38  ;;  %v470_v42 = vsub.f32 %v437_v4, %v458_v39  ;;  %v469_v43 = vsub.f32 %v436_v5, %v455_v40  ;;  %490 = vadd.xlane.f32.xlu0 %v489_v41  ;;  %v1104_v4 = vmov 65535  }
 0x182   :  { %v543_v5 = vsel %vm541_vm3, 4294967295, %v1104_v4 }
 0x183   :  { %v1231_v44 = vpop.eup %1072  ;;  %v483_v45 = vmul.f32 1.442695, %v470_v42  ;;  %v481_v46 = vmul.f32 1.442695, %v469_v43  ;;  %v544_v7 = vsel %vm542_vm4, %v543_v5, 0 }
 0x184   :  { %v492_v47 = vsel %vm440_vm2, %v1231_v44, 0.0  ;;  %v546_v8 = vand.u32 %v544_v7, %v55_v3  ;;  %v592_v11 = vand.u32 %v544_v7, %v56_v10  ;;  %v638_v14 = vand.u32 %v544_v7, %v57_v13 }
 0x185   :  { %1078 = vpow2.f32 %v483_v45  ;;  %493 = vadd.xlane.f32.xlu1 %v492_v47  ;;  %v730_v20 = vand.u32 %v544_v7, %v59_v19  ;;  %v776_v23 = vand.u32 %v544_v7, %v60_v22  ;;  %v822_v26 = vand.u32 %v544_v7, %v61_v25 }
 0x186   :  { %1080 = vpow2.f32 %v481_v46  ;;  %1020 = vmatpush3.bf16.msra.mxu0 %v546_v8  ;;  %1026 = vmatpush3.bf16.msra.mxu1 %v592_v11  ;;  %v868_v29 = vand.u32 %v544_v7, %v62_v28 }
 0x187   :  { %v1235_v48 = vpop.eup %1074  ;;  %1031 = vmatprep.subr.bf16.mxu0 %v1102_v0  ;;  %1037 = vmatprep.subr.bf16.mxu1 %v1102_v0 }
 0x188   :  { %v464_v49 = vpop.xlane.xlu1 %463  ;;  %v461_v50 = vpop.xlane.xlu0 %460  ;;  %v495_v51 = vsel %vm440_vm2, %v1235_v48, 0.0 }
 0x189   :  { %v472_v52 = vsub.f32 %v439_v17, %v464_v49  ;;  %v471_v53 = vsub.f32 %v438_v16, %v461_v50  ;;  %496 = vadd.xlane.f32.xlu0 %v495_v51  ;;  %v58_v16 = vpack.c.bf16 %v50_v15, %v50_v15 }
 0x18b   :  { %v1239_v54 = vpop.eup %1076  ;;  %v487_v55 = vmul.f32 1.442695, %v472_v52  ;;  %v485_v56 = vmul.f32 1.442695, %v471_v53  ;;  %v684_v17 = vand.u32 %v544_v7, %v58_v16 }
 0x18c   :  { %v498_v57 = vsel %vm440_vm2, %v1239_v54, 0.0 }
 0x18d   :  { %1082 = vpow2.f32 %v487_v55  ;;  %499 = vadd.xlane.f32.xlu1 %v498_v57 }
 0x18e   :  { %1084 = vpow2.f32 %v485_v56 }
 0x18f   :  { %v1243_v58 = vpop.eup %1078 }
 0x190   :  { %v1245_v59 = vpop.eup %1080  ;;  %v504_v60 = vsel %vm440_vm2, %v1243_v58, 0.0 }
 0x191   :  { %505 = vadd.xlane.f32.xlu1 %v504_v60  ;;  %v501_v61 = vsel %vm440_vm2, %v1245_v59, 0.0 }
 0x192   :  { %502 = vadd.xlane.f32.xlu0 %v501_v61 }
 0x197   :  { %v1251_v62 = vpop.eup %1082 }
 0x198   :  { %v1256_v1 = vpop.eup %1084  ;;  %v510_v2 = vsel %vm440_vm2, %v1251_v62, 0.0 }
 0x199   :  { %511 = vadd.xlane.f32.xlu1 %v510_v2  ;;  %v507_v6 = vsel %vm440_vm2, %v1256_v1, 0.0 }
 0x19a   :  { %508 = vadd.xlane.f32.xlu0 %v507_v6 }
 0x20e   :  { %v491_v30 = vpop.xlane.xlu0 %490 }
 0x20f   :  { %1086 = vrcp.f32 %v491_v30 }
 0x212   :  { %v494_v31 = vpop.xlane.xlu1 %493 }
 0x213   :  { %1088 = vrcp.f32 %v494_v31 }
 0x216   :  { %v497_v32 = vpop.xlane.xlu0 %496 }
 0x217   :  { %1090 = vrcp.f32 %v497_v32 }
 0x219   :  { %v1087_v33 = vpop.eup %1086 }
 0x21a   :  { %v521_v34 = vmul.f32 %v1087_v33, %v1227_v37  ;;  %v500_v35 = vpop.xlane.xlu1 %499 }
 0x21b   :  { %1092 = vrcp.f32 %v500_v35 }
 0x21c   :  { %v529_v36 = vpack.c.bf16 %v521_v34, %v521_v34 }
 0x21d   :  { %v1089_v38 = vpop.eup %1088 }
 0x21e   :  { %v522_v39 = vmul.f32 %v1089_v38, %v1231_v44  ;;  %v506_v40 = vpop.xlane.xlu1 %505  ;;  %1022 = vmatmul.mubr.msk.bf16.vlgmr.msra.gmra.mrb[16].mxu0 %vm537_vm5, %v529_v36 }
 0x21f   :  { %1094 = vrcp.f32 %v506_v40  ;;  %v503_v41 = vpop.xlane.xlu0 %502  ;;  %1032 = vmatpush3.bf16.msra.mxu0 %v638_v14  ;;  %1033 = vmatprep.mubr.msk.bf16.mxu0 %vm1103_vm1, %v1102_v0 }
 0x220   :  { %1096 = vrcp.f32 %v503_v41  ;;  %v530_v42 = vpack.c.bf16 %v522_v39, %v522_v39  ;;  %1043 = vmatprep.subr.bf16.mxu0 %v1102_v0 }
 0x221   :  { %v1091_v37 = vpop.eup %1090 }
 0x222   :  { %v523_v43 = vmul.f32 %v1091_v37, %v1235_v48  ;;  %1028 = vmatmul.mubr.msk.bf16.vlgmr.msra.gmra.mrb[16].mxu1 %vm537_vm5, %v530_v42 }
 0x223   :  { %1038 = vmatpush3.bf16.msra.mxu1 %v684_v17  ;;  %1039 = vmatprep.mubr.msk.bf16.mxu1 %vm1103_vm1, %v1102_v0 }
 0x224   :  { %v531_v44 = vpack.c.bf16 %v523_v43, %v523_v43  ;;  %1049 = vmatprep.subr.bf16.mxu1 %v1102_v0 }
 0x225   :  { %v1093_v45 = vpop.eup %1092 }
 0x226   :  { %v524_v46 = vmul.f32 %v1093_v45, %v1239_v54  ;;  %v512_v47 = vpop.xlane.xlu1 %511  ;;  %1034 = vmatmul.mubr.msk.bf16.vlgmr.msra.gmra.mrb[20].mxu0 %vm537_vm5, %v531_v44 }
 0x227   :  { %1098 = vrcp.f32 %v512_v47  ;;  %v509_v49 = vpop.xlane.xlu0 %508  ;;  %1044 = vmatpush3.bf16.msra.mxu0 %v730_v20  ;;  %1045 = vmatprep.mubr.msk.bf16.mxu0 %vm1103_vm1, %v1102_v0 }
 0x228   :  { %1100 = vrcp.f32 %v509_v49  ;;  %v532_v48 = vpack.c.bf16 %v524_v46, %v524_v46  ;;  %1055 = vmatprep.subr.bf16.mxu0 %v1102_v0 }
 0x229   :  { %v1095_v50 = vpop.eup %1094 }
 0x22a   :  { %v1097_v51 = vpop.eup %1096  ;;  %1040 = vmatmul.mubr.msk.bf16.vlgmr.msra.gmra.mrb[20].mxu1 %vm537_vm5, %v532_v48  ;;  %v526_v53 = vmul.f32 %v1095_v50, %v1243_v58 }
 0x22b   :  { %v525_v52 = vmul.f32 %v1097_v51, %v1245_v59  ;;  %1050 = vmatpush3.bf16.msra.mxu1 %v776_v23  ;;  %1051 = vmatprep.mubr.msk.bf16.mxu1 %vm1103_vm1, %v1102_v0 }
 0x22c   :  { %1061 = vmatprep.subr.bf16.mxu1 %v1102_v0  ;;  %v534_v55 = vpack.c.bf16 %v526_v53, %v526_v53 }
 0x22d   :  { %v533_v54 = vpack.c.bf16 %v525_v52, %v525_v52 }
 0x22f   :  { %1046 = vmatmul.mubr.msk.bf16.vlgmr.msra.gmra.mrb[24].mxu0 %vm537_vm5, %v533_v54 }
 0x230   :  { %1056 = vmatpush3.bf16.msra.mxu0 %v822_v26  ;;  %1057 = vmatprep.mubr.msk.bf16.mxu0 %vm1103_vm1, %v1102_v0 }
 0x231   :  { %v1099_v56 = vpop.eup %1098 }
 0x232   :  { %v1101_v57 = vpop.eup %1100  ;;  %1052 = vmatmul.mubr.msk.bf16.vlgmr.msra.gmra.mrb[24].mxu1 %vm537_vm5, %v534_v55  ;;  %v528_v58 = vmul.f32 %v1099_v56, %v1251_v62 }
 0x233   :  { %v527_v59 = vmul.f32 %v1101_v57, %v1256_v1  ;;  %1062 = vmatpush3.bf16.msra.mxu1 %v868_v29  ;;  %1063 = vmatprep.mubr.msk.bf16.mxu1 %vm1103_vm1, %v1102_v0 }
 0x234   :  { %v536_v61 = vpack.c.bf16 %v528_v58, %v528_v58 }
 0x235   :  { %v535_v60 = vpack.c.bf16 %v527_v59, %v527_v59 }
 0x237   :  { %1058 = vmatmul.mubr.msk.bf16.vlgmr.msra.gmra.mrb[28].mxu0 %vm537_vm5, %v535_v60 }
 0x23a   :  { %1064 = vmatmul.mubr.msk.bf16.vlgmr.msra.gmra.mrb[28].mxu1 %vm537_vm5, %v536_v61 }
 0x2f1   :  { %v582_v63 = vpop.f32.mrb[16].mxu0 }
 0x2f2   :  { %911 = vst.msk [vmem:[%s1352_s3] sm:$0x7] %vm910_vm6, %v582_v63  ;;  %v1023_v1 = vpop.f32.mrb[17].mxu0 }
 0x2f3   :  { %v585_v2 = vpop.f32.mrb[18].mxu0 }
 0x2f4   :  { %v1024_v3 = vpop.f32.mrb[19].mxu0 }
 0x2f5   :  { %v628_v4 = vpop.f32.mrb[16].mxu1 }
 0x2f6   :  { %912 = vst.msk [vmem:[%s1352_s3 + $0x4] sm:$0x7] %vm910_vm6, %v628_v4  ;;  %v1029_v0 = vpop.f32.mrb[17].mxu1 }
 0x2f7   :  { %v631_v62 = vpop.f32.mrb[18].mxu1 }
 0x2f8   :  { %v1030_v5 = vpop.f32.mrb[19].mxu1 }
 0x2f9   :  { %v674_v6 = vpop.f32.mrb[20].mxu0 }
 0x2fa   :  { %913 = vst.msk [vmem:[%s1352_s3 + $0x8] sm:$0x7] %vm910_vm6, %v674_v6  ;;  %v1035_v7 = vpop.f32.mrb[21].mxu0 }
 0x2fb   :  { %v677_v8 = vpop.f32.mrb[22].mxu0 }
 0x2fc   :  { %v1036_v9 = vpop.f32.mrb[23].mxu0 }
 0x2fd   :  { %v720_v10 = vpop.f32.mrb[20].mxu1 }
 0x2fe   :  { %914 = vst.msk [vmem:[%s1352_s3 + $0xc] sm:$0x7] %vm910_vm6, %v720_v10  ;;  %v1041_v11 = vpop.f32.mrb[21].mxu1 }
 0x2ff   :  { %v723_v12 = vpop.f32.mrb[22].mxu1 }
 0x300   :  { %v1042_v13 = vpop.f32.mrb[23].mxu1 }
 0x302   :  { %v766_v14 = vpop.f32.mrb[24].mxu0 }
 0x303   :  { %915 = vst.msk [vmem:[%s1352_s3 + $0x10] sm:$0x7] %vm910_vm6, %v766_v14  ;;  %v1047_v15 = vpop.f32.mrb[25].mxu0 }
 0x304   :  { %v769_v16 = vpop.f32.mrb[26].mxu0 }
 0x305   :  { %v1048_v17 = vpop.f32.mrb[27].mxu0  ;;  %v812_v18 = vpop.f32.mrb[24].mxu1 }
 0x306   :  { %916 = vst.msk [vmem:[%s1352_s3 + $0x14] sm:$0x7] %vm910_vm6, %v812_v18  ;;  %v1053_v19 = vpop.f32.mrb[25].mxu1 }
 0x307   :  { %v815_v20 = vpop.f32.mrb[26].mxu1 }
 0x308   :  { %v1054_v21 = vpop.f32.mrb[27].mxu1 }
 0x30a   :  { %v858_v22 = vpop.f32.mrb[28].mxu0 }
 0x30b   :  { %917 = vst.msk [vmem:[%s1352_s3 + $0x18] sm:$0x7] %vm910_vm6, %v858_v22  ;;  %v1059_v23 = vpop.f32.mrb[29].mxu0 }
 0x30c   :  { %v861_v24 = vpop.f32.mrb[30].mxu0 }
 0x30d   :  { %v1060_v25 = vpop.f32.mrb[31].mxu0  ;;  %v904_v26 = vpop.f32.mrb[28].mxu1 }
 0x30e   :  { %918 = vst.msk [vmem:[%s1352_s3 + $0x1c] sm:$0x7] %vm910_vm6, %v904_v26  ;;  %v1065_v27 = vpop.f32.mrb[29].mxu1 }
 0x30f   :  { %v907_v28 = vpop.f32.mrb[30].mxu1 }
 0x310   :  { %v1066_v29 = vpop.f32.mrb[31].mxu1 }

</bundles_post_ra>
